<compile_context>
chip_gen: v5e
topology: v5e:2x2
jax: 0.10.0
libtpu: 0.0.40
codegen_flags: <defaults>
</compile_context>

<pallas_src>
import math
from functools import partial

import jax
import jax.numpy as jnp
from jax import lax
from jax.experimental import pallas as pl
from jax.experimental.pallas import tpu as pltpu

# NOTE: matmuls kept in f32 for exact parity with the reference module.  Setting
# this to jnp.bfloat16 doubles MXU throughput on v6e/v7x (keep
# preferred_element_type=f32); left at f32 so numerics match the spec exactly.
_MM_DTYPE = jnp.float32


# ----------------------------- generic matmul ------------------------------

def _matmul_bias_kernel(x_ref, w_ref, b_ref, o_ref, *, act_start):
    acc = jnp.dot(x_ref[...].astype(_MM_DTYPE), w_ref[...].astype(_MM_DTYPE),
                  preferred_element_type=jnp.float32) + b_ref[...]
    if act_start is not None:
        # SiLU fused onto the gate half of the output columns (EUP slot is idle
        # in a matmul kernel, so the sigmoid is essentially free filler).
        col = lax.broadcasted_iota(jnp.int32, acc.shape, 1)
        acc = jnp.where(col >= act_start, acc * jax.nn.sigmoid(acc), acc)
    o_ref[...] = acc


def matmul_bias(x, w, b=None, act_start=None, block_m=512):
    """(M, K) @ (K, N) + b, tiled over M.  Optionally applies SiLU to output
    columns >= act_start (used to fuse the gate activation into in_conv)."""
    x = x.astype(jnp.float32)
    w = w.astype(jnp.float32)
    M, K = x.shape
    Kw, N = w.shape
    assert K == Kw
    if K < 8:                       # pad tiny contraction dims (zeros are inert)
        x = jnp.pad(x, ((0, 0), (0, 8 - K)))
        w = jnp.pad(w, ((0, 8 - K), (0, 0)))
    Kp = x.shape[1]
    if b is None:
        b = jnp.zeros((N,), jnp.float32)
    b2 = jnp.reshape(b.astype(jnp.float32), (1, N))

    Mp = ((M + 7) // 8) * 8
    tm = min(block_m, Mp)
    Mp = ((Mp + tm - 1) // tm) * tm
    if Mp != M:
        x = jnp.pad(x, ((0, Mp - M), (0, 0)))

    out = pl.pallas_call(
        partial(_matmul_bias_kernel, act_start=act_start),
        grid=(Mp // tm,),
        in_specs=[
            pl.BlockSpec((tm, Kp), lambda i: (i, 0)),
            pl.BlockSpec((Kp, N), lambda i: (0, 0)),
            pl.BlockSpec((1, N), lambda i: (0, 0)),
        ],
        out_specs=pl.BlockSpec((tm, N), lambda i: (i, 0)),
        out_shape=jax.ShapeDtypeStruct((Mp, N), jnp.float32),
        compiler_params=pltpu.CompilerParams(dimension_semantics=("parallel",)),
    )(x, w, b2)
    return out[:M]


# ------------------------ depthwise 3x3 conv + SiLU -------------------------

def _dwconv3x3_silu_kernel(xpad_ref, w_ref, b_ref, o_ref):
    _, H, W, C = o_ref.shape
    wt = w_ref[...]                                            # (3, 3, C)
    acc = jnp.zeros(o_ref.shape, jnp.float32) + b_ref[...]     # bias (1, C)
    for dh in range(3):
        for dw in range(3):
            acc = acc + xpad_ref[:, dh:dh + H, dw:dw + W, :] * wt[dh, dw]
    o_ref[...] = acc * jax.nn.sigmoid(acc)                     # fused SiLU


def depthwise_conv3x3_silu(x, w, b):
    """x: (B,H,W,C); w: (3,3,C); b: (C,). 'same' depthwise conv + SiLU.
    Gridded over batch ("parallel") so megacore/pipelining can engage."""
    B, H, W, C = x.shape
    xpad = jnp.pad(x.astype(jnp.float32), ((0, 0), (1, 1), (1, 1), (0, 0)))
    # TODO(synk): for production H,W also tile rows with a 1-row halo.
    return pl.pallas_call(
        _dwconv3x3_silu_kernel,
        grid=(B,),
        in_specs=[
            pl.BlockSpec((1, H + 2, W + 2, C), lambda i: (i, 0, 0, 0)),
            pl.BlockSpec((3, 3, C), lambda i: (0, 0, 0)),
            pl.BlockSpec((1, C), lambda i: (0, 0)),
        ],
        out_specs=pl.BlockSpec((1, H, W, C), lambda i: (i, 0, 0, 0)),
        out_shape=jax.ShapeDtypeStruct((B, H, W, C), jnp.float32),
        compiler_params=pltpu.CompilerParams(dimension_semantics=("parallel",)),
    )(xpad, w.astype(jnp.float32), b.reshape(1, C).astype(jnp.float32))


# ----------------------------- selective scan -------------------------------

def _selective_scan_kernel(u_ref, dt_ref, bc_ref, arep_ref, r_ref, m_ref,
                           gb_ref, gc_ref, d_ref, dtb_ref, y_ref,
                           state_s, da_s, dbu_s, cexp_s, tmp_s, ybuf_s,
                           *, chunk, nstate):
    # u_ref, dt_ref, y_ref : (TL, KD)       ;  bc_ref : (TL, N*S) lane-dense packed B/C
    # arep_ref : (TL*N, KD) = A^T tiled     ;  r_ref : (TL*N, TL) row replication
    # m_ref : (TL*N, N*S) state-index mask  ;  gb/gc_ref : (N*S, KD) channel expansion
    # d_ref, dtb_ref : (1, KD)
    TL, KD = u_ref.shape
    N = nstate
    lt = pl.program_id(1)

    # ---- bulk vectorized precompute: EVERYTHING off the serial chain ----
    dt_raw = dt_ref[...] + dtb_ref[...]
    dt_all = jnp.where(dt_raw <= 20.0,
                       jnp.log1p(jnp.exp(jnp.minimum(dt_raw, 20.0))),
                       dt_raw)                                  # softplus, hoisted
    du = dt_all * u_ref[...]

    R = r_ref[...]
    # dA = exp(dt (replicated over n via MXU) * A^T): one bulk EUP pass.
    da_s[...] = jnp.exp(
        jnp.dot(R, dt_all, preferred_element_type=jnp.float32) * arep_ref[...])
    # expand lane-dense packed B/C -> (TL*N, KD) with constant 0/1 operators
    # (replicate rows with R, mask to the matching state index n, scatter over
    #  the per-direction channel block with G_B / G_C).  All MXU, hoisted.
    tmp_s[...] = jnp.dot(R, bc_ref[...], preferred_element_type=jnp.float32) * m_ref[...]
    cexp_s[...] = jnp.dot(tmp_s[...], gc_ref[...], preferred_element_type=jnp.float32)
    dbu_s[...] = jnp.dot(tmp_s[...], gb_ref[...], preferred_element_type=jnp.float32)
    dbu_s[...] = dbu_s[...] * jnp.dot(R, du, preferred_element_type=jnp.float32)

    # ---- carried hidden state: reset at the start of each batch ----
    # (padded tail rows only ever occur in the LAST tile of a batch, so a
    #  corrupted tail state is never consumed: the next batch resets here.)
    @pl.when(lt == 0)
    def _():
        state_s[...] = jnp.zeros_like(state_s)

    Dp = d_ref[...]
    n_chunks = TL // chunk

    def chunk_body(ci, state):
        base = pl.multiple_of(ci * chunk, chunk)
        rbase = pl.multiple_of(ci * (chunk * N), chunk * N)
        for t in range(chunk):                        # unrolled serial recurrence:
            rs = pl.multiple_of(rbase + t * N, N)     #   2 FMAs on 2 vregs / step
            state = da_s[pl.ds(rs, N), :] * state + dbu_s[pl.ds(rs, N), :]
            ybuf_s[pl.ds(t, 1), :] = jnp.sum(cexp_s[pl.ds(rs, N), :] * state,
                                             axis=0, keepdims=True)
        # one sublane-dense (chunk, KD) store to the output block
        y_ref[pl.ds(base, chunk), :] = ybuf_s[...] + Dp * u_ref[pl.ds(base, chunk), :]
        return state

    state_s[...] = lax.fori_loop(0, n_chunks, chunk_body, state_s[...])


def selective_scan(u, delta, A, Bst, Cst, D, delta_bias, *, max_tile_l=128, chunk=16):
    """
    u, delta : (B, L, KD) with d = k*C + c, KD = Kdir*C
    A        : (KD, N)
    Bst, Cst : (B, L, N, Kdir)  per-direction B/C (un-expanded over channels)
    D, delta_bias : (KD,)
    Implements: dt = softplus(delta + bias); h_t = exp(dt*A)*h_{t-1} + dt*B_t*u_t;
                y_t = C_t . h_t + D*u_t
    Grid is (batch, L-tiles); the hidden state is carried in VMEM scratch across
    L-tiles so production-size L never has to co-reside in VMEM.
    """
    Bb, L, KD = u.shape
    N = A.shape[1]
    Kdir = Bst.shape[-1]
    S = 128 // N                                   # lane slots per state index
    assert N * S == 128 and 2 * Kdir <= S, \
        "packed B/C layout needs N | 128 and 2*Kdir <= 128//N"
    Cper = KD // Kdir

    TL = min(max_tile_l, ((L + chunk - 1) // chunk) * chunk)
    TL = ((TL + chunk - 1) // chunk) * chunk
    Lp = ((L + TL - 1) // TL) * TL
    NLT = Lp // TL
    TLN = TL * N

    u = u.astype(jnp.float32)
    delta = delta.astype(jnp.float32)
    Bst = Bst.astype(jnp.float32)
    Cst = Cst.astype(jnp.float32)
    if Lp != L:
        u = jnp.pad(u, ((0, 0), (0, Lp - L), (0, 0)))
        delta = jnp.pad(delta, ((0, 0), (0, Lp - L), (0, 0)))
        Bst = jnp.pad(Bst, ((0, 0), (0, Lp - L), (0, 0), (0, 0)))
        Cst = jnp.pad(Cst, ((0, 0), (0, Lp - L), (0, 0), (0, 0)))

    # lane-dense packed B/C:  bc[b, l, n*S + k] = B[b,l,n,k] ; bc[..., n*S+Kdir+k] = C[b,l,n,k]
    bc = jnp.concatenate([Bst, Cst], axis=-1)                       # (B, Lp, N, 2*Kdir)
    if 2 * Kdir < S:
        bc = jnp.pad(bc, ((0, 0), (0, 0), (0, 0), (0, S - 2 * Kdir)))
    bc = bc.reshape(Bb, Lp, N * S)

    # constant 0/1 operators for the in-kernel expansion (resident in VMEM)
    rr = jnp.arange(TLN, dtype=jnp.int32)
    Rmat = (rr[:, None] // N == jnp.arange(TL, dtype=jnp.int32)[None, :]).astype(jnp.float32)
    Mmat = (jnp.arange(N * S, dtype=jnp.int32)[None, :] // S
            == (rr % N)[:, None]).astype(jnp.float32)
    jj = jnp.arange(N * S, dtype=jnp.int32)
    dd = jnp.arange(KD, dtype=jnp.int32)
    GB = (((jj % S)[:, None] == (dd // Cper)[None, :])
          & ((jj % S) < Kdir)[:, None]).astype(jnp.float32)
    GC = ((jj % S)[:, None] == (Kdir + dd // Cper)[None, :]).astype(jnp.float32)
    A_T = jnp.transpose(A).astype(jnp.float32)                     # (N, KD)
    A_rep = jnp.tile(A_T, (TL, 1))                                  # (TL*N, KD)

    out = pl.pallas_call(
        partial(_selective_scan_kernel, chunk=chunk, nstate=N),
        grid=(Bb, NLT),
        in_specs=[
            pl.BlockSpec((None, TL, KD), lambda b, j: (b, j, 0)),       # u
            pl.BlockSpec((None, TL, KD), lambda b, j: (b, j, 0)),       # delta
            pl.BlockSpec((None, TL, N * S), lambda b, j: (b, j, 0)),    # packed B/C
            pl.BlockSpec((TLN, KD), lambda b, j: (0, 0)),               # A^T tiled
            pl.BlockSpec((TLN, TL), lambda b, j: (0, 0)),               # R
            pl.BlockSpec((TLN, N * S), lambda b, j: (0, 0)),            # M
            pl.BlockSpec((N * S, KD), lambda b, j: (0, 0)),             # G_B
            pl.BlockSpec((N * S, KD), lambda b, j: (0, 0)),             # G_C
            pl.BlockSpec((1, KD), lambda b, j: (0, 0)),                 # D
            pl.BlockSpec((1, KD), lambda b, j: (0, 0)),                 # delta_bias
        ],
        out_specs=pl.BlockSpec((None, TL, KD), lambda b, j: (b, j, 0)),
        out_shape=jax.ShapeDtypeStruct((Bb, Lp, KD), jnp.float32),
        scratch_shapes=[
            pltpu.VMEM((N, KD), jnp.float32),         # carried hidden state
            pltpu.VMEM((TLN, KD), jnp.float32),       # dA  (hoisted exp)
            pltpu.VMEM((TLN, KD), jnp.float32),       # dB*u (hoisted)
            pltpu.VMEM((TLN, KD), jnp.float32),       # expanded C
            pltpu.VMEM((TLN, N * S), jnp.float32),    # masked replicated B/C
            pltpu.VMEM((chunk, KD), jnp.float32),     # per-chunk y buffer
        ],
        compiler_params=pltpu.CompilerParams(
            dimension_semantics=("parallel", "arbitrary"),
            vmem_limit_bytes=32 * 1024 * 1024),
    )(u, delta, bc, A_rep, Rmat, Mmat, GB, GC,
      D.reshape(1, KD).astype(jnp.float32),
      delta_bias.reshape(1, KD).astype(jnp.float32))
    return out[:, :L]


# ------------- fused LayerNorm + gate (+pool) (+out-projection) -------------

def _ln_gate(x, z, lnw, lnb):
    mu = jnp.mean(x, axis=-1, keepdims=True)
    var = jnp.mean((x - mu) ** 2, axis=-1, keepdims=True)
    return ((x - mu) * lax.rsqrt(var + 1e-5) * lnw + lnb) * z


def _ln_gate_pool_kernel(y_ref, z_ref, lnw_ref, lnb_ref, ps_ref):
    @pl.when(pl.program_id(1) == 0)
    def _():
        ps_ref[...] = jnp.zeros_like(ps_ref)
    y2 = _ln_gate(y_ref[...], z_ref[...], lnw_ref[...], lnb_ref[...])
    ps_ref[...] += jnp.sum(y2, axis=0, keepdims=True)


def _ln_gate_outproj_kernel(y_ref, z_ref, lnw_ref, lnb_ref, wt_ref, bb_ref, o_ref):
    y2 = _ln_gate(y_ref[...], z_ref[...], lnw_ref[...], lnb_ref[...])
    # out[o, l] = sum_c w_out[c, o] * y2[l, c]  -> lane-dense (d_model, TL) store
    out = lax.dot_general(wt_ref[...].astype(_MM_DTYPE), y2.astype(_MM_DTYPE),
                          dimension_numbers=(((1,), (1,)), ((), ())),
                          preferred_element_type=jnp.float32)
    o_ref[...] = out + bb_ref[...]


def _l_tiles(L, cap=512):
    if L <= cap:
        return L, L
    tl = cap                                   # multiple of 128
    return tl, ((L + tl - 1) // tl) * tl


def ln_gate_pool(ysum, z, ln_w, ln_b):
    """Per-batch sum over L of LayerNorm(ysum)*z  (y2 never hits HBM)."""
    Bb, L, C = ysum.shape
    tl, Lp = _l_tiles(L)
    if Lp != L:
        ysum = jnp.pad(ysum, ((0, 0), (0, Lp - L), (0, 0)))
        z = jnp.pad(z, ((0, 0), (0, Lp - L), (0, 0)))
    out = pl.pallas_call(
        _ln_gate_pool_kernel,
        grid=(Bb, Lp // tl),
        in_specs=[
            pl.BlockSpec((None, tl, C), lambda b, j: (b, j, 0)),
            pl.BlockSpec((None, tl, C), lambda b, j: (b, j, 0)),
            pl.BlockSpec((1, C), lambda b, j: (0, 0)),
            pl.BlockSpec((1, C), lambda b, j: (0, 0)),
        ],
        out_specs=pl.BlockSpec((None, 1, C), lambda b, j: (b, 0, 0)),
        out_shape=jax.ShapeDtypeStruct((Bb, 1, C), jnp.float32),
        compiler_params=pltpu.CompilerParams(
            dimension_semantics=("parallel", "arbitrary")),
    )(ysum.astype(jnp.float32), z.astype(jnp.float32),
      ln_w.reshape(1, C).astype(jnp.float32), ln_b.reshape(1, C).astype(jnp.float32))
    return out[:, 0, :]


def ln_gate_outproj(ysum, z, ln_w, ln_b, w_out, batch_bias):
    """out[b,o,l] = sum_c w_out[c,o]*(LN(ysum)*z)[b,l,c] + batch_bias[b,o].
    Emits (B, d_model, L): lane-dense stores and NCHW without a final transpose."""
    Bb, L, C = ysum.shape
    d_model = w_out.shape[1]
    tl, Lp = _l_tiles(L)
    if Lp != L:
        ysum = jnp.pad(ysum, ((0, 0), (0, Lp - L), (0, 0)))
        z = jnp.pad(z, ((0, 0), (0, Lp - L), (0, 0)))
    out = pl.pallas_call(
        _ln_gate_outproj_kernel,
        grid=(Bb, Lp // tl),
        in_specs=[
            pl.BlockSpec((None, tl, C), lambda b, j: (b, j, 0)),
            pl.BlockSpec((None, tl, C), lambda b, j: (b, j, 0)),
            pl.BlockSpec((1, C), lambda b, j: (0, 0)),
            pl.BlockSpec((1, C), lambda b, j: (0, 0)),
            pl.BlockSpec((d_model, C), lambda b, j: (0, 0)),
            pl.BlockSpec((None, d_model, 1), lambda b, j: (b, 0, 0)),
        ],
        out_specs=pl.BlockSpec((None, d_model, tl), lambda b, j: (b, 0, j)),
        out_shape=jax.ShapeDtypeStruct((Bb, d_model, Lp), jnp.float32),
        compiler_params=pltpu.CompilerParams(
            dimension_semantics=("parallel", "parallel")),
    )(ysum.astype(jnp.float32), z.astype(jnp.float32),
      ln_w.reshape(1, C).astype(jnp.float32), ln_b.reshape(1, C).astype(jnp.float32),
      jnp.transpose(w_out).astype(jnp.float32),
      batch_bias.reshape(Bb, d_model, 1).astype(jnp.float32))
    return out[:, :, :L]


# ------------------ channel-branch selective scan (plain JAX) ---------------

def _softplus_thresh(x):
    return jnp.where(x <= 20.0, jnp.log1p(jnp.exp(jnp.minimum(x, 20.0))), x)


def selective_scan_jax(u, delta, A, Bg, Cg, D, delta_bias):
    """Tiny group-shared selective scan in plain JAX (channel branch).
    u, delta: (B, L, G, Cd); A: (G, Cd, N); Bg, Cg: (B, L, G, N); D, bias: (G, Cd)."""
    dt = _softplus_thresh(delta + delta_bias)
    dA = jnp.exp(dt[..., None] * A[None, None])                  # (B,L,G,Cd,N)
    dBu = (dt * u)[..., None] * Bg[:, :, :, None, :]             # (B,L,G,Cd,N)

    def step(h, inp):
        dA_t, dBu_t = inp
        h = dA_t * h + dBu_t
        return h, h

    h0 = jnp.zeros(dA.shape[:1] + dA.shape[2:], jnp.float32)     # (B,G,Cd,N)
    _, hs = lax.scan(step, h0, (jnp.moveaxis(dA, 1, 0), jnp.moveaxis(dBu, 1, 0)))
    hs = jnp.moveaxis(hs, 0, 1)                                  # (B,L,G,Cd,N)
    y = jnp.einsum('blgcn,blgn->blgc', hs, Cg) + D[None, None] * u
    return y


# ----------------------------- parameters ----------------------------------

def make_config(d_model=16, d_state=16, ssm_ratio=2.0):
    d_expand = int(ssm_ratio * d_model)
    return dict(d_model=d_model, d_state=d_state,
                d_expand=d_expand, d_inner=d_expand,
                dt_rank=math.ceil(d_model / 16),
                K=4, KC=2, dc_inner=4, dtc_rank=6, dc_state=16)


def init_params(key, cfg):
    d_model, d_state = cfg['d_model'], cfg['d_state']
    d_expand, d_inner, R = cfg['d_expand'], cfg['d_inner'], cfg['dt_rank']
    K, KC = cfg['K'], cfg['KC']
    dc_inner, Rc, Nc = cfg['dc_inner'], cfg['dtc_rank'], cfg['dc_state']
    ks = jax.random.split(key, 16)
    p = {}
    p['w_in'] = 0.1 * jax.random.normal(ks[0], (d_model, 2 * d_expand), jnp.float32)
    p['b_in'] = 0.01 * jax.random.normal(ks[1], (2 * d_expand,), jnp.float32)
    p['w_dw'] = 0.1 * jax.random.normal(ks[2], (3, 3, d_expand), jnp.float32)
    p['b_dw'] = 0.01 * jax.random.normal(ks[3], (d_expand,), jnp.float32)
    p['x_proj_weight'] = (1.0 / math.sqrt(d_inner)) * jax.random.normal(
        ks[4], (K, R + 2 * d_state, d_inner), jnp.float32)
    std = R ** -0.5
    p['dt_projs_weight'] = jax.random.uniform(
        ks[5], (K, d_inner, R), jnp.float32, minval=-std, maxval=std)
    dt = jnp.exp(jax.random.uniform(ks[6], (K, d_inner), jnp.float32)
                 * (math.log(0.1) - math.log(0.001)) + math.log(0.001))
    dt = jnp.maximum(dt, 1e-4)
    p['dt_projs_bias'] = dt + jnp.log(-jnp.expm1(-dt))
    A = jnp.tile(jnp.arange(1, d_state + 1, dtype=jnp.float32)[None, :], (K * d_inner, 1))
    p['A_logs'] = jnp.log(A)
    p['Ds'] = jnp.ones((K * d_inner,), jnp.float32)
    p['out_norm_w'] = jnp.ones((d_inner,), jnp.float32)
    p['out_norm_b'] = jnp.zeros((d_inner,), jnp.float32)
    p['w_out'] = 0.1 * jax.random.normal(ks[7], (d_expand, d_model), jnp.float32)
    p['b_out'] = 0.01 * jax.random.normal(ks[8], (d_model,), jnp.float32)
    p['w_cin'] = jax.random.normal(ks[9], (1, dc_inner), jnp.float32)
    p['b_cin'] = 0.01 * jax.random.normal(ks[10], (dc_inner,), jnp.float32)
    p['w_cout'] = jax.random.normal(ks[11], (dc_inner, 1), jnp.float32)
    p['b_cout'] = jnp.zeros((1,), jnp.float32)
    p['xc_proj_weight'] = 0.5 * jax.random.normal(ks[12], (KC, Rc + 2 * Nc, dc_inner), jnp.float32)
    p['dtc_projs_weight'] = 0.3 * jax.random.normal(ks[13], (KC, dc_inner, Rc), jnp.float32)
    p['dtc_projs_bias'] = 0.3 * jax.random.normal(ks[14], (KC, dc_inner), jnp.float32)
    p['Ac_logs'] = 0.5 * jax.random.normal(ks[15], (KC * dc_inner, Nc), jnp.float32)
    p['Dsc'] = jnp.ones((KC * dc_inner,), jnp.float32)
    p['cn_w'] = jnp.ones((d_inner,), jnp.float32)
    p['cn_b'] = jnp.zeros((d_inner,), jnp.float32)
    return p


# ----------------------------- forward pass --------------------------------

def ss2d_forward(x_nchw, p, cfg):
    d_model, d_state = cfg['d_model'], cfg['d_state']
    d_expand, d_inner, R = cfg['d_expand'], cfg['d_inner'], cfg['dt_rank']
    K, KC = cfg['K'], cfg['KC']
    dc_inner, Rc, Nc = cfg['dc_inner'], cfg['dtc_rank'], cfg['dc_state']

    B, Cm, H, W = x_nchw.shape
    L = H * W
    x = jnp.transpose(x_nchw, (0, 2, 3, 1)).astype(jnp.float32)          # NHWC

    # in_conv (1x1) with SiLU fused onto the gate half; SiLU(depthwise conv) on xa
    xz = matmul_bias(x.reshape(B * L, Cm), p['w_in'], p['b_in'],
                     act_start=d_expand).reshape(B, H, W, 2 * d_expand)
    xa = xz[..., :d_expand]
    z = xz[..., d_expand:].reshape(B, L, d_expand)                        # SiLU already applied
    xa = depthwise_conv3x3_silu(xa, p['w_dw'], p['b_dw'])

    # ---------------- forward_corev1: 4-direction cross scan ----------------
    C = d_inner
    N = d_state
    x_row = xa.reshape(B, L, C)                                          # l = h*W + w
    x_col = jnp.transpose(xa, (0, 2, 1, 3)).reshape(B, L, C)             # l = w*H + h
    xs4 = jnp.stack([x_row, x_col, x_row[:, ::-1], x_col[:, ::-1]], axis=2)   # (B,L,K,C)
    u = xs4.reshape(B, L, K * C)                                         # d = k*C + c

    # fused per-direction projection as ONE block-diagonal matmul:
    #   per-direction columns: [0:C) -> delta (dt_proj composed with x_proj), [C:C+N) -> B, [C+N:) -> C
    xw_t = jnp.transpose(p['x_proj_weight'], (0, 2, 1)).astype(jnp.float32)    # (K, C, R+2N)
    dtw_t = jnp.transpose(p['dt_projs_weight'], (0, 2, 1)).astype(jnp.float32)  # (K, R, C)
    W_dt = jnp.einsum('kcr,krd->kcd', xw_t[:, :, :R], dtw_t)                    # (K, C, C)
    W_full = jnp.concatenate([W_dt, xw_t[:, :, R:]], axis=-1)                   # (K, C, C+2N)
    Cp2N = C + 2 * N
    W_bd = jnp.zeros((K * C, K * Cp2N), jnp.float32)
    for k in range(K):
        W_bd = W_bd.at[k * C:(k + 1) * C, k * Cp2N:(k + 1) * Cp2N].set(W_full[k])

    P = matmul_bias(u.reshape(B * L, K * C), W_bd)                               # (B*L, K*(C+2N))
    P4 = P.reshape(B, L, K, Cp2N)
    delta = P4[..., :C].reshape(B, L, K * C)                                     # d = k*C + c
    Bst = jnp.transpose(P4[..., C:C + N], (0, 1, 3, 2))                          # (B, L, N, K)
    Cst = jnp.transpose(P4[..., C + N:], (0, 1, 3, 2))                           # (B, L, N, K)

    A = -jnp.exp(p['A_logs'].astype(jnp.float32))                                # (K*C, N)
    dtb = p['dt_projs_bias'].reshape(-1)

    y = selective_scan(u, delta, A, Bst, Cst, p['Ds'], dtb)                      # (B, L, K*C)
    yr = y.reshape(B, L, K, C)

    def col2row(t):  # (B, L, C) with l = w*H + h  ->  l = h*W + w
        return jnp.transpose(t.reshape(B, W, H, C), (0, 2, 1, 3)).reshape(B, L, C)

    ysum = yr[:, :, 0] + yr[:, ::-1, 2] + col2row(yr[:, :, 1]) + col2row(yr[:, ::-1, 3])

    # fused LN + gate + spatial pooling (y2 is never materialized in HBM)
    pooled = ln_gate_pool(ysum, z, p['out_norm_w'], p['out_norm_b']) / float(L)  # (B, d_expand)

    # ---------------- cforward_corev1: channel-direction SSM (plain JAX) ----------------
    # (Lc=32, dc_inner=4, KD=8 -> far too small for an efficient Pallas launch)
    Lc = d_expand
    xc = pooled[:, :, None] * p['w_cin'].reshape(dc_inner) + p['b_cin']  # conv_cin 1x1: (B, Lc, dc)
    xsc = jnp.stack([xc, xc[:, ::-1]], axis=1)                           # (B, KC, Lc, dc)

    xc_dbl = jnp.einsum('bkld,kcd->bklc', xsc, p['xc_proj_weight'])      # (B, KC, Lc, Rc+2Nc)
    dts_c = xc_dbl[..., :Rc]
    Bcg = jnp.transpose(xc_dbl[..., Rc:Rc + Nc], (0, 2, 1, 3))           # (B, Lc, KC, Nc)
    Ccg = jnp.transpose(xc_dbl[..., Rc + Nc:], (0, 2, 1, 3))
    deltac = jnp.einsum('bklr,kdr->bkld', dts_c, p['dtc_projs_weight'])  # (B, KC, Lc, dc)

    uc = jnp.transpose(xsc, (0, 2, 1, 3))                                # (B, Lc, KC, dc)
    deltac = jnp.transpose(deltac, (0, 2, 1, 3))                         # (B, Lc, KC, dc)
    Ac = -jnp.exp(p['Ac_logs'].astype(jnp.float32)).reshape(KC, dc_inner, Nc)

    yc = selective_scan_jax(uc, deltac, Ac, Bcg, Ccg,
                            p['Dsc'].reshape(KC, dc_inner),
                            p['dtc_projs_bias'])                         # (B, Lc, KC, dc)
    yc2 = yc[:, :, 0] + yc[:, ::-1, 1]                                   # (B, Lc, dc)
    cvec = jnp.einsum('bld,do->blo', yc2, p['w_cout'])[..., 0] + p['b_cout'][0]   # (B, Lc)

    mu_c = jnp.mean(cvec, axis=-1, keepdims=True)                        # channel_norm (WithBias)
    var_c = jnp.mean((cvec - mu_c) ** 2, axis=-1, keepdims=True)
    c = (cvec - mu_c) * lax.rsqrt(var_c + 1e-5) * p['cn_w'] + p['cn_b']  # (B, d_expand)

    # fold channel bias and out_conv bias through the (linear) out projection:
    #   (y2 + c) @ w_out + b_out  ==  y2 @ w_out + (c @ w_out + b_out)
    batch_bias = c @ p['w_out'].astype(jnp.float32) + p['b_out']         # (B, d_model)

    # fused LN + gate + out_conv, emitted directly in (B, d_model, H*W) = NCHW layout
    out = ln_gate_outproj(ysum, z, p['out_norm_w'], p['out_norm_b'],
                          p['w_out'], batch_bias)                        # (B, d_model, L)
    return out.reshape(B, d_model, H, W)


# --------------------------------- main -------------------------------------

if __name__ == "__main__":
    cfg = make_config(d_model=16, d_state=16, ssm_ratio=2.0)

    key = jax.random.PRNGKey(0)
    k_x, k_p = jax.random.split(key)
    params = init_params(k_p, cfg)

    Bn, H, W = 2, 8, 8
    x = jax.random.normal(k_x, (Bn, cfg['d_model'], H, W), jnp.float32)   # NCHW like PyTorch

    fwd = jax.jit(lambda inp: ss2d_forward(inp, params, cfg))
    out = jax.block_until_ready(fwd(x))

    assert out.shape == (Bn, cfg['d_model'], H, W)
    assert bool(jnp.all(jnp.isfinite(out)))
    print("KERNEL_OK")
</pallas_src>

<mosaic_0001>
module attributes {stable_mosaic.version = 11 : i64} {
  func.func @_matmul_bias_kernel(%arg0: i32, %arg1: memref<128x16xf32, #tpu.memory_space<vmem>>, %arg2: memref<16x64xf32, #tpu.memory_space<vmem>>, %arg3: memref<1x64xf32, #tpu.memory_space<vmem>>, %arg4: memref<128x64xf32, #tpu.memory_space<vmem>>) attributes {dimension_semantics = [#tpu.dimension_semantics<parallel>], iteration_bounds = array<i64: 1>, scalar_prefetch = 0 : i64, scratch_operands = 0 : i64, tpu.core_type = #tpu.core_type<tc>, window_params = [{transform_indices = @transform_0, window_bounds = array<i64: 128, 16>}, {pipeline_mode = #tpu.pipeline_mode<synchronous>, transform_indices = @transform_1, window_bounds = array<i64: 16, 64>}, {pipeline_mode = #tpu.pipeline_mode<synchronous>, transform_indices = @transform_2, window_bounds = array<i64: 1, 64>}, {transform_indices = @transform_3, window_bounds = array<i64: 128, 64>}]} {
    %c0 = arith.constant 0 : index
    %c0_0 = arith.constant 0 : index
    %0 = vector.load %arg1[%c0, %c0_0] : memref<128x16xf32, #tpu.memory_space<vmem>>, vector<128x16xf32>
    %c0_1 = arith.constant 0 : index
    %c0_2 = arith.constant 0 : index
    %1 = vector.load %arg2[%c0_1, %c0_2] : memref<16x64xf32, #tpu.memory_space<vmem>>, vector<16x64xf32>
    %cst = arith.constant dense<0.000000e+00> : vector<128x64xf32>
    %2 = tpu.matmul %0, %1, %cst {dimension_numbers = #tpu.dot_dimension_numbers<[1], [0], [0], [1], [0, 0, 1, 1], [], []>} : vector<128x16xf32>, vector<16x64xf32>, vector<128x64xf32> -> vector<128x64xf32>
    %c0_3 = arith.constant 0 : index
    %c0_4 = arith.constant 0 : index
    %3 = vector.load %arg3[%c0_3, %c0_4] : memref<1x64xf32, #tpu.memory_space<vmem>>, vector<1x64xf32>
    %4 = vector.broadcast %3 : vector<1x64xf32> to vector<128x64xf32>
    %5 = arith.addf %2, %4 : vector<128x64xf32>
    %6 = tpu.iota {dimensions = array<i32: 1>} : vector<128x64xi32>
    %c32_i32 = arith.constant 32 : i32
    %7 = vector.broadcast %c32_i32 : i32 to vector<128x64xi32>
    %8 = arith.cmpi sge, %6, %7 : vector<128x64xi32>
    %9 = arith.negf %5 : vector<128x64xf32>
    %10 = math.exp %9 : vector<128x64xf32>
    %cst_5 = arith.constant 1.000000e+00 : f32
    %11 = vector.broadcast %cst_5 : f32 to vector<128x64xf32>
    %12 = arith.addf %11, %10 : vector<128x64xf32>
    %13 = arith.divf %11, %12 : vector<128x64xf32>
    %14 = arith.mulf %5, %13 : vector<128x64xf32>
    %15 = arith.select %8, %14, %5 : vector<128x64xi1>, vector<128x64xf32>
    %c0_6 = arith.constant 0 : index
    %c0_7 = arith.constant 0 : index
    %16 = vector.load %arg4[%c0_6, %c0_7] : memref<128x64xf32, #tpu.memory_space<vmem>>, vector<128x64xf32>
    tpu.vector_store %arg4[%c0_6, %c0_7], %15 {strides = array<i32>} : memref<128x64xf32, #tpu.memory_space<vmem>>, vector<128x64xf32>,
    return
  }
  func.func @transform_0(%arg0: i32) -> (i32, i32) {
    %c0_i32 = arith.constant 0 : i32
    %c0_i32_0 = arith.constant 0 : i32
    return %arg0, %c0_i32 : i32, i32
  }
  func.func @transform_1(%arg0: i32) -> (i32, i32) {
    %c0_i32 = arith.constant 0 : i32
    %c0_i32_0 = arith.constant 0 : i32
    %c0_i32_1 = arith.constant 0 : i32
    return %c0_i32, %c0_i32_0 : i32, i32
  }
  func.func @transform_2(%arg0: i32) -> (i32, i32) {
    %c0_i32 = arith.constant 0 : i32
    %c0_i32_0 = arith.constant 0 : i32
    %c0_i32_1 = arith.constant 0 : i32
    return %c0_i32, %c0_i32_0 : i32, i32
  }
  func.func @transform_3(%arg0: i32) -> (i32, i32) {
    %c0_i32 = arith.constant 0 : i32
    %c0_i32_0 = arith.constant 0 : i32
    return %arg0, %c0_i32 : i32, i32
  }
}

module attributes {stable_mosaic.version = 11 : i64} {
  func.func @_dwconv3x3_silu_kernel(%arg0: i32, %arg1: memref<1x10x10x32xf32, #tpu.memory_space<vmem>>, %arg2: memref<3x3x32xf32, #tpu.memory_space<vmem>>, %arg3: memref<1x32xf32, #tpu.memory_space<vmem>>, %arg4: memref<1x8x8x32xf32, #tpu.memory_space<vmem>>) attributes {dimension_semantics = [#tpu.dimension_semantics<parallel>], iteration_bounds = array<i64: 2>, scalar_prefetch = 0 : i64, scratch_operands = 0 : i64, tpu.core_type = #tpu.core_type<tc>, window_params = [{transform_indices = @transform_0, window_bounds = array<i64: 1, 10, 10, 32>}, {pipeline_mode = #tpu.pipeline_mode<synchronous>, transform_indices = @transform_1, window_bounds = array<i64: 3, 3, 32>}, {pipeline_mode = #tpu.pipeline_mode<synchronous>, transform_indices = @transform_2, window_bounds = array<i64: 1, 32>}, {transform_indices = @transform_3, window_bounds = array<i64: 1, 8, 8, 32>}]} {
    %c0 = arith.constant 0 : index
    %c0_0 = arith.constant 0 : index
    %c0_1 = arith.constant 0 : index
    %0 = vector.load %arg2[%c0, %c0_0, %c0_1] : memref<3x3x32xf32, #tpu.memory_space<vmem>>, vector<3x3x32xf32>
    %cst = arith.constant 0.000000e+00 : f32
    %1 = vector.broadcast %cst : f32 to vector<1x8x8x32xf32>
    %c0_2 = arith.constant 0 : index
    %c0_3 = arith.constant 0 : index
    %2 = vector.load %arg3[%c0_2, %c0_3] : memref<1x32xf32, #tpu.memory_space<vmem>>, vector<1x32xf32>
    %3 = vector.shape_cast %2 : vector<1x32xf32> to vector<1x1x1x32xf32>
    %4 = vector.broadcast %3 : vector<1x1x1x32xf32> to vector<1x8x8x32xf32>
    %5 = arith.addf %1, %4 : vector<1x8x8x32xf32>
    %c0_4 = arith.constant 0 : index
    %c0_5 = arith.constant 0 : index
    %c0_6 = arith.constant 0 : index
    %c0_7 = arith.constant 0 : index
    %6 = vector.load %arg1[%c0_4, %c0_5, %c0_6, %c0_7] : memref<1x10x10x32xf32, #tpu.memory_space<vmem>>, vector<1x8x8x32xf32>
    %7 = vector.extract_strided_slice %0 {offsets = [0, 0, 0], sizes = [1, 1, 32], strides = [1, 1, 1]} : vector<3x3x32xf32> to vector<1x1x32xf32>
    %8 = vector.shape_cast %7 : vector<1x1x32xf32> to vector<32xf32>
    %9 = vector.shape_cast %8 : vector<32xf32> to vector<1x1x1x32xf32>
    %10 = vector.broadcast %9 : vector<1x1x1x32xf32> to vector<1x8x8x32xf32>
    %11 = arith.mulf %6, %10 : vector<1x8x8x32xf32>
    %12 = arith.addf %5, %11 : vector<1x8x8x32xf32>
    %c0_8 = arith.constant 0 : index
    %c0_9 = arith.constant 0 : index
    %c1 = arith.constant 1 : index
    %c0_10 = arith.constant 0 : index
    %13 = vector.load %arg1[%c0_8, %c0_9, %c1, %c0_10] : memref<1x10x10x32xf32, #tpu.memory_space<vmem>>, vector<1x8x8x32xf32>
    %14 = vector.extract_strided_slice %0 {offsets = [0, 1, 0], sizes = [1, 1, 32], strides = [1, 1, 1]} : vector<3x3x32xf32> to vector<1x1x32xf32>
    %15 = vector.shape_cast %14 : vector<1x1x32xf32> to vector<32xf32>
    %16 = vector.shape_cast %15 : vector<32xf32> to vector<1x1x1x32xf32>
    %17 = vector.broadcast %16 : vector<1x1x1x32xf32> to vector<1x8x8x32xf32>
    %18 = arith.mulf %13, %17 : vector<1x8x8x32xf32>
    %19 = arith.addf %12, %18 : vector<1x8x8x32xf32>
    %c0_11 = arith.constant 0 : index
    %c0_12 = arith.constant 0 : index
    %c2 = arith.constant 2 : index
    %c0_13 = arith.constant 0 : index
    %20 = vector.load %arg1[%c0_11, %c0_12, %c2, %c0_13] : memref<1x10x10x32xf32, #tpu.memory_space<vmem>>, vector<1x8x8x32xf32>
    %21 = vector.extract_strided_slice %0 {offsets = [0, 2, 0], sizes = [1, 1, 32], strides = [1, 1, 1]} : vector<3x3x32xf32> to vector<1x1x32xf32>
    %22 = vector.shape_cast %21 : vector<1x1x32xf32> to vector<32xf32>
    %23 = vector.shape_cast %22 : vector<32xf32> to vector<1x1x1x32xf32>
    %24 = vector.broadcast %23 : vector<1x1x1x32xf32> to vector<1x8x8x32xf32>
    %25 = arith.mulf %20, %24 : vector<1x8x8x32xf32>
    %26 = arith.addf %19, %25 : vector<1x8x8x32xf32>
    %c0_14 = arith.constant 0 : index
    %c1_15 = arith.constant 1 : index
    %c0_16 = arith.constant 0 : index
    %c0_17 = arith.constant 0 : index
    %27 = vector.load %arg1[%c0_14, %c1_15, %c0_16, %c0_17] : memref<1x10x10x32xf32, #tpu.memory_space<vmem>>, vector<1x8x8x32xf32>
    %28 = vector.extract_strided_slice %0 {offsets = [1, 0, 0], sizes = [1, 1, 32], strides = [1, 1, 1]} : vector<3x3x32xf32> to vector<1x1x32xf32>
    %29 = vector.shape_cast %28 : vector<1x1x32xf32> to vector<32xf32>
    %30 = vector.shape_cast %29 : vector<32xf32> to vector<1x1x1x32xf32>
    %31 = vector.broadcast %30 : vector<1x1x1x32xf32> to vector<1x8x8x32xf32>
    %32 = arith.mulf %27, %31 : vector<1x8x8x32xf32>
    %33 = arith.addf %26, %32 : vector<1x8x8x32xf32>
    %c0_18 = arith.constant 0 : index
    %c1_19 = arith.constant 1 : index
    %c1_20 = arith.constant 1 : index
    %c0_21 = arith.constant 0 : index
    %34 = vector.load %arg1[%c0_18, %c1_19, %c1_20, %c0_21] : memref<1x10x10x32xf32, #tpu.memory_space<vmem>>, vector<1x8x8x32xf32>
    %35 = vector.extract_strided_slice %0 {offsets = [1, 1, 0], sizes = [1, 1, 32], strides = [1, 1, 1]} : vector<3x3x32xf32> to vector<1x1x32xf32>
    %36 = vector.shape_cast %35 : vector<1x1x32xf32> to vector<32xf32>
    %37 = vector.shape_cast %36 : vector<32xf32> to vector<1x1x1x32xf32>
    %38 = vector.broadcast %37 : vector<1x1x1x32xf32> to vector<1x8x8x32xf32>
    %39 = arith.mulf %34, %38 : vector<1x8x8x32xf32>
    %40 = arith.addf %33, %39 : vector<1x8x8x32xf32>
    %c0_22 = arith.constant 0 : index
    %c1_23 = arith.constant 1 : index
    %c2_24 = arith.constant 2 : index
    %c0_25 = arith.constant 0 : index
    %41 = vector.load %arg1[%c0_22, %c1_23, %c2_24, %c0_25] : memref<1x10x10x32xf32, #tpu.memory_space<vmem>>, vector<1x8x8x32xf32>
    %42 = vector.extract_strided_slice %0 {offsets = [1, 2, 0], sizes = [1, 1, 32], strides = [1, 1, 1]} : vector<3x3x32xf32> to vector<1x1x32xf32>
    %43 = vector.shape_cast %42 : vector<1x1x32xf32> to vector<32xf32>
    %44 = vector.shape_cast %43 : vector<32xf32> to vector<1x1x1x32xf32>
    %45 = vector.broadcast %44 : vector<1x1x1x32xf32> to vector<1x8x8x32xf32>
    %46 = arith.mulf %41, %45 : vector<1x8x8x32xf32>
    %47 = arith.addf %40, %46 : vector<1x8x8x32xf32>
    %c0_26 = arith.constant 0 : index
    %c2_27 = arith.constant 2 : index
    %c0_28 = arith.constant 0 : index
    %c0_29 = arith.constant 0 : index
    %48 = vector.load %arg1[%c0_26, %c2_27, %c0_28, %c0_29] : memref<1x10x10x32xf32, #tpu.memory_space<vmem>>, vector<1x8x8x32xf32>
    %49 = vector.extract_strided_slice %0 {offsets = [2, 0, 0], sizes = [1, 1, 32], strides = [1, 1, 1]} : vector<3x3x32xf32> to vector<1x1x32xf32>
    %50 = vector.shape_cast %49 : vector<1x1x32xf32> to vector<32xf32>
    %51 = vector.shape_cast %50 : vector<32xf32> to vector<1x1x1x32xf32>
    %52 = vector.broadcast %51 : vector<1x1x1x32xf32> to vector<1x8x8x32xf32>
    %53 = arith.mulf %48, %52 : vector<1x8x8x32xf32>
    %54 = arith.addf %47, %53 : vector<1x8x8x32xf32>
    %c0_30 = arith.constant 0 : index
    %c2_31 = arith.constant 2 : index
    %c1_32 = arith.constant 1 : index
    %c0_33 = arith.constant 0 : index
    %55 = vector.load %arg1[%c0_30, %c2_31, %c1_32, %c0_33] : memref<1x10x10x32xf32, #tpu.memory_space<vmem>>, vector<1x8x8x32xf32>
    %56 = vector.extract_strided_slice %0 {offsets = [2, 1, 0], sizes = [1, 1, 32], strides = [1, 1, 1]} : vector<3x3x32xf32> to vector<1x1x32xf32>
    %57 = vector.shape_cast %56 : vector<1x1x32xf32> to vector<32xf32>
    %58 = vector.shape_cast %57 : vector<32xf32> to vector<1x1x1x32xf32>
    %59 = vector.broadcast %58 : vector<1x1x1x32xf32> to vector<1x8x8x32xf32>
    %60 = arith.mulf %55, %59 : vector<1x8x8x32xf32>
    %61 = arith.addf %54, %60 : vector<1x8x8x32xf32>
    %c0_34 = arith.constant 0 : index
    %c2_35 = arith.constant 2 : index
    %c2_36 = arith.constant 2 : index
    %c0_37 = arith.constant 0 : index
    %62 = vector.load %arg1[%c0_34, %c2_35, %c2_36, %c0_37] : memref<1x10x10x32xf32, #tpu.memory_space<vmem>>, vector<1x8x8x32xf32>
    %63 = vector.extract_strided_slice %0 {offsets = [2, 2, 0], sizes = [1, 1, 32], strides = [1, 1, 1]} : vector<3x3x32xf32> to vector<1x1x32xf32>
    %64 = vector.shape_cast %63 : vector<1x1x32xf32> to vector<32xf32>
    %65 = vector.shape_cast %64 : vector<32xf32> to vector<1x1x1x32xf32>
    %66 = vector.broadcast %65 : vector<1x1x1x32xf32> to vector<1x8x8x32xf32>
    %67 = arith.mulf %62, %66 : vector<1x8x8x32xf32>
    %68 = arith.addf %61, %67 : vector<1x8x8x32xf32>
    %69 = arith.negf %68 : vector<1x8x8x32xf32>
    %70 = math.exp %69 : vector<1x8x8x32xf32>
    %cst_38 = arith.constant 1.000000e+00 : f32
    %71 = vector.broadcast %cst_38 : f32 to vector<1x8x8x32xf32>
    %72 = arith.addf %71, %70 : vector<1x8x8x32xf32>
    %73 = arith.divf %71, %72 : vector<1x8x8x32xf32>
    %74 = arith.mulf %68, %73 : vector<1x8x8x32xf32>
    %c0_39 = arith.constant 0 : index
    %c0_40 = arith.constant 0 : index
    %c0_41 = arith.constant 0 : index
    %c0_42 = arith.constant 0 : index
    %75 = vector.load %arg4[%c0_39, %c0_40, %c0_41, %c0_42] : memref<1x8x8x32xf32, #tpu.memory_space<vmem>>, vector<1x8x8x32xf32>
    tpu.vector_store %arg4[%c0_39, %c0_40, %c0_41, %c0_42], %74 {strides = array<i32>} : memref<1x8x8x32xf32, #tpu.memory_space<vmem>>, vector<1x8x8x32xf32>,
    return
  }
  func.func @transform_0(%arg0: i32) -> (i32, i32, i32, i32) {
    %c0_i32 = arith.constant 0 : i32
    %c0_i32_0 = arith.constant 0 : i32
    %c0_i32_1 = arith.constant 0 : i32
    %c0_i32_2 = arith.constant 0 : i32
    return %arg0, %c0_i32, %c0_i32_0, %c0_i32_1 : i32, i32, i32, i32
  }
  func.func @transform_1(%arg0: i32) -> (i32, i32, i32) {
    %c0_i32 = arith.constant 0 : i32
    %c0_i32_0 = arith.constant 0 : i32
    %c0_i32_1 = arith.constant 0 : i32
    %c0_i32_2 = arith.constant 0 : i32
    return %c0_i32, %c0_i32_0, %c0_i32_1 : i32, i32, i32
  }
  func.func @transform_2(%arg0: i32) -> (i32, i32) {
    %c0_i32 = arith.constant 0 : i32
    %c0_i32_0 = arith.constant 0 : i32
    %c0_i32_1 = arith.constant 0 : i32
    return %c0_i32, %c0_i32_0 : i32, i32
  }
  func.func @transform_3(%arg0: i32) -> (i32, i32, i32, i32) {
    %c0_i32 = arith.constant 0 : i32
    %c0_i32_0 = arith.constant 0 : i32
    %c0_i32_1 = arith.constant 0 : i32
    %c0_i32_2 = arith.constant 0 : i32
    return %arg0, %c0_i32, %c0_i32_0, %c0_i32_1 : i32, i32, i32, i32
  }
}

module attributes {stable_mosaic.version = 11 : i64} {
  func.func @_matmul_bias_kernel(%arg0: i32, %arg1: memref<128x128xf32, #tpu.memory_space<vmem>>, %arg2: memref<128x256xf32, #tpu.memory_space<vmem>>, %arg3: memref<1x256xf32, #tpu.memory_space<vmem>>, %arg4: memref<128x256xf32, #tpu.memory_space<vmem>>) attributes {dimension_semantics = [#tpu.dimension_semantics<parallel>], iteration_bounds = array<i64: 1>, scalar_prefetch = 0 : i64, scratch_operands = 0 : i64, tpu.core_type = #tpu.core_type<tc>, window_params = [{transform_indices = @transform_0, window_bounds = array<i64: 128, 128>}, {pipeline_mode = #tpu.pipeline_mode<synchronous>, transform_indices = @transform_1, window_bounds = array<i64: 128, 256>}, {pipeline_mode = #tpu.pipeline_mode<synchronous>, transform_indices = @transform_2, window_bounds = array<i64: 1, 256>}, {transform_indices = @transform_3, window_bounds = array<i64: 128, 256>}]} {
    %c0 = arith.constant 0 : index
    %c0_0 = arith.constant 0 : index
    %0 = vector.load %arg1[%c0, %c0_0] : memref<128x128xf32, #tpu.memory_space<vmem>>, vector<128x128xf32>
    %c0_1 = arith.constant 0 : index
    %c0_2 = arith.constant 0 : index
    %1 = vector.load %arg2[%c0_1, %c0_2] : memref<128x256xf32, #tpu.memory_space<vmem>>, vector<128x256xf32>
    %cst = arith.constant dense<0.000000e+00> : vector<128x256xf32>
    %2 = tpu.matmul %0, %1, %cst {dimension_numbers = #tpu.dot_dimension_numbers<[1], [0], [0], [1], [0, 0, 1, 1], [], []>} : vector<128x128xf32>, vector<128x256xf32>, vector<128x256xf32> -> vector<128x256xf32>
    %c0_3 = arith.constant 0 : index
    %c0_4 = arith.constant 0 : index
    %3 = vector.load %arg3[%c0_3, %c0_4] : memref<1x256xf32, #tpu.memory_space<vmem>>, vector<1x256xf32>
    %4 = vector.broadcast %3 : vector<1x256xf32> to vector<128x256xf32>
    %5 = arith.addf %2, %4 : vector<128x256xf32>
    %c0_5 = arith.constant 0 : index
    %c0_6 = arith.constant 0 : index
    %6 = vector.load %arg4[%c0_5, %c0_6] : memref<128x256xf32, #tpu.memory_space<vmem>>, vector<128x256xf32>
    tpu.vector_store %arg4[%c0_5, %c0_6], %5 {strides = array<i32>} : memref<128x256xf32, #tpu.memory_space<vmem>>, vector<128x256xf32>,
    return
  }
  func.func @transform_0(%arg0: i32) -> (i32, i32) {
    %c0_i32 = arith.constant 0 : i32
    %c0_i32_0 = arith.constant 0 : i32
    return %arg0, %c0_i32 : i32, i32
  }
  func.func @transform_1(%arg0: i32) -> (i32, i32) {
    %c0_i32 = arith.constant 0 : i32
    %c0_i32_0 = arith.constant 0 : i32
    %c0_i32_1 = arith.constant 0 : i32
    return %c0_i32, %c0_i32_0 : i32, i32
  }
  func.func @transform_2(%arg0: i32) -> (i32, i32) {
    %c0_i32 = arith.constant 0 : i32
    %c0_i32_0 = arith.constant 0 : i32
    %c0_i32_1 = arith.constant 0 : i32
    return %c0_i32, %c0_i32_0 : i32, i32
  }
  func.func @transform_3(%arg0: i32) -> (i32, i32) {
    %c0_i32 = arith.constant 0 : i32
    %c0_i32_0 = arith.constant 0 : i32
    return %arg0, %c0_i32 : i32, i32
  }
}

module attributes {stable_mosaic.version = 11 : i64} {
  func.func @_selective_scan_kernel(%arg0: i32, %arg1: i32, %arg2: memref<1x64x128xf32, #tpu.memory_space<vmem>>, %arg3: memref<1x64x128xf32, #tpu.memory_space<vmem>>, %arg4: memref<1x64x128xf32, #tpu.memory_space<vmem>>, %arg5: memref<1024x128xf32, #tpu.memory_space<vmem>>, %arg6: memref<1024x64xf32, #tpu.memory_space<vmem>>, %arg7: memref<1024x128xf32, #tpu.memory_space<vmem>>, %arg8: memref<128x128xf32, #tpu.memory_space<vmem>>, %arg9: memref<128x128xf32, #tpu.memory_space<vmem>>, %arg10: memref<1x128xf32, #tpu.memory_space<vmem>>, %arg11: memref<1x128xf32, #tpu.memory_space<vmem>>, %arg12: memref<1x64x128xf32, #tpu.memory_space<vmem>>, %arg13: memref<16x128xf32, #tpu.memory_space<vmem>>, %arg14: memref<1024x128xf32, #tpu.memory_space<vmem>>, %arg15: memref<1024x128xf32, #tpu.memory_space<vmem>>, %arg16: memref<1024x128xf32, #tpu.memory_space<vmem>>, %arg17: memref<1024x128xf32, #tpu.memory_space<vmem>>, %arg18: memref<16x128xf32, #tpu.memory_space<vmem>>) attributes {dimension_semantics = [#tpu.dimension_semantics<parallel>, #tpu.dimension_semantics<arbitrary>], iteration_bounds = array<i64: 2, 1>, scalar_prefetch = 0 : i64, scratch_operands = 6 : i64, tpu.core_type = #tpu.core_type<tc>, window_params = [{transform_indices = @transform_0, window_bounds = array<i64: 1, 64, 128>}, {transform_indices = @transform_1, window_bounds = array<i64: 1, 64, 128>}, {transform_indices = @transform_2, window_bounds = array<i64: 1, 64, 128>}, {pipeline_mode = #tpu.pipeline_mode<synchronous>, transform_indices = @transform_3, window_bounds = array<i64: 1024, 128>}, {pipeline_mode = #tpu.pipeline_mode<synchronous>, transform_indices = @transform_4, window_bounds = array<i64: 1024, 64>}, {pipeline_mode = #tpu.pipeline_mode<synchronous>, transform_indices = @transform_5, window_bounds = array<i64: 1024, 128>}, {pipeline_mode = #tpu.pipeline_mode<synchronous>, transform_indices = @transform_6, window_bounds = array<i64: 128, 128>}, {pipeline_mode = #tpu.pipeline_mode<synchronous>, transform_indices = @transform_7, window_bounds = array<i64: 128, 128>}, {pipeline_mode = #tpu.pipeline_mode<synchronous>, transform_indices = @transform_8, window_bounds = array<i64: 1, 128>}, {pipeline_mode = #tpu.pipeline_mode<synchronous>, transform_indices = @transform_9, window_bounds = array<i64: 1, 128>}, {transform_indices = @transform_10, window_bounds = array<i64: 1, 64, 128>}]} {
    %c0 = arith.constant 0 : index
    %c0_0 = arith.constant 0 : index
    %c0_1 = arith.constant 0 : index
    %0 = vector.load %arg3[%c0, %c0_0, %c0_1] : memref<1x64x128xf32, #tpu.memory_space<vmem>>, vector<1x64x128xf32>
    %1 = vector.shape_cast %0 : vector<1x64x128xf32> to vector<64x128xf32>
    %c0_2 = arith.constant 0 : index
    %c0_3 = arith.constant 0 : index
    %2 = vector.load %arg11[%c0_2, %c0_3] : memref<1x128xf32, #tpu.memory_space<vmem>>, vector<1x128xf32>
    %3 = vector.broadcast %2 : vector<1x128xf32> to vector<64x128xf32>
    %4 = arith.addf %1, %3 : vector<64x128xf32>
    %cst = arith.constant 2.000000e+01 : f32
    %5 = vector.broadcast %cst : f32 to vector<64x128xf32>
    %6 = arith.cmpf ole, %4, %5 : vector<64x128xf32>
    %cst_4 = arith.constant 2.000000e+01 : f32
    %7 = vector.broadcast %cst_4 : f32 to vector<64x128xf32>
    %8 = arith.minimumf %4, %7 : vector<64x128xf32>
    %9 = math.exp %8 : vector<64x128xf32>
    %10 = math.log1p %9 : vector<64x128xf32>
    %11 = arith.select %6, %10, %4 : vector<64x128xi1>, vector<64x128xf32>
    %c0_5 = arith.constant 0 : index
    %c0_6 = arith.constant 0 : index
    %c0_7 = arith.constant 0 : index
    %12 = vector.load %arg2[%c0_5, %c0_6, %c0_7] : memref<1x64x128xf32, #tpu.memory_space<vmem>>, vector<1x64x128xf32>
    %13 = vector.shape_cast %12 : vector<1x64x128xf32> to vector<64x128xf32>
    %14 = arith.mulf %11, %13 : vector<64x128xf32>
    %c0_8 = arith.constant 0 : index
    %c0_9 = arith.constant 0 : index
    %15 = vector.load %arg6[%c0_8, %c0_9] : memref<1024x64xf32, #tpu.memory_space<vmem>>, vector<1024x64xf32>
    %cst_10 = arith.constant dense<0.000000e+00> : vector<1024x128xf32>
    %16 = tpu.matmul %15, %11, %cst_10 {dimension_numbers = #tpu.dot_dimension_numbers<[1], [0], [0], [1], [0, 0, 1, 1], [], []>} : vector<1024x64xf32>, vector<64x128xf32>, vector<1024x128xf32> -> vector<1024x128xf32>
    %c0_11 = arith.constant 0 : index
    %c0_12 = arith.constant 0 : index
    %17 = vector.load %arg5[%c0_11, %c0_12] : memref<1024x128xf32, #tpu.memory_space<vmem>>, vector<1024x128xf32>
    %18 = arith.mulf %16, %17 : vector<1024x128xf32>
    %19 = math.exp %18 : vector<1024x128xf32>
    %c0_13 = arith.constant 0 : index
    %c0_14 = arith.constant 0 : index
    %20 = vector.load %arg14[%c0_13, %c0_14] : memref<1024x128xf32, #tpu.memory_space<vmem>>, vector<1024x128xf32>
    tpu.vector_store %arg14[%c0_13, %c0_14], %19 {strides = array<i32>} : memref<1024x128xf32, #tpu.memory_space<vmem>>, vector<1024x128xf32>,
    %c0_15 = arith.constant 0 : index
    %c0_16 = arith.constant 0 : index
    %c0_17 = arith.constant 0 : index
    %21 = vector.load %arg4[%c0_15, %c0_16, %c0_17] : memref<1x64x128xf32, #tpu.memory_space<vmem>>, vector<1x64x128xf32>
    %22 = vector.shape_cast %21 : vector<1x64x128xf32> to vector<64x128xf32>
    %cst_18 = arith.constant dense<0.000000e+00> : vector<1024x128xf32>
    %23 = tpu.matmul %15, %22, %cst_18 {dimension_numbers = #tpu.dot_dimension_numbers<[1], [0], [0], [1], [0, 0, 1, 1], [], []>} : vector<1024x64xf32>, vector<64x128xf32>, vector<1024x128xf32> -> vector<1024x128xf32>
    %c0_19 = arith.constant 0 : index
    %c0_20 = arith.constant 0 : index
    %24 = vector.load %arg7[%c0_19, %c0_20] : memref<1024x128xf32, #tpu.memory_space<vmem>>, vector<1024x128xf32>
    %25 = arith.mulf %23, %24 : vector<1024x128xf32>
    %c0_21 = arith.constant 0 : index
    %c0_22 = arith.constant 0 : index
    %26 = vector.load %arg17[%c0_21, %c0_22] : memref<1024x128xf32, #tpu.memory_space<vmem>>, vector<1024x128xf32>
    tpu.vector_store %arg17[%c0_21, %c0_22], %25 {strides = array<i32>} : memref<1024x128xf32, #tpu.memory_space<vmem>>, vector<1024x128xf32>,
    %c0_23 = arith.constant 0 : index
    %c0_24 = arith.constant 0 : index
    %27 = vector.load %arg17[%c0_23, %c0_24] : memref<1024x128xf32, #tpu.memory_space<vmem>>, vector<1024x128xf32>
    %c0_25 = arith.constant 0 : index
    %c0_26 = arith.constant 0 : index
    %28 = vector.load %arg9[%c0_25, %c0_26] : memref<128x128xf32, #tpu.memory_space<vmem>>, vector<128x128xf32>
    %cst_27 = arith.constant dense<0.000000e+00> : vector<1024x128xf32>
    %29 = tpu.matmul %27, %28, %cst_27 {dimension_numbers = #tpu.dot_dimension_numbers<[1], [0], [0], [1], [0, 0, 1, 1], [], []>} : vector<1024x128xf32>, vector<128x128xf32>, vector<1024x128xf32> -> vector<1024x128xf32>
    %c0_28 = arith.constant 0 : index
    %c0_29 = arith.constant 0 : index
    %30 = vector.load %arg16[%c0_28, %c0_29] : memref<1024x128xf32, #tpu.memory_space<vmem>>, vector<1024x128xf32>
    tpu.vector_store %arg16[%c0_28, %c0_29], %29 {strides = array<i32>} : memref<1024x128xf32, #tpu.memory_space<vmem>>, vector<1024x128xf32>,
    %c0_30 = arith.constant 0 : index
    %c0_31 = arith.constant 0 : index
    %31 = vector.load %arg17[%c0_30, %c0_31] : memref<1024x128xf32, #tpu.memory_space<vmem>>, vector<1024x128xf32>
    %c0_32 = arith.constant 0 : index
    %c0_33 = arith.constant 0 : index
    %32 = vector.load %arg8[%c0_32, %c0_33] : memref<128x128xf32, #tpu.memory_space<vmem>>, vector<128x128xf32>
    %cst_34 = arith.constant dense<0.000000e+00> : vector<1024x128xf32>
    %33 = tpu.matmul %31, %32, %cst_34 {dimension_numbers = #tpu.dot_dimension_numbers<[1], [0], [0], [1], [0, 0, 1, 1], [], []>} : vector<1024x128xf32>, vector<128x128xf32>, vector<1024x128xf32> -> vector<1024x128xf32>
    %c0_35 = arith.constant 0 : index
    %c0_36 = arith.constant 0 : index
    %34 = vector.load %arg15[%c0_35, %c0_36] : memref<1024x128xf32, #tpu.memory_space<vmem>>, vector<1024x128xf32>
    tpu.vector_store %arg15[%c0_35, %c0_36], %33 {strides = array<i32>} : memref<1024x128xf32, #tpu.memory_space<vmem>>, vector<1024x128xf32>,
    %c0_37 = arith.constant 0 : index
    %c0_38 = arith.constant 0 : index
    %35 = vector.load %arg15[%c0_37, %c0_38] : memref<1024x128xf32, #tpu.memory_space<vmem>>, vector<1024x128xf32>
    %cst_39 = arith.constant dense<0.000000e+00> : vector<1024x128xf32>
    %36 = tpu.matmul %15, %14, %cst_39 {dimension_numbers = #tpu.dot_dimension_numbers<[1], [0], [0], [1], [0, 0, 1, 1], [], []>} : vector<1024x64xf32>, vector<64x128xf32>, vector<1024x128xf32> -> vector<1024x128xf32>
    %37 = arith.mulf %35, %36 : vector<1024x128xf32>
    %c0_40 = arith.constant 0 : index
    %c0_41 = arith.constant 0 : index
    %38 = vector.load %arg15[%c0_40, %c0_41] : memref<1024x128xf32, #tpu.memory_space<vmem>>, vector<1024x128xf32>
    tpu.vector_store %arg15[%c0_40, %c0_41], %37 {strides = array<i32>} : memref<1024x128xf32, #tpu.memory_space<vmem>>, vector<1024x128xf32>,
    %c0_i32 = arith.constant 0 : i32
    %39 = arith.cmpi eq, %arg1, %c0_i32 : i32
    %40 = arith.extui %39 : i1 to i32
    %c0_i32_42 = arith.constant 0 : i32
    %41 = arith.cmpi ne, %40, %c0_i32_42 : i32
    scf.if %41 {
      %cst_51 = arith.constant 0.000000e+00 : f32
      %47 = vector.broadcast %cst_51 : f32 to vector<16x128xf32>
      %c0_52 = arith.constant 0 : index
      %c0_53 = arith.constant 0 : index
      %48 = vector.load %arg13[%c0_52, %c0_53] : memref<16x128xf32, #tpu.memory_space<vmem>>, vector<16x128xf32>
      tpu.vector_store %arg13[%c0_52, %c0_53], %47 {strides = array<i32>} : memref<16x128xf32, #tpu.memory_space<vmem>>, vector<16x128xf32>,
    } else {
    }
    %c0_43 = arith.constant 0 : index
    %c0_44 = arith.constant 0 : index
    %42 = vector.load %arg10[%c0_43, %c0_44] : memref<1x128xf32, #tpu.memory_space<vmem>>, vector<1x128xf32>
    %c0_45 = arith.constant 0 : index
    %c0_46 = arith.constant 0 : index
    %43 = vector.load %arg13[%c0_45, %c0_46] : memref<16x128xf32, #tpu.memory_space<vmem>>, vector<16x128xf32>
    %c0_i32_47 = arith.constant 0 : i32
    %c4_i32 = arith.constant 4 : i32
    %44 = arith.addi %c0_i32_47, %c4_i32 : i32
    %c1_i32 = arith.constant 1 : i32
    %45 = scf.for %arg19 = %c0_i32_47 to %44 step %c1_i32 iter_args(%arg20 = %43) -> (vector<16x128xf32>)  : i32 {
      %c16_i32 = arith.constant 16 : i32
      %47 = arith.muli %arg19, %c16_i32 : i32
      %48 = tpu.assume_multiple %47, 16 : i32
      %c256_i32 = arith.constant 256 : i32
      %49 = arith.muli %arg19, %c256_i32 : i32
      %50 = tpu.assume_multiple %49, 256 : i32
      %c0_i32_51 = arith.constant 0 : i32
      %51 = arith.addi %50, %c0_i32_51 : i32
      %52 = tpu.assume_multiple %51, 16 : i32
      %53 = arith.index_cast %52 : i32 to index
      %c0_52 = arith.constant 0 : index
      %54 = vector.load %arg14[%53, %c0_52] : memref<1024x128xf32, #tpu.memory_space<vmem>>, vector<16x128xf32>
      %55 = arith.mulf %54, %arg20 : vector<16x128xf32>
      %56 = arith.index_cast %52 : i32 to index
      %c0_53 = arith.constant 0 : index
      %57 = vector.load %arg15[%56, %c0_53] : memref<1024x128xf32, #tpu.memory_space<vmem>>, vector<16x128xf32>
      %58 = arith.addf %55, %57 : vector<16x128xf32>
      %59 = arith.index_cast %52 : i32 to index
      %c0_54 = arith.constant 0 : index
      %60 = vector.load %arg16[%59, %c0_54] : memref<1024x128xf32, #tpu.memory_space<vmem>>, vector<16x128xf32>
      %61 = arith.mulf %60, %58 : vector<16x128xf32>
      %cst_55 = arith.constant dense<0.000000e+00> : vector<128xf32>
      %62 = vector.multi_reduction <add>, %61, %cst_55 [0] : vector<16x128xf32> to vector<128xf32>
      %63 = vector.shape_cast %62 : vector<128xf32> to vector<1x128xf32>
      %c0_56 = arith.constant 0 : index
      %c0_57 = arith.constant 0 : index
      %64 = vector.load %arg18[%c0_56, %c0_57] : memref<16x128xf32, #tpu.memory_space<vmem>>, vector<1x128xf32>
      tpu.vector_store %arg18[%c0_56, %c0_57], %63 {strides = array<i32>} : memref<16x128xf32, #tpu.memory_space<vmem>>, vector<1x128xf32>,
      %c16_i32_58 = arith.constant 16 : i32
      %65 = arith.addi %50, %c16_i32_58 : i32
      %66 = tpu.assume_multiple %65, 16 : i32
      %67 = arith.index_cast %66 : i32 to index
      %c0_59 = arith.constant 0 : index
      %68 = vector.load %arg14[%67, %c0_59] : memref<1024x128xf32, #tpu.memory_space<vmem>>, vector<16x128xf32>
      %69 = arith.mulf %68, %58 : vector<16x128xf32>
      %70 = arith.index_cast %66 : i32 to index
      %c0_60 = arith.constant 0 : index
      %71 = vector.load %arg15[%70, %c0_60] : memref<1024x128xf32, #tpu.memory_space<vmem>>, vector<16x128xf32>
      %72 = arith.addf %69, %71 : vector<16x128xf32>
      %73 = arith.index_cast %66 : i32 to index
      %c0_61 = arith.constant 0 : index
      %74 = vector.load %arg16[%73, %c0_61] : memref<1024x128xf32, #tpu.memory_space<vmem>>, vector<16x128xf32>
      %75 = arith.mulf %74, %72 : vector<16x128xf32>
      %cst_62 = arith.constant dense<0.000000e+00> : vector<128xf32>
      %76 = vector.multi_reduction <add>, %75, %cst_62 [0] : vector<16x128xf32> to vector<128xf32>
      %77 = vector.shape_cast %76 : vector<128xf32> to vector<1x128xf32>
      %c1 = arith.constant 1 : index
      %c0_63 = arith.constant 0 : index
      %78 = vector.load %arg18[%c1, %c0_63] : memref<16x128xf32, #tpu.memory_space<vmem>>, vector<1x128xf32>
      tpu.vector_store %arg18[%c1, %c0_63], %77 {strides = array<i32>} : memref<16x128xf32, #tpu.memory_space<vmem>>, vector<1x128xf32>,
      %c32_i32 = arith.constant 32 : i32
      %79 = arith.addi %50, %c32_i32 : i32
      %80 = tpu.assume_multiple %79, 16 : i32
      %81 = arith.index_cast %80 : i32 to index
      %c0_64 = arith.constant 0 : index
      %82 = vector.load %arg14[%81, %c0_64] : memref<1024x128xf32, #tpu.memory_space<vmem>>, vector<16x128xf32>
      %83 = arith.mulf %82, %72 : vector<16x128xf32>
      %84 = arith.index_cast %80 : i32 to index
      %c0_65 = arith.constant 0 : index
      %85 = vector.load %arg15[%84, %c0_65] : memref<1024x128xf32, #tpu.memory_space<vmem>>, vector<16x128xf32>
      %86 = arith.addf %83, %85 : vector<16x128xf32>
      %87 = arith.index_cast %80 : i32 to index
      %c0_66 = arith.constant 0 : index
      %88 = vector.load %arg16[%87, %c0_66] : memref<1024x128xf32, #tpu.memory_space<vmem>>, vector<16x128xf32>
      %89 = arith.mulf %88, %86 : vector<16x128xf32>
      %cst_67 = arith.constant dense<0.000000e+00> : vector<128xf32>
      %90 = vector.multi_reduction <add>, %89, %cst_67 [0] : vector<16x128xf32> to vector<128xf32>
      %91 = vector.shape_cast %90 : vector<128xf32> to vector<1x128xf32>
      %c2 = arith.constant 2 : index
      %c0_68 = arith.constant 0 : index
      %92 = vector.load %arg18[%c2, %c0_68] : memref<16x128xf32, #tpu.memory_space<vmem>>, vector<1x128xf32>
      tpu.vector_store %arg18[%c2, %c0_68], %91 {strides = array<i32>} : memref<16x128xf32, #tpu.memory_space<vmem>>, vector<1x128xf32>,
      %c48_i32 = arith.constant 48 : i32
      %93 = arith.addi %50, %c48_i32 : i32
      %94 = tpu.assume_multiple %93, 16 : i32
      %95 = arith.index_cast %94 : i32 to index
      %c0_69 = arith.constant 0 : index
      %96 = vector.load %arg14[%95, %c0_69] : memref<1024x128xf32, #tpu.memory_space<vmem>>, vector<16x128xf32>
      %97 = arith.mulf %96, %86 : vector<16x128xf32>
      %98 = arith.index_cast %94 : i32 to index
      %c0_70 = arith.constant 0 : index
      %99 = vector.load %arg15[%98, %c0_70] : memref<1024x128xf32, #tpu.memory_space<vmem>>, vector<16x128xf32>
      %100 = arith.addf %97, %99 : vector<16x128xf32>
      %101 = arith.index_cast %94 : i32 to index
      %c0_71 = arith.constant 0 : index
      %102 = vector.load %arg16[%101, %c0_71] : memref<1024x128xf32, #tpu.memory_space<vmem>>, vector<16x128xf32>
      %103 = arith.mulf %102, %100 : vector<16x128xf32>
      %cst_72 = arith.constant dense<0.000000e+00> : vector<128xf32>
      %104 = vector.multi_reduction <add>, %103, %cst_72 [0] : vector<16x128xf32> to vector<128xf32>
      %105 = vector.shape_cast %104 : vector<128xf32> to vector<1x128xf32>
      %c3 = arith.constant 3 : index
      %c0_73 = arith.constant 0 : index
      %106 = vector.load %arg18[%c3, %c0_73] : memref<16x128xf32, #tpu.memory_space<vmem>>, vector<1x128xf32>
      tpu.vector_store %arg18[%c3, %c0_73], %105 {strides = array<i32>} : memref<16x128xf32, #tpu.memory_space<vmem>>, vector<1x128xf32>,
      %c64_i32 = arith.constant 64 : i32
      %107 = arith.addi %50, %c64_i32 : i32
      %108 = tpu.assume_multiple %107, 16 : i32
      %109 = arith.index_cast %108 : i32 to index
      %c0_74 = arith.constant 0 : index
      %110 = vector.load %arg14[%109, %c0_74] : memref<1024x128xf32, #tpu.memory_space<vmem>>, vector<16x128xf32>
      %111 = arith.mulf %110, %100 : vector<16x128xf32>
      %112 = arith.index_cast %108 : i32 to index
      %c0_75 = arith.constant 0 : index
      %113 = vector.load %arg15[%112, %c0_75] : memref<1024x128xf32, #tpu.memory_space<vmem>>, vector<16x128xf32>
      %114 = arith.addf %111, %113 : vector<16x128xf32>
      %115 = arith.index_cast %108 : i32 to index
      %c0_76 = arith.constant 0 : index
      %116 = vector.load %arg16[%115, %c0_76] : memref<1024x128xf32, #tpu.memory_space<vmem>>, vector<16x128xf32>
      %117 = arith.mulf %116, %114 : vector<16x128xf32>
      %cst_77 = arith.constant dense<0.000000e+00> : vector<128xf32>
      %118 = vector.multi_reduction <add>, %117, %cst_77 [0] : vector<16x128xf32> to vector<128xf32>
      %119 = vector.shape_cast %118 : vector<128xf32> to vector<1x128xf32>
      %c4 = arith.constant 4 : index
      %c0_78 = arith.constant 0 : index
      %120 = vector.load %arg18[%c4, %c0_78] : memref<16x128xf32, #tpu.memory_space<vmem>>, vector<1x128xf32>
      tpu.vector_store %arg18[%c4, %c0_78], %119 {strides = array<i32>} : memref<16x128xf32, #tpu.memory_space<vmem>>, vector<1x128xf32>,
      %c80_i32 = arith.constant 80 : i32
      %121 = arith.addi %50, %c80_i32 : i32
      %122 = tpu.assume_multiple %121, 16 : i32
      %123 = arith.index_cast %122 : i32 to index
      %c0_79 = arith.constant 0 : index
      %124 = vector.load %arg14[%123, %c0_79] : memref<1024x128xf32, #tpu.memory_space<vmem>>, vector<16x128xf32>
      %125 = arith.mulf %124, %114 : vector<16x128xf32>
      %126 = arith.index_cast %122 : i32 to index
      %c0_80 = arith.constant 0 : index
      %127 = vector.load %arg15[%126, %c0_80] : memref<1024x128xf32, #tpu.memory_space<vmem>>, vector<16x128xf32>
      %128 = arith.addf %125, %127 : vector<16x128xf32>
      %129 = arith.index_cast %122 : i32 to index
      %c0_81 = arith.constant 0 : index
      %130 = vector.load %arg16[%129, %c0_81] : memref<1024x128xf32, #tpu.memory_space<vmem>>, vector<16x128xf32>
      %131 = arith.mulf %130, %128 : vector<16x128xf32>
      %cst_82 = arith.constant dense<0.000000e+00> : vector<128xf32>
      %132 = vector.multi_reduction <add>, %131, %cst_82 [0] : vector<16x128xf32> to vector<128xf32>
      %133 = vector.shape_cast %132 : vector<128xf32> to vector<1x128xf32>
      %c5 = arith.constant 5 : index
      %c0_83 = arith.constant 0 : index
      %134 = vector.load %arg18[%c5, %c0_83] : memref<16x128xf32, #tpu.memory_space<vmem>>, vector<1x128xf32>
      tpu.vector_store %arg18[%c5, %c0_83], %133 {strides = array<i32>} : memref<16x128xf32, #tpu.memory_space<vmem>>, vector<1x128xf32>,
      %c96_i32 = arith.constant 96 : i32
      %135 = arith.addi %50, %c96_i32 : i32
      %136 = tpu.assume_multiple %135, 16 : i32
      %137 = arith.index_cast %136 : i32 to index
      %c0_84 = arith.constant 0 : index
      %138 = vector.load %arg14[%137, %c0_84] : memref<1024x128xf32, #tpu.memory_space<vmem>>, vector<16x128xf32>
      %139 = arith.mulf %138, %128 : vector<16x128xf32>
      %140 = arith.index_cast %136 : i32 to index
      %c0_85 = arith.constant 0 : index
      %141 = vector.load %arg15[%140, %c0_85] : memref<1024x128xf32, #tpu.memory_space<vmem>>, vector<16x128xf32>
      %142 = arith.addf %139, %141 : vector<16x128xf32>
      %143 = arith.index_cast %136 : i32 to index
      %c0_86 = arith.constant 0 : index
      %144 = vector.load %arg16[%143, %c0_86] : memref<1024x128xf32, #tpu.memory_space<vmem>>, vector<16x128xf32>
      %145 = arith.mulf %144, %142 : vector<16x128xf32>
      %cst_87 = arith.constant dense<0.000000e+00> : vector<128xf32>
      %146 = vector.multi_reduction <add>, %145, %cst_87 [0] : vector<16x128xf32> to vector<128xf32>
      %147 = vector.shape_cast %146 : vector<128xf32> to vector<1x128xf32>
      %c6 = arith.constant 6 : index
      %c0_88 = arith.constant 0 : index
      %148 = vector.load %arg18[%c6, %c0_88] : memref<16x128xf32, #tpu.memory_space<vmem>>, vector<1x128xf32>
      tpu.vector_store %arg18[%c6, %c0_88], %147 {strides = array<i32>} : memref<16x128xf32, #tpu.memory_space<vmem>>, vector<1x128xf32>,
      %c112_i32 = arith.constant 112 : i32
      %149 = arith.addi %50, %c112_i32 : i32
      %150 = tpu.assume_multiple %149, 16 : i32
      %151 = arith.index_cast %150 : i32 to index
      %c0_89 = arith.constant 0 : index
      %152 = vector.load %arg14[%151, %c0_89] : memref<1024x128xf32, #tpu.memory_space<vmem>>, vector<16x128xf32>
      %153 = arith.mulf %152, %142 : vector<16x128xf32>
      %154 = arith.index_cast %150 : i32 to index
      %c0_90 = arith.constant 0 : index
      %155 = vector.load %arg15[%154, %c0_90] : memref<1024x128xf32, #tpu.memory_space<vmem>>, vector<16x128xf32>
      %156 = arith.addf %153, %155 : vector<16x128xf32>
      %157 = arith.index_cast %150 : i32 to index
      %c0_91 = arith.constant 0 : index
      %158 = vector.load %arg16[%157, %c0_91] : memref<1024x128xf32, #tpu.memory_space<vmem>>, vector<16x128xf32>
      %159 = arith.mulf %158, %156 : vector<16x128xf32>
      %cst_92 = arith.constant dense<0.000000e+00> : vector<128xf32>
      %160 = vector.multi_reduction <add>, %159, %cst_92 [0] : vector<16x128xf32> to vector<128xf32>
      %161 = vector.shape_cast %160 : vector<128xf32> to vector<1x128xf32>
      %c7 = arith.constant 7 : index
      %c0_93 = arith.constant 0 : index
      %162 = vector.load %arg18[%c7, %c0_93] : memref<16x128xf32, #tpu.memory_space<vmem>>, vector<1x128xf32>
      tpu.vector_store %arg18[%c7, %c0_93], %161 {strides = array<i32>} : memref<16x128xf32, #tpu.memory_space<vmem>>, vector<1x128xf32>,
      %c128_i32 = arith.constant 128 : i32
      %163 = arith.addi %50, %c128_i32 : i32
      %164 = tpu.assume_multiple %163, 16 : i32
      %165 = arith.index_cast %164 : i32 to index
      %c0_94 = arith.constant 0 : index
      %166 = vector.load %arg14[%165, %c0_94] : memref<1024x128xf32, #tpu.memory_space<vmem>>, vector<16x128xf32>
      %167 = arith.mulf %166, %156 : vector<16x128xf32>
      %168 = arith.index_cast %164 : i32 to index
      %c0_95 = arith.constant 0 : index
      %169 = vector.load %arg15[%168, %c0_95] : memref<1024x128xf32, #tpu.memory_space<vmem>>, vector<16x128xf32>
      %170 = arith.addf %167, %169 : vector<16x128xf32>
      %171 = arith.index_cast %164 : i32 to index
      %c0_96 = arith.constant 0 : index
      %172 = vector.load %arg16[%171, %c0_96] : memref<1024x128xf32, #tpu.memory_space<vmem>>, vector<16x128xf32>
      %173 = arith.mulf %172, %170 : vector<16x128xf32>
      %cst_97 = arith.constant dense<0.000000e+00> : vector<128xf32>
      %174 = vector.multi_reduction <add>, %173, %cst_97 [0] : vector<16x128xf32> to vector<128xf32>
      %175 = vector.shape_cast %174 : vector<128xf32> to vector<1x128xf32>
      %c8 = arith.constant 8 : index
      %c0_98 = arith.constant 0 : index
      %176 = vector.load %arg18[%c8, %c0_98] : memref<16x128xf32, #tpu.memory_space<vmem>>, vector<1x128xf32>
      tpu.vector_store %arg18[%c8, %c0_98], %175 {strides = array<i32>} : memref<16x128xf32, #tpu.memory_space<vmem>>, vector<1x128xf32>,
      %c144_i32 = arith.constant 144 : i32
      %177 = arith.addi %50, %c144_i32 : i32
      %178 = tpu.assume_multiple %177, 16 : i32
      %179 = arith.index_cast %178 : i32 to index
      %c0_99 = arith.constant 0 : index
      %180 = vector.load %arg14[%179, %c0_99] : memref<1024x128xf32, #tpu.memory_space<vmem>>, vector<16x128xf32>
      %181 = arith.mulf %180, %170 : vector<16x128xf32>
      %182 = arith.index_cast %178 : i32 to index
      %c0_100 = arith.constant 0 : index
      %183 = vector.load %arg15[%182, %c0_100] : memref<1024x128xf32, #tpu.memory_space<vmem>>, vector<16x128xf32>
      %184 = arith.addf %181, %183 : vector<16x128xf32>
      %185 = arith.index_cast %178 : i32 to index
      %c0_101 = arith.constant 0 : index
      %186 = vector.load %arg16[%185, %c0_101] : memref<1024x128xf32, #tpu.memory_space<vmem>>, vector<16x128xf32>
      %187 = arith.mulf %186, %184 : vector<16x128xf32>
      %cst_102 = arith.constant dense<0.000000e+00> : vector<128xf32>
      %188 = vector.multi_reduction <add>, %187, %cst_102 [0] : vector<16x128xf32> to vector<128xf32>
      %189 = vector.shape_cast %188 : vector<128xf32> to vector<1x128xf32>
      %c9 = arith.constant 9 : index
      %c0_103 = arith.constant 0 : index
      %190 = vector.load %arg18[%c9, %c0_103] : memref<16x128xf32, #tpu.memory_space<vmem>>, vector<1x128xf32>
      tpu.vector_store %arg18[%c9, %c0_103], %189 {strides = array<i32>} : memref<16x128xf32, #tpu.memory_space<vmem>>, vector<1x128xf32>,
      %c160_i32 = arith.constant 160 : i32
      %191 = arith.addi %50, %c160_i32 : i32
      %192 = tpu.assume_multiple %191, 16 : i32
      %193 = arith.index_cast %192 : i32 to index
      %c0_104 = arith.constant 0 : index
      %194 = vector.load %arg14[%193, %c0_104] : memref<1024x128xf32, #tpu.memory_space<vmem>>, vector<16x128xf32>
      %195 = arith.mulf %194, %184 : vector<16x128xf32>
      %196 = arith.index_cast %192 : i32 to index
      %c0_105 = arith.constant 0 : index
      %197 = vector.load %arg15[%196, %c0_105] : memref<1024x128xf32, #tpu.memory_space<vmem>>, vector<16x128xf32>
      %198 = arith.addf %195, %197 : vector<16x128xf32>
      %199 = arith.index_cast %192 : i32 to index
      %c0_106 = arith.constant 0 : index
      %200 = vector.load %arg16[%199, %c0_106] : memref<1024x128xf32, #tpu.memory_space<vmem>>, vector<16x128xf32>
      %201 = arith.mulf %200, %198 : vector<16x128xf32>
      %cst_107 = arith.constant dense<0.000000e+00> : vector<128xf32>
      %202 = vector.multi_reduction <add>, %201, %cst_107 [0] : vector<16x128xf32> to vector<128xf32>
      %203 = vector.shape_cast %202 : vector<128xf32> to vector<1x128xf32>
      %c10 = arith.constant 10 : index
      %c0_108 = arith.constant 0 : index
      %204 = vector.load %arg18[%c10, %c0_108] : memref<16x128xf32, #tpu.memory_space<vmem>>, vector<1x128xf32>
      tpu.vector_store %arg18[%c10, %c0_108], %203 {strides = array<i32>} : memref<16x128xf32, #tpu.memory_space<vmem>>, vector<1x128xf32>,
      %c176_i32 = arith.constant 176 : i32
      %205 = arith.addi %50, %c176_i32 : i32
      %206 = tpu.assume_multiple %205, 16 : i32
      %207 = arith.index_cast %206 : i32 to index
      %c0_109 = arith.constant 0 : index
      %208 = vector.load %arg14[%207, %c0_109] : memref<1024x128xf32, #tpu.memory_space<vmem>>, vector<16x128xf32>
      %209 = arith.mulf %208, %198 : vector<16x128xf32>
      %210 = arith.index_cast %206 : i32 to index
      %c0_110 = arith.constant 0 : index
      %211 = vector.load %arg15[%210, %c0_110] : memref<1024x128xf32, #tpu.memory_space<vmem>>, vector<16x128xf32>
      %212 = arith.addf %209, %211 : vector<16x128xf32>
      %213 = arith.index_cast %206 : i32 to index
      %c0_111 = arith.constant 0 : index
      %214 = vector.load %arg16[%213, %c0_111] : memref<1024x128xf32, #tpu.memory_space<vmem>>, vector<16x128xf32>
      %215 = arith.mulf %214, %212 : vector<16x128xf32>
      %cst_112 = arith.constant dense<0.000000e+00> : vector<128xf32>
      %216 = vector.multi_reduction <add>, %215, %cst_112 [0] : vector<16x128xf32> to vector<128xf32>
      %217 = vector.shape_cast %216 : vector<128xf32> to vector<1x128xf32>
      %c11 = arith.constant 11 : index
      %c0_113 = arith.constant 0 : index
      %218 = vector.load %arg18[%c11, %c0_113] : memref<16x128xf32, #tpu.memory_space<vmem>>, vector<1x128xf32>
      tpu.vector_store %arg18[%c11, %c0_113], %217 {strides = array<i32>} : memref<16x128xf32, #tpu.memory_space<vmem>>, vector<1x128xf32>,
      %c192_i32 = arith.constant 192 : i32
      %219 = arith.addi %50, %c192_i32 : i32
      %220 = tpu.assume_multiple %219, 16 : i32
      %221 = arith.index_cast %220 : i32 to index
      %c0_114 = arith.constant 0 : index
      %222 = vector.load %arg14[%221, %c0_114] : memref<1024x128xf32, #tpu.memory_space<vmem>>, vector<16x128xf32>
      %223 = arith.mulf %222, %212 : vector<16x128xf32>
      %224 = arith.index_cast %220 : i32 to index
      %c0_115 = arith.constant 0 : index
      %225 = vector.load %arg15[%224, %c0_115] : memref<1024x128xf32, #tpu.memory_space<vmem>>, vector<16x128xf32>
      %226 = arith.addf %223, %225 : vector<16x128xf32>
      %227 = arith.index_cast %220 : i32 to index
      %c0_116 = arith.constant 0 : index
      %228 = vector.load %arg16[%227, %c0_116] : memref<1024x128xf32, #tpu.memory_space<vmem>>, vector<16x128xf32>
      %229 = arith.mulf %228, %226 : vector<16x128xf32>
      %cst_117 = arith.constant dense<0.000000e+00> : vector<128xf32>
      %230 = vector.multi_reduction <add>, %229, %cst_117 [0] : vector<16x128xf32> to vector<128xf32>
      %231 = vector.shape_cast %230 : vector<128xf32> to vector<1x128xf32>
      %c12 = arith.constant 12 : index
      %c0_118 = arith.constant 0 : index
      %232 = vector.load %arg18[%c12, %c0_118] : memref<16x128xf32, #tpu.memory_space<vmem>>, vector<1x128xf32>
      tpu.vector_store %arg18[%c12, %c0_118], %231 {strides = array<i32>} : memref<16x128xf32, #tpu.memory_space<vmem>>, vector<1x128xf32>,
      %c208_i32 = arith.constant 208 : i32
      %233 = arith.addi %50, %c208_i32 : i32
      %234 = tpu.assume_multiple %233, 16 : i32
      %235 = arith.index_cast %234 : i32 to index
      %c0_119 = arith.constant 0 : index
      %236 = vector.load %arg14[%235, %c0_119] : memref<1024x128xf32, #tpu.memory_space<vmem>>, vector<16x128xf32>
      %237 = arith.mulf %236, %226 : vector<16x128xf32>
      %238 = arith.index_cast %234 : i32 to index
      %c0_120 = arith.constant 0 : index
      %239 = vector.load %arg15[%238, %c0_120] : memref<1024x128xf32, #tpu.memory_space<vmem>>, vector<16x128xf32>
      %240 = arith.addf %237, %239 : vector<16x128xf32>
      %241 = arith.index_cast %234 : i32 to index
      %c0_121 = arith.constant 0 : index
      %242 = vector.load %arg16[%241, %c0_121] : memref<1024x128xf32, #tpu.memory_space<vmem>>, vector<16x128xf32>
      %243 = arith.mulf %242, %240 : vector<16x128xf32>
      %cst_122 = arith.constant dense<0.000000e+00> : vector<128xf32>
      %244 = vector.multi_reduction <add>, %243, %cst_122 [0] : vector<16x128xf32> to vector<128xf32>
      %245 = vector.shape_cast %244 : vector<128xf32> to vector<1x128xf32>
      %c13 = arith.constant 13 : index
      %c0_123 = arith.constant 0 : index
      %246 = vector.load %arg18[%c13, %c0_123] : memref<16x128xf32, #tpu.memory_space<vmem>>, vector<1x128xf32>
      tpu.vector_store %arg18[%c13, %c0_123], %245 {strides = array<i32>} : memref<16x128xf32, #tpu.memory_space<vmem>>, vector<1x128xf32>,
      %c224_i32 = arith.constant 224 : i32
      %247 = arith.addi %50, %c224_i32 : i32
      %248 = tpu.assume_multiple %247, 16 : i32
      %249 = arith.index_cast %248 : i32 to index
      %c0_124 = arith.constant 0 : index
      %250 = vector.load %arg14[%249, %c0_124] : memref<1024x128xf32, #tpu.memory_space<vmem>>, vector<16x128xf32>
      %251 = arith.mulf %250, %240 : vector<16x128xf32>
      %252 = arith.index_cast %248 : i32 to index
      %c0_125 = arith.constant 0 : index
      %253 = vector.load %arg15[%252, %c0_125] : memref<1024x128xf32, #tpu.memory_space<vmem>>, vector<16x128xf32>
      %254 = arith.addf %251, %253 : vector<16x128xf32>
      %255 = arith.index_cast %248 : i32 to index
      %c0_126 = arith.constant 0 : index
      %256 = vector.load %arg16[%255, %c0_126] : memref<1024x128xf32, #tpu.memory_space<vmem>>, vector<16x128xf32>
      %257 = arith.mulf %256, %254 : vector<16x128xf32>
      %cst_127 = arith.constant dense<0.000000e+00> : vector<128xf32>
      %258 = vector.multi_reduction <add>, %257, %cst_127 [0] : vector<16x128xf32> to vector<128xf32>
      %259 = vector.shape_cast %258 : vector<128xf32> to vector<1x128xf32>
      %c14 = arith.constant 14 : index
      %c0_128 = arith.constant 0 : index
      %260 = vector.load %arg18[%c14, %c0_128] : memref<16x128xf32, #tpu.memory_space<vmem>>, vector<1x128xf32>
      tpu.vector_store %arg18[%c14, %c0_128], %259 {strides = array<i32>} : memref<16x128xf32, #tpu.memory_space<vmem>>, vector<1x128xf32>,
      %c240_i32 = arith.constant 240 : i32
      %261 = arith.addi %50, %c240_i32 : i32
      %262 = tpu.assume_multiple %261, 16 : i32
      %263 = arith.index_cast %262 : i32 to index
      %c0_129 = arith.constant 0 : index
      %264 = vector.load %arg14[%263, %c0_129] : memref<1024x128xf32, #tpu.memory_space<vmem>>, vector<16x128xf32>
      %265 = arith.mulf %264, %254 : vector<16x128xf32>
      %266 = arith.index_cast %262 : i32 to index
      %c0_130 = arith.constant 0 : index
      %267 = vector.load %arg15[%266, %c0_130] : memref<1024x128xf32, #tpu.memory_space<vmem>>, vector<16x128xf32>
      %268 = arith.addf %265, %267 : vector<16x128xf32>
      %269 = arith.index_cast %262 : i32 to index
      %c0_131 = arith.constant 0 : index
      %270 = vector.load %arg16[%269, %c0_131] : memref<1024x128xf32, #tpu.memory_space<vmem>>, vector<16x128xf32>
      %271 = arith.mulf %270, %268 : vector<16x128xf32>
      %cst_132 = arith.constant dense<0.000000e+00> : vector<128xf32>
      %272 = vector.multi_reduction <add>, %271, %cst_132 [0] : vector<16x128xf32> to vector<128xf32>
      %273 = vector.shape_cast %272 : vector<128xf32> to vector<1x128xf32>
      %c15 = arith.constant 15 : index
      %c0_133 = arith.constant 0 : index
      %274 = vector.load %arg18[%c15, %c0_133] : memref<16x128xf32, #tpu.memory_space<vmem>>, vector<1x128xf32>
      tpu.vector_store %arg18[%c15, %c0_133], %273 {strides = array<i32>} : memref<16x128xf32, #tpu.memory_space<vmem>>, vector<1x128xf32>,
      %c0_134 = arith.constant 0 : index
      %c0_135 = arith.constant 0 : index
      %275 = vector.load %arg18[%c0_134, %c0_135] : memref<16x128xf32, #tpu.memory_space<vmem>>, vector<16x128xf32>
      %c0_136 = arith.constant 0 : index
      %276 = arith.index_cast %48 : i32 to index
      %c0_137 = arith.constant 0 : index
      %277 = vector.load %arg2[%c0_136, %276, %c0_137] : memref<1x64x128xf32, #tpu.memory_space<vmem>>, vector<1x16x128xf32>
      %278 = vector.shape_cast %277 : vector<1x16x128xf32> to vector<16x128xf32>
      %279 = vector.broadcast %42 : vector<1x128xf32> to vector<16x128xf32>
      %280 = arith.mulf %279, %278 : vector<16x128xf32>
      %281 = arith.addf %275, %280 : vector<16x128xf32>
      %c0_138 = arith.constant 0 : index
      %282 = arith.index_cast %48 : i32 to index
      %c0_139 = arith.constant 0 : index
      %283 = vector.load %arg12[%c0_138, %282, %c0_139] : memref<1x64x128xf32, #tpu.memory_space<vmem>>, vector<1x16x128xf32>
      %284 = vector.shape_cast %283 : vector<1x16x128xf32> to vector<16x128xf32>
      %285 = vector.shape_cast %281 : vector<16x128xf32> to vector<1x16x128xf32>
      tpu.vector_store %arg12[%c0_138, %282, %c0_139], %285 {strides = array<i32>} : memref<1x64x128xf32, #tpu.memory_space<vmem>>, vector<1x16x128xf32>,
      scf.yield %268 : vector<16x128xf32>
    }
    %c4_i32_48 = arith.constant 4 : i32
    %c0_49 = arith.constant 0 : index
    %c0_50 = arith.constant 0 : index
    %46 = vector.load %arg13[%c0_49, %c0_50] : memref<16x128xf32, #tpu.memory_space<vmem>>, vector<16x128xf32>
    tpu.vector_store %arg13[%c0_49, %c0_50], %45 {strides = array<i32>} : memref<16x128xf32, #tpu.memory_space<vmem>>, vector<16x128xf32>,
    return
  }
  func.func @transform_0(%arg0: i32, %arg1: i32) -> (i32, i32, i32) {
    %c0_i32 = arith.constant 0 : i32
    %c0_i32_0 = arith.constant 0 : i32
    return %arg0, %arg1, %c0_i32 : i32, i32, i32
  }
  func.func @transform_1(%arg0: i32, %arg1: i32) -> (i32, i32, i32) {
    %c0_i32 = arith.constant 0 : i32
    %c0_i32_0 = arith.constant 0 : i32
    return %arg0, %arg1, %c0_i32 : i32, i32, i32
  }
  func.func @transform_2(%arg0: i32, %arg1: i32) -> (i32, i32, i32) {
    %c0_i32 = arith.constant 0 : i32
    %c0_i32_0 = arith.constant 0 : i32
    return %arg0, %arg1, %c0_i32 : i32, i32, i32
  }
  func.func @transform_3(%arg0: i32, %arg1: i32) -> (i32, i32) {
    %c0_i32 = arith.constant 0 : i32
    %c0_i32_0 = arith.constant 0 : i32
    %c0_i32_1 = arith.constant 0 : i32
    return %c0_i32, %c0_i32_0 : i32, i32
  }
  func.func @transform_4(%arg0: i32, %arg1: i32) -> (i32, i32) {
    %c0_i32 = arith.constant 0 : i32
    %c0_i32_0 = arith.constant 0 : i32
    %c0_i32_1 = arith.constant 0 : i32
    return %c0_i32, %c0_i32_0 : i32, i32
  }
  func.func @transform_5(%arg0: i32, %arg1: i32) -> (i32, i32) {
    %c0_i32 = arith.constant 0 : i32
    %c0_i32_0 = arith.constant 0 : i32
    %c0_i32_1 = arith.constant 0 : i32
    return %c0_i32, %c0_i32_0 : i32, i32
  }
  func.func @transform_6(%arg0: i32, %arg1: i32) -> (i32, i32) {
    %c0_i32 = arith.constant 0 : i32
    %c0_i32_0 = arith.constant 0 : i32
    %c0_i32_1 = arith.constant 0 : i32
    return %c0_i32, %c0_i32_0 : i32, i32
  }
  func.func @transform_7(%arg0: i32, %arg1: i32) -> (i32, i32) {
    %c0_i32 = arith.constant 0 : i32
    %c0_i32_0 = arith.constant 0 : i32
    %c0_i32_1 = arith.constant 0 : i32
    return %c0_i32, %c0_i32_0 : i32, i32
  }
  func.func @transform_8(%arg0: i32, %arg1: i32) -> (i32, i32) {
    %c0_i32 = arith.constant 0 : i32
    %c0_i32_0 = arith.constant 0 : i32
    %c0_i32_1 = arith.constant 0 : i32
    return %c0_i32, %c0_i32_0 : i32, i32
  }
  func.func @transform_9(%arg0: i32, %arg1: i32) -> (i32, i32) {
    %c0_i32 = arith.constant 0 : i32
    %c0_i32_0 = arith.constant 0 : i32
    %c0_i32_1 = arith.constant 0 : i32
    return %c0_i32, %c0_i32_0 : i32, i32
  }
  func.func @transform_10(%arg0: i32, %arg1: i32) -> (i32, i32, i32) {
    %c0_i32 = arith.constant 0 : i32
    %c0_i32_0 = arith.constant 0 : i32
    return %arg0, %arg1, %c0_i32 : i32, i32, i32
  }
}

module attributes {stable_mosaic.version = 11 : i64} {
  func.func @_ln_gate_pool_kernel(%arg0: i32, %arg1: i32, %arg2: memref<1x64x32xf32, #tpu.memory_space<vmem>>, %arg3: memref<1x64x32xf32, #tpu.memory_space<vmem>>, %arg4: memref<1x32xf32, #tpu.memory_space<vmem>>, %arg5: memref<1x32xf32, #tpu.memory_space<vmem>>, %arg6: memref<1x1x32xf32, #tpu.memory_space<vmem>>) attributes {dimension_semantics = [#tpu.dimension_semantics<parallel>, #tpu.dimension_semantics<arbitrary>], iteration_bounds = array<i64: 2, 1>, scalar_prefetch = 0 : i64, scratch_operands = 0 : i64, tpu.core_type = #tpu.core_type<tc>, window_params = [{transform_indices = @transform_0, window_bounds = array<i64: 1, 64, 32>}, {transform_indices = @transform_1, window_bounds = array<i64: 1, 64, 32>}, {pipeline_mode = #tpu.pipeline_mode<synchronous>, transform_indices = @transform_2, window_bounds = array<i64: 1, 32>}, {pipeline_mode = #tpu.pipeline_mode<synchronous>, transform_indices = @transform_3, window_bounds = array<i64: 1, 32>}, {transform_indices = @transform_4, window_bounds = array<i64: 1, 1, 32>}]} {
    %c0_i32 = arith.constant 0 : i32
    %0 = arith.cmpi eq, %arg1, %c0_i32 : i32
    %1 = arith.extui %0 : i1 to i32
    %c0_i32_0 = arith.constant 0 : i32
    %2 = arith.cmpi ne, %1, %c0_i32_0 : i32
    scf.if %2 {
      %cst_21 = arith.constant 0.000000e+00 : f32
      %40 = vector.broadcast %cst_21 : f32 to vector<1x32xf32>
      %c0_22 = arith.constant 0 : index
      %c0_23 = arith.constant 0 : index
      %c0_24 = arith.constant 0 : index
      %41 = vector.load %arg6[%c0_22, %c0_23, %c0_24] : memref<1x1x32xf32, #tpu.memory_space<vmem>>, vector<1x1x32xf32>
      %42 = vector.shape_cast %41 : vector<1x1x32xf32> to vector<1x32xf32>
      %43 = vector.shape_cast %40 : vector<1x32xf32> to vector<1x1x32xf32>
      tpu.vector_store %arg6[%c0_22, %c0_23, %c0_24], %43 {strides = array<i32>} : memref<1x1x32xf32, #tpu.memory_space<vmem>>, vector<1x1x32xf32>,
    } else {
    }
    %c0 = arith.constant 0 : index
    %c0_1 = arith.constant 0 : index
    %c0_2 = arith.constant 0 : index
    %3 = vector.load %arg2[%c0, %c0_1, %c0_2] : memref<1x64x32xf32, #tpu.memory_space<vmem>>, vector<1x64x32xf32>
    %4 = vector.shape_cast %3 : vector<1x64x32xf32> to vector<64x32xf32>
    %c0_3 = arith.constant 0 : index
    %c0_4 = arith.constant 0 : index
    %c0_5 = arith.constant 0 : index
    %5 = vector.load %arg3[%c0_3, %c0_4, %c0_5] : memref<1x64x32xf32, #tpu.memory_space<vmem>>, vector<1x64x32xf32>
    %6 = vector.shape_cast %5 : vector<1x64x32xf32> to vector<64x32xf32>
    %c0_6 = arith.constant 0 : index
    %c0_7 = arith.constant 0 : index
    %7 = vector.load %arg4[%c0_6, %c0_7] : memref<1x32xf32, #tpu.memory_space<vmem>>, vector<1x32xf32>
    %c0_8 = arith.constant 0 : index
    %c0_9 = arith.constant 0 : index
    %8 = vector.load %arg5[%c0_8, %c0_9] : memref<1x32xf32, #tpu.memory_space<vmem>>, vector<1x32xf32>
    %cst = arith.constant dense<0.000000e+00> : vector<64xf32>
    %9 = vector.multi_reduction <add>, %4, %cst [1] : vector<64x32xf32> to vector<64xf32>
    %10 = vector.shape_cast %9 : vector<64xf32> to vector<64x1xf32>
    %cst_10 = arith.constant 3.200000e+01 : f32
    %11 = vector.broadcast %cst_10 : f32 to vector<64x1xf32>
    %12 = arith.divf %10, %11 : vector<64x1xf32>
    %13 = vector.broadcast %12 : vector<64x1xf32> to vector<64x32xf32>
    %14 = arith.subf %4, %13 : vector<64x32xf32>
    %15 = arith.mulf %14, %14 : vector<64x32xf32>
    %cst_11 = arith.constant dense<0.000000e+00> : vector<64xf32>
    %16 = vector.multi_reduction <add>, %15, %cst_11 [1] : vector<64x32xf32> to vector<64xf32>
    %17 = vector.shape_cast %16 : vector<64xf32> to vector<64x1xf32>
    %cst_12 = arith.constant 3.200000e+01 : f32
    %18 = vector.broadcast %cst_12 : f32 to vector<64x1xf32>
    %19 = arith.divf %17, %18 : vector<64x1xf32>
    %20 = vector.broadcast %12 : vector<64x1xf32> to vector<64x32xf32>
    %21 = arith.subf %4, %20 : vector<64x32xf32>
    %cst_13 = arith.constant 9.99999974E-6 : f32
    %22 = vector.broadcast %cst_13 : f32 to vector<64x1xf32>
    %23 = arith.addf %19, %22 : vector<64x1xf32>
    %24 = math.rsqrt %23 : vector<64x1xf32>
    %25 = vector.broadcast %24 : vector<64x1xf32> to vector<64x32xf32>
    %26 = arith.mulf %21, %25 : vector<64x32xf32>
    %27 = vector.broadcast %7 : vector<1x32xf32> to vector<64x32xf32>
    %28 = arith.mulf %26, %27 : vector<64x32xf32>
    %29 = vector.broadcast %8 : vector<1x32xf32> to vector<64x32xf32>
    %30 = arith.addf %28, %29 : vector<64x32xf32>
    %31 = arith.mulf %30, %6 : vector<64x32xf32>
    %c0_14 = arith.constant 0 : index
    %c0_15 = arith.constant 0 : index
    %c0_16 = arith.constant 0 : index
    %32 = vector.load %arg6[%c0_14, %c0_15, %c0_16] : memref<1x1x32xf32, #tpu.memory_space<vmem>>, vector<1x1x32xf32>
    %33 = vector.shape_cast %32 : vector<1x1x32xf32> to vector<1x32xf32>
    %cst_17 = arith.constant dense<0.000000e+00> : vector<32xf32>
    %34 = vector.multi_reduction <add>, %31, %cst_17 [0] : vector<64x32xf32> to vector<32xf32>
    %35 = vector.shape_cast %34 : vector<32xf32> to vector<1x32xf32>
    %36 = arith.addf %33, %35 : vector<1x32xf32>
    %c0_18 = arith.constant 0 : index
    %c0_19 = arith.constant 0 : index
    %c0_20 = arith.constant 0 : index
    %37 = vector.load %arg6[%c0_18, %c0_19, %c0_20] : memref<1x1x32xf32, #tpu.memory_space<vmem>>, vector<1x1x32xf32>
    %38 = vector.shape_cast %37 : vector<1x1x32xf32> to vector<1x32xf32>
    %39 = vector.shape_cast %36 : vector<1x32xf32> to vector<1x1x32xf32>
    tpu.vector_store %arg6[%c0_18, %c0_19, %c0_20], %39 {strides = array<i32>} : memref<1x1x32xf32, #tpu.memory_space<vmem>>, vector<1x1x32xf32>,
    return
  }
  func.func @transform_0(%arg0: i32, %arg1: i32) -> (i32, i32, i32) {
    %c0_i32 = arith.constant 0 : i32
    %c0_i32_0 = arith.constant 0 : i32
    return %arg0, %arg1, %c0_i32 : i32, i32, i32
  }
  func.func @transform_1(%arg0: i32, %arg1: i32) -> (i32, i32, i32) {
    %c0_i32 = arith.constant 0 : i32
    %c0_i32_0 = arith.constant 0 : i32
    return %arg0, %arg1, %c0_i32 : i32, i32, i32
  }
  func.func @transform_2(%arg0: i32, %arg1: i32) -> (i32, i32) {
    %c0_i32 = arith.constant 0 : i32
    %c0_i32_0 = arith.constant 0 : i32
    %c0_i32_1 = arith.constant 0 : i32
    return %c0_i32, %c0_i32_0 : i32, i32
  }
  func.func @transform_3(%arg0: i32, %arg1: i32) -> (i32, i32) {
    %c0_i32 = arith.constant 0 : i32
    %c0_i32_0 = arith.constant 0 : i32
    %c0_i32_1 = arith.constant 0 : i32
    return %c0_i32, %c0_i32_0 : i32, i32
  }
  func.func @transform_4(%arg0: i32, %arg1: i32) -> (i32, i32, i32) {
    %c0_i32 = arith.constant 0 : i32
    %c0_i32_0 = arith.constant 0 : i32
    %c0_i32_1 = arith.constant 0 : i32
    return %arg0, %c0_i32, %c0_i32_0 : i32, i32, i32
  }
}

module attributes {stable_mosaic.version = 11 : i64} {
  func.func @_ln_gate_outproj_kernel(%arg0: i32, %arg1: i32, %arg2: memref<1x64x32xf32, #tpu.memory_space<vmem>>, %arg3: memref<1x64x32xf32, #tpu.memory_space<vmem>>, %arg4: memref<1x32xf32, #tpu.memory_space<vmem>>, %arg5: memref<1x32xf32, #tpu.memory_space<vmem>>, %arg6: memref<16x32xf32, #tpu.memory_space<vmem>>, %arg7: memref<1x16x1xf32, #tpu.memory_space<vmem>>, %arg8: memref<1x16x64xf32, #tpu.memory_space<vmem>>) attributes {dimension_semantics = [#tpu.dimension_semantics<parallel>, #tpu.dimension_semantics<parallel>], iteration_bounds = array<i64: 2, 1>, scalar_prefetch = 0 : i64, scratch_operands = 0 : i64, tpu.core_type = #tpu.core_type<tc>, window_params = [{transform_indices = @transform_0, window_bounds = array<i64: 1, 64, 32>}, {transform_indices = @transform_1, window_bounds = array<i64: 1, 64, 32>}, {pipeline_mode = #tpu.pipeline_mode<synchronous>, transform_indices = @transform_2, window_bounds = array<i64: 1, 32>}, {pipeline_mode = #tpu.pipeline_mode<synchronous>, transform_indices = @transform_3, window_bounds = array<i64: 1, 32>}, {pipeline_mode = #tpu.pipeline_mode<synchronous>, transform_indices = @transform_4, window_bounds = array<i64: 16, 32>}, {transform_indices = @transform_5, window_bounds = array<i64: 1, 16, 1>}, {transform_indices = @transform_6, window_bounds = array<i64: 1, 16, 64>}]} {
    %c0 = arith.constant 0 : index
    %c0_0 = arith.constant 0 : index
    %c0_1 = arith.constant 0 : index
    %0 = vector.load %arg2[%c0, %c0_0, %c0_1] : memref<1x64x32xf32, #tpu.memory_space<vmem>>, vector<1x64x32xf32>
    %1 = vector.shape_cast %0 : vector<1x64x32xf32> to vector<64x32xf32>
    %c0_2 = arith.constant 0 : index
    %c0_3 = arith.constant 0 : index
    %c0_4 = arith.constant 0 : index
    %2 = vector.load %arg3[%c0_2, %c0_3, %c0_4] : memref<1x64x32xf32, #tpu.memory_space<vmem>>, vector<1x64x32xf32>
    %3 = vector.shape_cast %2 : vector<1x64x32xf32> to vector<64x32xf32>
    %c0_5 = arith.constant 0 : index
    %c0_6 = arith.constant 0 : index
    %4 = vector.load %arg4[%c0_5, %c0_6] : memref<1x32xf32, #tpu.memory_space<vmem>>, vector<1x32xf32>
    %c0_7 = arith.constant 0 : index
    %c0_8 = arith.constant 0 : index
    %5 = vector.load %arg5[%c0_7, %c0_8] : memref<1x32xf32, #tpu.memory_space<vmem>>, vector<1x32xf32>
    %cst = arith.constant dense<0.000000e+00> : vector<64xf32>
    %6 = vector.multi_reduction <add>, %1, %cst [1] : vector<64x32xf32> to vector<64xf32>
    %7 = vector.shape_cast %6 : vector<64xf32> to vector<64x1xf32>
    %cst_9 = arith.constant 3.200000e+01 : f32
    %8 = vector.broadcast %cst_9 : f32 to vector<64x1xf32>
    %9 = arith.divf %7, %8 : vector<64x1xf32>
    %10 = vector.broadcast %9 : vector<64x1xf32> to vector<64x32xf32>
    %11 = arith.subf %1, %10 : vector<64x32xf32>
    %12 = arith.mulf %11, %11 : vector<64x32xf32>
    %cst_10 = arith.constant dense<0.000000e+00> : vector<64xf32>
    %13 = vector.multi_reduction <add>, %12, %cst_10 [1] : vector<64x32xf32> to vector<64xf32>
    %14 = vector.shape_cast %13 : vector<64xf32> to vector<64x1xf32>
    %cst_11 = arith.constant 3.200000e+01 : f32
    %15 = vector.broadcast %cst_11 : f32 to vector<64x1xf32>
    %16 = arith.divf %14, %15 : vector<64x1xf32>
    %17 = vector.broadcast %9 : vector<64x1xf32> to vector<64x32xf32>
    %18 = arith.subf %1, %17 : vector<64x32xf32>
    %cst_12 = arith.constant 9.99999974E-6 : f32
    %19 = vector.broadcast %cst_12 : f32 to vector<64x1xf32>
    %20 = arith.addf %16, %19 : vector<64x1xf32>
    %21 = math.rsqrt %20 : vector<64x1xf32>
    %22 = vector.broadcast %21 : vector<64x1xf32> to vector<64x32xf32>
    %23 = arith.mulf %18, %22 : vector<64x32xf32>
    %24 = vector.broadcast %4 : vector<1x32xf32> to vector<64x32xf32>
    %25 = arith.mulf %23, %24 : vector<64x32xf32>
    %26 = vector.broadcast %5 : vector<1x32xf32> to vector<64x32xf32>
    %27 = arith.addf %25, %26 : vector<64x32xf32>
    %28 = arith.mulf %27, %3 : vector<64x32xf32>
    %c0_13 = arith.constant 0 : index
    %c0_14 = arith.constant 0 : index
    %29 = vector.load %arg6[%c0_13, %c0_14] : memref<16x32xf32, #tpu.memory_space<vmem>>, vector<16x32xf32>
    %cst_15 = arith.constant dense<0.000000e+00> : vector<16x64xf32>
    %30 = tpu.matmul %29, %28, %cst_15 {dimension_numbers = #tpu.dot_dimension_numbers<[1], [1], [0], [0], [0, 0, 1, 0], [], []>} : vector<16x32xf32>, vector<64x32xf32>, vector<16x64xf32> -> vector<16x64xf32>
    %c0_16 = arith.constant 0 : index
    %c0_17 = arith.constant 0 : index
    %c0_18 = arith.constant 0 : index
    %31 = vector.load %arg7[%c0_16, %c0_17, %c0_18] : memref<1x16x1xf32, #tpu.memory_space<vmem>>, vector<1x16x1xf32>
    %32 = vector.shape_cast %31 : vector<1x16x1xf32> to vector<16x1xf32>
    %33 = vector.broadcast %32 : vector<16x1xf32> to vector<16x64xf32>
    %34 = arith.addf %30, %33 : vector<16x64xf32>
    %c0_19 = arith.constant 0 : index
    %c0_20 = arith.constant 0 : index
    %c0_21 = arith.constant 0 : index
    %35 = vector.load %arg8[%c0_19, %c0_20, %c0_21] : memref<1x16x64xf32, #tpu.memory_space<vmem>>, vector<1x16x64xf32>
    %36 = vector.shape_cast %35 : vector<1x16x64xf32> to vector<16x64xf32>
    %37 = vector.shape_cast %34 : vector<16x64xf32> to vector<1x16x64xf32>
    tpu.vector_store %arg8[%c0_19, %c0_20, %c0_21], %37 {strides = array<i32>} : memref<1x16x64xf32, #tpu.memory_space<vmem>>, vector<1x16x64xf32>,
    return
  }
  func.func @transform_0(%arg0: i32, %arg1: i32) -> (i32, i32, i32) {
    %c0_i32 = arith.constant 0 : i32
    %c0_i32_0 = arith.constant 0 : i32
    return %arg0, %arg1, %c0_i32 : i32, i32, i32
  }
  func.func @transform_1(%arg0: i32, %arg1: i32) -> (i32, i32, i32) {
    %c0_i32 = arith.constant 0 : i32
    %c0_i32_0 = arith.constant 0 : i32
    return %arg0, %arg1, %c0_i32 : i32, i32, i32
  }
  func.func @transform_2(%arg0: i32, %arg1: i32) -> (i32, i32) {
    %c0_i32 = arith.constant 0 : i32
    %c0_i32_0 = arith.constant 0 : i32
    %c0_i32_1 = arith.constant 0 : i32
    return %c0_i32, %c0_i32_0 : i32, i32
  }
  func.func @transform_3(%arg0: i32, %arg1: i32) -> (i32, i32) {
    %c0_i32 = arith.constant 0 : i32
    %c0_i32_0 = arith.constant 0 : i32
    %c0_i32_1 = arith.constant 0 : i32
    return %c0_i32, %c0_i32_0 : i32, i32
  }
  func.func @transform_4(%arg0: i32, %arg1: i32) -> (i32, i32) {
    %c0_i32 = arith.constant 0 : i32
    %c0_i32_0 = arith.constant 0 : i32
    %c0_i32_1 = arith.constant 0 : i32
    return %c0_i32, %c0_i32_0 : i32, i32
  }
  func.func @transform_5(%arg0: i32, %arg1: i32) -> (i32, i32, i32) {
    %c0_i32 = arith.constant 0 : i32
    %c0_i32_0 = arith.constant 0 : i32
    %c0_i32_1 = arith.constant 0 : i32
    return %arg0, %c0_i32, %c0_i32_0 : i32, i32, i32
  }
  func.func @transform_6(%arg0: i32, %arg1: i32) -> (i32, i32, i32) {
    %c0_i32 = arith.constant 0 : i32
    %c0_i32_0 = arith.constant 0 : i32
    return %arg0, %c0_i32, %arg1 : i32, i32, i32
  }
}

</mosaic_0001>

<bundles_post_ra>
// kernel: _lambda_.6
= control target key start
LH: loop header
LB: loop body
LE: loop exit
PB: predicated region body
PF: predicated region fallthrough
CT: control target
= control target key end

     0   :  { %8 = vsyncpa [#allocation3], 0  ;;  %s659_s15 = smov [#allocation2]   ;;  %s660_s17 = smov 128   ;;  %s1124_s0 = inlined_call_operand.hbm [shape: f32[128,16], index: 0, kind: input, shape index: {}]   ;;  %s1125_s1 = inlined_call_operand.vmem [shape: f32[16,64], index: 1, kind: input, shape index: {}]   ;;  %s1126_s2 = inlined_call_operand.vmem [shape: f32[1,64], index: 2, kind: input, shape index: {}]   ;;  %s1127_s3 = inlined_call_operand.vmem [shape: f32[128,64], index: 3, kind: output, shape index: {}]  }
   0x1   :  { %s13_s14 = sshll.u32 %s1124_s0, 4  ;;  %s15_s16 = sshll.u32 %s659_s15, 4  ;;  %s14_s14 = int_to_ptr.hbm [resolvable:$true] %s13_s14  ;;  %s16_s16 = int_to_ptr.vmem [resolvable:$true] %s15_s16 }
   0x2   :  { %s661_s18 = smov 8  }
   0x3   :  { %21 = dma.hbm_to_vmem [thread:$0]  %s14_s14, 2048, %s16_s16, [#allocation3], %s660_s17, %s660_s17, %s661_s18  }
   0x4   :  { %657 = dma.done.wait [#allocation3], 2048  }
   0x5   :  { %658 = vsyncadd [#allocation3], 4294965248  ;;  %v47_v0 = vld [vmem:[%s1125_s1 + $0x8] sm:$0xff]  ;;  %v46_v1 = vld [vmem:[%s1125_s1] sm:$0xff]  ;;  %vm52_vm0 = vcmask 130048   ;;  %v166_v39 = vlaneseq  ;;  %vm505_vm6 = vcmask 523264  }
   0x6   :  { %115 = vmatpush.msra.mxu0 %v47_v0  ;;  %559 = vmatpush.msra.mxu1 %v47_v0  ;;  %v30_v2 = vld [vmem:[#allocation2] sm:$0xff]  ;;  %v31_v6 = vld [vmem:[#allocation2 + $0x8] sm:$0xff]  ;;  %v32_v10 = vld [vmem:[#allocation2 + $0x10] sm:$0xff] }
   0x7   :  { %560 = vmatpush.msra.mxu2 %v47_v0  ;;  %561 = vmatpush.msra.mxu3 %v47_v0  ;;  %v34_v3 = vld [vmem:[#allocation2 + $0x20] sm:$0xff]  ;;  %v35_v7 = vld [vmem:[#allocation2 + $0x28] sm:$0xff]  ;;  %v36_v11 = vld [vmem:[#allocation2 + $0x30] sm:$0xff]  ;;  %v745_v46 = vand.u32 127, %v166_v39 }
   0x8   :  { %116 = vmatpush.msra.mxu0 %v46_v1  ;;  %562 = vmatpush.msra.mxu1 %v46_v1  ;;  %v38_v4 = vld [vmem:[#allocation2 + $0x40] sm:$0xff]  ;;  %v39_v8 = vld [vmem:[#allocation2 + $0x48] sm:$0xff]  ;;  %v40_v12 = vld [vmem:[#allocation2 + $0x50] sm:$0xff] }
   0x9   :  { %v42_v5 = vld [vmem:[#allocation2 + $0x60] sm:$0xff]  ;;  %563 = vmatpush.msra.mxu2 %v46_v1  ;;  %564 = vmatpush.msra.mxu3 %v46_v1  ;;  %v43_v9 = vld [vmem:[#allocation2 + $0x68] sm:$0xff]  ;;  %v44_v13 = vld [vmem:[#allocation2 + $0x70] sm:$0xff]  ;;  %vm168_vm4 = vcmp.ge.s32.totalorder %v745_v46, 32 }
   0xa   :  { %527 = vmatmul.msk.f32.vlgmr.msra.gmra.mxu0 %vm52_vm0, %v30_v2  ;;  %531 = vmatmul.msk.f32.vlgmr.msra.gmra.mxu1 %vm52_vm0, %v34_v3  ;;  %v33_v14 = vld [vmem:[#allocation2 + $0x18] sm:$0xff]  ;;  %v710_v18 = vld [vmem:[%s1126_s2] ss:$0 sm:$0xff] }
   0xb   :  { %535 = vmatmul.msk.f32.vlgmr.msra.gmra.mxu2 %vm52_vm0, %v38_v4  ;;  %539 = vmatmul.msk.f32.vlgmr.msra.gmra.mxu3 %vm52_vm0, %v42_v5  ;;  %v37_v15 = vld [vmem:[#allocation2 + $0x38] sm:$0xff] }
   0xc   :  { %v41_v16 = vld [vmem:[#allocation2 + $0x58] sm:$0xff] }
   0xd   :  { %v45_v17 = vld [vmem:[#allocation2 + $0x78] sm:$0xff] }
  0x12   :  { %528 = vmatmul.msk.f32.gmra.mxu0 %vm52_vm0, %v31_v6  ;;  %532 = vmatmul.msk.f32.gmra.mxu1 %vm52_vm0, %v35_v7 }
  0x13   :  { %536 = vmatmul.msk.f32.gmra.mxu2 %vm52_vm0, %v39_v8  ;;  %540 = vmatmul.msk.f32.gmra.mxu3 %vm52_vm0, %v43_v9 }
  0x1a   :  { %529 = vmatmul.msk.f32.gmra.mxu0 %vm52_vm0, %v32_v10  ;;  %533 = vmatmul.msk.f32.gmra.mxu1 %vm52_vm0, %v36_v11 }
  0x1b   :  { %537 = vmatmul.msk.f32.gmra.mxu2 %vm52_vm0, %v40_v12  ;;  %541 = vmatmul.msk.f32.gmra.mxu3 %vm52_vm0, %v44_v13 }
  0x22   :  { %530 = vmatmul.msk.f32.gmra.mxu0 %vm52_vm0, %v33_v14  ;;  %534 = vmatmul.msk.f32.gmra.mxu1 %vm52_vm0, %v37_v15 }
  0x23   :  { %538 = vmatmul.msk.f32.gmra.mxu2 %vm52_vm0, %v41_v16  ;;  %542 = vmatmul.msk.f32.gmra.mxu3 %vm52_vm0, %v45_v17 }
  0x87   :  { %v118_v19 = vpop.f32.mrf.mxu0  ;;  %v130_v20 = vpop.f32.mrf.mxu1 }
  0x88   :  { %v713_v21 = vadd.f32 %v710_v18, %v118_v19  ;;  %v716_v22 = vadd.f32 %v710_v18, %v130_v20 }
  0x8a   :  { %v543_v23 = vmul.f32 -1.442695, %v713_v21  ;;  %v547_v24 = vmul.f32 -1.442695, %v716_v22 }
  0x8c   :  { %569 = vpow2.f32 %v543_v23 }
  0x8d   :  { %571 = vpow2.f32 %v547_v24 }
  0x8e   :  { %v142_v25 = vpop.f32.mrf.mxu2  ;;  %v154_v26 = vpop.f32.mrf.mxu3 }
  0x8f   :  { %v721_v27 = vadd.f32 %v710_v18, %v142_v25  ;;  %v724_v28 = vadd.f32 %v710_v18, %v154_v26  ;;  %v121_v29 = vpop.f32.mrf.mxu0  ;;  %v133_v30 = vpop.f32.mrf.mxu1 }
  0x90   :  { %v727_v31 = vadd.f32 %v710_v18, %v121_v29  ;;  %v730_v32 = vadd.f32 %v710_v18, %v133_v30 }
  0x91   :  { %v551_v33 = vmul.f32 -1.442695, %v721_v27  ;;  %v555_v34 = vmul.f32 -1.442695, %v724_v28 }
  0x92   :  { %v570_v35 = vpop.eup %569  ;;  %v544_v38 = vmul.f32 -1.442695, %v727_v31  ;;  %v548_v41 = vmul.f32 -1.442695, %v730_v32 }
  0x93   :  { %v572_v36 = vpop.eup %571  ;;  %v734_v37 = vadd.f32 1.0, %v570_v35  ;;  %573 = vpow2.f32 %v551_v33 }
  0x94   :  { %v737_v40 = vadd.f32 1.0, %v572_v36  ;;  %575 = vpow2.f32 %v555_v34 }
  0x95   :  { %577 = vrcp.f32 %v734_v37  ;;  %v242_v47 = vand.u32 2147483647, %v734_v37  ;;  %v244_v48 = vand.u32 2147483648, %v734_v37  ;;  %vm238_vm1 = vweird.f32 %v734_v37 }
  0x96   :  { %579 = vrcp.f32 %v737_v40  ;;  %v145_v42 = vpop.f32.mrf.mxu2  ;;  %v157_v43 = vpop.f32.mrf.mxu3  ;;  %v302_v50 = vand.u32 2147483647, %v737_v40  ;;  %v304_v51 = vand.u32 2147483648, %v737_v40  ;;  %vm298_vm2 = vweird.f32 %v737_v40 }
  0x97   :  { %581 = vpow2.f32 %v544_v38  ;;  %v743_v44 = vadd.f32 %v710_v18, %v145_v42  ;;  %v124_v45 = vpop.f32.mrf.mxu0  ;;  %v753_v53 = vadd.f32 %v710_v18, %v157_v43  ;;  %v136_v59 = vpop.f32.mrf.mxu1  ;;  %vm765_vm3 = vcmp.eq.f32.partialorder %v242_v47, 8.507059e+37 }
  0x98   :  { %583 = vpow2.f32 %v548_v41  ;;  %v758_v56 = vadd.f32 %v710_v18, %v124_v45  ;;  %v245_v63 = vor.u32 1.1754944e-38, %v244_v48  ;;  %vm772_vm5 = vcmp.eq.f32.partialorder %v302_v50, 8.507059e+37 }
  0x99   :  { %v574_v49 = vpop.eup %573  ;;  %v552_v52 = vmul.f32 -1.442695, %v743_v44  ;;  %v305_v3 = vor.u32 1.1754944e-38, %v304_v51  ;;  %v556_v4 = vmul.f32 -1.442695, %v753_v53  ;;  %v782_v8 = vadd.f32 %v710_v18, %v136_v59 }
  0x9a   :  { %v576_v54 = vpop.eup %575  ;;  %v755_v55 = vadd.f32 1.0, %v574_v49  ;;  %v779_v7 = vmul.f32 -1.442695, %v758_v56 }
  0x9b   :  { %v578_v57 = vpop.eup %577  ;;  %v762_v58 = vadd.f32 1.0, %v576_v54  ;;  %v795_v24 = vmul.f32 -1.442695, %v782_v8 }
  0x9c   :  { %v580_v60 = vpop.eup %579  ;;  %v234_v61 = vmul.f32 %v578_v57, %v734_v37  ;;  %585 = vrcp.f32 %v755_v55  ;;  %vm239_vm7 = vweird.f32 %v578_v57  ;;  %v362_v10 = vand.u32 2147483647, %v755_v55 }
  0x9d   :  { %v582_v0 = vpop.eup %581  ;;  %v294_v1 = vmul.f32 %v580_v60, %v737_v40  ;;  %587 = vpow2.f32 %v552_v52  ;;  %v364_v11 = vand.u32 2147483648, %v755_v55  ;;  %v424_v13 = vand.u32 2147483648, %v762_v58  ;;  %vm240_vm10 = vmor %vm238_vm1, %vm239_vm7 }
  0x9e   :  { %v584_v5 = vpop.eup %583  ;;  %v235_v6 = vsub.f32 1.0, %v234_v61  ;;  %589 = vrcp.f32 %v762_v58  ;;  %v787_v14 = vadd.f32 1.0, %v582_v0  ;;  %vm299_vm8 = vweird.f32 %v580_v60  ;;  %v148_v19 = vpop.f32.mrf.mxu2 }
  0x9f   :  { %v295_v9 = vsub.f32 1.0, %v294_v1  ;;  %v789_v15 = vadd.f32 1.0, %v584_v5  ;;  %v422_v17 = vand.u32 2147483647, %v762_v58  ;;  %591 = vpow2.f32 %v556_v4  ;;  %vm300_vm13 = vmor %vm298_vm2, %vm299_vm8 }
  0xa0   :  { %v236_v12 = vmul.f32 %v578_v57, %v235_v6  ;;  %vm358_vm9 = vweird.f32 %v755_v55  ;;  %593 = vrcp.f32 %v787_v14  ;;  %vm801_vm11 = vcmp.eq.f32.partialorder %v362_v10, 8.507059e+37 }
  0xa1   :  { %v296_v16 = vmul.f32 %v580_v60, %v295_v9  ;;  %v365_v33 = vor.u32 1.1754944e-38, %v364_v11  ;;  %vm418_vm12 = vweird.f32 %v762_v58  ;;  %v425_v36 = vor.u32 1.1754944e-38, %v424_v13 }
  0xa2   :  { %v586_v20 = vpop.eup %585  ;;  %v237_v23 = vadd.f32 %v578_v57, %v236_v12  ;;  %595 = vrcp.f32 %v789_v15  ;;  %v811_v37 = vadd.f32 %v710_v18, %v148_v19  ;;  %vm816_vm14 = vcmp.eq.f32.partialorder %v422_v17, 8.507059e+37 }
  0xa3   :  { %v588_v25 = vpop.eup %587  ;;  %v297_v26 = vadd.f32 %v580_v60, %v296_v16  ;;  %v354_v29 = vmul.f32 %v586_v20, %v755_v55  ;;  %vm253_vm15 = vweird.f32 %v787_v14  ;;  %v257_v47 = vand.u32 2147483647, %v787_v14 }
  0xa4   :  { %v590_v34 = vpop.eup %589  ;;  %v241_v35 = vsel %vm240_vm10, %v578_v57, %v237_v23  ;;  %vm359_vm0 = vweird.f32 %v586_v20  ;;  %v259_v57 = vand.u32 2147483648, %v787_v14  ;;  %v830_v59 = vadd.f32 1.0, %v588_v25 }
  0xa5   :  { %v246_v38 = vsel %vm765_vm3, %v245_v63, %v241_v35  ;;  %v301_v39 = vsel %vm300_vm13, %v580_v60, %v297_v26  ;;  %v355_v41 = vsub.f32 1.0, %v354_v29  ;;  %v414_v42 = vmul.f32 %v590_v34, %v762_v58  ;;  %v592_v48 = vpop.eup %591  ;;  %vm360_vm2 = vmor %vm358_vm9, %vm359_vm0  ;;  %v160_v35 = vpop.f32.mrf.mxu3 }
  0xa6   :  { %v473_v40 = vmul.f32 %v246_v38, %v713_v21  ;;  %v306_v45 = vsel %vm772_vm5, %v305_v3, %v301_v39  ;;  %v594_v52 = vpop.eup %593  ;;  %vm419_vm1 = vweird.f32 %v590_v34  ;;  %vm846_vm3 = vcmp.eq.f32.partialorder %v257_v47, 8.507059e+37  ;;  %v139_v47 = vpop.f32.mrf.mxu1 }
  0xa7   :  { %v477_v49 = vmul.f32 %v306_v45, %v716_v22  ;;  %v356_v50 = vmul.f32 %v586_v20, %v355_v41  ;;  %v415_v51 = vsub.f32 1.0, %v414_v42  ;;  %v249_v63 = vmul.f32 %v594_v52, %v787_v14  ;;  %vm420_vm7 = vmor %vm418_vm12, %vm419_vm1  ;;  %v127_v42 = vpop.f32.mrf.mxu0 }
  0xa8   :  { %v489_v54 = vsel %vm168_vm4, %v473_v40, %v713_v21  ;;  %v596_v0 = vpop.eup %595  ;;  %vm313_vm5 = vweird.f32 %v789_v15  ;;  %597 = vrcp.f32 %v830_v59  ;;  %vm254_vm8 = vweird.f32 %v594_v52 }
  0xa9   :  { %506 = vst.msk [vmem:[%s1127_s3] sm:$0xff] %vm505_vm6, %v489_v54  ;;  %v493_v60 = vsel %vm168_vm4, %v477_v49, %v716_v22  ;;  %v357_v61 = vadd.f32 %v586_v20, %v356_v50  ;;  %v416_v62 = vmul.f32 %v590_v34, %v415_v51  ;;  %v852_v22 = vadd.f32 1.0, %v592_v48  ;;  %vm255_vm10 = vmor %vm253_vm15, %vm254_vm8 }
  0xaa   :  { %510 = vst.msk [vmem:[%s1127_s3 + $0x20] sm:$0xff] %vm505_vm6, %v493_v60  ;;  %v250_v3 = vsub.f32 1.0, %v249_v63  ;;  %v309_v4 = vmul.f32 %v596_v0, %v789_v15  ;;  %v317_v55 = vand.u32 2147483647, %v789_v15  ;;  %v319_v6 = vand.u32 2147483648, %v789_v15 }
  0xab   :  { %v361_v1 = vsel %vm360_vm2, %v586_v20, %v357_v61  ;;  %v417_v2 = vadd.f32 %v590_v34, %v416_v62  ;;  %vm314_vm9 = vweird.f32 %v596_v0  ;;  %v377_v16 = vand.u32 2147483647, %v830_v59 }
  0xac   :  { %v366_v5 = vsel %vm801_vm11, %v365_v33, %v361_v1  ;;  %v251_v11 = vmul.f32 %v594_v52, %v250_v3  ;;  %v310_v12 = vsub.f32 1.0, %v309_v4  ;;  %599 = vrcp.f32 %v852_v22  ;;  %vm315_vm13 = vmor %vm313_vm5, %vm314_vm9 }
  0xad   :  { %v481_v9 = vmul.f32 %v366_v5, %v721_v27  ;;  %v421_v10 = vsel %vm420_vm7, %v590_v34, %v417_v2  ;;  %v260_v25 = vor.u32 1.1754944e-38, %v259_v57  ;;  %vm878_vm11 = vcmp.eq.f32.partialorder %v317_v55, 8.507059e+37  ;;  %v151_v2 = vpop.f32.mrf.mxu2 }
  0xae   :  { %v426_v13 = vsel %vm816_vm14, %v425_v36, %v421_v10  ;;  %v252_v19 = vadd.f32 %v594_v52, %v251_v11  ;;  %v311_v20 = vmul.f32 %v596_v0, %v310_v12  ;;  %v598_v23 = vpop.eup %597  ;;  %vm373_vm12 = vweird.f32 %v830_v59 }
  0xaf   :  { %v497_v58 = vsel %vm168_vm4, %v481_v9, %v721_v27  ;;  %v485_v17 = vmul.f32 %v426_v13, %v724_v28  ;;  %v320_v27 = vor.u32 1.1754944e-38, %v319_v6  ;;  %v369_v34 = vmul.f32 %v598_v23, %v830_v59  ;;  %v163_v9 = vpop.f32.mrf.mxu3 }
  0xb0   :  { %514 = vst.msk [vmem:[%s1127_s3 + $0x40] sm:$0xff] %vm505_vm6, %v497_v58  ;;  %v256_v30 = vsel %vm255_vm10, %v594_v52, %v252_v19  ;;  %v312_v33 = vadd.f32 %v596_v0, %v311_v20  ;;  %vm374_vm14 = vweird.f32 %v598_v23  ;;  %vm896_vm15 = vcmp.eq.f32.partialorder %v377_v16, 8.507059e+37 }
  0xb1   :  { %v501_v29 = vsel %vm168_vm4, %v485_v17, %v724_v28  ;;  %v261_v14 = vsel %vm846_vm3, %v260_v25, %v256_v30  ;;  %v379_v36 = vand.u32 2147483648, %v830_v59  ;;  %v370_v41 = vsub.f32 1.0, %v369_v34  ;;  %vm375_vm0 = vmor %vm373_vm12, %vm374_vm14 }
  0xb2   :  { %518 = vst.msk [vmem:[%s1127_s3 + $0x60] sm:$0xff] %vm505_vm6, %v501_v29  ;;  %v474_v38 = vmul.f32 %v261_v14, %v727_v31  ;;  %v316_v39 = vsel %vm315_vm13, %v596_v0, %v312_v33  ;;  %601 = vpow2.f32 %v779_v7  ;;  %v600_v43 = vpop.eup %599  ;;  %v553_v15 = vmul.f32 -1.442695, %v811_v37 }
  0xb3   :  { %v321_v40 = vsel %vm878_vm11, %v320_v27, %v316_v39  ;;  %603 = vpow2.f32 %v795_v24  ;;  %v908_v45 = vadd.f32 %v710_v18, %v160_v35  ;;  %v371_v7 = vmul.f32 %v598_v23, %v370_v41 }
  0xb4   :  { %v490_v48 = vsel %vm168_vm4, %v474_v38, %v727_v31  ;;  %v478_v49 = vmul.f32 %v321_v40, %v730_v32  ;;  %v429_v50 = vmul.f32 %v600_v43, %v852_v22  ;;  %v380_v24 = vor.u32 1.1754944e-38, %v379_v36 }
  0xb5   :  { %507 = vst.msk [vmem:[%s1127_s3 + $0x8] sm:$0xff] %vm505_vm6, %v490_v48  ;;  %605 = vpow2.f32 %v553_v15  ;;  %v557_v51 = vmul.f32 -1.442695, %v908_v45  ;;  %v921_v52 = vadd.f32 %v710_v18, %v127_v42  ;;  %v372_v54 = vadd.f32 %v598_v23, %v371_v7 }
  0xb6   :  { %v494_v31 = vsel %vm168_vm4, %v478_v49, %v730_v32  ;;  %v430_v57 = vsub.f32 1.0, %v429_v50  ;;  %v927_v60 = vadd.f32 %v710_v18, %v139_v47  ;;  %v437_v61 = vand.u32 2147483647, %v852_v22 }
  0xb7   :  { %511 = vst.msk [vmem:[%s1127_s3 + $0x28] sm:$0xff] %vm505_vm6, %v494_v31  ;;  %v439_v62 = vand.u32 2147483648, %v852_v22  ;;  %607 = vpow2.f32 %v557_v51  ;;  %v546_v32 = vmul.f32 -1.442695, %v921_v52  ;;  %v376_v0 = vsel %vm375_vm0, %v598_v23, %v372_v54 }
  0xb8   :  { %v602_v63 = vpop.eup %601  ;;  %v431_v21 = vmul.f32 %v600_v43, %v430_v57  ;;  %vm434_vm1 = vweird.f32 %v600_v43  ;;  %v550_v1 = vmul.f32 -1.442695, %v927_v60  ;;  %v381_v4 = vsel %vm896_vm15, %v380_v24, %v376_v0 }
  0xb9   :  { %v604_v3 = vpop.eup %603  ;;  %vm433_vm2 = vweird.f32 %v852_v22  ;;  %v943_v59 = vadd.f32 1.0, %v602_v63  ;;  %609 = vpow2.f32 %v546_v32  ;;  %v482_v5 = vmul.f32 %v381_v4, %v743_v44 }
  0xba   :  { %v432_v55 = vadd.f32 %v600_v43, %v431_v21  ;;  %v946_v6 = vadd.f32 1.0, %v604_v3  ;;  %611 = vpow2.f32 %v550_v1  ;;  %vm435_vm3 = vmor %vm433_vm2, %vm434_vm1  ;;  %v440_v11 = vor.u32 1.1754944e-38, %v439_v62 }
  0xbb   :  { %v606_v10 = vpop.eup %605  ;;  %613 = vrcp.f32 %v943_v59  ;;  %v950_v12 = vadd.f32 %v710_v18, %v151_v2  ;;  %v498_v22 = vsel %vm168_vm4, %v482_v5, %v743_v44  ;;  %vm438_vm5 = vcmp.eq.f32.partialorder %v437_v61, 8.507059e+37 }
  0xbc   :  { %v436_v13 = vsel %vm435_vm3, %v600_v43, %v432_v55  ;;  %615 = vrcp.f32 %v946_v6  ;;  %515 = vst.msk [vmem:[%s1127_s3 + $0x48] sm:$0xff] %vm505_vm6, %v498_v22  ;;  %v272_v17 = vand.u32 2147483647, %v943_v59  ;;  %v962_v19 = vadd.f32 %v710_v18, %v163_v9 }
  0xbd   :  { %v608_v16 = vpop.eup %607  ;;  %v441_v58 = vsel %vm438_vm5, %v440_v11, %v436_v13  ;;  %v274_v44 = vand.u32 2147483648, %v943_v59  ;;  %v966_v23 = vadd.f32 1.0, %v606_v10  ;;  %v332_v27 = vand.u32 2147483647, %v946_v6 }
  0xbe   :  { %v486_v20 = vmul.f32 %v441_v58, %v753_v53  ;;  %v968_v25 = vadd.f32 1.0, %v608_v16  ;;  %v334_v29 = vand.u32 2147483648, %v946_v6  ;;  %v554_v30 = vmul.f32 -1.442695, %v950_v12 }
  0xbf   :  { %v610_v26 = vpop.eup %609  ;;  %617 = vrcp.f32 %v966_v23  ;;  %vm268_vm7 = vweird.f32 %v943_v59  ;;  %v558_v35 = vmul.f32 -1.442695, %v962_v19  ;;  %vm985_vm8 = vcmp.eq.f32.partialorder %v272_v17, 8.507059e+37 }
  0xc0   :  { %v612_v33 = vpop.eup %611  ;;  %v502_v18 = vsel %vm168_vm4, %v486_v20, %v753_v53  ;;  %619 = vrcp.f32 %v968_v25  ;;  %v275_v53 = vor.u32 1.1754944e-38, %v274_v44  ;;  %vm328_vm9 = vweird.f32 %v946_v6 }
  0xc1   :  { %v614_v34 = vpop.eup %613  ;;  %519 = vst.msk [vmem:[%s1127_s3 + $0x68] sm:$0xff] %vm505_vm6, %v502_v18  ;;  %vm991_vm10 = vcmp.eq.f32.partialorder %v332_v27, 8.507059e+37  ;;  %v335_v41 = vor.u32 1.1754944e-38, %v334_v29  ;;  %621 = vpow2.f32 %v554_v30  ;;  %v392_v43 = vand.u32 2147483647, %v966_v23 }
  0xc2   :  { %v616_v14 = vpop.eup %615  ;;  %v264_v28 = vmul.f32 %v614_v34, %v943_v59  ;;  %v394_v40 = vand.u32 2147483648, %v966_v23  ;;  %v997_v15 = vadd.f32 1.0, %v610_v26  ;;  %vm388_vm11 = vweird.f32 %v966_v23 }
  0xc3   :  { %v324_v38 = vmul.f32 %v616_v14, %v946_v6  ;;  %v452_v48 = vand.u32 2147483647, %v968_v25  ;;  %v1001_v49 = vadd.f32 1.0, %v612_v33  ;;  %623 = vpow2.f32 %v558_v35 }
  0xc4   :  { %v265_v42 = vsub.f32 1.0, %v264_v28  ;;  %vm269_vm12 = vweird.f32 %v614_v34  ;;  %v454_v24 = vand.u32 2147483648, %v968_v25  ;;  %625 = vrcp.f32 %v997_v15 }
  0xc5   :  { %v325_v47 = vsub.f32 1.0, %v324_v38  ;;  %v618_v7 = vpop.eup %617  ;;  %vm329_vm13 = vweird.f32 %v616_v14  ;;  %vm448_vm14 = vweird.f32 %v968_v25  ;;  %vm1007_vm15 = vcmp.eq.f32.partialorder %v392_v43, 8.507059e+37  ;;  %vm270_vm0 = vmor %vm268_vm7, %vm269_vm12 }
  0xc6   :  { %v266_v50 = vmul.f32 %v614_v34, %v265_v42  ;;  %v620_v51 = vpop.eup %619  ;;  %v384_v54 = vmul.f32 %v618_v7, %v966_v23  ;;  %v395_v62 = vor.u32 1.1754944e-38, %v394_v40  ;;  %vm1014_vm1 = vcmp.eq.f32.partialorder %v452_v48, 8.507059e+37  ;;  %vm330_vm2 = vmor %vm328_vm9, %vm329_vm13 }
  0xc7   :  { %v326_v31 = vmul.f32 %v616_v14, %v325_v47  ;;  %v444_v32 = vmul.f32 %v620_v51, %v968_v25  ;;  %v622_v63 = vpop.eup %621  ;;  %627 = vrcp.f32 %v1001_v49  ;;  %v455_v4 = vor.u32 1.1754944e-38, %v454_v24 }
  0xc8   :  { %v267_v57 = vadd.f32 %v614_v34, %v266_v50  ;;  %v385_v21 = vsub.f32 1.0, %v384_v54  ;;  %vm283_vm3 = vweird.f32 %v997_v15  ;;  %vm389_vm5 = vweird.f32 %v618_v7 }
  0xc9   :  { %v327_v0 = vadd.f32 %v616_v14, %v326_v31  ;;  %v445_v3 = vsub.f32 1.0, %v444_v32  ;;  %v624_v5 = vpop.eup %623  ;;  %vm449_vm7 = vweird.f32 %v620_v51  ;;  %v287_v17 = vand.u32 2147483647, %v997_v15 }
  0xca   :  { %v271_v2 = vsel %vm270_vm0, %v614_v34, %v267_v57  ;;  %v386_v9 = vmul.f32 %v618_v7, %v385_v21  ;;  %v626_v10 = vpop.eup %625  ;;  %v289_v26 = vand.u32 2147483648, %v997_v15  ;;  %v1036_v27 = vadd.f32 1.0, %v622_v63  ;;  %vm450_vm9 = vmor %vm448_vm14, %vm449_vm7 }
  0xcb   :  { %v276_v59 = vsel %vm985_vm8, %v275_v53, %v271_v2  ;;  %v331_v55 = vsel %vm330_vm2, %v616_v14, %v327_v0  ;;  %v446_v13 = vmul.f32 %v620_v51, %v445_v3  ;;  %v279_v58 = vmul.f32 %v626_v10, %v997_v15  ;;  %vm390_vm8 = vmor %vm388_vm11, %vm389_vm5 }
  0xcc   :  { %v475_v11 = vmul.f32 %v276_v59, %v758_v56  ;;  %v336_v22 = vsel %vm991_vm10, %v335_v41, %v331_v55  ;;  %v387_v16 = vadd.f32 %v618_v7, %v386_v9  ;;  %v1047_v23 = vadd.f32 1.0, %v624_v5 }
  0xcd   :  { %v479_v6 = vmul.f32 %v336_v22, %v782_v8  ;;  %v447_v44 = vadd.f32 %v620_v51, %v446_v13  ;;  %v628_v29 = vpop.eup %627  ;;  %vm284_vm10 = vweird.f32 %v626_v10  ;;  %629 = vrcp.f32 %v1036_v27 }
  0xce   :  { %v491_v20 = vsel %vm168_vm4, %v475_v11, %v758_v56  ;;  %v391_v33 = vsel %vm390_vm8, %v618_v7, %v387_v16  ;;  %v280_v56 = vsub.f32 1.0, %v279_v58  ;;  %v339_v35 = vmul.f32 %v628_v29, %v1001_v49  ;;  %vm285_vm12 = vmor %vm283_vm3, %vm284_vm10 }
  0xcf   :  { %508 = vst.msk [vmem:[%s1127_s3 + $0x10] sm:$0xff] %vm505_vm6, %v491_v20  ;;  %v495_v30 = vsel %vm168_vm4, %v479_v6, %v782_v8  ;;  %v396_v18 = vsel %vm1007_vm15, %v395_v62, %v391_v33  ;;  %v451_v34 = vsel %vm450_vm9, %v620_v51, %v447_v44  ;;  %v290_v36 = vor.u32 1.1754944e-38, %v289_v26 }
  0xd0   :  { %512 = vst.msk [vmem:[%s1127_s3 + $0x30] sm:$0xff] %vm505_vm6, %v495_v30  ;;  %v483_v8 = vmul.f32 %v396_v18, %v811_v37  ;;  %v456_v25 = vsel %vm1014_vm1, %v455_v4, %v451_v34  ;;  %v281_v14 = vmul.f32 %v626_v10, %v280_v56  ;;  %v340_v53 = vsub.f32 1.0, %v339_v35 }
  0xd1   :  { %v487_v28 = vmul.f32 %v456_v25, %v908_v45  ;;  %vm343_vm11 = vweird.f32 %v1001_v49  ;;  %v349_v41 = vand.u32 2147483648, %v1001_v49  ;;  %631 = vrcp.f32 %v1047_v23 }
  0xd2   :  { %v499_v38 = vsel %vm168_vm4, %v483_v8, %v811_v37  ;;  %v282_v39 = vadd.f32 %v626_v10, %v281_v14  ;;  %v341_v43 = vmul.f32 %v628_v29, %v340_v53  ;;  %vm344_vm13 = vweird.f32 %v628_v29 }
  0xd3   :  { %516 = vst.msk [vmem:[%s1127_s3 + $0x50] sm:$0xff] %vm505_vm6, %v499_v38  ;;  %v503_v42 = vsel %vm168_vm4, %v487_v28, %v908_v45  ;;  %v347_v37 = vand.u32 2147483647, %v1001_v49  ;;  %vm288_vm14 = vcmp.eq.f32.partialorder %v287_v17, 8.507059e+37  ;;  %v630_v7 = vpop.eup %629  ;;  %vm345_vm15 = vmor %vm343_vm11, %vm344_vm13  ;;  %v350_v15 = vor.u32 1.1754944e-38, %v349_v41 }
  0xd4   :  { %520 = vst.msk [vmem:[%s1127_s3 + $0x70] sm:$0xff] %vm505_vm6, %v503_v42  ;;  %v286_v40 = vsel %vm285_vm12, %v626_v10, %v282_v39  ;;  %v342_v48 = vadd.f32 %v628_v29, %v341_v43  ;;  %v399_v24 = vmul.f32 %v630_v7, %v1036_v27  ;;  %v407_v62 = vand.u32 2147483647, %v1036_v27 }
  0xd5   :  { %v291_v47 = vsel %vm288_vm14, %v290_v36, %v286_v40  ;;  %vm348_vm0 = vcmp.eq.f32.partialorder %v347_v37, 8.507059e+37  ;;  %v409_v32 = vand.u32 2147483648, %v1036_v27  ;;  %vm404_vm1 = vweird.f32 %v630_v7 }
  0xd6   :  { %v476_v45 = vmul.f32 %v291_v47, %v921_v52  ;;  %v346_v50 = vsel %vm345_vm15, %v628_v29, %v342_v48  ;;  %v400_v49 = vsub.f32 1.0, %v399_v24  ;;  %vm403_vm2 = vweird.f32 %v1036_v27 }
  0xd7   :  { %v632_v51 = vpop.eup %631  ;;  %v351_v54 = vsel %vm348_vm0, %v350_v15, %v346_v50  ;;  %v469_v21 = vand.u32 2147483648, %v1047_v23  ;;  %v467_v3 = vand.u32 2147483647, %v1047_v23  ;;  %vm405_vm5 = vmor %vm403_vm2, %vm404_vm1  ;;  %v410_v4 = vor.u32 1.1754944e-38, %v409_v32 }
  0xd8   :  { %v492_v31 = vsel %vm168_vm4, %v476_v45, %v921_v52  ;;  %v480_v57 = vmul.f32 %v351_v54, %v927_v60  ;;  %v459_v61 = vmul.f32 %v632_v51, %v1047_v23  ;;  %v401_v52 = vmul.f32 %v630_v7, %v400_v49 }
  0xd9   :  { %509 = vst.msk [vmem:[%s1127_s3 + $0x18] sm:$0xff] %vm505_vm6, %v492_v31  ;;  %vm464_vm3 = vweird.f32 %v632_v51  ;;  %vm408_vm7 = vcmp.eq.f32.partialorder %v407_v62, 8.507059e+37  ;;  %vm463_vm8 = vweird.f32 %v1047_v23  ;;  %v470_v55 = vor.u32 1.1754944e-38, %v469_v21 }
  0xda   :  { %v496_v63 = vsel %vm168_vm4, %v480_v57, %v927_v60  ;;  %v460_v0 = vsub.f32 1.0, %v459_v61  ;;  %v402_v1 = vadd.f32 %v630_v7, %v401_v52  ;;  %vm465_vm9 = vmor %vm463_vm8, %vm464_vm3  ;;  %vm468_vm10 = vcmp.eq.f32.partialorder %v467_v3, 8.507059e+37 }
  0xdb   :  { %513 = vst.msk [vmem:[%s1127_s3 + $0x38] sm:$0xff] %vm505_vm6, %v496_v63 }
  0xdc   :  { %v461_v2 = vmul.f32 %v632_v51, %v460_v0  ;;  %v406_v60 = vsel %vm405_vm5, %v630_v7, %v402_v1 }
  0xdd   :  { %v411_v59 = vsel %vm408_vm7, %v410_v4, %v406_v60 }
  0xde   :  { %v462_v5 = vadd.f32 %v632_v51, %v461_v2  ;;  %v484_v9 = vmul.f32 %v411_v59, %v950_v12 }
  0xe0   :  { %v466_v10 = vsel %vm465_vm9, %v632_v51, %v462_v5  ;;  %v500_v22 = vsel %vm168_vm4, %v484_v9, %v950_v12 }
  0xe1   :  { %v471_v11 = vsel %vm468_vm10, %v470_v55, %v466_v10  ;;  %517 = vst.msk [vmem:[%s1127_s3 + $0x58] sm:$0xff] %vm505_vm6, %v500_v22 }
  0xe2   :  { %v488_v13 = vmul.f32 %v471_v11, %v962_v19 }
  0xe4   :  { %v504_v6 = vsel %vm168_vm4, %v488_v13, %v962_v19 }
  0xe5   :  { %521 = vst.msk [vmem:[%s1127_s3 + $0x78] sm:$0xff] %vm505_vm6, %v504_v6 }
  0xe6   :  { %526 = vsyncpa [#allocation3], 1 }

// kernel: _lambda_.7
= control target key start
LH: loop header
LB: loop body
LE: loop exit
PB: predicated region body
PF: predicated region fallthrough
CT: control target
= control target key end

     0   :  { %s767_s12 = smov 0   ;;  %s1097_s0 = inlined_call_operand.vmem [shape: f32[2,10,10,32], index: 0, kind: input, shape index: {}]   ;;  %s1098_s1 = inlined_call_operand.vmem [shape: f32[3,3,32], index: 1, kind: input, shape index: {}]   ;;  %s1099_s2 = inlined_call_operand.vmem [shape: f32[1,32], index: 2, kind: input, shape index: {}]   ;;  %s1100_s3 = inlined_call_operand.vmem [shape: f32[2,8,8,32], index: 3, kind: output, shape index: {}]  }
   0x1 LB: > { %s630_s13 = sadd.s32 4294967295, %s745_s12   ;;  %p634_p0 = scmp.ge.s32.totalorder %s745_s12, 1  ;;  %s745_s12 = sphi %s767_s12, %s13_s12  }
   0x2   : > { %p137_p1 = scmp.lt.s32.totalorder %s745_s12, 3 }
   0x4   : > { %p138_p2 = pnand %p634_p0, %p137_p1 }
   0x5   : > { %p161_p3 = scmp.lt.s32.totalorder (!%p138_p2), %s630_s13, 1 }
   0x6   : > { %141 = sbr.rel (%p138_p2) target bundleno = 111 (0x6f), region = 32 }
   0xb   : > { %v171_v0 = vld [vmem:[%s1098_s1] sm:$0x7]  ;;  %s1118_s13 = smov (!%p161_p3, %s630_s13), 1  ;;  %v172_v1 = vld [vmem:[%s1098_s1 + $0x4] sm:$0x7]  ;;  %vm566_vm4 = vcmask 261120  }
   0xc   : > { %s697_s18 = smul.u32 160, %s1118_s13  ;;  %v784_v2 = vperm.slane %v171_v0, 0  ;;  %v786_v3 = vperm.slane %v171_v0, 1  ;;  %v173_v4 = vld [vmem:[%s1098_s1 + $0x8] sm:$0x7]  ;;  %v801_v6 = vperm.slane %v171_v0, 2 }
   0xd   : > { %v799_v5 = vld [vmem:[%s1099_s2] ss:$0 sm:$0xff]  ;;  %v803_v7 = vperm.slane %v172_v1, 0  ;;  %v808_v11 = vperm.slane %v172_v1, 1  ;;  %v810_v12 = vperm.slane %v172_v1, 2  ;;  %v817_v18 = vperm.slane %v173_v4, 0 }
   0xe   : > { %s794_s23 = scalar_lea.vmem %s1097_s0, %s697_s18  ;;  %v819_v19 = vperm.slane %v173_v4, 1  ;;  %v821_v20 = vperm.slane %v173_v4, 2  ;;  %s696_s26 = sshll.u32 %s1118_s13, 6 }
   0xf   : > { %v179_v8 = vld [vmem:[%s794_s23] sm:$0xff]  ;;  %v638_v15 = vld [vmem:[%s794_s23 + $0x10] sm:$0xff]  ;;  %s1013_s29 = scalar_lea.vmem %s1100_s3, %s696_s26 }
  0x10   : > { %v204_v9 = vld [vmem:[%s794_s23 + $0x1] sm:$0xff]  ;;  %v188_v13 = vmul.f32 %v784_v2, %v179_v8  ;;  %v646_v16 = vld [vmem:[%s794_s23 + $0x11] sm:$0xff]  ;;  %v189_v21 = vmul.f32 %v638_v15, %v784_v2  ;;  %v264_v24 = vmul.f32 %v638_v15, %v803_v7 }
  0x11   : > { %v229_v10 = vld [vmem:[%s794_s23 + $0x2] sm:$0xff]  ;;  %v213_v14 = vmul.f32 %v786_v3, %v204_v9  ;;  %v654_v17 = vld [vmem:[%s794_s23 + $0x12] sm:$0xff]  ;;  %v289_v26 = vmul.f32 %v646_v16, %v808_v11  ;;  %v214_v29 = vmul.f32 %v646_v16, %v786_v3 }
  0x12   : > { %v196_v22 = vadd.f32 %v799_v5, %v188_v13  ;;  %v238_v23 = vmul.f32 %v801_v6, %v229_v10  ;;  %v662_v25 = vld [vmem:[%s794_s23 + $0x20] sm:$0xff]  ;;  %v197_v28 = vadd.f32 %v799_v5, %v189_v21  ;;  %v239_v30 = vmul.f32 %v654_v17, %v801_v6  ;;  %v663_v43 = vld [vmem:[%s794_s23 + $0x30] sm:$0xff] }
  0x13   : > { %v670_v27 = vld [vmem:[%s794_s23 + $0x21] sm:$0xff]  ;;  %v314_v32 = vmul.f32 %v654_v17, %v810_v12  ;;  %v340_v33 = vmul.f32 %v662_v25, %v817_v18  ;;  %v265_v38 = vmul.f32 %v662_v25, %v803_v7  ;;  %v190_v39 = vmul.f32 %v662_v25, %v784_v2  ;;  %v671_v44 = vld [vmem:[%s794_s23 + $0x31] sm:$0xff] }
  0x14   : > { %v221_v31 = vadd.f32 %v213_v14, %v196_v22  ;;  %v365_v34 = vmul.f32 %v670_v27, %v819_v19  ;;  %v678_v35 = vld [vmem:[%s794_s23 + $0x22] sm:$0xff]  ;;  %v222_v37 = vadd.f32 %v214_v29, %v197_v28  ;;  %v290_v41 = vmul.f32 %v670_v27, %v808_v11  ;;  %v679_v48 = vld [vmem:[%s794_s23 + $0x32] sm:$0xff] }
  0x15   : > { %v390_v36 = vmul.f32 %v678_v35, %v821_v20  ;;  %v315_v42 = vmul.f32 %v678_v35, %v810_v12  ;;  %v215_v45 = vmul.f32 %v670_v27, %v786_v3  ;;  %v341_v47 = vmul.f32 %v663_v43, %v817_v18  ;;  %v664_v57 = vld [vmem:[%s794_s23 + $0x40] sm:$0xff] }
  0x16   : > { %v246_v40 = vadd.f32 %v238_v23, %v221_v31  ;;  %v247_v46 = vadd.f32 %v239_v30, %v222_v37  ;;  %v198_v49 = vadd.f32 %v799_v5, %v190_v39  ;;  %v240_v50 = vmul.f32 %v678_v35, %v801_v6  ;;  %v672_v4 = vld [vmem:[%s794_s23 + $0x41] sm:$0xff]  ;;  %v665_v31 = vld [vmem:[%s794_s23 + $0x50] sm:$0xff] }
  0x17   : > { %v366_v52 = vmul.f32 %v671_v44, %v819_v19  ;;  %v391_v53 = vmul.f32 %v679_v48, %v821_v20  ;;  %v266_v54 = vmul.f32 %v663_v43, %v803_v7  ;;  %v191_v58 = vmul.f32 %v663_v43, %v784_v2  ;;  %v680_v8 = vld [vmem:[%s794_s23 + $0x42] sm:$0xff]  ;;  %v681_v43 = vld [vmem:[%s794_s23 + $0x52] sm:$0xff] }
  0x18   : > { %v272_v51 = vadd.f32 %v264_v24, %v246_v40  ;;  %v273_v55 = vadd.f32 %v265_v38, %v247_v46  ;;  %v223_v56 = vadd.f32 %v215_v45, %v198_v49  ;;  %v216_v59 = vmul.f32 %v671_v44, %v786_v3 }
  0x19   : > { %v291_v61 = vmul.f32 %v671_v44, %v808_v11  ;;  %v316_v62 = vmul.f32 %v679_v48, %v810_v12  ;;  %v342_v63 = vmul.f32 %v664_v57, %v817_v18  ;;  %v199_v9 = vadd.f32 %v799_v5, %v191_v58 }
  0x1a   : > { %v297_v60 = vadd.f32 %v289_v26, %v272_v51  ;;  %v298_v0 = vadd.f32 %v290_v41, %v273_v55  ;;  %v248_v1 = vadd.f32 %v240_v50, %v223_v56  ;;  %v241_v10 = vmul.f32 %v679_v48, %v801_v6 }
  0x1b   : > { %v367_v14 = vmul.f32 %v672_v4, %v819_v19  ;;  %v392_v15 = vmul.f32 %v680_v8, %v821_v20  ;;  %v267_v16 = vmul.f32 %v664_v57, %v803_v7  ;;  %v224_v22 = vadd.f32 %v216_v59, %v199_v9 }
  0x1c   : > { %v322_v13 = vadd.f32 %v314_v32, %v297_v60  ;;  %v323_v17 = vadd.f32 %v315_v42, %v298_v0  ;;  %v274_v21 = vadd.f32 %v266_v54, %v248_v1  ;;  %v192_v23 = vmul.f32 %v664_v57, %v784_v2  ;;  %v673_v42 = vld [vmem:[%s794_s23 + $0x51] sm:$0xff]  ;;  %v666_v60 = vld [vmem:[%s794_s23 + $0x60] sm:$0xff] }
  0x1d   : > { %v292_v25 = vmul.f32 %v672_v4, %v808_v11  ;;  %v217_v26 = vmul.f32 %v672_v4, %v786_v3  ;;  %v242_v27 = vmul.f32 %v680_v8, %v801_v6  ;;  %v249_v30 = vadd.f32 %v241_v10, %v224_v22  ;;  %v674_v4 = vld [vmem:[%s794_s23 + $0x61] sm:$0xff] }
  0x1e   : > { %v348_v24 = vadd.f32 %v340_v33, %v322_v13  ;;  %v349_v28 = vadd.f32 %v341_v47, %v323_v17  ;;  %v299_v29 = vadd.f32 %v291_v61, %v274_v21  ;;  %v200_v32 = vadd.f32 %v799_v5, %v192_v23 }
  0x1f   : > { %v317_v37 = vmul.f32 %v680_v8, %v810_v12  ;;  %v343_v38 = vmul.f32 %v665_v31, %v817_v18  ;;  %v268_v33 = vmul.f32 %v665_v31, %v803_v7  ;;  %v275_v41 = vadd.f32 %v267_v16, %v249_v30  ;;  %v667_v30 = vld [vmem:[%s794_s23 + $0x70] sm:$0xff] }
  0x20   : > { %v373_v35 = vadd.f32 %v365_v34, %v348_v24  ;;  %v374_v39 = vadd.f32 %v366_v52, %v349_v28  ;;  %v324_v40 = vadd.f32 %v316_v62, %v299_v29  ;;  %v225_v44 = vadd.f32 %v217_v26, %v200_v32  ;;  %v682_v24 = vld [vmem:[%s794_s23 + $0x62] sm:$0xff] }
  0x21   : > { %v368_v46 = vmul.f32 %v673_v42, %v819_v19  ;;  %v393_v47 = vmul.f32 %v681_v43, %v821_v20  ;;  %v293_v34 = vmul.f32 %v673_v42, %v808_v11  ;;  %v300_v50 = vadd.f32 %v292_v25, %v275_v41 }
  0x22   : > { %v876_v45 = vadd.f32 %v390_v36, %v373_v35  ;;  %v881_v48 = vadd.f32 %v391_v53, %v374_v39  ;;  %v350_v49 = vadd.f32 %v342_v63, %v324_v40  ;;  %v250_v51 = vadd.f32 %v242_v27, %v225_v44  ;;  %v913_v39 = vld [vmem:[%s794_s23 + $0x71] sm:$0xff] }
  0x23   : > { %v318_v54 = vmul.f32 %v681_v43, %v810_v12  ;;  %v193_v36 = vmul.f32 %v665_v31, %v784_v2  ;;  %v218_v55 = vmul.f32 %v673_v42, %v786_v3  ;;  %v325_v58 = vadd.f32 %v317_v37, %v300_v50  ;;  %v916_v40 = vld [vmem:[%s794_s23 + $0x72] sm:$0xff] }
  0x24   : > { %v686_v52 = vmul.f32 -1.442695, %v876_v45  ;;  %v687_v56 = vmul.f32 -1.442695, %v881_v48  ;;  %v375_v57 = vadd.f32 %v367_v14, %v350_v49  ;;  %v276_v59 = vadd.f32 %v268_v33, %v250_v51 }
  0x25   : > { %v344_v53 = vmul.f32 %v666_v60, %v817_v18  ;;  %v201_v61 = vadd.f32 %v799_v5, %v193_v36  ;;  %v243_v62 = vmul.f32 %v681_v43, %v801_v6  ;;  %v351_v0 = vadd.f32 %v343_v38, %v325_v58 }
  0x26   : > { %707 = vpow2.f32 %v686_v52  ;;  %v892_v63 = vadd.f32 %v392_v15, %v375_v57  ;;  %v301_v1 = vadd.f32 %v293_v34, %v276_v59  ;;  %v269_v9 = vmul.f32 %v666_v60, %v803_v7 }
  0x27   : > { %709 = vpow2.f32 %v687_v56  ;;  %v226_v8 = vadd.f32 %v218_v55, %v201_v61  ;;  %v376_v13 = vadd.f32 %v368_v46, %v351_v0  ;;  %v369_v16 = vmul.f32 %v674_v4, %v819_v19  ;;  %v938_v56 = vld [vmem:[%s794_s23 + $0x80] sm:$0xff] }
  0x28   : > { %v688_v10 = vmul.f32 -1.442695, %v892_v63  ;;  %v326_v14 = vadd.f32 %v318_v54, %v301_v1  ;;  %v294_v21 = vmul.f32 %v674_v4, %v808_v11  ;;  %v194_v15 = vmul.f32 %v666_v60, %v784_v2 }
  0x29   : > { %v251_v17 = vadd.f32 %v243_v62, %v226_v8  ;;  %v900_v22 = vadd.f32 %v393_v47, %v376_v13  ;;  %v219_v25 = vmul.f32 %v674_v4, %v786_v3  ;;  %v394_v27 = vmul.f32 %v682_v24, %v821_v20 }
  0x2a   : > { %711 = vpow2.f32 %v688_v10  ;;  %v352_v23 = vadd.f32 %v344_v53, %v326_v14  ;;  %v319_v29 = vmul.f32 %v682_v24, %v810_v12  ;;  %v202_v31 = vadd.f32 %v799_v5, %v194_v15  ;;  %v946_v53 = vld [vmem:[%s794_s23 + $0x81] sm:$0xff] }
  0x2b   : > { %v277_v28 = vadd.f32 %v269_v9, %v251_v17  ;;  %v689_v37 = vmul.f32 -1.442695, %v900_v22  ;;  %v345_v33 = vmul.f32 %v667_v30, %v817_v18  ;;  %v370_v43 = vmul.f32 %v913_v39, %v819_v19 }
  0x2c   : > { %v708_v26 = vpop.eup %707  ;;  %v377_v38 = vadd.f32 %v369_v16, %v352_v23  ;;  %v395_v44 = vmul.f32 %v916_v40, %v821_v20  ;;  %v227_v46 = vadd.f32 %v219_v25, %v202_v31  ;;  %v244_v47 = vmul.f32 %v682_v24, %v801_v6 }
  0x2d   : > { %v710_v32 = vpop.eup %709  ;;  %v908_v35 = vadd.f32 1.0, %v708_v26  ;;  %v302_v42 = vadd.f32 %v294_v21, %v277_v28  ;;  %v270_v34 = vmul.f32 %v667_v30, %v803_v7  ;;  %v295_v51 = vmul.f32 %v913_v39, %v808_v11  ;;  %v970_v28 = vld [vmem:[%s794_s23 + $0x82] sm:$0xff] }
  0x2e   : > { %v918_v41 = vadd.f32 1.0, %v710_v32  ;;  %v933_v36 = vadd.f32 %v394_v27, %v377_v38  ;;  %v320_v55 = vmul.f32 %v916_v40, %v810_v12  ;;  %v346_v60 = vmul.f32 %v938_v56, %v817_v18 }
  0x2f   : > { %713 = vrcp.f32 %v908_v35  ;;  %v447_v49 = vand.u32 2147483647, %v908_v35  ;;  %v449_v50 = vand.u32 2147483648, %v908_v35  ;;  %v327_v59 = vadd.f32 %v319_v29, %v302_v42 }
  0x30   : > { %715 = vrcp.f32 %v918_v41  ;;  %v712_v52 = vpop.eup %711  ;;  %v462_v54 = vand.u32 2147483647, %v918_v41  ;;  %v464_v57 = vand.u32 2147483648, %v918_v41  ;;  %vm443_vm0 = vweird.f32 %v908_v35 }
  0x31   : > { %717 = vpow2.f32 %v689_v37  ;;  %v941_v58 = vadd.f32 1.0, %v712_v52  ;;  %v690_v61 = vmul.f32 -1.442695, %v933_v36  ;;  %v252_v62 = vadd.f32 %v244_v47, %v227_v46 }
  0x32   : > { %v952_v0 = vmul.f32 %v946_v53, %v819_v19  ;;  %vm954_vm1 = vcmp.eq.f32.partialorder %v447_v49, 8.507059e+37  ;;  %v450_v4 = vor.u32 1.1754944e-38, %v449_v50  ;;  %vm458_vm2 = vweird.f32 %v918_v41 }
  0x33   : > { %719 = vrcp.f32 %v941_v58  ;;  %vm960_vm3 = vcmp.eq.f32.partialorder %v462_v54, 8.507059e+37  ;;  %v353_v10 = vadd.f32 %v345_v33, %v327_v59  ;;  %v278_v13 = vadd.f32 %v270_v34, %v252_v62 }
  0x34   : > { %721 = vpow2.f32 %v690_v61  ;;  %v465_v17 = vor.u32 1.1754944e-38, %v464_v57  ;;  %v477_v21 = vand.u32 2147483647, %v941_v58  ;;  %v195_v15 = vmul.f32 %v667_v30, %v784_v2 }
  0x35   : > { %v714_v8 = vpop.eup %713  ;;  %v479_v25 = vand.u32 2147483648, %v941_v58  ;;  %v378_v26 = vadd.f32 %v370_v43, %v353_v10  ;;  %v303_v27 = vadd.f32 %v295_v51, %v278_v13  ;;  %v396_v32 = vmul.f32 %v970_v28, %v821_v20 }
  0x36   : > { %v716_v14 = vpop.eup %715  ;;  %v439_v16 = vmul.f32 %v714_v8, %v908_v35  ;;  %vm444_vm5 = vweird.f32 %v714_v8  ;;  %vm473_vm7 = vweird.f32 %v941_v58  ;;  %v203_v42 = vadd.f32 %v799_v5, %v195_v15 }
  0x37   : > { %v718_v23 = vpop.eup %717  ;;  %v454_v24 = vmul.f32 %v716_v14, %v918_v41  ;;  %vm459_vm6 = vweird.f32 %v716_v14  ;;  %v977_v2 = vadd.f32 %v395_v44, %v378_v26  ;;  %v328_v33 = vadd.f32 %v320_v55, %v303_v27  ;;  %vm983_vm8 = vmor %vm443_vm0, %vm444_vm5  ;;  %v669_v27 = vld [vmem:[%s794_s23 + $0x90] sm:$0xff] }
  0x38   : > { %v440_v29 = vsub.f32 1.0, %v439_v16  ;;  %v972_v31 = vadd.f32 1.0, %v718_v23  ;;  %vm988_vm9 = vcmp.eq.f32.partialorder %v477_v21, 8.507059e+37  ;;  %v480_v49 = vor.u32 1.1754944e-38, %v479_v25  ;;  %vm996_vm10 = vmor %vm458_vm2, %vm459_vm6 }
  0x39   : > { %v455_v37 = vsub.f32 1.0, %v454_v24  ;;  %v720_v30 = vpop.eup %719  ;;  %v691_v51 = vmul.f32 -1.442695, %v977_v2  ;;  %v220_v52 = vmul.f32 %v913_v39, %v786_v3  ;;  %v354_v61 = vadd.f32 %v346_v60, %v328_v33 }
  0x3a   : > { %v441_v38 = vmul.f32 %v714_v8, %v440_v29  ;;  %723 = vrcp.f32 %v972_v31  ;;  %v722_v43 = vpop.eup %721  ;;  %v469_v34 = vmul.f32 %v720_v30, %v941_v58  ;;  %vm474_vm11 = vweird.f32 %v720_v30 }
  0x3b   : > { %v456_v47 = vmul.f32 %v716_v14, %v455_v37  ;;  %v1000_v35 = vadd.f32 1.0, %v722_v43  ;;  %v492_v57 = vand.u32 2147483647, %v972_v31  ;;  %v494_v41 = vand.u32 2147483648, %v972_v31  ;;  %vm1026_vm12 = vmor %vm473_vm7, %vm474_vm11 }
  0x3c   : > { %v442_v50 = vadd.f32 %v714_v8, %v441_v38  ;;  %v470_v55 = vsub.f32 1.0, %v469_v34  ;;  %vm488_vm13 = vweird.f32 %v972_v31  ;;  %v379_v9 = vadd.f32 %v952_v0, %v354_v61  ;;  %v685_v34 = vld [vmem:[%s794_s23 + $0x92] sm:$0xff] }
  0x3d   : > { %v457_v54 = vadd.f32 %v716_v14, %v456_v47  ;;  %725 = vrcp.f32 %v1000_v35  ;;  %vm1037_vm14 = vcmp.eq.f32.partialorder %v492_v57, 8.507059e+37  ;;  %v495_v58 = vor.u32 1.1754944e-38, %v494_v41 }
  0x3e   : > { %v446_v59 = vsel %vm983_vm8, %v714_v8, %v442_v50  ;;  %v471_v62 = vmul.f32 %v720_v30, %v470_v55  ;;  %v245_v8 = vmul.f32 %v916_v40, %v801_v6  ;;  %727 = vpow2.f32 %v691_v51 }
  0x3f   : > { %v451_v3 = vsel %vm954_vm1, %v450_v4, %v446_v59  ;;  %v461_v39 = vsel %vm996_vm10, %v716_v14, %v457_v54  ;;  %v271_v4 = vmul.f32 %v938_v56, %v803_v7  ;;  %v228_v16 = vadd.f32 %v220_v52, %v203_v42 }
  0x40   : > { %v724_v10 = vpop.eup %723  ;;  %v558_v60 = vmul.f32 %v451_v3, %v876_v45  ;;  %v466_v13 = vsel %vm960_vm3, %v465_v17, %v461_v39  ;;  %v472_v6 = vadd.f32 %v720_v30, %v471_v62  ;;  %vm503_vm0 = vweird.f32 %v1000_v35 }
  0x41   : > { %v559_v14 = vmul.f32 %v466_v13, %v881_v48  ;;  %v484_v40 = vmul.f32 %v724_v10, %v972_v31  ;;  %vm489_vm15 = vweird.f32 %v724_v10  ;;  %v1049_v21 = vadd.f32 %v396_v32, %v379_v9  ;;  %v677_v31 = vld [vmem:[%s794_s23 + $0x91] sm:$0xff] }
  0x42   : > { %567 = vst.msk [vmem:[%s1013_s29] sm:$0xff] %vm566_vm4, %v558_v60  ;;  %v476_v7 = vsel %vm1026_vm12, %v720_v30, %v472_v6  ;;  %v253_v15 = vadd.f32 %v245_v8, %v228_v16  ;;  %v296_v0 = vmul.f32 %v946_v53, %v808_v11  ;;  %v507_v26 = vand.u32 2147483647, %v1000_v35  ;;  %vm1059_vm1 = vmor %vm488_vm13, %vm489_vm15 }
  0x43   : > { %568 = vst.msk [vmem:[%s1013_s29 + $0x8] sm:$0xff] %vm566_vm4, %v559_v14  ;;  %v485_v48 = vsub.f32 1.0, %v484_v40  ;;  %v726_v56 = vpop.eup %725  ;;  %v481_v17 = vsel %vm988_vm9, %v480_v49, %v476_v7  ;;  %v509_v32 = vand.u32 2147483648, %v1000_v35  ;;  %v692_v11 = vmul.f32 -1.442695, %v1049_v21 }
  0x44   : > { %v560_v23 = vmul.f32 %v481_v17, %v892_v63  ;;  %v499_v25 = vmul.f32 %v726_v56, %v1000_v35  ;;  %v728_v29 = vpop.eup %727  ;;  %v279_v63 = vadd.f32 %v271_v4, %v253_v15  ;;  %v321_v53 = vmul.f32 %v970_v28, %v810_v12 }
  0x45   : > { %v486_v24 = vmul.f32 %v724_v10, %v485_v48  ;;  %vm504_vm2 = vweird.f32 %v726_v56  ;;  %v435_v33 = vadd.f32 1.0, %v728_v29  ;;  %729 = vpow2.f32 %v692_v11 }
  0x46   : > { %569 = vst.msk [vmem:[%s1013_s29 + $0x10] sm:$0xff] %vm566_vm4, %v560_v23  ;;  %v500_v38 = vsub.f32 1.0, %v499_v25  ;;  %v304_v42 = vadd.f32 %v296_v0, %v279_v63  ;;  %v347_v43 = vmul.f32 %v669_v27, %v817_v18  ;;  %vm505_vm3 = vmor %vm503_vm0, %vm504_vm2  ;;  %v510_v28 = vor.u32 1.1754944e-38, %v509_v32 }
  0x47   : > { %v487_v30 = vadd.f32 %v724_v10, %v486_v24  ;;  %731 = vrcp.f32 %v435_v33  ;;  %v372_v49 = vmul.f32 %v677_v31, %v819_v19  ;;  %vm508_vm5 = vcmp.eq.f32.partialorder %v507_v26, 8.507059e+37 }
  0x48   : > { %v501_v47 = vmul.f32 %v726_v56, %v500_v38  ;;  %v329_v44 = vadd.f32 %v321_v53, %v304_v42  ;;  %v397_v51 = vmul.f32 %v685_v34, %v821_v20  ;;  %vm518_vm6 = vweird.f32 %v435_v33 }
  0x49   : > { %v491_v46 = vsel %vm1059_vm1, %v724_v10, %v487_v30  ;;  %v522_v20 = vand.u32 2147483647, %v435_v33 }
  0x4a   : > { %v496_v12 = vsel %vm1037_vm14, %v495_v58, %v491_v46  ;;  %v502_v18 = vadd.f32 %v726_v56, %v501_v47  ;;  %v355_v5 = vadd.f32 %v347_v43, %v329_v44 }
  0x4b   : > { %v561_v50 = vmul.f32 %v496_v12, %v900_v22  ;;  %v730_v54 = vpop.eup %729  ;;  %v524_v22 = vand.u32 2147483648, %v435_v33  ;;  %vm523_vm9 = vcmp.eq.f32.partialorder %v522_v20, 8.507059e+37 }
  0x4c   : > { %v506_v52 = vsel %vm505_vm3, %v726_v56, %v502_v18  ;;  %v380_v57 = vadd.f32 %v372_v49, %v355_v5  ;;  %v436_v41 = vadd.f32 1.0, %v730_v54 }
  0x4d   : > { %570 = vst.msk [vmem:[%s1013_s29 + $0x18] sm:$0xff] %vm566_vm4, %v561_v50  ;;  %v511_v55 = vsel %vm508_vm5, %v510_v28, %v506_v52  ;;  %v732_v35 = vpop.eup %731  ;;  %v525_v8 = vor.u32 1.1754944e-38, %v524_v22 }
  0x4e   : > { %v562_v59 = vmul.f32 %v511_v55, %v933_v36  ;;  %v514_v61 = vmul.f32 %v732_v35, %v435_v33  ;;  %v405_v19 = vadd.f32 %v397_v51, %v380_v57  ;;  %733 = vrcp.f32 %v436_v41 }
  0x4f   : > { %vm519_vm7 = vweird.f32 %v732_v35  ;;  %vm533_vm10 = vweird.f32 %v436_v41  ;;  %v539_v4 = vand.u32 2147483648, %v436_v41  ;;  %v537_v45 = vand.u32 2147483647, %v436_v41 }
  0x50   : > { %571 = vst.msk [vmem:[%s1013_s29 + $0x20] sm:$0xff] %vm566_vm4, %v562_v59  ;;  %v515_v3 = vsub.f32 1.0, %v514_v61  ;;  %v693_v39 = vmul.f32 -1.442695, %v405_v19  ;;  %vm520_vm8 = vmor %vm518_vm6, %vm519_vm7 }
  0x51   : > { %v540_v16 = vor.u32 1.1754944e-38, %v539_v4  ;;  %vm538_vm13 = vcmp.eq.f32.partialorder %v537_v45, 8.507059e+37 }
  0x52   : > { %v516_v62 = vmul.f32 %v732_v35, %v515_v3  ;;  %735 = vpow2.f32 %v693_v39 }
  0x54   : > { %v517_v10 = vadd.f32 %v732_v35, %v516_v62  ;;  %v734_v36 = vpop.eup %733 }
  0x55   : > { %v529_v13 = vmul.f32 %v734_v36, %v436_v41  ;;  %vm534_vm11 = vweird.f32 %v734_v36 }
  0x56   : > { %v521_v60 = vsel %vm520_vm8, %v732_v35, %v517_v10  ;;  %vm535_vm12 = vmor %vm533_vm10, %vm534_vm11 }
  0x57   : > { %v526_v1 = vsel %vm523_vm9, %v525_v8, %v521_v60  ;;  %v530_v40 = vsub.f32 1.0, %v529_v13 }
  0x58   : > { %v736_v14 = vpop.eup %735  ;;  %v563_v6 = vmul.f32 %v526_v1, %v977_v2 }
  0x59   : > { %v437_v58 = vadd.f32 1.0, %v736_v14  ;;  %v531_v9 = vmul.f32 %v734_v36, %v530_v40 }
  0x5a   : > { %572 = vst.msk [vmem:[%s1013_s29 + $0x28] sm:$0xff] %vm566_vm4, %v563_v6 }
  0x5b   : > { %737 = vrcp.f32 %v437_v58  ;;  %v532_v7 = vadd.f32 %v734_v36, %v531_v9  ;;  %v554_v0 = vand.u32 2147483648, %v437_v58  ;;  %vm548_vm14 = vweird.f32 %v437_v58 }
  0x5c   : > { %v552_v24 = vand.u32 2147483647, %v437_v58 }
  0x5d   : > { %v536_v48 = vsel %vm535_vm12, %v734_v36, %v532_v7  ;;  %v555_v26 = vor.u32 1.1754944e-38, %v554_v0 }
  0x5e   : > { %v541_v56 = vsel %vm538_vm13, %v540_v16, %v536_v48  ;;  %vm553_vm1 = vcmp.eq.f32.partialorder %v552_v24, 8.507059e+37 }
  0x5f   : > { %v564_v17 = vmul.f32 %v541_v56, %v1049_v21 }
  0x61   : > { %v738_v15 = vpop.eup %737  ;;  %573 = vst.msk [vmem:[%s1013_s29 + $0x30] sm:$0xff] %vm566_vm4, %v564_v17 }
  0x62   : > { %v544_v2 = vmul.f32 %v738_v15, %v437_v58  ;;  %vm549_vm15 = vweird.f32 %v738_v15 }
  0x63   : > { %vm550_vm0 = vmor %vm548_vm14, %vm549_vm15 }
  0x64   : > { %v545_v23 = vsub.f32 1.0, %v544_v2 }
  0x66   : > { %v546_v25 = vmul.f32 %v738_v15, %v545_v23 }
  0x68   : > { %v547_v27 = vadd.f32 %v738_v15, %v546_v25 }
  0x6a   : > { %v551_v29 = vsel %vm550_vm0, %v738_v15, %v547_v27 }
  0x6b   : > { %v556_v37 = vsel %vm553_vm1, %v555_v26, %v551_v29 }
  0x6c   : > { %v565_v32 = vmul.f32 %v556_v37, %v405_v19 }
  0x6e   : > { %574 = vst.msk [vmem:[%s1013_s29 + $0x38] sm:$0xff] %vm566_vm4, %v565_v32 }
  0x6f PF: > { %s13_s12 = sadd.s32 1, %s745_s12  }
  0x70   : > { %p10_p4 = scmp.ge.s32.totalorder %s13_s12, 4  }
  0x72   :  { %12 = sbr.rel (!%p10_p4) target bundleno = 1 (0x1), region = 64 }

// kernel: _lambda_.8
= control target key start
LH: loop header
LB: loop body
LE: loop exit
PB: predicated region body
PF: predicated region fallthrough
CT: control target
= control target key end

     0   :  { %s565_s1 = inlined_call_operand.vmem [shape: f32[128,256], index: 1, kind: input, shape index: {}]   ;;  %s566_s0 = inlined_call_operand.vmem [shape: f32[128,128], index: 0, kind: input, shape index: {}]   ;;  %s567_s2 = inlined_call_operand.vmem [shape: f32[1,256], index: 2, kind: input, shape index: {}]   ;;  %s568_s3 = inlined_call_operand.vmem [shape: f32[128,256], index: 3, kind: output, shape index: {}]  }
   0x1   :  { %v60_v0 = vld [vmem:[%s565_s1 + $0xf0] sm:$0xff]  ;;  %v61_v1 = vld [vmem:[%s565_s1 + $0xf8] sm:$0xff]  ;;  %v58_v2 = vld [vmem:[%s565_s1 + $0xe0] sm:$0xff] }
   0x2   :  { %234 = vmatpush.msra.mxu2 %v60_v0  ;;  %250 = vmatpush.msra.mxu3 %v61_v1  ;;  %v59_v3 = vld [vmem:[%s565_s1 + $0xe8] sm:$0xff]  ;;  %v56_v4 = vld [vmem:[%s565_s1 + $0xd0] sm:$0xff]  ;;  %v57_v5 = vld [vmem:[%s565_s1 + $0xd8] sm:$0xff] }
   0x3   :  { %68 = vmatpush.msra.mxu0 %v60_v0  ;;  %133 = vmatpush.msra.mxu1 %v61_v1  ;;  %v54_v6 = vld [vmem:[%s565_s1 + $0xc0] sm:$0xff]  ;;  %v55_v7 = vld [vmem:[%s565_s1 + $0xc8] sm:$0xff]  ;;  %v52_v8 = vld [vmem:[%s565_s1 + $0xb0] sm:$0xff] }
   0x4   :  { %235 = vmatpush.msra.mxu2 %v58_v2  ;;  %251 = vmatpush.msra.mxu3 %v59_v3  ;;  %v53_v9 = vld [vmem:[%s565_s1 + $0xb8] sm:$0xff]  ;;  %v50_v10 = vld [vmem:[%s565_s1 + $0xa0] sm:$0xff]  ;;  %v51_v11 = vld [vmem:[%s565_s1 + $0xa8] sm:$0xff] }
   0x5   :  { %69 = vmatpush.msra.mxu0 %v58_v2  ;;  %134 = vmatpush.msra.mxu1 %v59_v3  ;;  %v48_v12 = vld [vmem:[%s565_s1 + $0x90] sm:$0xff]  ;;  %v49_v13 = vld [vmem:[%s565_s1 + $0x98] sm:$0xff]  ;;  %v46_v14 = vld [vmem:[%s565_s1 + $0x80] sm:$0xff] }
   0x6   :  { %236 = vmatpush.msra.mxu2 %v56_v4  ;;  %252 = vmatpush.msra.mxu3 %v57_v5  ;;  %v47_v15 = vld [vmem:[%s565_s1 + $0x88] sm:$0xff]  ;;  %v44_v16 = vld [vmem:[%s565_s1 + $0x70] sm:$0xff]  ;;  %v45_v17 = vld [vmem:[%s565_s1 + $0x78] sm:$0xff] }
   0x7   :  { %70 = vmatpush.msra.mxu0 %v56_v4  ;;  %135 = vmatpush.msra.mxu1 %v57_v5  ;;  %v42_v18 = vld [vmem:[%s565_s1 + $0x60] sm:$0xff]  ;;  %v43_v19 = vld [vmem:[%s565_s1 + $0x68] sm:$0xff]  ;;  %v40_v20 = vld [vmem:[%s565_s1 + $0x50] sm:$0xff] }
   0x8   :  { %237 = vmatpush.msra.mxu2 %v54_v6  ;;  %253 = vmatpush.msra.mxu3 %v55_v7  ;;  %v41_v21 = vld [vmem:[%s565_s1 + $0x58] sm:$0xff]  ;;  %v38_v22 = vld [vmem:[%s565_s1 + $0x40] sm:$0xff]  ;;  %v39_v23 = vld [vmem:[%s565_s1 + $0x48] sm:$0xff] }
   0x9   :  { %71 = vmatpush.msra.mxu0 %v54_v6  ;;  %136 = vmatpush.msra.mxu1 %v55_v7  ;;  %v36_v24 = vld [vmem:[%s565_s1 + $0x30] sm:$0xff]  ;;  %v37_v25 = vld [vmem:[%s565_s1 + $0x38] sm:$0xff]  ;;  %v34_v26 = vld [vmem:[%s565_s1 + $0x20] sm:$0xff] }
   0xa   :  { %238 = vmatpush.msra.mxu2 %v52_v8  ;;  %254 = vmatpush.msra.mxu3 %v53_v9  ;;  %v35_v27 = vld [vmem:[%s565_s1 + $0x28] sm:$0xff]  ;;  %v32_v28 = vld [vmem:[%s565_s1 + $0x10] sm:$0xff]  ;;  %v33_v29 = vld [vmem:[%s565_s1 + $0x18] sm:$0xff] }
   0xb   :  { %72 = vmatpush.msra.mxu0 %v52_v8  ;;  %137 = vmatpush.msra.mxu1 %v53_v9  ;;  %v30_v30 = vld [vmem:[%s565_s1] sm:$0xff]  ;;  %v31_v31 = vld [vmem:[%s565_s1 + $0x8] sm:$0xff]  ;;  %v24_v36 = vld [vmem:[%s566_s0 + $0x50] sm:$0xff] }
   0xc   :  { %239 = vmatpush.msra.mxu2 %v50_v10  ;;  %255 = vmatpush.msra.mxu3 %v51_v11  ;;  %v22_v32 = vld [vmem:[%s566_s0 + $0x40] sm:$0xff]  ;;  %v23_v34 = vld [vmem:[%s566_s0 + $0x48] sm:$0xff]  ;;  %v16_v37 = vld [vmem:[%s566_s0 + $0x10] sm:$0xff] }
   0xd   :  { %73 = vmatpush.msra.mxu0 %v50_v10  ;;  %138 = vmatpush.msra.mxu1 %v51_v11  ;;  %v14_v33 = vld [vmem:[%s566_s0] sm:$0xff]  ;;  %v15_v35 = vld [vmem:[%s566_s0 + $0x8] sm:$0xff]  ;;  %v25_v38 = vld [vmem:[%s566_s0 + $0x58] sm:$0xff] }
   0xe   :  { %240 = vmatpush.msra.mxu2 %v48_v12  ;;  %256 = vmatpush.msra.mxu3 %v49_v13  ;;  %v17_v39 = vld [vmem:[%s566_s0 + $0x18] sm:$0xff]  ;;  %v26_v40 = vld [vmem:[%s566_s0 + $0x60] sm:$0xff]  ;;  %v27_v42 = vld [vmem:[%s566_s0 + $0x68] sm:$0xff] }
   0xf   :  { %74 = vmatpush.msra.mxu0 %v48_v12  ;;  %139 = vmatpush.msra.mxu1 %v49_v13  ;;  %v18_v41 = vld [vmem:[%s566_s0 + $0x20] sm:$0xff]  ;;  %v19_v43 = vld [vmem:[%s566_s0 + $0x28] sm:$0xff]  ;;  %v28_v44 = vld [vmem:[%s566_s0 + $0x70] sm:$0xff] }
  0x10   :  { %241 = vmatpush.msra.mxu2 %v46_v14  ;;  %257 = vmatpush.msra.mxu3 %v47_v15  ;;  %v20_v45 = vld [vmem:[%s566_s0 + $0x30] sm:$0xff]  ;;  %v29_v46 = vld [vmem:[%s566_s0 + $0x78] sm:$0xff]  ;;  %v62_v48 = vld [vmem:[%s567_s2] sm:$0x3] }
  0x11   :  { %75 = vmatpush.msra.mxu0 %v46_v14  ;;  %140 = vmatpush.msra.mxu1 %v47_v15  ;;  %v21_v47 = vld [vmem:[%s566_s0 + $0x38] sm:$0xff]  ;;  %v433_v49 = vperm.slane %v62_v48, 0  ;;  %v435_v50 = vperm.slane %v62_v48, 1 }
  0x12   :  { %242 = vmatpush.msra.mxu2 %v44_v16  ;;  %258 = vmatpush.msra.mxu3 %v45_v17 }
  0x13   :  { %76 = vmatpush.msra.mxu0 %v44_v16  ;;  %141 = vmatpush.msra.mxu1 %v45_v17 }
  0x14   :  { %243 = vmatpush.msra.mxu2 %v42_v18  ;;  %259 = vmatpush.msra.mxu3 %v43_v19 }
  0x15   :  { %77 = vmatpush.msra.mxu0 %v42_v18  ;;  %142 = vmatpush.msra.mxu1 %v43_v19 }
  0x16   :  { %244 = vmatpush.msra.mxu2 %v40_v20  ;;  %260 = vmatpush.msra.mxu3 %v41_v21 }
  0x17   :  { %78 = vmatpush.msra.mxu0 %v40_v20  ;;  %143 = vmatpush.msra.mxu1 %v41_v21 }
  0x18   :  { %245 = vmatpush.msra.mxu2 %v38_v22  ;;  %261 = vmatpush.msra.mxu3 %v39_v23 }
  0x19   :  { %79 = vmatpush.msra.mxu0 %v38_v22  ;;  %144 = vmatpush.msra.mxu1 %v39_v23 }
  0x1a   :  { %246 = vmatpush.msra.mxu2 %v36_v24  ;;  %262 = vmatpush.msra.mxu3 %v37_v25 }
  0x1b   :  { %80 = vmatpush.msra.mxu0 %v36_v24  ;;  %145 = vmatpush.msra.mxu1 %v37_v25 }
  0x1c   :  { %247 = vmatpush.msra.mxu2 %v34_v26  ;;  %263 = vmatpush.msra.mxu3 %v35_v27 }
  0x1d   :  { %81 = vmatpush.msra.mxu0 %v34_v26  ;;  %146 = vmatpush.msra.mxu1 %v35_v27 }
  0x1e   :  { %248 = vmatpush.msra.mxu2 %v32_v28  ;;  %264 = vmatpush.msra.mxu3 %v33_v29 }
  0x1f   :  { %82 = vmatpush.msra.mxu0 %v32_v28  ;;  %147 = vmatpush.msra.mxu1 %v33_v29 }
  0x20   :  { %249 = vmatpush.msra.mxu2 %v30_v30  ;;  %265 = vmatpush.msra.mxu3 %v31_v31 }
  0x21   :  { %108 = vmatmul.f32.vlgmr.msra.gmra.mxu2 %v22_v32  ;;  %173 = vmatmul.f32.vlgmr.msra.gmra.mxu3 %v22_v32 }
  0x22   :  { %83 = vmatpush.msra.mxu0 %v30_v30  ;;  %148 = vmatpush.msra.mxu1 %v31_v31 }
  0x23   :  { %84 = vmatmul.f32.vlgmr.msra.gmra.mxu0 %v14_v33  ;;  %149 = vmatmul.f32.vlgmr.msra.gmra.mxu1 %v14_v33 }
  0x29   :  { %111 = vmatmul.f32.gmra.mxu2 %v23_v34  ;;  %176 = vmatmul.f32.gmra.mxu3 %v23_v34 }
  0x2b   :  { %87 = vmatmul.f32.gmra.mxu0 %v15_v35  ;;  %152 = vmatmul.f32.gmra.mxu1 %v15_v35 }
  0x31   :  { %114 = vmatmul.f32.gmra.mxu2 %v24_v36  ;;  %179 = vmatmul.f32.gmra.mxu3 %v24_v36 }
  0x33   :  { %90 = vmatmul.f32.gmra.mxu0 %v16_v37  ;;  %155 = vmatmul.f32.gmra.mxu1 %v16_v37 }
  0x39   :  { %117 = vmatmul.f32.gmra.mxu2 %v25_v38  ;;  %182 = vmatmul.f32.gmra.mxu3 %v25_v38 }
  0x3b   :  { %93 = vmatmul.f32.gmra.mxu0 %v17_v39  ;;  %158 = vmatmul.f32.gmra.mxu1 %v17_v39 }
  0x41   :  { %120 = vmatmul.f32.gmra.mxu2 %v26_v40  ;;  %185 = vmatmul.f32.gmra.mxu3 %v26_v40 }
  0x43   :  { %96 = vmatmul.f32.gmra.mxu0 %v18_v41  ;;  %161 = vmatmul.f32.gmra.mxu1 %v18_v41 }
  0x49   :  { %123 = vmatmul.f32.gmra.mxu2 %v27_v42  ;;  %188 = vmatmul.f32.gmra.mxu3 %v27_v42 }
  0x4b   :  { %99 = vmatmul.f32.gmra.mxu0 %v19_v43  ;;  %164 = vmatmul.f32.gmra.mxu1 %v19_v43 }
  0x51   :  { %126 = vmatmul.f32.gmra.mxu2 %v28_v44  ;;  %191 = vmatmul.f32.gmra.mxu3 %v28_v44 }
  0x53   :  { %102 = vmatmul.f32.gmra.mxu0 %v20_v45  ;;  %167 = vmatmul.f32.gmra.mxu1 %v20_v45 }
  0x59   :  { %129 = vmatmul.f32.gmra.mxu2 %v29_v46  ;;  %194 = vmatmul.f32.gmra.mxu3 %v29_v46 }
  0x5b   :  { %105 = vmatmul.f32.gmra.mxu0 %v21_v47  ;;  %170 = vmatmul.f32.gmra.mxu1 %v21_v47 }
  0xa0   :  { %v85_v51 = vpop.f32.mrf.mxu0  ;;  %v150_v52 = vpop.f32.mrf.mxu1 }
  0xa1   :  { %v86_v53 = vadd.f32 %v85_v51, %v433_v49  ;;  %v151_v54 = vadd.f32 %v150_v52, %v435_v50 }
  0xa3   :  { %198 = vst [vmem:[%s568_s3] sm:$0xff] %v86_v53 }
  0xa4   :  { %v109_v55 = vpop.f32.mrf.mxu2  ;;  %199 = vst [vmem:[%s568_s3 + $0x8] sm:$0xff] %v151_v54  ;;  %v174_v56 = vpop.f32.mrf.mxu3 }
  0xa5   :  { %v110_v57 = vadd.f32 %v109_v55, %v433_v49  ;;  %v175_v58 = vadd.f32 %v174_v56, %v435_v50 }
  0xa7   :  { %214 = vst [vmem:[%s568_s3 + $0x80] sm:$0xff] %v110_v57 }
  0xa8   :  { %215 = vst [vmem:[%s568_s3 + $0x88] sm:$0xff] %v175_v58  ;;  %v88_v59 = vpop.f32.mrf.mxu0  ;;  %v153_v60 = vpop.f32.mrf.mxu1 }
  0xa9   :  { %v89_v61 = vadd.f32 %v88_v59, %v433_v49  ;;  %v154_v62 = vadd.f32 %v153_v60, %v435_v50 }
  0xab   :  { %200 = vst [vmem:[%s568_s3 + $0x10] sm:$0xff] %v89_v61 }
  0xac   :  { %v112_v63 = vpop.f32.mrf.mxu2  ;;  %201 = vst [vmem:[%s568_s3 + $0x18] sm:$0xff] %v154_v62  ;;  %v177_v0 = vpop.f32.mrf.mxu3 }
  0xad   :  { %v113_v1 = vadd.f32 %v112_v63, %v433_v49  ;;  %v178_v2 = vadd.f32 %v177_v0, %v435_v50 }
  0xaf   :  { %216 = vst [vmem:[%s568_s3 + $0x90] sm:$0xff] %v113_v1 }
  0xb0   :  { %217 = vst [vmem:[%s568_s3 + $0x98] sm:$0xff] %v178_v2  ;;  %v91_v3 = vpop.f32.mrf.mxu0  ;;  %v156_v4 = vpop.f32.mrf.mxu1 }
  0xb1   :  { %v92_v5 = vadd.f32 %v91_v3, %v433_v49  ;;  %v157_v6 = vadd.f32 %v156_v4, %v435_v50 }
  0xb3   :  { %202 = vst [vmem:[%s568_s3 + $0x20] sm:$0xff] %v92_v5 }
  0xb4   :  { %v115_v7 = vpop.f32.mrf.mxu2  ;;  %203 = vst [vmem:[%s568_s3 + $0x28] sm:$0xff] %v157_v6  ;;  %v180_v8 = vpop.f32.mrf.mxu3 }
  0xb5   :  { %v116_v9 = vadd.f32 %v115_v7, %v433_v49  ;;  %v181_v10 = vadd.f32 %v180_v8, %v435_v50 }
  0xb7   :  { %218 = vst [vmem:[%s568_s3 + $0xa0] sm:$0xff] %v116_v9 }
  0xb8   :  { %219 = vst [vmem:[%s568_s3 + $0xa8] sm:$0xff] %v181_v10  ;;  %v94_v11 = vpop.f32.mrf.mxu0  ;;  %v159_v12 = vpop.f32.mrf.mxu1 }
  0xb9   :  { %v95_v13 = vadd.f32 %v94_v11, %v433_v49  ;;  %v160_v14 = vadd.f32 %v159_v12, %v435_v50 }
  0xbb   :  { %204 = vst [vmem:[%s568_s3 + $0x30] sm:$0xff] %v95_v13 }
  0xbc   :  { %v118_v15 = vpop.f32.mrf.mxu2  ;;  %205 = vst [vmem:[%s568_s3 + $0x38] sm:$0xff] %v160_v14  ;;  %v183_v16 = vpop.f32.mrf.mxu3 }
  0xbd   :  { %v119_v17 = vadd.f32 %v118_v15, %v433_v49  ;;  %v184_v18 = vadd.f32 %v183_v16, %v435_v50 }
  0xbf   :  { %220 = vst [vmem:[%s568_s3 + $0xb0] sm:$0xff] %v119_v17 }
  0xc0   :  { %221 = vst [vmem:[%s568_s3 + $0xb8] sm:$0xff] %v184_v18  ;;  %v97_v19 = vpop.f32.mrf.mxu0  ;;  %v162_v20 = vpop.f32.mrf.mxu1 }
  0xc1   :  { %v98_v21 = vadd.f32 %v97_v19, %v433_v49  ;;  %v163_v22 = vadd.f32 %v162_v20, %v435_v50 }
  0xc3   :  { %206 = vst [vmem:[%s568_s3 + $0x40] sm:$0xff] %v98_v21 }
  0xc4   :  { %v121_v23 = vpop.f32.mrf.mxu2  ;;  %207 = vst [vmem:[%s568_s3 + $0x48] sm:$0xff] %v163_v22  ;;  %v186_v24 = vpop.f32.mrf.mxu3 }
  0xc5   :  { %v122_v25 = vadd.f32 %v121_v23, %v433_v49  ;;  %v187_v26 = vadd.f32 %v186_v24, %v435_v50 }
  0xc7   :  { %222 = vst [vmem:[%s568_s3 + $0xc0] sm:$0xff] %v122_v25 }
  0xc8   :  { %223 = vst [vmem:[%s568_s3 + $0xc8] sm:$0xff] %v187_v26  ;;  %v100_v27 = vpop.f32.mrf.mxu0  ;;  %v165_v28 = vpop.f32.mrf.mxu1 }
  0xc9   :  { %v101_v29 = vadd.f32 %v100_v27, %v433_v49  ;;  %v166_v30 = vadd.f32 %v165_v28, %v435_v50 }
  0xcb   :  { %208 = vst [vmem:[%s568_s3 + $0x50] sm:$0xff] %v101_v29 }
  0xcc   :  { %v124_v31 = vpop.f32.mrf.mxu2  ;;  %209 = vst [vmem:[%s568_s3 + $0x58] sm:$0xff] %v166_v30  ;;  %v189_v32 = vpop.f32.mrf.mxu3 }
  0xcd   :  { %v125_v33 = vadd.f32 %v124_v31, %v433_v49  ;;  %v190_v34 = vadd.f32 %v189_v32, %v435_v50 }
  0xcf   :  { %224 = vst [vmem:[%s568_s3 + $0xd0] sm:$0xff] %v125_v33 }
  0xd0   :  { %225 = vst [vmem:[%s568_s3 + $0xd8] sm:$0xff] %v190_v34  ;;  %v103_v35 = vpop.f32.mrf.mxu0  ;;  %v168_v36 = vpop.f32.mrf.mxu1 }
  0xd1   :  { %v104_v37 = vadd.f32 %v103_v35, %v433_v49  ;;  %v169_v38 = vadd.f32 %v168_v36, %v435_v50 }
  0xd3   :  { %210 = vst [vmem:[%s568_s3 + $0x60] sm:$0xff] %v104_v37 }
  0xd4   :  { %v127_v39 = vpop.f32.mrf.mxu2  ;;  %211 = vst [vmem:[%s568_s3 + $0x68] sm:$0xff] %v169_v38  ;;  %v192_v40 = vpop.f32.mrf.mxu3 }
  0xd5   :  { %v128_v41 = vadd.f32 %v127_v39, %v433_v49  ;;  %v193_v42 = vadd.f32 %v192_v40, %v435_v50 }
  0xd7   :  { %226 = vst [vmem:[%s568_s3 + $0xe0] sm:$0xff] %v128_v41 }
  0xd8   :  { %227 = vst [vmem:[%s568_s3 + $0xe8] sm:$0xff] %v193_v42  ;;  %v106_v43 = vpop.f32.mrf.mxu0  ;;  %v171_v44 = vpop.f32.mrf.mxu1 }
  0xd9   :  { %v107_v45 = vadd.f32 %v106_v43, %v433_v49  ;;  %v172_v46 = vadd.f32 %v171_v44, %v435_v50 }
  0xdb   :  { %212 = vst [vmem:[%s568_s3 + $0x70] sm:$0xff] %v107_v45 }
  0xdc   :  { %v130_v47 = vpop.f32.mrf.mxu2  ;;  %213 = vst [vmem:[%s568_s3 + $0x78] sm:$0xff] %v172_v46  ;;  %v195_v48 = vpop.f32.mrf.mxu3 }
  0xdd   :  { %v131_v51 = vadd.f32 %v130_v47, %v433_v49  ;;  %v196_v52 = vadd.f32 %v195_v48, %v435_v50 }
  0xdf   :  { %228 = vst [vmem:[%s568_s3 + $0xf0] sm:$0xff] %v131_v51 }
  0xe0   :  { %229 = vst [vmem:[%s568_s3 + $0xf8] sm:$0xff] %v196_v52 }

// kernel: _lambda_.10
= control target key start
LH: loop header
LB: loop body
LE: loop exit
PB: predicated region body
PF: predicated region fallthrough
CT: control target
= control target key end

     0   :  { %s710_s15 = smov 0   ;;  %s712_s16 = smov 0   ;;  %s931_s0 = inlined_call_operand.vmem [shape: f32[2,64,32], index: 0, kind: input, shape index: {}]   ;;  %s932_s1 = inlined_call_operand.vmem [shape: f32[2,64,32], index: 1, kind: input, shape index: {}]   ;;  %s933_s2 = inlined_call_operand.vmem [shape: f32[1,32], index: 2, kind: input, shape index: {}]   ;;  %s934_s3 = inlined_call_operand.vmem [shape: f32[1,32], index: 3, kind: input, shape index: {}]   ;;  %s935_s4 = inlined_call_operand.vmem [shape: f32[2,1,32], index: 4, kind: output, shape index: {}]  }
   0x1   :  { %s714_s17 = smov 0  }
   0x2 LB: > { %s26_s18 = sadd.s32 1, %s677_s16  ;;  %p604_p0 = scmp.ge.s32.totalorder %s681_s17, 1  ;;  %s681_s17 = sphi %s714_s17, %s14_s17   ;;  %s677_s16 = sphi %s712_s16, %s943_s16   ;;  %s673_s15 = sphi %s710_s15, %s942_s15  }
   0x3   : > { %p28_p1 = scmp.ge.s32.totalorder %s26_s18, 2  ;;  %p198_p2 = scmp.lt.s32.totalorder %s681_s17, 3 }
   0x5   : > { %s945_s18 = smov (%p28_p1, %s26_s18), 0  ;;  %p199_p3 = pnand %p604_p0, %p198_p2 }
   0x6   : > { %p236_p4 = scmp.lt.s32.totalorder (!%p199_p3), %s673_s15, 1 }
   0x7   : > { %202 = sbr.rel (%p199_p3) target bundleno = 329 (0x149), region = 36 }
   0xc   : > { %s947_s15 = smov (!%p236_p4, %s673_s15), 1  ;;  %vm262_vm0 = vcmask 253952   ;;  %vm282_vm1 = vcmask 261120   ;;  %v683_v0 = vmov 0.0   ;;  %v684_v17 = vmov 32.0  }
   0xd   : > { %s611_s19 = sshll.u32 %s947_s15, 6  ;;  %s735_s22 = scalar_lea.vmem %s935_s4, %s947_s15  ;;  %641 = vrcp.f32 %v684_v17 }
   0xe   : > { %s243_s25 = scalar_lea.vmem %s931_s0, %s611_s19  ;;  %263 = vst.msk [vmem:[%s735_s22] sm:$0x1] %vm262_vm0, %v683_v0  ;;  %s867_s6 = scalar_lea.vmem %s932_s1, %s611_s19 }
   0xf   : > { %v268_v1 = vld [vmem:[%s243_s25 + $0x20] sm:$0xff]  ;;  %v266_v2 = vld [vmem:[%s243_s25 + $0x10] sm:$0xff]  ;;  %v269_v7 = vld [vmem:[%s243_s25 + $0x28] sm:$0xff] }
  0x10   : > { %v264_v3 = vld [vmem:[%s243_s25] sm:$0xff]  ;;  %v295_v4 = vsel %vm282_vm1, %v268_v1, 0.0  ;;  %v289_v5 = vsel %vm282_vm1, %v266_v2, 0.0  ;;  %v267_v8 = vld [vmem:[%s243_s25 + $0x18] sm:$0xff]  ;;  %v265_v9 = vld [vmem:[%s243_s25 + $0x8] sm:$0xff]  ;;  %v298_v10 = vsel %vm282_vm1, %v269_v7, 0.0 }
  0x11   : > { %v283_v6 = vsel %vm282_vm1, %v264_v3, 0.0  ;;  %296 = vadd.xlane.f32.xlu2 %v295_v4  ;;  %290 = vadd.xlane.f32.xlu1 %v289_v5  ;;  %v292_v11 = vsel %vm282_vm1, %v267_v8, 0.0  ;;  %v286_v12 = vsel %vm282_vm1, %v265_v9, 0.0  ;;  %v271_v13 = vld [vmem:[%s243_s25 + $0x38] sm:$0xff]  ;;  %v270_v14 = vld [vmem:[%s243_s25 + $0x30] sm:$0xff] }
  0x12   : > { %284 = vadd.xlane.f32.xlu0 %v283_v6  ;;  %v304_v15 = vsel %vm282_vm1, %v271_v13, 0.0  ;;  %v301_v16 = vsel %vm282_vm1, %v270_v14, 0.0 }
  0x13   : > { %v642_v18 = vpop.eup %641 }
  0x14   : > { %v308_v19 = vmul.f32 32.0, %v642_v18  ;;  %vm312_vm2 = vweird.f32 %v642_v18 }
  0x16   : > { %v309_v20 = vsub.f32 1.0, %v308_v19 }
  0x18   : > { %v310_v21 = vmul.f32 %v642_v18, %v309_v20 }
  0x19   : > { %299 = vadd.xlane.f32.xlu2 %v298_v10  ;;  %293 = vadd.xlane.f32.xlu1 %v292_v11 }
  0x1a   : > { %287 = vadd.xlane.f32.xlu0 %v286_v12  ;;  %v311_v22 = vadd.f32 %v642_v18, %v310_v21 }
  0x1c   : > { %v752_v23 = vsel %vm312_vm2, %v642_v18, %v311_v22 }
  0x21   : > { %305 = vadd.xlane.f32.xlu1 %v304_v15 }
  0x22   : > { %302 = vadd.xlane.f32.xlu0 %v301_v16 }
  0x84   : > { %v297_v24 = vpop.xlane.xlu2 %296  ;;  %v291_v25 = vpop.xlane.xlu1 %290 }
  0x85   : > { %v316_v26 = vmul.f32 %v752_v23, %v291_v25  ;;  %v285_v27 = vpop.xlane.xlu0 %284  ;;  %v318_v43 = vmul.f32 %v752_v23, %v297_v24 }
  0x86   : > { %v314_v28 = vmul.f32 %v752_v23, %v285_v27 }
  0x87   : > { %v756_v29 = vsub.f32 %v266_v2, %v316_v26  ;;  %v784_v50 = vsub.f32 %v268_v1, %v318_v43 }
  0x88   : > { %v758_v30 = vsub.f32 %v264_v3, %v314_v28 }
  0x89   : > { %v332_v31 = vmul.f32 %v756_v29, %v756_v29  ;;  %v334_v57 = vmul.f32 %v784_v50, %v784_v50 }
  0x8a   : > { %v330_v32 = vmul.f32 %v758_v30, %v758_v30 }
  0x8b   : > { %v344_v33 = vsel %vm282_vm1, %v332_v31, 0.0  ;;  %v350_v60 = vsel %vm282_vm1, %v334_v57, 0.0 }
  0x8c   : > { %v300_v34 = vpop.xlane.xlu2 %299  ;;  %345 = vadd.xlane.f32.xlu1 %v344_v33  ;;  %v294_v35 = vpop.xlane.xlu1 %293  ;;  %v338_v36 = vsel %vm282_vm1, %v330_v32, 0.0 }
  0x8d   : > { %v319_v37 = vmul.f32 %v752_v23, %v300_v34  ;;  %v317_v38 = vmul.f32 %v752_v23, %v294_v35  ;;  %339 = vadd.xlane.f32.xlu2 %v338_v36  ;;  %v288_v39 = vpop.xlane.xlu0 %287 }
  0x8e   : > { %v315_v40 = vmul.f32 %v752_v23, %v288_v39 }
  0x8f   : > { %v769_v41 = vsub.f32 %v269_v7, %v319_v37  ;;  %v771_v42 = vsub.f32 %v267_v8, %v317_v38 }
  0x90   : > { %v774_v44 = vsub.f32 %v265_v9, %v315_v40 }
  0x91   : > { %v335_v45 = vmul.f32 %v769_v41, %v769_v41  ;;  %v333_v46 = vmul.f32 %v771_v42, %v771_v42 }
  0x92   : > { %v331_v47 = vmul.f32 %v774_v44, %v774_v44 }
  0x93   : > { %v353_v48 = vsel %vm282_vm1, %v335_v45, 0.0  ;;  %v347_v49 = vsel %vm282_vm1, %v333_v46, 0.0 }
  0x94   : > { %354 = vadd.xlane.f32.xlu1 %v353_v48  ;;  %v341_v51 = vsel %vm282_vm1, %v331_v47, 0.0  ;;  %v306_v52 = vpop.xlane.xlu1 %305 }
  0x95   : > { %348 = vadd.xlane.f32.xlu2 %v347_v49  ;;  %342 = vadd.xlane.f32.xlu0 %v341_v51  ;;  %v303_v53 = vpop.xlane.xlu0 %302  ;;  %v321_v55 = vmul.f32 %v752_v23, %v306_v52 }
  0x96   : > { %v320_v54 = vmul.f32 %v752_v23, %v303_v53 }
  0x97   : > { %v793_v58 = vsub.f32 %v271_v13, %v321_v55 }
  0x98   : > { %v789_v56 = vsub.f32 %v270_v14, %v320_v54  ;;  %v835_v54 = vld [vmem:[%s933_s2] ss:$0 sm:$0xff] }
  0x99   : > { %v337_v62 = vmul.f32 %v793_v58, %v793_v58 }
  0x9a   : > { %v336_v59 = vmul.f32 %v789_v56, %v789_v56 }
  0x9b   : > { %v359_v63 = vsel %vm282_vm1, %v337_v62, 0.0 }
  0x9c   : > { %v356_v61 = vsel %vm282_vm1, %v336_v59, 0.0 }
  0x9d   : > { %351 = vadd.xlane.f32.xlu0 %v350_v60  ;;  %357 = vadd.xlane.f32.xlu2 %v356_v61 }
  0xa5   : > { %360 = vadd.xlane.f32.xlu0 %v359_v63 }
  0xff   : > { %v346_v0 = vpop.xlane.xlu1 %345 }
 0x100   : > { %v364_v1 = vmul.f32 %v346_v0, %v752_v23  ;;  %v340_v2 = vpop.xlane.xlu2 %339 }
 0x101   : > { %v362_v3 = vmul.f32 %v340_v2, %v752_v23 }
 0x102   : > { %v372_v4 = vadd.f32 1e-05, %v364_v1 }
 0x103   : > { %v370_v5 = vadd.f32 1e-05, %v362_v3 }
 0x104   : > { %643 = vrsqrt.f32 %v372_v4  ;;  %vm404_vm4 = vweird.f32 %v372_v4 }
 0x105   : > { %645 = vrsqrt.f32 %v370_v5  ;;  %vm384_vm5 = vweird.f32 %v370_v5 }
 0x107   : > { %v355_v6 = vpop.xlane.xlu1 %354 }
 0x108   : > { %v367_v7 = vmul.f32 %v355_v6, %v752_v23  ;;  %v349_v8 = vpop.xlane.xlu2 %348  ;;  %v343_v9 = vpop.xlane.xlu0 %342 }
 0x109   : > { %v365_v10 = vmul.f32 %v349_v8, %v752_v23  ;;  %v363_v11 = vmul.f32 %v343_v9, %v752_v23 }
 0x10a   : > { %v644_v12 = vpop.eup %643  ;;  %v807_v13 = vadd.f32 1e-05, %v367_v7 }
 0x10b   : > { %v646_v14 = vpop.eup %645  ;;  %v399_v15 = vmul.f32 %v644_v12, %v372_v4  ;;  %v373_v16 = vadd.f32 1e-05, %v365_v10  ;;  %v809_v17 = vadd.f32 1e-05, %v363_v11  ;;  %vm405_vm6 = vweird.f32 %v644_v12 }
 0x10c   : > { %v379_v18 = vmul.f32 %v646_v14, %v370_v5  ;;  %647 = vrsqrt.f32 %v807_v13  ;;  %vm385_vm3 = vweird.f32 %v646_v14  ;;  %vm827_vm8 = vmor %vm404_vm4, %vm405_vm6  ;;  %vm434_vm14 = vweird.f32 %v807_v13 }
 0x10d   : > { %v400_v19 = vmul.f32 %v644_v12, %v399_v15  ;;  %649 = vrsqrt.f32 %v373_v16  ;;  %vm386_vm7 = vmor %vm384_vm5, %vm385_vm3  ;;  %vm414_vm9 = vweird.f32 %v373_v16  ;;  %vm394_vm12 = vweird.f32 %v809_v17 }
 0x10e   : > { %v380_v20 = vmul.f32 %v646_v14, %v379_v18  ;;  %651 = vrsqrt.f32 %v809_v17  ;;  %v272_v18 = vld [vmem:[%s867_s6] sm:$0xff] }
 0x10f   : > { %v401_v21 = vmul.f32 0.5, %v400_v19 }
 0x110   : > { %v381_v22 = vmul.f32 0.5, %v380_v20  ;;  %v358_v24 = vpop.xlane.xlu2 %357  ;;  %v352_v25 = vpop.xlane.xlu0 %351 }
 0x111   : > { %v402_v26 = vsub.f32 1.5, %v401_v21  ;;  %v368_v27 = vmul.f32 %v358_v24, %v752_v23  ;;  %v366_v28 = vmul.f32 %v352_v25, %v752_v23  ;;  %v273_v21 = vld [vmem:[%s867_s6 + $0x8] sm:$0xff] }
 0x112   : > { %v815_v31 = vpop.eup %647  ;;  %v382_v32 = vsub.f32 1.5, %v381_v22 }
 0x113   : > { %v650_v33 = vpop.eup %649  ;;  %v429_v34 = vmul.f32 %v815_v31, %v807_v13  ;;  %v819_v35 = vadd.f32 1e-05, %v368_v27  ;;  %v821_v39 = vadd.f32 1e-05, %v366_v28  ;;  %v403_v40 = vmul.f32 %v644_v12, %v402_v26  ;;  %v274_v26 = vld [vmem:[%s867_s6 + $0x10] sm:$0xff] }
 0x114   : > { %v652_v36 = vpop.eup %651  ;;  %v383_v37 = vmul.f32 %v646_v14, %v382_v32  ;;  %v409_v38 = vmul.f32 %v650_v33, %v373_v16  ;;  %vm415_vm10 = vweird.f32 %v650_v33  ;;  %vm435_vm15 = vweird.f32 %v815_v31 }
 0x115   : > { %v430_v43 = vmul.f32 %v815_v31, %v429_v34  ;;  %v389_v45 = vmul.f32 %v652_v36, %v809_v17  ;;  %653 = vrsqrt.f32 %v819_v35  ;;  %v407_v55 = vsel %vm827_vm8, %v644_v12, %v403_v40  ;;  %vm849_vm13 = vmor %vm414_vm9, %vm415_vm10 }
 0x116   : > { %v387_v46 = vsel %vm386_vm7, %v646_v14, %v383_v37  ;;  %v410_v47 = vmul.f32 %v650_v33, %v409_v38  ;;  %655 = vrsqrt.f32 %v821_v39  ;;  %vm395_vm11 = vweird.f32 %v652_v36  ;;  %vm873_vm3 = vmor %vm434_vm14, %vm435_vm15 }
 0x117   : > { %v431_v48 = vmul.f32 0.5, %v430_v43  ;;  %v390_v49 = vmul.f32 %v652_v36, %v389_v45  ;;  %v458_v57 = vmul.f32 %v387_v46, %v758_v30  ;;  %v460_v1 = vmul.f32 %v407_v55, %v756_v29  ;;  %v846_v30 = vld [vmem:[%s934_s3] ss:$0 sm:$0xff]  ;;  %vm396_vm2 = vmor %vm394_vm12, %vm395_vm11 }
 0x118   : > { %v411_v52 = vmul.f32 0.5, %v410_v47  ;;  %v361_v53 = vpop.xlane.xlu0 %360  ;;  %vm444_vm4 = vweird.f32 %v819_v35  ;;  %vm424_vm8 = vweird.f32 %v821_v39 }
 0x119   : > { %v391_v59 = vmul.f32 0.5, %v390_v49  ;;  %v369_v60 = vmul.f32 %v361_v53, %v752_v23  ;;  %v432_v61 = vsub.f32 1.5, %v431_v48  ;;  %v469_v23 = vmul.f32 %v835_v54, %v458_v57  ;;  %v275_v48 = vld [vmem:[%s867_s6 + $0x18] sm:$0xff] }
 0x11a   : > { %v412_v62 = vsub.f32 1.5, %v411_v52  ;;  %v471_v11 = vmul.f32 %v835_v54, %v460_v1 }
 0x11b   : > { %v392_v63 = vsub.f32 1.5, %v391_v59  ;;  %v654_v0 = vpop.eup %653  ;;  %v854_v6 = vadd.f32 1e-05, %v369_v60  ;;  %v433_v7 = vmul.f32 %v815_v31, %v432_v61  ;;  %v480_v14 = vadd.f32 %v846_v30, %v469_v23 }
 0x11c   : > { %v413_v2 = vmul.f32 %v650_v33, %v412_v62  ;;  %v439_v5 = vmul.f32 %v654_v0, %v819_v35  ;;  %v656_v29 = vpop.eup %655  ;;  %vm445_vm5 = vweird.f32 %v654_v0  ;;  %v482_v24 = vadd.f32 %v846_v30, %v471_v11  ;;  %v277_v62 = vld [vmem:[%s867_s6 + $0x28] sm:$0xff] }
 0x11d   : > { %v393_v4 = vmul.f32 %v652_v36, %v392_v63  ;;  %v419_v13 = vmul.f32 %v656_v29, %v821_v39  ;;  %657 = vrsqrt.f32 %v854_v6  ;;  %v437_v19 = vsel %vm873_vm3, %v815_v31, %v433_v7  ;;  %vm446_vm6 = vmor %vm444_vm4, %vm445_vm5  ;;  %v276_v63 = vld [vmem:[%s867_s6 + $0x20] sm:$0xff] }
 0x11e   : > { %v417_v8 = vsel %vm849_vm13, %v650_v33, %v413_v2  ;;  %v440_v10 = vmul.f32 %v654_v0, %v439_v5  ;;  %v488_v27 = vmul.f32 %v480_v14, %v272_v18  ;;  %v463_v28 = vmul.f32 %v437_v19, %v769_v41  ;;  %v278_v5 = vld [vmem:[%s867_s6 + $0x30] sm:$0xff]  ;;  %v279_v14 = vld [vmem:[%s867_s6 + $0x38] sm:$0xff] }
 0x11f   : > { %v397_v9 = vsel %vm396_vm2, %v652_v36, %v393_v4  ;;  %v461_v16 = vmul.f32 %v417_v8, %v771_v42  ;;  %v420_v20 = vmul.f32 %v656_v29, %v419_v13  ;;  %vm425_vm7 = vweird.f32 %v656_v29 }
 0x120   : > { %v459_v12 = vmul.f32 %v397_v9, %v774_v44  ;;  %v441_v17 = vmul.f32 0.5, %v440_v10  ;;  %v490_v37 = vmul.f32 %v482_v24, %v274_v26  ;;  %v497_v41 = vsel %vm282_vm1, %v488_v27, 0.0  ;;  %vm426_vm9 = vmor %vm424_vm8, %vm425_vm7 }
 0x121   : > { %v421_v25 = vmul.f32 0.5, %v420_v20  ;;  %v472_v32 = vmul.f32 %v835_v54, %v461_v16  ;;  %v474_v45 = vmul.f32 %v835_v54, %v463_v28  ;;  %vm454_vm11 = vweird.f32 %v854_v6 }
 0x122   : > { %v470_v44 = vmul.f32 %v835_v54, %v459_v12  ;;  %v442_v22 = vsub.f32 1.5, %v441_v17  ;;  %v500_v53 = vsel %vm282_vm1, %v490_v37, 0.0 }
 0x123   : > { %v422_v34 = vsub.f32 1.5, %v421_v25  ;;  %v658_v36 = vpop.eup %657  ;;  %v483_v46 = vadd.f32 %v846_v30, %v472_v32  ;;  %v485_v57 = vadd.f32 %v846_v30, %v474_v45 }
 0x124   : > { %v481_v42 = vadd.f32 %v846_v30, %v470_v44  ;;  %v443_v31 = vmul.f32 %v654_v0, %v442_v22  ;;  %v449_v43 = vmul.f32 %v658_v36, %v854_v6  ;;  %vm455_vm10 = vweird.f32 %v658_v36 }
 0x125   : > { %v423_v40 = vmul.f32 %v656_v29, %v422_v34  ;;  %v491_v59 = vmul.f32 %v483_v46, %v275_v48  ;;  %vm456_vm12 = vmor %vm454_vm11, %vm455_vm10 }
 0x126   : > { %v489_v33 = vmul.f32 %v481_v42, %v273_v21  ;;  %v447_v35 = vsel %vm446_vm6, %v654_v0, %v443_v31  ;;  %v450_v51 = vmul.f32 %v658_v36, %v449_v43  ;;  %v496_v42 = vld [vmem:[%s735_s22] sm:$0x1] }
 0x127   : > { %v464_v47 = vmul.f32 %v447_v35, %v789_v56  ;;  %v427_v39 = vsel %vm426_vm9, %v656_v29, %v423_v40  ;;  %v502_v23 = vsel %vm282_vm1, %v491_v59, 0.0 }
 0x128   : > { %v498_v38 = vsel %vm282_vm1, %v489_v33, 0.0  ;;  %v462_v52 = vmul.f32 %v427_v39, %v784_v50  ;;  %v451_v55 = vmul.f32 0.5, %v450_v51  ;;  %v493_v50 = vmul.f32 %v485_v57, %v277_v62 }
 0x129   : > { %v499_v49 = vadd.f32 %v498_v38, %v497_v41  ;;  %v475_v60 = vmul.f32 %v835_v54, %v464_v47 }
 0x12a   : > { %v473_v61 = vmul.f32 %v835_v54, %v462_v52  ;;  %v452_v0 = vsub.f32 1.5, %v451_v55  ;;  %v506_v11 = vsel %vm282_vm1, %v493_v50, 0.0 }
 0x12b   : > { %v501_v56 = vadd.f32 %v500_v53, %v499_v49  ;;  %v486_v3 = vadd.f32 %v846_v30, %v475_v60 }
 0x12c   : > { %v484_v1 = vadd.f32 %v846_v30, %v473_v61  ;;  %v453_v2 = vmul.f32 %v658_v36, %v452_v0 }
 0x12d   : > { %v503_v29 = vadd.f32 %v502_v23, %v501_v56  ;;  %v494_v6 = vmul.f32 %v486_v3, %v278_v5 }
 0x12e   : > { %v492_v4 = vmul.f32 %v484_v1, %v276_v63  ;;  %v457_v7 = vsel %vm456_vm12, %v658_v36, %v453_v2 }
 0x12f   : > { %v465_v9 = vmul.f32 %v457_v7, %v793_v58  ;;  %v508_v16 = vsel %vm282_vm1, %v494_v6, 0.0 }
 0x130   : > { %v504_v8 = vsel %vm282_vm1, %v492_v4, 0.0 }
 0x131   : > { %v505_v10 = vadd.f32 %v504_v8, %v503_v29  ;;  %v476_v12 = vmul.f32 %v835_v54, %v465_v9 }
 0x133   : > { %v507_v13 = vadd.f32 %v506_v11, %v505_v10  ;;  %v487_v15 = vadd.f32 %v846_v30, %v476_v12 }
 0x135   : > { %v495_v17 = vmul.f32 %v487_v15, %v279_v14  ;;  %v509_v18 = vadd.f32 %v508_v16, %v507_v13 }
 0x137   : > { %v510_v19 = vsel %vm282_vm1, %v495_v17, 0.0 }
 0x138   : > { %v511_v44 = vadd.f32 %v510_v19, %v509_v18 }
 0x13a   : > { %v512_v58 = vrot.slane %v511_v44, 4 }
 0x13c   : > { %v513_v20 = vadd.f32 %v512_v58, %v511_v44 }
 0x13e   : > { %v514_v21 = vrot.slane %v513_v20, 2 }
 0x140   : > { %v515_v22 = vadd.f32 %v514_v21, %v513_v20 }
 0x142   : > { %v516_v24 = vrot.slane %v515_v22, 1 }
 0x144   : > { %v517_v25 = vadd.f32 %v516_v24, %v515_v22 }
 0x146   : > { %v518_v54 = vadd.f32 %v517_v25, %v496_v42 }
 0x148   : > { %520 = vst.msk [vmem:[%s735_s22] sm:$0x1] %vm262_vm0, %v518_v54 }
 0x149 PF: > { %s14_s17 = sadd.s32 1, %s681_s17   ;;  %s942_s15 = smov %s677_s16 }
 0x14a   : > { %p11_p5 = scmp.ge.s32.totalorder %s14_s17, 4   ;;  %s943_s16 = smov %s945_s18 }
 0x14c   :  { %13 = sbr.rel (!%p11_p5) target bundleno = 2 (0x2), region = 73 }

// kernel: custom-call.1
= control target key start
LH: loop header
LB: loop body
LE: loop exit
PB: predicated region body
PF: predicated region fallthrough
CT: control target
= control target key end

     0   :  { %s6_s0 = inlined_call_operand.vmem [shape: f32[32,2,2,4,16], index: 0, kind: output, shape index: {}]  }

// kernel: custom-call
= control target key start
LH: loop header
LB: loop body
LE: loop exit
PB: predicated region body
PF: predicated region fallthrough
CT: control target
= control target key end

     0   :  { %s6_s0 = inlined_call_operand.vmem [shape: f32[2,2,4,16], index: 0, kind: output, shape index: {}]  }

// kernel: _lambda_.11
= control target key start
LH: loop header
LB: loop body
LE: loop exit
PB: predicated region body
PF: predicated region fallthrough
CT: control target
= control target key end

     0   :  { %s906_s21 = smov 0   ;;  %s908_s22 = smov 0   ;;  %s1180_s0 = inlined_call_operand.vmem [shape: f32[2,64,32], index: 0, kind: input, shape index: {}]   ;;  %s1181_s1 = inlined_call_operand.vmem [shape: f32[2,64,32], index: 1, kind: input, shape index: {}]   ;;  %s1182_s2 = inlined_call_operand.vmem [shape: f32[1,32], index: 2, kind: input, shape index: {}]   ;;  %s1183_s3 = inlined_call_operand.vmem [shape: f32[1,32], index: 3, kind: input, shape index: {}]   ;;  %s1184_s4 = inlined_call_operand.vmem [shape: f32[16,32], index: 4, kind: input, shape index: {}]   ;;  %s1185_s5 = inlined_call_operand.vmem [shape: f32[2,16,1], index: 5, kind: input, shape index: {}]   ;;  %s1186_s6 = inlined_call_operand.vmem [shape: f32[2,16,64], index: 6, kind: output, shape index: {}]  }
   0x1   :  { %s910_s23 = smov 0  }
   0x2 LB: > { %s28_s24 = sadd.s32 1, %s863_s22  ;;  %p763_p0 = scmp.ge.s32.totalorder %s867_s23, 1  ;;  %s867_s23 = sphi %s910_s23, %s16_s23   ;;  %s863_s22 = sphi %s908_s22, %s1194_s22   ;;  %s859_s21 = sphi %s906_s21, %s1193_s21  }
   0x3   : > { %p30_p1 = scmp.ge.s32.totalorder %s28_s24, 2  ;;  %p260_p2 = scmp.lt.s32.totalorder %s867_s23, 3 }
   0x5   : > { %s1196_s24 = smov (%p30_p1, %s28_s24), 0  ;;  %p261_p3 = pnand %p763_p0, %p260_p2 }
   0x6   : > { %p312_p4 = scmp.lt.s32.totalorder (!%p261_p3), %s859_s21, 1 }
   0x7   : > { %264 = sbr.rel (%p261_p3) target bundleno = 452 (0x1c4), region = 44 }
   0xc   : > { %s1198_s21 = smov (!%p312_p4, %s859_s21), 1  ;;  %vm362_vm0 = vcmask 261120   ;;  %v869_v16 = vmov 32.0  }
   0xd   : > { %s784_s25 = sshll.u32 %s1198_s21, 6  ;;  %827 = vrcp.f32 %v869_v16  ;;  %s786_s12 = sshll.u32 %s1198_s21, 4 }
   0xe   : > { %s319_s28 = scalar_lea.vmem %s1180_s0, %s784_s25  ;;  %s1040_s9 = scalar_lea.vmem %s1181_s1, %s784_s25 }
   0xf   : > { %v351_v0 = vld [vmem:[%s319_s28 + $0x38] sm:$0xff]  ;;  %v349_v1 = vld [vmem:[%s319_s28 + $0x28] sm:$0xff]  ;;  %v350_v6 = vld [vmem:[%s319_s28 + $0x30] sm:$0xff]  ;;  %s335_s15 = scalar_lea.vmem %s1185_s5, %s786_s12  ;;  %s343_s26 = scalar_lea.vmem %s1186_s6, %s786_s12 }
  0x10   : > { %v347_v2 = vld [vmem:[%s319_s28 + $0x18] sm:$0xff]  ;;  %v384_v3 = vsel %vm362_vm0, %v351_v0, 0.0  ;;  %v378_v4 = vsel %vm362_vm0, %v349_v1, 0.0  ;;  %v348_v7 = vld [vmem:[%s319_s28 + $0x20] sm:$0xff]  ;;  %v346_v8 = vld [vmem:[%s319_s28 + $0x10] sm:$0xff]  ;;  %v381_v9 = vsel %vm362_vm0, %v350_v6, 0.0 }
  0x11   : > { %v372_v5 = vsel %vm362_vm0, %v347_v2, 0.0  ;;  %385 = vadd.xlane.f32.xlu0 %v384_v3  ;;  %379 = vadd.xlane.f32.xlu1 %v378_v4  ;;  %v375_v10 = vsel %vm362_vm0, %v348_v7, 0.0  ;;  %v369_v11 = vsel %vm362_vm0, %v346_v8, 0.0  ;;  %v345_v12 = vld [vmem:[%s319_s28 + $0x8] sm:$0xff]  ;;  %v344_v13 = vld [vmem:[%s319_s28] sm:$0xff] }
  0x12   : > { %373 = vadd.xlane.f32.xlu2 %v372_v5  ;;  %v366_v14 = vsel %vm362_vm0, %v345_v12, 0.0  ;;  %v363_v15 = vsel %vm362_vm0, %v344_v13, 0.0 }
  0x13   : > { %v828_v17 = vpop.eup %827 }
  0x14   : > { %v388_v18 = vmul.f32 32.0, %v828_v17  ;;  %vm392_vm1 = vweird.f32 %v828_v17 }
  0x16   : > { %v389_v19 = vsub.f32 1.0, %v388_v18 }
  0x18   : > { %v390_v20 = vmul.f32 %v828_v17, %v389_v19 }
  0x19   : > { %382 = vadd.xlane.f32.xlu0 %v381_v9  ;;  %376 = vadd.xlane.f32.xlu1 %v375_v10 }
  0x1a   : > { %370 = vadd.xlane.f32.xlu2 %v369_v11  ;;  %v391_v21 = vadd.f32 %v828_v17, %v390_v20 }
  0x1c   : > { %v940_v22 = vsel %vm392_vm1, %v828_v17, %v391_v21 }
  0x21   : > { %367 = vadd.xlane.f32.xlu0 %v366_v14  ;;  %364 = vadd.xlane.f32.xlu1 %v363_v15 }
  0x84   : > { %v386_v23 = vpop.xlane.xlu0 %385  ;;  %v380_v24 = vpop.xlane.xlu1 %379 }
  0x85   : > { %v401_v25 = vmul.f32 %v940_v22, %v386_v23  ;;  %v399_v26 = vmul.f32 %v940_v22, %v380_v24  ;;  %v374_v27 = vpop.xlane.xlu2 %373 }
  0x86   : > { %v397_v36 = vmul.f32 %v940_v22, %v374_v27 }
  0x87   : > { %v944_v28 = vsub.f32 %v351_v0, %v401_v25  ;;  %v946_v29 = vsub.f32 %v349_v1, %v399_v26 }
  0x88   : > { %v964_v44 = vsub.f32 %v347_v2, %v397_v36 }
  0x89   : > { %v417_v30 = vmul.f32 %v944_v28, %v944_v28  ;;  %v415_v31 = vmul.f32 %v946_v29, %v946_v29 }
  0x8a   : > { %v413_v54 = vmul.f32 %v964_v44, %v964_v44 }
  0x8b   : > { %v439_v32 = vsel %vm362_vm0, %v417_v30, 0.0  ;;  %v433_v33 = vsel %vm362_vm0, %v415_v31, 0.0 }
  0x8c   : > { %v383_v34 = vpop.xlane.xlu0 %382  ;;  %v377_v35 = vpop.xlane.xlu1 %376  ;;  %440 = vadd.xlane.f32.xlu2 %v439_v32  ;;  %434 = vadd.xlane.f32.xlu1 %v433_v33  ;;  %v427_v57 = vsel %vm362_vm0, %v413_v54, 0.0 }
  0x8d   : > { %v400_v37 = vmul.f32 %v940_v22, %v383_v34  ;;  %v398_v38 = vmul.f32 %v940_v22, %v377_v35  ;;  %v371_v39 = vpop.xlane.xlu2 %370 }
  0x8e   : > { %v396_v40 = vmul.f32 %v940_v22, %v371_v39 }
  0x8f   : > { %v958_v41 = vsub.f32 %v350_v6, %v400_v37  ;;  %v960_v42 = vsub.f32 %v348_v7, %v398_v38 }
  0x90   : > { %v962_v43 = vsub.f32 %v346_v8, %v396_v40 }
  0x91   : > { %v414_v45 = vmul.f32 %v960_v42, %v960_v42  ;;  %v416_v46 = vmul.f32 %v958_v41, %v958_v41 }
  0x92   : > { %v412_v47 = vmul.f32 %v962_v43, %v962_v43 }
  0x93   : > { %v430_v48 = vsel %vm362_vm0, %v414_v45, 0.0  ;;  %v436_v49 = vsel %vm362_vm0, %v416_v46, 0.0  ;;  %v1030_v46 = vld [vmem:[%s1182_s2] ss:$0 sm:$0xff] }
  0x94   : > { %431 = vadd.xlane.f32.xlu2 %v430_v48  ;;  %437 = vadd.xlane.f32.xlu0 %v436_v49  ;;  %v368_v50 = vpop.xlane.xlu0 %367  ;;  %v424_v51 = vsel %vm362_vm0, %v412_v47, 0.0  ;;  %v365_v52 = vpop.xlane.xlu1 %364 }
  0x95   : > { %v395_v53 = vmul.f32 %v940_v22, %v368_v50  ;;  %425 = vadd.xlane.f32.xlu1 %v424_v51  ;;  %v394_v55 = vmul.f32 %v940_v22, %v365_v52 }
  0x97   : > { %v979_v56 = vsub.f32 %v345_v12, %v395_v53  ;;  %v984_v59 = vsub.f32 %v344_v13, %v394_v55  ;;  %v1046_v55 = vld [vmem:[%s1183_s3] ss:$0 sm:$0xff] }
  0x99   : > { %v411_v58 = vmul.f32 %v979_v56, %v979_v56  ;;  %v410_v61 = vmul.f32 %v984_v59, %v984_v59 }
  0x9b   : > { %v421_v60 = vsel %vm362_vm0, %v411_v58, 0.0  ;;  %v418_v62 = vsel %vm362_vm0, %v410_v61, 0.0 }
  0x9c   : > { %428 = vadd.xlane.f32.xlu0 %v427_v57  ;;  %422 = vadd.xlane.f32.xlu2 %v421_v60 }
  0xa4   : > { %419 = vadd.xlane.f32.xlu0 %v418_v62 }
  0xff   : > { %v441_v63 = vpop.xlane.xlu2 %440  ;;  %v435_v0 = vpop.xlane.xlu1 %434 }
 0x100   : > { %v449_v1 = vmul.f32 %v441_v63, %v940_v22  ;;  %v447_v2 = vmul.f32 %v435_v0, %v940_v22 }
 0x102   : > { %v457_v3 = vadd.f32 1e-05, %v449_v1  ;;  %v455_v4 = vadd.f32 1e-05, %v447_v2  ;;  %v359_v2 = vld [vmem:[%s1040_s9 + $0x38] sm:$0xff] }
 0x104   : > { %829 = vrsqrt.f32 %v457_v3  ;;  %vm534_vm3 = vweird.f32 %v457_v3  ;;  %vm514_vm5 = vweird.f32 %v455_v4 }
 0x105   : > { %831 = vrsqrt.f32 %v455_v4 }
 0x107   : > { %v432_v5 = vpop.xlane.xlu2 %431  ;;  %v438_v6 = vpop.xlane.xlu0 %437 }
 0x108   : > { %v446_v7 = vmul.f32 %v432_v5, %v940_v22  ;;  %v448_v8 = vmul.f32 %v438_v6, %v940_v22  ;;  %v426_v9 = vpop.xlane.xlu1 %425 }
 0x109   : > { %v444_v10 = vmul.f32 %v426_v9, %v940_v22 }
 0x10a   : > { %v830_v11 = vpop.eup %829  ;;  %v995_v12 = vadd.f32 1e-05, %v446_v7  ;;  %v997_v13 = vadd.f32 1e-05, %v448_v8 }
 0x10b   : > { %v999_v14 = vpop.eup %831  ;;  %v529_v15 = vmul.f32 %v830_v11, %v457_v3  ;;  %v1001_v16 = vadd.f32 1e-05, %v444_v10  ;;  %vm535_vm2 = vweird.f32 %v830_v11 }
 0x10c   : > { %v509_v17 = vmul.f32 %v999_v14, %v455_v4  ;;  %833 = vrsqrt.f32 %v995_v12  ;;  %vm536_vm4 = vmor %vm534_vm3, %vm535_vm2  ;;  %vm515_vm6 = vweird.f32 %v999_v14  ;;  %vm504_vm7 = vweird.f32 %v995_v12 }
 0x10d   : > { %v530_v18 = vmul.f32 %v830_v11, %v529_v15  ;;  %835 = vrsqrt.f32 %v997_v13  ;;  %vm1054_vm9 = vmor %vm514_vm5, %vm515_vm6  ;;  %vm524_vm11 = vweird.f32 %v997_v13  ;;  %vm484_vm14 = vweird.f32 %v1001_v16 }
 0x10e   : > { %v510_v19 = vmul.f32 %v999_v14, %v509_v17  ;;  %837 = vrsqrt.f32 %v1001_v16 }
 0x10f   : > { %v531_v20 = vmul.f32 0.5, %v530_v18  ;;  %v423_v21 = vpop.xlane.xlu2 %422  ;;  %v429_v23 = vpop.xlane.xlu0 %428 }
 0x110   : > { %v511_v24 = vmul.f32 0.5, %v510_v19  ;;  %v443_v25 = vmul.f32 %v423_v21, %v940_v22  ;;  %v445_v26 = vmul.f32 %v429_v23, %v940_v22 }
 0x111   : > { %v532_v27 = vsub.f32 1.5, %v531_v20 }
 0x112   : > { %v1010_v30 = vpop.eup %833  ;;  %v1012_v31 = vadd.f32 1e-05, %v443_v25  ;;  %v1014_v32 = vadd.f32 1e-05, %v445_v26  ;;  %v512_v35 = vsub.f32 1.5, %v511_v24  ;;  %v358_v26 = vld [vmem:[%s1040_s9 + $0x30] sm:$0xff] }
 0x113   : > { %v836_v33 = vpop.eup %835  ;;  %v533_v34 = vmul.f32 %v830_v11, %v532_v27  ;;  %v499_v36 = vmul.f32 %v1010_v30, %v995_v12  ;;  %vm505_vm10 = vweird.f32 %v1010_v30  ;;  %v578_v27 = vld [vmem:[%s335_s15] sm:$0xff] }
 0x114   : > { %v1018_v37 = vpop.eup %837  ;;  %v519_v38 = vmul.f32 %v836_v33, %v997_v13  ;;  %839 = vrsqrt.f32 %v1012_v31  ;;  %v513_v47 = vmul.f32 %v999_v14, %v512_v35  ;;  %vm525_vm8 = vweird.f32 %v836_v33  ;;  %vm1079_vm13 = vmor %vm504_vm7, %vm505_vm10 }
 0x115   : > { %v500_v39 = vmul.f32 %v1010_v30, %v499_v36  ;;  %v479_v40 = vmul.f32 %v1018_v37, %v1001_v16  ;;  %841 = vrsqrt.f32 %v1014_v32  ;;  %v537_v51 = vsel %vm536_vm4, %v830_v11, %v533_v34  ;;  %vm526_vm12 = vmor %vm524_vm11, %vm525_vm8 }
 0x116   : > { %v520_v45 = vmul.f32 %v836_v33, %v519_v38  ;;  %v545_v54 = vmul.f32 %v537_v51, %v944_v28  ;;  %v517_v63 = vsel %vm1054_vm9, %v999_v14, %v513_v47  ;;  %vm485_vm15 = vweird.f32 %v1018_v37 }
 0x117   : > { %v501_v48 = vmul.f32 0.5, %v500_v39  ;;  %v480_v49 = vmul.f32 %v1018_v37, %v479_v40  ;;  %v420_v50 = vpop.xlane.xlu0 %419  ;;  %v543_v8 = vmul.f32 %v517_v63, %v946_v29  ;;  %vm1104_vm2 = vmor %vm484_vm14, %vm485_vm15  ;;  %vm474_vm3 = vweird.f32 %v1012_v31 }
 0x118   : > { %v521_v52 = vmul.f32 0.5, %v520_v45  ;;  %v442_v53 = vmul.f32 %v420_v50, %v940_v22  ;;  %v556_v62 = vmul.f32 %v1030_v46, %v545_v54  ;;  %vm494_vm4 = vweird.f32 %v1014_v32 }
 0x119   : > { %v502_v57 = vsub.f32 1.5, %v501_v48  ;;  %v481_v28 = vmul.f32 0.5, %v480_v49  ;;  %v554_v21 = vmul.f32 %v1030_v46, %v543_v8  ;;  %v870_v36 = vmov 0   ;;  %v357_v48 = vld [vmem:[%s1040_s9 + $0x28] sm:$0xff] }
 0x11a   : > { %v1049_v58 = vpop.eup %839  ;;  %v522_v60 = vsub.f32 1.5, %v521_v52  ;;  %v1058_v61 = vadd.f32 1e-05, %v442_v53  ;;  %v567_v5 = vadd.f32 %v1046_v55, %v556_v62  ;;  %822 = vset.pattern.permute.xlu1 %v870_v36  ;;  %823 = vset.pattern.permute.xlu2 %v870_v36  ;;  %v577_v8 = vld [vmem:[%s1184_s4 + $0x8] sm:$0xff]  ;;  %vm643_vm11 = vcmask 523264  }
 0x11b   : > { %v503_v0 = vmul.f32 %v1010_v30, %v502_v57  ;;  %v469_v1 = vmul.f32 %v1049_v58, %v1012_v31  ;;  %v842_v3 = vpop.eup %841  ;;  %v482_v11 = vsub.f32 1.5, %v481_v28  ;;  %vm475_vm5 = vweird.f32 %v1049_v58  ;;  %582 = vperm.xlu1 %822, %v578_v27   ;;  %824 = vset.pattern.permute.xlu0 %v870_v36  ;;  %v356_v57 = vld [vmem:[%s1040_s9 + $0x20] sm:$0xff]  ;;  %v355_v28 = vld [vmem:[%s1040_s9 + $0x18] sm:$0xff] }
 0x11c   : > { %v523_v4 = vmul.f32 %v836_v33, %v522_v60  ;;  %843 = vrsqrt.f32 %v1058_v61  ;;  %v489_v7 = vmul.f32 %v842_v3, %v1014_v32  ;;  %v575_v13 = vmul.f32 %v567_v5, %v359_v2  ;;  %vm476_vm7 = vmor %vm474_vm3, %vm475_vm5 }
 0x11d   : > { %v470_v6 = vmul.f32 %v1049_v58, %v469_v1  ;;  %v507_v14 = vsel %vm1079_vm13, %v1010_v30, %v503_v0  ;;  %v483_v20 = vmul.f32 %v1018_v37, %v482_v11  ;;  %vm495_vm1 = vweird.f32 %v842_v3  ;;  %v579_v30 = vld [vmem:[%s335_s15 + $0x8] sm:$0xff]  ;;  %v354_v0 = vld [vmem:[%s1040_s9 + $0x10] sm:$0xff] }
 0x11e   : > { %v527_v10 = vsel %vm526_vm12, %v836_v33, %v523_v4  ;;  %v490_v18 = vmul.f32 %v842_v3, %v489_v7  ;;  %772 = vmatpush.xpose.msk.msra.mxu0 %vm362_vm0, %v575_v13  ;;  %788 = vmatpush.xpose.msk.msra.mxu1 %vm362_vm0, %v575_v13  ;;  %v542_v19 = vmul.f32 %v507_v14, %v960_v42  ;;  %vm496_vm6 = vmor %vm494_vm4, %vm495_vm1  ;;  %vm464_vm8 = vweird.f32 %v1058_v61  ;;  %v353_v4 = vld [vmem:[%s1040_s9 + $0x8] sm:$0xff] }
 0x11f   : > { %v544_v15 = vmul.f32 %v527_v10, %v958_v41  ;;  %v471_v17 = vmul.f32 0.5, %v470_v6  ;;  %v565_v38 = vadd.f32 %v1046_v55, %v554_v21  ;;  %587 = vperm.xlu2 %823, %v579_v30   ;;  %v487_v32 = vsel %vm1104_vm2, %v1018_v37, %v483_v20  ;;  %v352_v6 = vld [vmem:[%s1040_s9] sm:$0xff] }
 0x120   : > { %v491_v29 = vmul.f32 0.5, %v490_v18  ;;  %v553_v39 = vmul.f32 %v1030_v46, %v542_v19  ;;  %v540_v51 = vmul.f32 %v487_v32, %v962_v43 }
 0x121   : > { %v555_v12 = vmul.f32 %v1030_v46, %v544_v15  ;;  %v472_v23 = vsub.f32 1.5, %v471_v17  ;;  %v573_v37 = vmul.f32 %v565_v38, %v357_v48 }
 0x122   : > { %v844_v41 = vpop.eup %843  ;;  %v492_v24 = vsub.f32 1.5, %v491_v29  ;;  %v564_v52 = vadd.f32 %v1046_v55, %v553_v39  ;;  %v551_v60 = vmul.f32 %v1030_v46, %v540_v51 }
 0x123   : > { %v459_v25 = vmul.f32 %v844_v41, %v1058_v61  ;;  %v566_v42 = vadd.f32 %v1046_v55, %v555_v12  ;;  %v473_v40 = vmul.f32 %v1049_v58, %v472_v23  ;;  %vm465_vm9 = vweird.f32 %v844_v41 }
 0x124   : > { %v493_v34 = vmul.f32 %v842_v3, %v492_v24  ;;  %vm466_vm10 = vmor %vm464_vm8, %vm465_vm9  ;;  %v572_v31 = vmul.f32 %v564_v52, %v356_v57  ;;  %v562_v63 = vadd.f32 %v1046_v55, %v551_v60 }
 0x125   : > { %v460_v35 = vmul.f32 %v844_v41, %v459_v25  ;;  %v574_v16 = vmul.f32 %v566_v42, %v358_v26 }
 0x126   : > { %v497_v45 = vsel %vm496_vm6, %v842_v3, %v493_v34  ;;  %v570_v1 = vmul.f32 %v562_v63, %v354_v0 }
 0x127   : > { %v461_v47 = vmul.f32 0.5, %v460_v35  ;;  %v541_v49 = vmul.f32 %v497_v45, %v964_v44  ;;  %773 = vmatpush.xpose.msk.msra.mxu0 %vm362_vm0, %v574_v16  ;;  %789 = vmatpush.xpose.msk.msra.mxu1 %vm362_vm0, %v574_v16  ;;  %v477_v44 = vsel %vm476_vm7, %v1049_v58, %v473_v40 }
 0x128   : > { %v539_v43 = vmul.f32 %v477_v44, %v979_v56 }
 0x129   : > { %v462_v50 = vsub.f32 1.5, %v461_v47  ;;  %v552_v53 = vmul.f32 %v1030_v46, %v541_v49 }
 0x12a   : > { %v550_v56 = vmul.f32 %v1030_v46, %v539_v43 }
 0x12b   : > { %v463_v54 = vmul.f32 %v844_v41, %v462_v50  ;;  %774 = vmatpush.xpose.msk.msra.mxu0 %vm362_vm0, %v573_v37  ;;  %790 = vmatpush.xpose.msk.msra.mxu1 %vm362_vm0, %v573_v37  ;;  %v563_v22 = vadd.f32 %v1046_v55, %v552_v53 }
 0x12c   : > { %v561_v2 = vadd.f32 %v1046_v55, %v550_v56 }
 0x12d   : > { %v467_v58 = vsel %vm466_vm10, %v844_v41, %v463_v54  ;;  %v571_v62 = vmul.f32 %v563_v22, %v355_v28 }
 0x12e   : > { %v538_v61 = vmul.f32 %v467_v58, %v984_v59  ;;  %v569_v59 = vmul.f32 %v561_v2, %v353_v4 }
 0x12f   : > { %775 = vmatpush.xpose.msk.msra.mxu0 %vm362_vm0, %v572_v31  ;;  %791 = vmatpush.xpose.msk.msra.mxu1 %vm362_vm0, %v572_v31 }
 0x130   : > { %v549_v3 = vmul.f32 %v1030_v46, %v538_v61  ;;  %v576_v46 = vld [vmem:[%s1184_s4] sm:$0xff] }
 0x132   : > { %v560_v5 = vadd.f32 %v1046_v55, %v549_v3 }
 0x133   : > { %776 = vmatpush.xpose.msk.msra.mxu0 %vm362_vm0, %v571_v62  ;;  %792 = vmatpush.xpose.msk.msra.mxu1 %vm362_vm0, %v571_v62 }
 0x134   : > { %v568_v7 = vmul.f32 %v560_v5, %v352_v6 }
 0x137   : > { %777 = vmatpush.xpose.msk.msra.mxu0 %vm362_vm0, %v570_v1  ;;  %793 = vmatpush.xpose.msk.msra.mxu1 %vm362_vm0, %v570_v1 }
 0x13b   : > { %778 = vmatpush.xpose.msk.msra.mxu0 %vm362_vm0, %v569_v59  ;;  %794 = vmatpush.xpose.msk.msra.mxu1 %vm362_vm0, %v569_v59 }
 0x13f   : > { %779 = vmatpush.xpose.msk.msra.mxu0 %vm362_vm0, %v568_v7  ;;  %795 = vmatpush.xpose.msk.msra.mxu1 %vm362_vm0, %v568_v7 }
 0x142   : > { %780 = vmatmul.msk.f32.vlgmr.msra.gmra.mxu0 %vm362_vm0, %v576_v46  ;;  %781 = vmatmul.msk.f32.vlgmr.msra.gmra.mxu1 %vm362_vm0, %v577_v8 }
 0x179   : > { %v588_v55 = vpop.permute.xlu2 %587 }
 0x18d   : > { %v583_v9 = vpop.permute.xlu1 %582 }
 0x1bf   : > { %v637_v10 = vpop.f32.mrf.mxu0  ;;  %v640_v11 = vpop.f32.mrf.mxu1 }
 0x1c0   : > { %v641_v13 = vadd.f32 %v640_v11, %v588_v55  ;;  %v638_v14 = vadd.f32 %v637_v10, %v583_v9 }
 0x1c2   : > { %645 = vst.msk [vmem:[%s343_s26 + $0x8] sm:$0xff] %vm643_vm11, %v641_v13 }
 0x1c3   : > { %644 = vst.msk [vmem:[%s343_s26] sm:$0xff] %vm643_vm11, %v638_v14 }
 0x1c4 PF: > { %s16_s23 = sadd.s32 1, %s867_s23   ;;  %s1193_s21 = smov %s863_s22 }
 0x1c5   : > { %p13_p5 = scmp.ge.s32.totalorder %s16_s23, 4   ;;  %s1194_s22 = smov %s1196_s24 }
 0x1c7   :  { %15 = sbr.rel (!%p13_p5) target bundleno = 2 (0x2), region = 80 }

// kernel: _lambda_.9
= control target key start
LH: loop header
LB: loop body
LE: loop exit
PB: predicated region body
PF: predicated region fallthrough
CT: control target
= control target key end

     0   :  { %s6936_s13 = smov 0   ;;  %s6938_s14 = smov 0   ;;  %s9921_s0 = inlined_call_operand.vmem [shape: f32[2,64,128], index: 0, kind: input, shape index: {}]   ;;  %s9922_s1 = inlined_call_operand.vmem [shape: f32[2,64,128], index: 1, kind: input, shape index: {}]   ;;  %s9923_s2 = inlined_call_operand.vmem [shape: f32[2,64,128], index: 2, kind: input, shape index: {}]   ;;  %s9924_s3 = inlined_call_operand.vmem [shape: f32[1024,128], index: 3, kind: input, shape index: {}]   ;;  %s9925_s4 = inlined_call_operand.vmem [shape: f32[1024,64], index: 4, kind: input, shape index: {}]   ;;  %s9926_s5 = inlined_call_operand.vmem [shape: f32[1024,128], index: 5, kind: input, shape index: {}]   ;;  %s9927_s6 = inlined_call_operand.vmem [shape: f32[128,128], index: 6, kind: input, shape index: {}]   ;;  %s9928_s7 = inlined_call_operand.vmem [shape: f32[128,128], index: 7, kind: input, shape index: {}]   ;;  %s9929_s8 = inlined_call_operand.vmem [shape: f32[1,128], index: 8, kind: input, shape index: {}]   ;;  %s9930_s9 = inlined_call_operand.vmem [shape: f32[1,128], index: 9, kind: input, shape index: {}]   ;;  %s9931_s10 = inlined_call_operand.vmem [shape: f32[2,64,128], index: 10, kind: output, shape index: {}]  }
   0x1   :  { %s6940_s15 = smov 0  }
   0x2 LB: > { %s32_s16 = sadd.s32 1, %s6863_s14  ;;  %p5799_p0 = scmp.ge.s32.totalorder %s6867_s15, 1  ;;  %s6867_s15 = sphi %s6940_s15, %s20_s15   ;;  %s6863_s14 = sphi %s6938_s14, %s9949_s14   ;;  %s6859_s13 = sphi %s6936_s13, %s9948_s13  }
   0x3   : > { %p34_p1 = scmp.ge.s32.totalorder %s32_s16, 2  ;;  %p367_p2 = scmp.lt.s32.totalorder %s6867_s15, 3 }
   0x5   : > { %s9951_s16 = smov (%p34_p1, %s32_s16), 0  ;;  %p368_p3 = pnand %p5799_p0, %p367_p2 }
   0x6   : > { %p432_p4 = scmp.lt.s32.totalorder (!%p368_p3), %s6859_s13, 1  ;;  %s9771_s23 = smov (!%p368_p3), 0  }
   0x7   : > { %371 = sbr.rel (%p368_p3) target bundleno = 1709 (0x6ad), region = 60 }
   0xc   : > { %s9953_s13 = smov (!%p432_p4, %s6859_s13), 1  ;;  %v6416_v0 = vld [vmem:[%s9930_s9] ss:$0 sm:$0xff] }
   0xd   : > { %s6957_s19 = sshll.u32 %s9953_s13, 6  ;;  %v655_v62 = vld [vmem:[%s9925_s4 + $0x120] sm:$0xff] }
   0xe   : > { %s449_s22 = scalar_lea.vmem %s9922_s1, %s6957_s19  ;;  %s469_s25 = scalar_lea.vmem %s9931_s10, %s6957_s19 }
   0xf   : > { %v478_v1 = vld [vmem:[%s449_s22 + $0x38] sm:$0xff]  ;;  %v477_v2 = vld [vmem:[%s449_s22 + $0x30] sm:$0xff]  ;;  %v476_v3 = vld [vmem:[%s449_s22 + $0x28] sm:$0xff]  ;;  %s7119_s28 = scalar_lea.vmem %s9923_s2, %s6957_s19  ;;  %s7261_s29 = scalar_lea.vmem %s9921_s0, %s6957_s19 }
  0x10   : > { %v6967_v4 = vadd.f32 %v6416_v0, %v478_v1  ;;  %v6969_v5 = vadd.f32 %v6416_v0, %v477_v2  ;;  %v6971_v6 = vadd.f32 %v6416_v0, %v476_v3  ;;  %v475_v7 = vld [vmem:[%s449_s22 + $0x20] sm:$0xff]  ;;  %v474_v8 = vld [vmem:[%s449_s22 + $0x18] sm:$0xff]  ;;  %v473_v9 = vld [vmem:[%s449_s22 + $0x10] sm:$0xff] }
  0x11   : > { %v6973_v10 = vadd.f32 %v6416_v0, %v475_v7  ;;  %v6975_v11 = vadd.f32 %v6416_v0, %v474_v8  ;;  %v6977_v12 = vadd.f32 %v6416_v0, %v473_v9  ;;  %v472_v17 = vld [vmem:[%s449_s22 + $0x8] sm:$0xff]  ;;  %v471_v18 = vld [vmem:[%s449_s22] sm:$0xff] }
  0x12   : > { %v506_v13 = vmin.f32 %v6967_v4, 20.0  ;;  %v505_v14 = vmin.f32 %v6969_v5, 20.0  ;;  %v504_v15 = vmin.f32 %v6971_v6, 20.0  ;;  %v6985_v26 = vadd.f32 %v6416_v0, %v472_v17 }
  0x13   : > { %v503_v16 = vmin.f32 %v6973_v10, 20.0  ;;  %v502_v21 = vmin.f32 %v6975_v11, 20.0  ;;  %v501_v24 = vmin.f32 %v6977_v12, 20.0  ;;  %v6987_v27 = vadd.f32 %v6416_v0, %v471_v18  ;;  %v685_v18 = vld [vmem:[%s9925_s4 + $0x210] sm:$0xff] }
  0x14   : > { %v521_v19 = vmul.f32 1.442695, %v506_v13  ;;  %v519_v20 = vmul.f32 1.442695, %v505_v14  ;;  %v517_v22 = vmul.f32 1.442695, %v504_v15 }
  0x15   : > { %v515_v23 = vmul.f32 1.442695, %v503_v16  ;;  %v513_v25 = vmul.f32 1.442695, %v502_v21  ;;  %v511_v28 = vmul.f32 1.442695, %v501_v24 }
  0x16   : > { %6417 = vpow2.f32 %v521_v19  ;;  %v500_v29 = vmin.f32 %v6985_v26, 20.0  ;;  %v499_v30 = vmin.f32 %v6987_v27, 20.0  ;;  %vm498_vm0 = vcmp.le.f32.partialorder %v6967_v4, 20.0  ;;  %v664_v15 = vld [vmem:[%s9925_s4 + $0x168] sm:$0xff] }
  0x17   : > { %6419 = vpow2.f32 %v519_v20  ;;  %vm497_vm1 = vcmp.le.f32.partialorder %v6969_v5, 20.0  ;;  %vm496_vm2 = vcmp.le.f32.partialorder %v6971_v6, 20.0  ;;  %vm495_vm5 = vcmp.le.f32.partialorder %v6973_v10, 20.0 }
  0x18   : > { %6421 = vpow2.f32 %v517_v22  ;;  %v509_v31 = vmul.f32 1.442695, %v500_v29  ;;  %v507_v32 = vmul.f32 1.442695, %v499_v30  ;;  %vm494_vm7 = vcmp.le.f32.partialorder %v6975_v11, 20.0 }
  0x19   : > { %6423 = vpow2.f32 %v515_v23  ;;  %vm493_vm11 = vcmp.le.f32.partialorder %v6977_v12, 20.0  ;;  %vm492_vm13 = vcmp.le.f32.partialorder %v6985_v26, 20.0  ;;  %vm491_vm15 = vcmp.le.f32.partialorder %v6987_v27, 20.0 }
  0x1a   : > { %6425 = vpow2.f32 %v513_v25 }
  0x1b   : > { %6427 = vpow2.f32 %v511_v28 }
  0x1c   : > { %v6418_v33 = vpop.eup %6417  ;;  %6429 = vpow2.f32 %v509_v31 }
  0x1d   : > { %v6420_v34 = vpop.eup %6419  ;;  %v586_v35 = vadd.f32 1.0, %v6418_v33  ;;  %v589_v36 = vmul.f32 -0.5, %v6418_v33  ;;  %v592_v37 = vand.u32 2147483647, %v6418_v33  ;;  %6431 = vpow2.f32 %v507_v32 }
  0x1e   : > { %v6422_v38 = vpop.eup %6421  ;;  %v577_v39 = vadd.f32 1.0, %v6420_v34  ;;  %v580_v40 = vmul.f32 -0.5, %v6420_v34  ;;  %v583_v41 = vand.u32 2147483647, %v6420_v34 }
  0x1f   : > { %v6424_v42 = vpop.eup %6423  ;;  %6433 = vlog2.f32 %v586_v35  ;;  %v590_v43 = vadd.f32 1.0, %v589_v36  ;;  %v568_v44 = vadd.f32 1.0, %v6422_v38  ;;  %v571_v47 = vmul.f32 -0.5, %v6422_v38 }
  0x20   : > { %v6426_v45 = vpop.eup %6425  ;;  %6435 = vlog2.f32 %v577_v39  ;;  %v581_v46 = vadd.f32 1.0, %v580_v40  ;;  %vm6994_vm3 = vcmp.lt.f32.partialorder %v592_v37, 0.0004427343  ;;  %v574_v49 = vand.u32 2147483647, %v6422_v38 }
  0x21   : > { %6437 = vlog2.f32 %v568_v44  ;;  %v559_v50 = vadd.f32 1.0, %v6424_v42  ;;  %v6998_v51 = vpop.eup %6427  ;;  %vm7000_vm4 = vcmp.lt.f32.partialorder %v583_v41, 0.0004427343  ;;  %v572_v53 = vadd.f32 1.0, %v571_v47 }
  0x22   : > { %v562_v54 = vmul.f32 -0.5, %v6424_v42  ;;  %v565_v55 = vand.u32 2147483647, %v6424_v42  ;;  %v7005_v56 = vpop.eup %6429  ;;  %v591_v57 = vmul.f32 %v6418_v33, %v590_v43  ;;  %v550_v58 = vadd.f32 1.0, %v6426_v45 }
  0x23   : > { %6439 = vlog2.f32 %v559_v50  ;;  %v553_v59 = vmul.f32 -0.5, %v6426_v45  ;;  %v7007_v60 = vpop.eup %6431  ;;  %v582_v61 = vmul.f32 %v6420_v34, %v581_v46  ;;  %vm7009_vm6 = vcmp.lt.f32.partialorder %v574_v49, 0.0004427343  ;;  %v3108_v50 = vld [vmem:[%s9928_s7 + $0x70] sm:$0xff] }
  0x24   : > { %v563_v63 = vadd.f32 1.0, %v562_v54  ;;  %v556_v0 = vand.u32 2147483647, %v6426_v45  ;;  %6441 = vlog2.f32 %v550_v58  ;;  %v541_v3 = vadd.f32 1.0, %v6998_v51 }
  0x25   : > { %v6434_v1 = vpop.eup %6433  ;;  %v554_v2 = vadd.f32 1.0, %v553_v59  ;;  %v544_v7 = vmul.f32 -0.5, %v6998_v51  ;;  %v573_v13 = vmul.f32 %v6422_v38, %v572_v53  ;;  %vm7016_vm8 = vcmp.lt.f32.partialorder %v565_v55, 0.0004427343  ;;  %v2180_v59 = vld [vmem:[%s7119_s28 + $0x38] sm:$0xff] }
  0x26   : > { %v6436_v8 = vpop.eup %6435  ;;  %v588_v9 = vmul.f32 0.6931472, %v6434_v1  ;;  %v564_v14 = vmul.f32 %v6424_v42, %v563_v63  ;;  %vm7020_vm9 = vcmp.lt.f32.partialorder %v556_v0, 0.0004427343  ;;  %6443 = vlog2.f32 %v541_v3  ;;  %v656_v63 = vld [vmem:[%s9925_s4 + $0x128] sm:$0xff]  ;;  %v657_v1 = vld [vmem:[%s9925_s4 + $0x130] sm:$0xff] }
  0x27   : > { %v6438_v16 = vpop.eup %6437  ;;  %v579_v17 = vmul.f32 0.6931472, %v6436_v8  ;;  %v545_v19 = vadd.f32 1.0, %v544_v7  ;;  %v547_v22 = vand.u32 2147483647, %v6998_v51  ;;  %v532_v23 = vadd.f32 1.0, %v7005_v56 }
  0x28   : > { %v594_v20 = vsel %vm6994_vm3, %v591_v57, %v588_v9  ;;  %v570_v21 = vmul.f32 0.6931472, %v6438_v16  ;;  %v555_v29 = vmul.f32 %v6426_v45, %v554_v2  ;;  %v535_v30 = vmul.f32 -0.5, %v7005_v56  ;;  %v652_v57 = vld [vmem:[%s9925_s4 + $0x108] sm:$0xff]  ;;  %v658_v2 = vld [vmem:[%s9925_s4 + $0x138] sm:$0xff]  ;;  %v659_v3 = vld [vmem:[%s9925_s4 + $0x140] sm:$0xff] }
  0x29   : > { %v6440_v24 = vpop.eup %6439  ;;  %v7031_v25 = vsel %vm498_vm0, %v594_v20, %v6967_v4  ;;  %v585_v28 = vsel %vm7000_vm4, %v582_v61, %v579_v17  ;;  %6445 = vlog2.f32 %v532_v23  ;;  %v546_v35 = vmul.f32 %v6998_v51, %v545_v19  ;;  %v654_v61 = vld [vmem:[%s9925_s4 + $0x118] sm:$0xff]  ;;  %v2178_v0 = vld [vmem:[%s7119_s28 + $0x28] sm:$0xff]  ;;  %v2177_v8 = vld [vmem:[%s7119_s28 + $0x20] sm:$0xff] }
  0x2a   : > { %6335 = vmatpush.msra.mxu1 %v7031_v25  ;;  %v7040_v31 = vsel %vm497_vm1, %v585_v28, %v6969_v5  ;;  %v576_v32 = vsel %vm7009_vm6, %v573_v13, %v570_v21  ;;  %v561_v33 = vmul.f32 0.6931472, %v6440_v24  ;;  %6336 = vmatpush.msra.mxu2 %v7031_v25  ;;  %v6442_v4 = vpop.eup %6441  ;;  %v536_v36 = vadd.f32 1.0, %v535_v30  ;;  %v660_v7 = vld [vmem:[%s9925_s4 + $0x148] sm:$0xff]  ;;  %v661_v9 = vld [vmem:[%s9925_s4 + $0x150] sm:$0xff]  ;;  %v662_v13 = vld [vmem:[%s9925_s4 + $0x158] sm:$0xff] }
  0x2b   : > { %v7048_v34 = vsel %vm496_vm2, %v576_v32, %v6971_v6  ;;  %v523_v37 = vadd.f32 1.0, %v7007_v60  ;;  %1140 = vmatpush.msra.mxu0 %v7031_v25  ;;  %6337 = vmatpush.msra.mxu3 %v7031_v25  ;;  %v552_v38 = vmul.f32 0.6931472, %v6442_v4  ;;  %v538_v39 = vand.u32 2147483647, %v7005_v56  ;;  %v665_v16 = vld [vmem:[%s9925_s4 + $0x170] sm:$0xff] }
  0x2c   : > { %6338 = vmatpush.msra.mxu1 %v7040_v31  ;;  %v567_v5 = vsel %vm7016_vm8, %v564_v14, %v561_v33  ;;  %v526_v6 = vmul.f32 -0.5, %v7007_v60  ;;  %6339 = vmatpush.msra.mxu2 %v7040_v31  ;;  %v6444_v40 = vpop.eup %6443  ;;  %vm7065_vm10 = vcmp.lt.f32.partialorder %v547_v22, 0.0004427343  ;;  %v537_v46 = vmul.f32 %v7005_v56, %v536_v36  ;;  %v663_v14 = vld [vmem:[%s9925_s4 + $0x160] sm:$0xff]  ;;  %v2176_v19 = vld [vmem:[%s7119_s28 + $0x18] sm:$0xff]  ;;  %v7215_v21 = vld [vmem:[%s9925_s4 + $0x8] sm:$0xff] }
  0x2d   : > { %v7063_v41 = vsel %vm495_vm5, %v567_v5, %v6973_v10  ;;  %6447 = vlog2.f32 %v523_v37  ;;  %1141 = vmatpush.msra.mxu0 %v7040_v31  ;;  %6340 = vmatpush.msra.mxu3 %v7040_v31  ;;  %v558_v43 = vsel %vm7020_vm9, %v555_v29, %v552_v38  ;;  %v543_v44 = vmul.f32 0.6931472, %v6444_v40  ;;  %v7199_v17 = vld [vmem:[%s9925_s4] sm:$0xff]  ;;  %v666_v20 = vld [vmem:[%s9925_s4 + $0x178] sm:$0xff]  ;;  %v7230_v24 = vld [vmem:[%s9925_s4 + $0x10] sm:$0xff] }
  0x2e   : > { %6341 = vmatpush.msra.mxu1 %v7048_v34  ;;  %v527_v45 = vadd.f32 1.0, %v526_v6  ;;  %6342 = vmatpush.msra.mxu2 %v7048_v34  ;;  %v7079_v10 = vsel %vm494_vm7, %v558_v43, %v6975_v11  ;;  %v529_v47 = vand.u32 2147483647, %v7007_v60  ;;  %vm7088_vm12 = vcmp.lt.f32.partialorder %v538_v39, 0.0004427343  ;;  %v686_v22 = vld [vmem:[%s9925_s4 + $0x218] sm:$0xff] }
  0x2f   : > { %1142 = vmatpush.msra.mxu0 %v7048_v34  ;;  %6343 = vmatpush.msra.mxu3 %v7048_v34  ;;  %v6446_v48 = vpop.eup %6445  ;;  %v549_v49 = vsel %vm7065_vm10, %v546_v35, %v543_v44  ;;  %vm747_vm0 = vcmask 523264   ;;  %v667_v23 = vld [vmem:[%s9925_s4 + $0x180] sm:$0xff]  ;;  %v717_v29 = vld [vmem:[%s9925_s4 + $0x310] sm:$0xff]  ;;  %v3109_v30 = vld [vmem:[%s9928_s7 + $0x78] sm:$0xff] }
  0x30   : > { %6344 = vmatpush.msra.mxu1 %v7063_v41  ;;  %6345 = vmatpush.msra.mxu2 %v7063_v41  ;;  %v7094_v11 = vsel %vm493_vm11, %v549_v49, %v6977_v12  ;;  %v534_v51 = vmul.f32 0.6931472, %v6446_v48  ;;  %v528_v52 = vmul.f32 %v7007_v60, %v527_v45  ;;  %vm7104_vm14 = vcmp.lt.f32.partialorder %v529_v47, 0.0004427343  ;;  %v2179_v60 = vld [vmem:[%s7119_s28 + $0x30] sm:$0xff]  ;;  %v687_v28 = vld [vmem:[%s9925_s4 + $0x220] sm:$0xff] }
  0x31   : > { %1143 = vmatpush.msra.mxu0 %v7063_v41  ;;  %6346 = vmatpush.msra.mxu3 %v7063_v41  ;;  %v1566_v32 = vld [vmem:[%s9924_s3 + $0x108] sm:$0xff]  ;;  %v7255_v35 = vld [vmem:[%s9925_s4 + $0x18] sm:$0xff]  ;;  %v1567_v42 = vld [vmem:[%s9924_s3 + $0x110] sm:$0xff] }
  0x32   : > { %6347 = vmatpush.msra.mxu1 %v7079_v10  ;;  %6348 = vmatpush.msra.mxu2 %v7079_v10  ;;  %v540_v54 = vsel %vm7088_vm12, %v537_v46, %v534_v51  ;;  %v668_v4 = vld [vmem:[%s9925_s4 + $0x188] sm:$0xff]  ;;  %v718_v5 = vld [vmem:[%s9925_s4 + $0x318] sm:$0xff]  ;;  %v669_v44 = vld [vmem:[%s9925_s4 + $0x190] sm:$0xff] }
  0x33   : > { %v6448_v53 = vpop.eup %6447  ;;  %1144 = vmatpush.msra.mxu0 %v7079_v10  ;;  %6349 = vmatpush.msra.mxu3 %v7079_v10  ;;  %v7112_v55 = vsel %vm492_vm13, %v540_v54, %v6985_v26  ;;  %v688_v37 = vld [vmem:[%s9925_s4 + $0x228] sm:$0xff]  ;;  %v610_v39 = vld [vmem:[%s7261_s29 + $0x38] sm:$0xff]  ;;  %v7291_v45 = vld [vmem:[%s9925_s4 + $0x20] sm:$0xff] }
  0x34   : > { %6350 = vmatpush.msra.mxu1 %v7094_v11  ;;  %v525_v56 = vmul.f32 0.6931472, %v6448_v53  ;;  %6351 = vmatpush.msra.mxu2 %v7094_v11  ;;  %v3782_v6 = vld [vmem:[%s9927_s6 + $0x78] sm:$0xff]  ;;  %v7279_v40 = vmul.f32 %v610_v39, %v7031_v25  ;;  %v689_v25 = vld [vmem:[%s9925_s4 + $0x230] sm:$0xff]  ;;  %v719_v47 = vld [vmem:[%s9925_s4 + $0x320] sm:$0xff] }
  0x35   : > { %1145 = vmatpush.msra.mxu0 %v7094_v11  ;;  %6352 = vmatpush.msra.mxu3 %v7094_v11  ;;  %v1568_v51 = vld [vmem:[%s9924_s3 + $0x118] sm:$0xff]  ;;  %v624_v54 = vld [vmem:[%s9925_s4 + $0x28] sm:$0xff] }
  0x36   : > { %6353 = vmatpush.msra.mxu1 %v7112_v55  ;;  %v531_v26 = vsel %vm7104_vm14, %v528_v52, %v525_v56  ;;  %6354 = vmatpush.msra.mxu2 %v7112_v55  ;;  %v670_v53 = vld [vmem:[%s9925_s4 + $0x198] sm:$0xff] }
  0x37   : > { %v7132_v58 = vsel %vm491_vm15, %v531_v26, %v6987_v27  ;;  %1146 = vmatpush.msra.mxu0 %v7112_v55  ;;  %6355 = vmatpush.msra.mxu3 %v7112_v55  ;;  %v653_v27 = vld [vmem:[%s9925_s4 + $0x110] sm:$0xff]  ;;  %v690_v56 = vld [vmem:[%s9925_s4 + $0x238] sm:$0xff]  ;;  %v720_v26 = vld [vmem:[%s9925_s4 + $0x328] sm:$0xff] }
  0x38   : > { %6356 = vmatpush.msra.mxu1 %v7132_v58  ;;  %6357 = vmatpush.msra.mxu2 %v7132_v58 }
  0x39   : > { %5841 = vmatmul.msk.f32.vlgmr.msra.gmra.mxu1 %vm747_vm0, %v652_v57  ;;  %1147 = vmatpush.msra.mxu0 %v7132_v58 }
  0x3a   : > { %2189 = vmatpush.msrb.mxu1 %v2180_v59  ;;  %6358 = vmatpush.msra.mxu3 %v7132_v58 }
  0x3b   : > { %5808 = vmatmul.msk.f32.vlgmr.msra.gmra.mxu0 %vm747_vm0, %v7199_v17  ;;  %5874 = vmatmul.msk.f32.vlgmr.msra.gmra.mxu2 %vm747_vm0, %v685_v18 }
  0x3c   : > { %2190 = vmatpush.msrb.mxu1 %v2179_v60  ;;  %5906 = vmatmul.msk.f32.vlgmr.msra.gmra.mxu3 %vm747_vm0, %v717_v29  ;;  %v2175_v60 = vld [vmem:[%s7119_s28 + $0x10] sm:$0xff] }
  0x3d   : > { %3110 = vmatpush.msrb.mxu2 %v3109_v30  ;;  %3783 = vmatpush.msrb.mxu3 %v3782_v6  ;;  %v609_v29 = vld [vmem:[%s7261_s29 + $0x30] sm:$0xff]  ;;  %v3106_v6 = vld [vmem:[%s9928_s7 + $0x60] sm:$0xff] }
  0x3e   : > { %2191 = vmatpush.msrb.mxu1 %v2178_v0  ;;  %4448 = vmatpush.msrb.mxu0 %v7279_v40  ;;  %v625_v0 = vld [vmem:[%s9925_s4 + $0x30] sm:$0xff]  ;;  %v7376_v30 = vmul.f32 %v609_v29, %v7040_v31 }
  0x3f   : > { %3111 = vmatpush.msrb.mxu2 %v3108_v50  ;;  %v693_v31 = vld [vmem:[%s9925_s4 + $0x250] sm:$0xff] }
  0x40   : > { %2192 = vmatpush.msrb.mxu1 %v2177_v8  ;;  %4449 = vmatpush.msrb.mxu0 %v7376_v30 }
  0x41   : > { %5842 = vmatmul.msk.f32.gmra.mxu1 %vm747_vm0, %v653_v27  ;;  %v3781_v27 = vld [vmem:[%s9927_s6 + $0x70] sm:$0xff] }
  0x42   : > { %2193 = vmatpush.msrb.mxu1 %v2176_v19  ;;  %3784 = vmatpush.msrb.mxu3 %v3781_v27  ;;  %v692_v19 = vld [vmem:[%s9925_s4 + $0x248] sm:$0xff] }
  0x43   : > { %5809 = vmatmul.msk.f32.gmra.mxu0 %vm747_vm0, %v7215_v21  ;;  %5875 = vmatmul.msk.f32.gmra.mxu2 %vm747_vm0, %v686_v22 }
  0x44   : > { %5907 = vmatmul.msk.f32.gmra.mxu3 %vm747_vm0, %v718_v5  ;;  %2194 = vmatpush.msrb.mxu1 %v2175_v60  ;;  %v723_v5 = vld [vmem:[%s9925_s4 + $0x340] sm:$0xff] }
  0x49   : > { %5843 = vmatmul.msk.f32.gmra.mxu1 %vm747_vm0, %v654_v61  ;;  %v1569_v61 = vld [vmem:[%s9924_s3 + $0x120] sm:$0xff] }
  0x4b   : > { %5810 = vmatmul.msk.f32.gmra.mxu0 %vm747_vm0, %v7230_v24  ;;  %5876 = vmatmul.msk.f32.gmra.mxu2 %vm747_vm0, %v687_v28  ;;  %v3780_v28 = vld [vmem:[%s9927_s6 + $0x68] sm:$0xff] }
  0x4c   : > { %5908 = vmatmul.msk.f32.gmra.mxu3 %vm747_vm0, %v719_v47  ;;  %v694_v47 = vld [vmem:[%s9925_s4 + $0x258] sm:$0xff] }
  0x4d   : > { %3785 = vmatpush.msrb.mxu3 %v3780_v28 }
  0x51   : > { %5844 = vmatmul.msk.f32.gmra.mxu1 %vm747_vm0, %v655_v62 }
  0x53   : > { %5811 = vmatmul.msk.f32.gmra.mxu0 %vm747_vm0, %v7255_v35  ;;  %5877 = vmatmul.msk.f32.gmra.mxu2 %vm747_vm0, %v688_v37 }
  0x54   : > { %5909 = vmatmul.msk.f32.gmra.mxu3 %vm747_vm0, %v720_v26 }
  0x59   : > { %5845 = vmatmul.msk.f32.gmra.mxu1 %vm747_vm0, %v656_v63  ;;  %v671_v63 = vld [vmem:[%s9925_s4 + $0x1a0] sm:$0xff] }
  0x5b   : > { %5812 = vmatmul.msk.f32.gmra.mxu0 %vm747_vm0, %v7291_v45  ;;  %5878 = vmatmul.msk.f32.gmra.mxu2 %vm747_vm0, %v689_v25 }
  0x61   : > { %5846 = vmatmul.msk.f32.gmra.mxu1 %vm747_vm0, %v657_v1 }
  0x63   : > { %5813 = vmatmul.msk.f32.gmra.mxu0 %vm747_vm0, %v624_v54  ;;  %5879 = vmatmul.msk.f32.gmra.mxu2 %vm747_vm0, %v690_v56  ;;  %v629_v56 = vld [vmem:[%s9925_s4 + $0x50] sm:$0xff] }
  0x69   : > { %5847 = vmatmul.msk.f32.gmra.mxu1 %vm747_vm0, %v658_v2  ;;  %v691_v2 = vld [vmem:[%s9925_s4 + $0x240] sm:$0xff] }
  0x6b   : > { %5814 = vmatmul.msk.f32.gmra.mxu0 %vm747_vm0, %v625_v0  ;;  %5880 = vmatmul.msk.f32.gmra.mxu2 %vm747_vm0, %v691_v2  ;;  %v630_v2 = vld [vmem:[%s9925_s4 + $0x58] sm:$0xff] }
  0x71   : > { %5848 = vmatmul.msk.f32.gmra.mxu1 %vm747_vm0, %v659_v3  ;;  %v721_v3 = vld [vmem:[%s9925_s4 + $0x330] sm:$0xff] }
  0x72   : > { %5910 = vmatmul.msk.f32.gmra.mxu3 %vm747_vm0, %v721_v3 }
  0x73   : > { %5881 = vmatmul.msk.f32.gmra.mxu2 %vm747_vm0, %v692_v19  ;;  %v677_v19 = vld [vmem:[%s9925_s4 + $0x1d0] sm:$0xff] }
  0x79   : > { %5849 = vmatmul.msk.f32.gmra.mxu1 %vm747_vm0, %v660_v7 }
  0x7b   : > { %5882 = vmatmul.msk.f32.gmra.mxu2 %vm747_vm0, %v693_v31  ;;  %v632_v31 = vld [vmem:[%s9925_s4 + $0x68] sm:$0xff] }
  0x81   : > { %5850 = vmatmul.msk.f32.gmra.mxu1 %vm747_vm0, %v661_v9  ;;  %v3107_v9 = vld [vmem:[%s9928_s7 + $0x68] sm:$0xff] }
  0x82   : > { %3112 = vmatpush.msrb.mxu2 %v3107_v9 }
  0x83   : > { %5883 = vmatmul.msk.f32.gmra.mxu2 %vm747_vm0, %v694_v47  ;;  %v633_v47 = vld [vmem:[%s9925_s4 + $0x70] sm:$0xff] }
  0x84   : > { %3113 = vmatpush.msrb.mxu2 %v3106_v6 }
  0x89   : > { %5851 = vmatmul.msk.f32.gmra.mxu1 %vm747_vm0, %v662_v13  ;;  %v1570_v13 = vld [vmem:[%s9924_s3 + $0x128] sm:$0xff] }
  0x91   : > { %5852 = vmatmul.msk.f32.gmra.mxu1 %vm747_vm0, %v663_v14 }
  0x99   : > { %5853 = vmatmul.msk.f32.gmra.mxu1 %vm747_vm0, %v664_v15  ;;  %v672_v15 = vld [vmem:[%s9925_s4 + $0x1a8] sm:$0xff] }
  0xa1   : > { %5854 = vmatmul.msk.f32.gmra.mxu1 %vm747_vm0, %v665_v16  ;;  %v626_v16 = vld [vmem:[%s9925_s4 + $0x38] sm:$0xff] }
  0xa2   : > { %5815 = vmatmul.msk.f32.gmra.mxu0 %vm747_vm0, %v626_v16  ;;  %v1575_v16 = vld [vmem:[%s9924_s3 + $0x150] sm:$0xff] }
  0xa9   : > { %5855 = vmatmul.msk.f32.gmra.mxu1 %vm747_vm0, %v666_v20  ;;  %v722_v20 = vld [vmem:[%s9925_s4 + $0x338] sm:$0xff] }
  0xaa   : > { %5911 = vmatmul.msk.f32.gmra.mxu3 %vm747_vm0, %v722_v20  ;;  %v631_v20 = vld [vmem:[%s9925_s4 + $0x60] sm:$0xff] }
  0xb1   : > { %5856 = vmatmul.msk.f32.gmra.mxu1 %vm747_vm0, %v667_v23 }
  0xb2   : > { %5912 = vmatmul.msk.f32.gmra.mxu3 %vm747_vm0, %v723_v5 }
  0xb6   : > { %v1248_v33 = vpop.f32.mrf.mxu1 }
  0xb7   : > { %v1694_v36 = vmul.f32 %v1566_v32, %v1248_v33  ;;  %v1571_v32 = vld [vmem:[%s9924_s3 + $0x130] sm:$0xff] }
  0xb9   : > { %v1855_v38 = vmul.f32 1.442695, %v1694_v36  ;;  %5857 = vmatmul.msk.f32.gmra.mxu1 %vm747_vm0, %v668_v4  ;;  %v673_v4 = vld [vmem:[%s9925_s4 + $0x1b0] sm:$0xff]  ;;  %v627_v36 = vld [vmem:[%s9925_s4 + $0x40] sm:$0xff] }
  0xba   : > { %5816 = vmatmul.msk.f32.gmra.mxu0 %vm747_vm0, %v627_v36 }
  0xbb   : > { %6449 = vpow2.f32 %v1855_v38 }
  0xbe   : > { %v1251_v43 = vpop.f32.mrf.mxu1 }
  0xbf   : > { %v1695_v46 = vmul.f32 %v1567_v42, %v1251_v43  ;;  %v1572_v42 = vld [vmem:[%s9924_s3 + $0x138] sm:$0xff] }
  0xc1   : > { %v6450_v48 = vpop.eup %6449  ;;  %v1857_v49 = vmul.f32 1.442695, %v1695_v46  ;;  %5858 = vmatmul.msk.f32.gmra.mxu1 %vm747_vm0, %v669_v44  ;;  %v674_v44 = vld [vmem:[%s9925_s4 + $0x1b8] sm:$0xff]  ;;  %v628_v46 = vld [vmem:[%s9925_s4 + $0x48] sm:$0xff] }
  0xc2   : > { %2078 = vst [vmem:[#allocation3 + $0x108] sm:$0xff] %v6450_v48  ;;  %5817 = vmatmul.msk.f32.gmra.mxu0 %vm747_vm0, %v628_v46  ;;  %v724_v48 = vld [vmem:[%s9925_s4 + $0x348] sm:$0xff] }
  0xc3   : > { %6451 = vpow2.f32 %v1857_v49  ;;  %5913 = vmatmul.msk.f32.gmra.mxu3 %vm747_vm0, %v724_v48 }
  0xc6   : > { %v1254_v52 = vpop.f32.mrf.mxu1 }
  0xc7   : > { %v1696_v12 = vmul.f32 %v1568_v51, %v1254_v52  ;;  %v3779_v51 = vld [vmem:[%s9927_s6 + $0x60] sm:$0xff]  ;;  %v2174_v52 = vld [vmem:[%s7119_s28 + $0x8] sm:$0xff] }
  0xc8   : > { %3786 = vmatpush.msrb.mxu3 %v3779_v51  ;;  %2195 = vmatpush.msrb.mxu1 %v2174_v52 }
  0xc9   : > { %v6452_v57 = vpop.eup %6451  ;;  %v1859_v59 = vmul.f32 1.442695, %v1696_v12  ;;  %5859 = vmatmul.msk.f32.gmra.mxu1 %vm747_vm0, %v670_v53  ;;  %v1573_v53 = vld [vmem:[%s9924_s3 + $0x140] sm:$0xff] }
  0xca   : > { %2079 = vst [vmem:[#allocation3 + $0x110] sm:$0xff] %v6452_v57  ;;  %v675_v12 = vld [vmem:[%s9925_s4 + $0x1c0] sm:$0xff]  ;;  %5818 = vmatmul.msk.f32.gmra.mxu0 %vm747_vm0, %v629_v56 }
  0xcb   : > { %6453 = vpow2.f32 %v1859_v59  ;;  %v695_v57 = vld [vmem:[%s9925_s4 + $0x260] sm:$0xff]  ;;  %v725_v59 = vld [vmem:[%s9925_s4 + $0x350] sm:$0xff] }
  0xcc   : > { %5884 = vmatmul.msk.f32.gmra.mxu2 %vm747_vm0, %v695_v57  ;;  %5914 = vmatmul.msk.f32.gmra.mxu3 %vm747_vm0, %v725_v59  ;;  %v634_v57 = vld [vmem:[%s9925_s4 + $0x78] sm:$0xff] }
  0xce   : > { %v1257_v62 = vpop.f32.mrf.mxu1 }
  0xcf   : > { %v1697_v1 = vmul.f32 %v1569_v61, %v1257_v62  ;;  %v3105_v61 = vld [vmem:[%s9928_s7 + $0x58] sm:$0xff] }
  0xd0   : > { %v3778_v62 = vld [vmem:[%s9927_s6 + $0x58] sm:$0xff]  ;;  %3114 = vmatpush.msrb.mxu2 %v3105_v61 }
  0xd1   : > { %v6454_v7 = vpop.eup %6453  ;;  %v1861_v8 = vmul.f32 1.442695, %v1697_v1  ;;  %5860 = vmatmul.msk.f32.gmra.mxu1 %vm747_vm0, %v671_v63  ;;  %3787 = vmatpush.msrb.mxu3 %v3778_v62  ;;  %v1574_v63 = vld [vmem:[%s9924_s3 + $0x148] sm:$0xff] }
  0xd2   : > { %2080 = vst [vmem:[#allocation3 + $0x118] sm:$0xff] %v6454_v7  ;;  %v676_v1 = vld [vmem:[%s9925_s4 + $0x1c8] sm:$0xff]  ;;  %5819 = vmatmul.msk.f32.gmra.mxu0 %vm747_vm0, %v630_v2  ;;  %v1149_v2 = vpop.f32.mrf.mxu0 }
  0xd3   : > { %6455 = vpow2.f32 %v1861_v8  ;;  %v696_v7 = vld [vmem:[%s9925_s4 + $0x268] sm:$0xff]  ;;  %v726_v8 = vld [vmem:[%s9925_s4 + $0x358] sm:$0xff] }
  0xd4   : > { %5885 = vmatmul.msk.f32.gmra.mxu2 %vm747_vm0, %v696_v7  ;;  %5915 = vmatmul.msk.f32.gmra.mxu3 %vm747_vm0, %v726_v8  ;;  %v681_v7 = vld [vmem:[%s9925_s4 + $0x1f0] sm:$0xff]  ;;  %v635_v8 = vld [vmem:[%s9925_s4 + $0x80] sm:$0xff] }
  0xd6   : > { %v1260_v14 = vpop.f32.mrf.mxu1 }
  0xd7   : > { %v1698_v18 = vmul.f32 %v1570_v13, %v1260_v14  ;;  %v608_v14 = vld [vmem:[%s7261_s29 + $0x28] sm:$0xff] }
  0xd9   : > { %v6456_v22 = vpop.eup %6455  ;;  %v1863_v23 = vmul.f32 1.442695, %v1698_v18  ;;  %5861 = vmatmul.msk.f32.gmra.mxu1 %vm747_vm0, %v672_v15  ;;  %v7470_v15 = vmul.f32 %v608_v14, %v7048_v34  ;;  %v697_v34 = vld [vmem:[%s9925_s4 + $0x270] sm:$0xff] }
  0xda   : > { %2081 = vst [vmem:[#allocation3 + $0x120] sm:$0xff] %v6456_v22  ;;  %5820 = vmatmul.msk.f32.gmra.mxu0 %vm747_vm0, %v631_v20  ;;  %v1580_v20 = vld [vmem:[%s9924_s3 + $0x178] sm:$0xff] }
  0xdb   : > { %6457 = vpow2.f32 %v1863_v23  ;;  %4450 = vmatpush.msrb.mxu0 %v7470_v15  ;;  %v727_v23 = vld [vmem:[%s9925_s4 + $0x360] sm:$0xff] }
  0xdc   : > { %5886 = vmatmul.msk.f32.gmra.mxu2 %vm747_vm0, %v697_v34  ;;  %5916 = vmatmul.msk.f32.gmra.mxu3 %vm747_vm0, %v727_v23  ;;  %v1152_v34 = vpop.f32.mrf.mxu0 }
  0xde   : > { %v1263_v33 = vpop.f32.mrf.mxu1 }
  0xdf   : > { %v1699_v37 = vmul.f32 %v1571_v32, %v1263_v33  ;;  %v3104_v32 = vld [vmem:[%s9928_s7 + $0x50] sm:$0xff] }
  0xe0   : > { %v3777_v33 = vld [vmem:[%s9927_s6 + $0x50] sm:$0xff]  ;;  %3115 = vmatpush.msrb.mxu2 %v3104_v32 }
  0xe1   : > { %v6458_v38 = vpop.eup %6457  ;;  %v1865_v39 = vmul.f32 1.442695, %v1699_v37  ;;  %5862 = vmatmul.msk.f32.gmra.mxu1 %vm747_vm0, %v673_v4  ;;  %3788 = vmatpush.msrb.mxu3 %v3777_v33  ;;  %v1576_v4 = vld [vmem:[%s9924_s3 + $0x158] sm:$0xff] }
  0xe2   : > { %2082 = vst [vmem:[#allocation3 + $0x128] sm:$0xff] %v6458_v38  ;;  %v678_v37 = vld [vmem:[%s9925_s4 + $0x1d8] sm:$0xff]  ;;  %5821 = vmatmul.msk.f32.gmra.mxu0 %vm747_vm0, %v632_v31  ;;  %v1533_v31 = vld [vmem:[%s9924_s3] sm:$0xff] }
  0xe3   : > { %6459 = vpow2.f32 %v1865_v39  ;;  %v698_v38 = vld [vmem:[%s9925_s4 + $0x278] sm:$0xff]  ;;  %v728_v39 = vld [vmem:[%s9925_s4 + $0x368] sm:$0xff] }
  0xe4   : > { %5887 = vmatmul.msk.f32.gmra.mxu2 %vm747_vm0, %v698_v38  ;;  %5917 = vmatmul.msk.f32.gmra.mxu3 %vm747_vm0, %v728_v39  ;;  %v702_v33 = vld [vmem:[%s9925_s4 + $0x298] sm:$0xff]  ;;  %v1661_v38 = vmul.f32 %v1533_v31, %v1149_v2  ;;  %v1443_v2 = vpop.f32.mrf.mxu3 }
  0xe6   : > { %v1266_v43 = vpop.f32.mrf.mxu1 }
  0xe7   : > { %v1700_v25 = vmul.f32 %v1572_v42, %v1266_v43  ;;  %v2173_v43 = vld [vmem:[%s7119_s28] sm:$0xff] }
  0xe8   : > { %2196 = vmatpush.msrb.mxu1 %v2173_v43  ;;  %v1155_v43 = vpop.f32.mrf.mxu0 }
  0xe9   : > { %v6460_v49 = vpop.eup %6459  ;;  %v1867_v50 = vmul.f32 1.442695, %v1700_v25  ;;  %5863 = vmatmul.msk.f32.gmra.mxu1 %vm747_vm0, %v674_v44  ;;  %v1577_v44 = vld [vmem:[%s9924_s3 + $0x160] sm:$0xff] }
  0xea   : > { %2083 = vst [vmem:[#allocation3 + $0x130] sm:$0xff] %v6460_v49  ;;  %v679_v25 = vld [vmem:[%s9925_s4 + $0x1e0] sm:$0xff]  ;;  %5822 = vmatmul.msk.f32.gmra.mxu0 %vm747_vm0, %v633_v47 }
  0xeb   : > { %6461 = vpow2.f32 %v1867_v50  ;;  %v699_v49 = vld [vmem:[%s9925_s4 + $0x280] sm:$0xff]  ;;  %v729_v50 = vld [vmem:[%s9925_s4 + $0x370] sm:$0xff] }
  0xec   : > { %5888 = vmatmul.msk.f32.gmra.mxu2 %vm747_vm0, %v699_v49  ;;  %5918 = vmatmul.msk.f32.gmra.mxu3 %vm747_vm0, %v729_v50  ;;  %v683_v47 = vld [vmem:[%s9925_s4 + $0x200] sm:$0xff] }
  0xed   : > { %v703_v50 = vld [vmem:[%s9925_s4 + $0x2a0] sm:$0xff] }
  0xee   : > { %v1269_v54 = vpop.f32.mrf.mxu1 }
  0xef   : > { %v1701_v26 = vmul.f32 %v1573_v53, %v1269_v54  ;;  %v3103_v53 = vld [vmem:[%s9928_s7 + $0x48] sm:$0xff] }
  0xf0   : > { %v3776_v54 = vld [vmem:[%s9927_s6 + $0x48] sm:$0xff]  ;;  %3116 = vmatpush.msrb.mxu2 %v3103_v53 }
  0xf1   : > { %v6462_v60 = vpop.eup %6461  ;;  %v1869_v27 = vmul.f32 1.442695, %v1701_v26  ;;  %5864 = vmatmul.msk.f32.gmra.mxu1 %vm747_vm0, %v675_v12  ;;  %3789 = vmatpush.msrb.mxu3 %v3776_v54  ;;  %v1578_v12 = vld [vmem:[%s9924_s3 + $0x168] sm:$0xff]  ;;  %v3774_v54 = vld [vmem:[%s9927_s6 + $0x38] sm:$0xff] }
  0xf2   : > { %2084 = vst [vmem:[#allocation3 + $0x138] sm:$0xff] %v6462_v60  ;;  %v680_v26 = vld [vmem:[%s9925_s4 + $0x1e8] sm:$0xff]  ;;  %5823 = vmatmul.msk.f32.gmra.mxu0 %vm747_vm0, %v634_v57  ;;  %v1600_v57 = vld [vmem:[%s9924_s3 + $0x218] sm:$0xff] }
  0xf3   : > { %6463 = vpow2.f32 %v1869_v27  ;;  %v700_v60 = vld [vmem:[%s9925_s4 + $0x288] sm:$0xff]  ;;  %v730_v27 = vld [vmem:[%s9925_s4 + $0x378] sm:$0xff] }
  0xf4   : > { %5889 = vmatmul.msk.f32.gmra.mxu2 %vm747_vm0, %v700_v60  ;;  %5919 = vmatmul.msk.f32.gmra.mxu3 %vm747_vm0, %v730_v27 }
  0xf6   : > { %v1272_v0 = vpop.f32.mrf.mxu1 }
  0xf7   : > { %v1702_v3 = vmul.f32 %v1574_v63, %v1272_v0  ;;  %v607_v63 = vld [vmem:[%s7261_s29 + $0x20] sm:$0xff] }
  0xf8   : > { %v7564_v0 = vmul.f32 %v607_v63, %v7063_v41  ;;  %v701_v41 = vld [vmem:[%s9925_s4 + $0x290] sm:$0xff] }
  0xf9   : > { %v6464_v9 = vpop.eup %6463  ;;  %v1871_v13 = vmul.f32 1.442695, %v1702_v3  ;;  %5865 = vmatmul.msk.f32.gmra.mxu1 %vm747_vm0, %v676_v1  ;;  %v1579_v1 = vld [vmem:[%s9924_s3 + $0x170] sm:$0xff] }
  0xfa   : > { %2085 = vst [vmem:[#allocation3 + $0x140] sm:$0xff] %v6464_v9  ;;  %4451 = vmatpush.msrb.mxu0 %v7564_v0 }
  0xfb   : > { %6465 = vpow2.f32 %v1871_v13  ;;  %5824 = vmatmul.msk.f32.gmra.mxu0 %vm747_vm0, %v635_v8  ;;  %v731_v13 = vld [vmem:[%s9925_s4 + $0x380] sm:$0xff]  ;;  %v684_v8 = vld [vmem:[%s9925_s4 + $0x208] sm:$0xff] }
  0xfc   : > { %5890 = vmatmul.msk.f32.gmra.mxu2 %vm747_vm0, %v701_v41  ;;  %5920 = vmatmul.msk.f32.gmra.mxu3 %vm747_vm0, %v731_v13  ;;  %v638_v13 = vld [vmem:[%s9925_s4 + $0x98] sm:$0xff] }
  0xfe   : > { %v1275_v18 = vpop.f32.mrf.mxu1 }
  0xff   : > { %v1703_v22 = vmul.f32 %v1575_v16, %v1275_v18  ;;  %v3775_v18 = vld [vmem:[%s9927_s6 + $0x40] sm:$0xff] }
 0x100   : > { %3790 = vmatpush.msrb.mxu3 %v3775_v18  ;;  %v704_v18 = vld [vmem:[%s9925_s4 + $0x2a8] sm:$0xff] }
 0x101   : > { %v6466_v28 = vpop.eup %6465  ;;  %v1873_v29 = vmul.f32 1.442695, %v1703_v22  ;;  %5866 = vmatmul.msk.f32.gmra.mxu1 %vm747_vm0, %v677_v19  ;;  %v3102_v19 = vld [vmem:[%s9928_s7 + $0x40] sm:$0xff]  ;;  %v1347_v22 = vpop.f32.mrf.mxu2 }
 0x102   : > { %2086 = vst [vmem:[#allocation3 + $0x148] sm:$0xff] %v6466_v28  ;;  %3117 = vmatpush.msrb.mxu2 %v3102_v19  ;;  %v682_v28 = vld [vmem:[%s9925_s4 + $0x1f8] sm:$0xff]  ;;  %3791 = vmatpush.msrb.mxu3 %v3774_v54 }
 0x103   : > { %6467 = vpow2.f32 %v1873_v29  ;;  %v636_v29 = vld [vmem:[%s9925_s4 + $0x88] sm:$0xff]  ;;  %v734_v19 = vld [vmem:[%s9925_s4 + $0x398] sm:$0xff] }
 0x104   : > { %5825 = vmatmul.msk.f32.gmra.mxu0 %vm747_vm0, %v636_v29  ;;  %5891 = vmatmul.msk.f32.gmra.mxu2 %vm747_vm0, %v702_v33  ;;  %v1536_v54 = vld [vmem:[%s9924_s3 + $0x18] sm:$0xff] }
 0x106   : > { %v1278_v36 = vpop.f32.mrf.mxu1 }
 0x107   : > { %v1704_v5 = vmul.f32 %v1576_v4, %v1278_v36  ;;  %v732_v4 = vld [vmem:[%s9925_s4 + $0x388] sm:$0xff] }
 0x108   : > { %5921 = vmatmul.msk.f32.gmra.mxu3 %vm747_vm0, %v732_v4  ;;  %v1583_v4 = vld [vmem:[%s9924_s3 + $0x190] sm:$0xff] }
 0x109   : > { %v6468_v6 = vpop.eup %6467  ;;  %v1875_v42 = vmul.f32 1.442695, %v1704_v5  ;;  %5867 = vmatmul.msk.f32.gmra.mxu1 %vm747_vm0, %v678_v37  ;;  %v1599_v5 = vld [vmem:[%s9924_s3 + $0x210] sm:$0xff] }
 0x10a   : > { %2087 = vst [vmem:[#allocation3 + $0x150] sm:$0xff] %v6468_v6  ;;  %v1727_v39 = vmul.f32 %v1599_v5, %v1347_v22  ;;  %v1581_v6 = vld [vmem:[%s9924_s3 + $0x180] sm:$0xff] }
 0x10b   : > { %6469 = vpow2.f32 %v1875_v42  ;;  %v1350_v42 = vpop.f32.mrf.mxu2 }
 0x10c   : > { %5892 = vmatmul.msk.f32.gmra.mxu2 %vm747_vm0, %v703_v50  ;;  %v1728_v60 = vmul.f32 %v1600_v57, %v1350_v42 }
 0x10e   : > { %v1281_v46 = vpop.f32.mrf.mxu1 }
 0x10f   : > { %v1705_v48 = vmul.f32 %v1577_v44, %v1281_v46  ;;  %v1789_v44 = vmul.f32 1.442695, %v1661_v38  ;;  %v1921_v46 = vmul.f32 1.442695, %v1727_v39 }
 0x111   : > { %v6470_v51 = vpop.eup %6469  ;;  %v1877_v52 = vmul.f32 1.442695, %v1705_v48  ;;  %5868 = vmatmul.msk.f32.gmra.mxu1 %vm747_vm0, %v679_v25  ;;  %v637_v48 = vld [vmem:[%s9925_s4 + $0x90] sm:$0xff] }
 0x112   : > { %2088 = vst [vmem:[#allocation3 + $0x158] sm:$0xff] %v6470_v51  ;;  %5826 = vmatmul.msk.f32.gmra.mxu0 %vm747_vm0, %v637_v48  ;;  %v733_v51 = vld [vmem:[%s9925_s4 + $0x390] sm:$0xff] }
 0x113   : > { %6471 = vpow2.f32 %v1877_v52  ;;  %5922 = vmatmul.msk.f32.gmra.mxu3 %vm747_vm0, %v733_v51  ;;  %v1353_v27 = vpop.f32.mrf.mxu2  ;;  %v705_v48 = vld [vmem:[%s9925_s4 + $0x2b0] sm:$0xff] }
 0x114   : > { %5893 = vmatmul.msk.f32.gmra.mxu2 %vm747_vm0, %v704_v18 }
 0x116   : > { %v1284_v56 = vpop.f32.mrf.mxu1 }
 0x117   : > { %v1706_v59 = vmul.f32 %v1578_v12, %v1284_v56  ;;  %v3101_v12 = vld [vmem:[%s9928_s7 + $0x38] sm:$0xff]  ;;  %v1534_v56 = vld [vmem:[%s9924_s3 + $0x8] sm:$0xff] }
 0x118   : > { %3118 = vmatpush.msrb.mxu2 %v3101_v12  ;;  %v1602_v12 = vld [vmem:[%s9924_s3 + $0x228] sm:$0xff] }
 0x119   : > { %v6472_v61 = vpop.eup %6471  ;;  %v1879_v62 = vmul.f32 1.442695, %v1706_v59  ;;  %5869 = vmatmul.msk.f32.gmra.mxu1 %vm747_vm0, %v680_v26  ;;  %v1662_v26 = vmul.f32 %v1534_v56, %v1152_v34  ;;  %v1582_v59 = vld [vmem:[%s9924_s3 + $0x188] sm:$0xff]  ;;  %v606_v34 = vld [vmem:[%s7261_s29 + $0x18] sm:$0xff] }
 0x11a   : > { %2089 = vst [vmem:[#allocation3 + $0x160] sm:$0xff] %v6472_v61  ;;  %v1631_v61 = vld [vmem:[%s9924_s3 + $0x310] sm:$0xff]  ;;  %5827 = vmatmul.msk.f32.gmra.mxu0 %vm747_vm0, %v638_v13  ;;  %v7680_v29 = vmul.f32 %v606_v34, %v7079_v10  ;;  %v1446_v10 = vpop.f32.mrf.mxu3  ;;  %v1584_v56 = vld [vmem:[%s9924_s3 + $0x198] sm:$0xff] }
 0x11b   : > { %6473 = vpow2.f32 %v1879_v62  ;;  %v7654_v62 = vpop.f32.mrf.mxu0  ;;  %v1759_v41 = vmul.f32 %v1631_v61, %v1443_v2  ;;  %5923 = vmatmul.msk.f32.gmra.mxu3 %vm747_vm0, %v734_v19  ;;  %v706_v13 = vld [vmem:[%s9925_s4 + $0x2b8] sm:$0xff]  ;;  %v1537_v19 = vld [vmem:[%s9924_s3 + $0x20] sm:$0xff] }
 0x11c   : > { %4452 = vmatpush.msrb.mxu0 %v7680_v29  ;;  %5894 = vmatmul.msk.f32.gmra.mxu2 %vm747_vm0, %v705_v48  ;;  %v3099_v48 = vld [vmem:[%s9928_s7 + $0x28] sm:$0xff] }
 0x11e   : > { %v1287_v3 = vpop.f32.mrf.mxu1 }
 0x11f   : > { %v1707_v9 = vmul.f32 %v1579_v1, %v1287_v3  ;;  %v1791_v1 = vmul.f32 1.442695, %v1662_v26 }
 0x121   : > { %v6474_v14 = vpop.eup %6473  ;;  %v1881_v16 = vmul.f32 1.442695, %v1707_v9  ;;  %5870 = vmatmul.msk.f32.gmra.mxu1 %vm747_vm0, %v681_v7  ;;  %v1923_v9 = vmul.f32 1.442695, %v1728_v60 }
 0x122   : > { %2090 = vst [vmem:[#allocation3 + $0x168] sm:$0xff] %v6474_v14 }
 0x123   : > { %6475 = vpow2.f32 %v1881_v16  ;;  %v1985_v16 = vmul.f32 1.442695, %v1759_v41  ;;  %v7688_v31 = vpop.f32.mrf.mxu0 }
 0x124   : > { %5895 = vmatmul.msk.f32.gmra.mxu2 %vm747_vm0, %v706_v13  ;;  %v605_v13 = vld [vmem:[%s7261_s29 + $0x10] sm:$0xff] }
 0x126   : > { %v1290_v23 = vpop.f32.mrf.mxu1 }
 0x127   : > { %v1708_v32 = vmul.f32 %v1580_v20, %v1290_v23  ;;  %v1535_v23 = vld [vmem:[%s9924_s3 + $0x10] sm:$0xff] }
 0x129   : > { %v6476_v36 = vpop.eup %6475  ;;  %v1883_v37 = vmul.f32 1.442695, %v1708_v32  ;;  %5871 = vmatmul.msk.f32.gmra.mxu1 %vm747_vm0, %v682_v28  ;;  %v1601_v28 = vld [vmem:[%s9924_s3 + $0x220] sm:$0xff]  ;;  %v1663_v32 = vmul.f32 %v1535_v23, %v1155_v43 }
 0x12a   : > { %2091 = vst [vmem:[#allocation3 + $0x170] sm:$0xff] %v6476_v36  ;;  %v1729_v33 = vmul.f32 %v1601_v28, %v1353_v27  ;;  %v1356_v36 = vpop.f32.mrf.mxu2  ;;  %v1634_v28 = vld [vmem:[%s9924_s3 + $0x328] sm:$0xff] }
 0x12b   : > { %6477 = vpow2.f32 %v1883_v37  ;;  %v1632_v37 = vld [vmem:[%s9924_s3 + $0x318] sm:$0xff]  ;;  %v1793_v38 = vmul.f32 1.442695, %v1663_v32  ;;  %v1730_v26 = vmul.f32 %v1602_v12, %v1356_v36  ;;  %v7724_v60 = vpop.f32.mrf.mxu0 }
 0x12c   : > { %6479 = vpow2.f32 %v1789_v44  ;;  %v1925_v39 = vmul.f32 1.442695, %v1729_v33  ;;  %v1760_v43 = vmul.f32 %v1632_v37, %v1446_v10  ;;  %v639_v44 = vld [vmem:[%s9925_s4 + $0xa0] sm:$0xff] }
 0x12d   : > { %6481 = vpow2.f32 %v1921_v46  ;;  %5828 = vmatmul.msk.f32.gmra.mxu0 %vm747_vm0, %v639_v44  ;;  %v1927_v2 = vmul.f32 1.442695, %v1730_v26  ;;  %v737_v44 = vld [vmem:[%s9925_s4 + $0x3b0] sm:$0xff] }
 0x12e   : > { %v1293_v25 = vpop.f32.mrf.mxu1 }
 0x12f   : > { %v1709_v49 = vmul.f32 %v1581_v6, %v1293_v25 }
 0x131   : > { %v6478_v52 = vpop.eup %6477  ;;  %v1885_v53 = vmul.f32 1.442695, %v1709_v49  ;;  %5872 = vmatmul.msk.f32.gmra.mxu1 %vm747_vm0, %v683_v47  ;;  %v1987_v47 = vmul.f32 1.442695, %v1760_v43  ;;  %v735_v49 = vld [vmem:[%s9925_s4 + $0x3a0] sm:$0xff] }
 0x132   : > { %2092 = vst [vmem:[#allocation3 + $0x178] sm:$0xff] %v6478_v52  ;;  %v6480_v63 = vpop.eup %6479  ;;  %v3773_v52 = vld [vmem:[%s9927_s6 + $0x30] sm:$0xff]  ;;  %5924 = vmatmul.msk.f32.gmra.mxu3 %vm747_vm0, %v735_v49  ;;  %v1359_v57 = vpop.f32.mrf.mxu2  ;;  %v707_v43 = vld [vmem:[%s9925_s4 + $0x2c0] sm:$0xff]  ;;  %v1538_v49 = vld [vmem:[%s9924_s3 + $0x28] sm:$0xff] }
 0x133   : > { %6483 = vpow2.f32 %v1885_v53  ;;  %v6482_v3 = vpop.eup %6481  ;;  %2045 = vst [vmem:[#allocation3] sm:$0xff] %v6480_v63  ;;  %v3100_v53 = vld [vmem:[%s9928_s7 + $0x30] sm:$0xff]  ;;  %3792 = vmatpush.msrb.mxu3 %v3773_v52  ;;  %v1449_v63 = vpop.f32.mrf.mxu3  ;;  %5896 = vmatmul.msk.f32.gmra.mxu2 %vm747_vm0, %v707_v43  ;;  %v1540_v43 = vld [vmem:[%s9924_s3 + $0x38] sm:$0xff] }
 0x134   : > { %2111 = vst [vmem:[#allocation3 + $0x210] sm:$0xff] %v6482_v3  ;;  %6485 = vpow2.f32 %v1791_v1  ;;  %3119 = vmatpush.msrb.mxu2 %v3100_v53  ;;  %v7753_v32 = vpop.f32.mrf.mxu0 }
 0x135   : > { %6487 = vpow2.f32 %v1923_v9 }
 0x136   : > { %v1296_v7 = vpop.f32.mrf.mxu1  ;;  %6489 = vpow2.f32 %v1985_v16  ;;  %3120 = vmatpush.msrb.mxu2 %v3099_v48  ;;  %v1637_v48 = vld [vmem:[%s9924_s3 + $0x340] sm:$0xff] }
 0x137   : > { %v1710_v14 = vmul.f32 %v1582_v59, %v1296_v7  ;;  %v1633_v59 = vld [vmem:[%s9924_s3 + $0x320] sm:$0xff]  ;;  %v640_v7 = vld [vmem:[%s9925_s4 + $0xa8] sm:$0xff] }
 0x138   : > { %v1761_v3 = vmul.f32 %v1633_v59, %v1449_v63  ;;  %5829 = vmatmul.msk.f32.gmra.mxu0 %vm747_vm0, %v640_v7 }
 0x139   : > { %v6484_v20 = vpop.eup %6483  ;;  %v1887_v22 = vmul.f32 1.442695, %v1710_v14  ;;  %5873 = vmatmul.msk.f32.gmra.mxu1 %vm747_vm0, %v684_v8  ;;  %v736_v14 = vld [vmem:[%s9925_s4 + $0x3a8] sm:$0xff] }
 0x13a   : > { %2093 = vst [vmem:[#allocation3 + $0x180] sm:$0xff] %v6484_v20  ;;  %v6486_v5 = vpop.eup %6485  ;;  %v1989_v41 = vmul.f32 1.442695, %v1761_v3  ;;  %v1603_v20 = vld [vmem:[%s9924_s3 + $0x230] sm:$0xff]  ;;  %5925 = vmatmul.msk.f32.gmra.mxu3 %vm747_vm0, %v736_v14  ;;  %v1362_v23 = vpop.f32.mrf.mxu2  ;;  %v738_v3 = vld [vmem:[%s9925_s4 + $0x3b8] sm:$0xff] }
 0x13b   : > { %6491 = vpow2.f32 %v1887_v22  ;;  %v6488_v6 = vpop.eup %6487  ;;  %2046 = vst [vmem:[#allocation3 + $0x8] sm:$0xff] %v6486_v5  ;;  %v1665_v22 = vmul.f32 %v1537_v19, %v7688_v31  ;;  %v1731_v34 = vmul.f32 %v1603_v20, %v1359_v57  ;;  %v1452_v37 = vpop.f32.mrf.mxu3  ;;  %v1636_v20 = vld [vmem:[%s9924_s3 + $0x338] sm:$0xff] }
 0x13c   : > { %2112 = vst [vmem:[#allocation3 + $0x218] sm:$0xff] %v6488_v6  ;;  %6493 = vpow2.f32 %v1793_v38  ;;  %v6490_v25 = vpop.eup %6489  ;;  %v1762_v31 = vmul.f32 %v1634_v28, %v1452_v37 }
 0x13d   : > { %6495 = vpow2.f32 %v1925_v39  ;;  %2143 = vst [vmem:[#allocation3 + $0x310] sm:$0xff] %v6490_v25  ;;  %v1929_v36 = vmul.f32 1.442695, %v1731_v34  ;;  %v641_v39 = vld [vmem:[%s9925_s4 + $0xb0] sm:$0xff] }
 0x13e   : > { %v1299_v42 = vpop.f32.mrf.mxu1  ;;  %6497 = vpow2.f32 %v1987_v47  ;;  %v3772_v47 = vld [vmem:[%s9927_s6 + $0x28] sm:$0xff] }
 0x13f   : > { %v1711_v46 = vmul.f32 %v1583_v4, %v1299_v42  ;;  %v1797_v4 = vmul.f32 1.442695, %v1665_v22  ;;  %v1991_v42 = vmul.f32 1.442695, %v1762_v31  ;;  %3793 = vmatpush.msrb.mxu3 %v3772_v47  ;;  %v739_v31 = vld [vmem:[%s9925_s4 + $0x3c0] sm:$0xff] }
 0x140   : > { %5830 = vmatmul.msk.f32.gmra.mxu0 %vm747_vm0, %v641_v39 }
 0x141   : > { %v6492_v50 = vpop.eup %6491  ;;  %v1889_v51 = vmul.f32 1.442695, %v1711_v46  ;;  %5936 = vmatmul.msk.f32.vlgmr.msrb.gmra.mxu1 %vm747_vm0, %v7199_v17  ;;  %v1664_v17 = vmul.f32 %v1536_v54, %v7654_v62  ;;  %v1635_v54 = vld [vmem:[%s9924_s3 + $0x330] sm:$0xff] }
 0x142   : > { %2094 = vst [vmem:[#allocation3 + $0x188] sm:$0xff] %v6492_v50  ;;  %v6494_v27 = vpop.eup %6493  ;;  %5926 = vmatmul.msk.f32.gmra.mxu3 %vm747_vm0, %v737_v44  ;;  %v1604_v50 = vld [vmem:[%s9924_s3 + $0x238] sm:$0xff]  ;;  %v1365_v53 = vpop.f32.mrf.mxu2  ;;  %v1606_v44 = vld [vmem:[%s9924_s3 + $0x248] sm:$0xff] }
 0x143   : > { %6499 = vpow2.f32 %v1889_v51  ;;  %v1795_v61 = vmul.f32 1.442695, %v1664_v17  ;;  %v6496_v62 = vpop.eup %6495  ;;  %2047 = vst [vmem:[#allocation3 + $0x10] sm:$0xff] %v6494_v27  ;;  %v1586_v51 = vld [vmem:[%s9924_s3 + $0x1a8] sm:$0xff]  ;;  %v1732_v52 = vmul.f32 %v1604_v50, %v1362_v23  ;;  %v7788_v17 = vpop.f32.mrf.mxu0 }
 0x144   : > { %2113 = vst [vmem:[#allocation3 + $0x220] sm:$0xff] %v6496_v62  ;;  %v6498_v9 = vpop.eup %6497  ;;  %v1455_v26 = vpop.f32.mrf.mxu3 }
 0x145   : > { %6501 = vpow2.f32 %v1795_v61  ;;  %2144 = vst [vmem:[#allocation3 + $0x318] sm:$0xff] %v6498_v9  ;;  %v1763_v27 = vmul.f32 %v1635_v54, %v1455_v26  ;;  %v642_v61 = vld [vmem:[%s9925_s4 + $0xb8] sm:$0xff]  ;;  %v1539_v9 = vld [vmem:[%s9924_s3 + $0x30] sm:$0xff] }
 0x146   : > { %v1302_v1 = vpop.f32.mrf.mxu1  ;;  %6503 = vpow2.f32 %v1927_v2  ;;  %v708_v2 = vld [vmem:[%s9925_s4 + $0x2c8] sm:$0xff]  ;;  %v1667_v14 = vmul.f32 %v1539_v9, %v7753_v32 }
 0x147   : > { %v1712_v8 = vmul.f32 %v1584_v56, %v1302_v1  ;;  %6505 = vpow2.f32 %v1989_v41  ;;  %v1993_v1 = vmul.f32 1.442695, %v1763_v27  ;;  %5897 = vmatmul.msk.f32.gmra.mxu2 %vm747_vm0, %v708_v2  ;;  %v1605_v41 = vld [vmem:[%s9924_s3 + $0x240] sm:$0xff]  ;;  %v3770_v2 = vld [vmem:[%s9927_s6 + $0x18] sm:$0xff] }
 0x148   : > { %5831 = vmatmul.msk.f32.gmra.mxu0 %vm747_vm0, %v642_v61 }
 0x149   : > { %v6500_v16 = vpop.eup %6499  ;;  %v1891_v18 = vmul.f32 1.442695, %v1712_v8  ;;  %5937 = vmatmul.msk.f32.gmra.mxu1 %vm747_vm0, %v7215_v21  ;;  %v1585_v21 = vld [vmem:[%s9924_s3 + $0x1a0] sm:$0xff] }
 0x14a   : > { %2095 = vst [vmem:[#allocation3 + $0x190] sm:$0xff] %v6500_v16  ;;  %5927 = vmatmul.msk.f32.gmra.mxu3 %vm747_vm0, %v738_v3  ;;  %v7813_v16 = vmul.f32 %v605_v13, %v7094_v11  ;;  %v1368_v19 = vpop.f32.mrf.mxu2 }
 0x14b   : > { %6507 = vpow2.f32 %v1891_v18  ;;  %v6502_v33 = vpop.eup %6501  ;;  %v1587_v18 = vld [vmem:[%s9924_s3 + $0x1b0] sm:$0xff]  ;;  %v7821_v22 = vpop.f32.mrf.mxu0 }
 0x14c   : > { %v6504_v5 = vpop.eup %6503  ;;  %2048 = vst [vmem:[#allocation3 + $0x18] sm:$0xff] %v6502_v33  ;;  %6509 = vpow2.f32 %v1797_v4  ;;  %4453 = vmatpush.msrb.mxu0 %v7813_v16  ;;  %v1458_v28 = vpop.f32.mrf.mxu3  ;;  %v643_v4 = vld [vmem:[%s9925_s4 + $0xc0] sm:$0xff] }
 0x14d   : > { %2114 = vst [vmem:[#allocation3 + $0x228] sm:$0xff] %v6504_v5  ;;  %v6506_v6 = vpop.eup %6505  ;;  %6511 = vpow2.f32 %v1929_v36  ;;  %v1764_v33 = vmul.f32 %v1636_v20, %v1458_v28 }
 0x14e   : > { %v1305_v38 = vpop.f32.mrf.mxu1  ;;  %2145 = vst [vmem:[#allocation3 + $0x320] sm:$0xff] %v6506_v6  ;;  %6513 = vpow2.f32 %v1991_v42  ;;  %v3771_v6 = vld [vmem:[%s9927_s6 + $0x20] sm:$0xff] }
 0x14f   : > { %v1713_v10 = vmul.f32 %v1585_v21, %v1305_v38  ;;  %v1801_v21 = vmul.f32 1.442695, %v1667_v14  ;;  %v1995_v5 = vmul.f32 1.442695, %v1764_v33  ;;  %v709_v38 = vld [vmem:[%s9925_s4 + $0x2d0] sm:$0xff]  ;;  %v3098_v42 = vld [vmem:[%s9928_s7 + $0x20] sm:$0xff]  ;;  %3794 = vmatpush.msrb.mxu3 %v3771_v6 }
 0x150   : > { %5832 = vmatmul.msk.f32.gmra.mxu0 %vm747_vm0, %v643_v4  ;;  %5898 = vmatmul.msk.f32.gmra.mxu2 %vm747_vm0, %v709_v38  ;;  %v741_v33 = vld [vmem:[%s9925_s4 + $0x3d0] sm:$0xff]  ;;  %v1542_v38 = vld [vmem:[%s9924_s3 + $0x48] sm:$0xff] }
 0x151   : > { %v6508_v46 = vpop.eup %6507  ;;  %v1893_v25 = vmul.f32 1.442695, %v1713_v10  ;;  %5938 = vmatmul.msk.f32.gmra.mxu1 %vm747_vm0, %v7230_v24  ;;  %v1666_v24 = vmul.f32 %v1538_v49, %v7724_v60  ;;  %v1931_v60 = vmul.f32 1.442695, %v1732_v52  ;;  %3121 = vmatpush.msrb.mxu2 %v3098_v42  ;;  %v1590_v6 = vld [vmem:[%s9924_s3 + $0x1c8] sm:$0xff] }
 0x152   : > { %2096 = vst [vmem:[#allocation3 + $0x198] sm:$0xff] %v6508_v46  ;;  %v6510_v12 = vpop.eup %6509  ;;  %5928 = vmatmul.msk.f32.gmra.mxu3 %vm747_vm0, %v739_v31  ;;  %v1588_v46 = vld [vmem:[%s9924_s3 + $0x1b8] sm:$0xff]  ;;  %v1371_v47 = vpop.f32.mrf.mxu2 }
 0x153   : > { %6515 = vpow2.f32 %v1893_v25  ;;  %v1799_v56 = vmul.f32 1.442695, %v1666_v24  ;;  %v6512_v57 = vpop.eup %6511  ;;  %2049 = vst [vmem:[#allocation3 + $0x20] sm:$0xff] %v6510_v12  ;;  %v1734_v25 = vmul.f32 %v1606_v44, %v1368_v19  ;;  %v7857_v49 = vpop.f32.mrf.mxu0  ;;  %v644_v12 = vld [vmem:[%s9925_s4 + $0xc8] sm:$0xff]  ;;  %3795 = vmatpush.msrb.mxu3 %v3770_v2  ;;  %v1608_v31 = vld [vmem:[%s9924_s3 + $0x258] sm:$0xff] }
 0x154   : > { %2115 = vst [vmem:[#allocation3 + $0x230] sm:$0xff] %v6512_v57  ;;  %v6514_v62 = vpop.eup %6513 }
 0x155   : > { %6517 = vpow2.f32 %v1799_v56  ;;  %2146 = vst [vmem:[#allocation3 + $0x328] sm:$0xff] %v6514_v62  ;;  %v1935_v54 = vmul.f32 1.442695, %v1734_v25  ;;  %v1541_v62 = vld [vmem:[%s9924_s3 + $0x40] sm:$0xff] }
 0x156   : > { %v1308_v59 = vpop.f32.mrf.mxu1  ;;  %6519 = vpow2.f32 %v1931_v60  ;;  %v740_v60 = vld [vmem:[%s9925_s4 + $0x3c8] sm:$0xff]  ;;  %v1669_v3 = vmul.f32 %v1541_v62, %v7821_v22 }
 0x157   : > { %v1714_v63 = vmul.f32 %v1586_v51, %v1308_v59  ;;  %6521 = vpow2.f32 %v1993_v1  ;;  %v1461_v51 = vpop.f32.mrf.mxu3  ;;  %v710_v59 = vld [vmem:[%s9925_s4 + $0x2d8] sm:$0xff]  ;;  %v1607_v1 = vld [vmem:[%s9924_s3 + $0x250] sm:$0xff]  ;;  %v604_v62 = vld [vmem:[%s7261_s29 + $0x8] sm:$0xff] }
 0x158   : > { %5833 = vmatmul.msk.f32.gmra.mxu0 %vm747_vm0, %v644_v12  ;;  %5899 = vmatmul.msk.f32.gmra.mxu2 %vm747_vm0, %v710_v59  ;;  %v1609_v59 = vld [vmem:[%s9924_s3 + $0x260] sm:$0xff]  ;;  %v7967_v2 = vmul.f32 %v604_v62, %v7112_v55  ;;  %v1642_v62 = vld [vmem:[%s9924_s3 + $0x368] sm:$0xff] }
 0x159   : > { %v6516_v7 = vpop.eup %6515  ;;  %v1895_v8 = vmul.f32 1.442695, %v1714_v63  ;;  %5939 = vmatmul.msk.f32.gmra.mxu1 %vm747_vm0, %v7255_v35  ;;  %v1733_v35 = vmul.f32 %v1605_v41, %v1365_v53  ;;  %v7872_v63 = vld [vmem:[%s9925_s4 + $0x28] sm:$0xff]  ;;  %v647_v55 = vld [vmem:[%s9925_s4 + $0xe0] sm:$0xff] }
 0x15a   : > { %2097 = vst [vmem:[#allocation3 + $0x1a0] sm:$0xff] %v6516_v7  ;;  %5929 = vmatmul.msk.f32.gmra.mxu3 %vm747_vm0, %v740_v60  ;;  %v1735_v7 = vmul.f32 %v1607_v1, %v1371_v47  ;;  %v1374_v9 = vpop.f32.mrf.mxu2  ;;  %v1638_v41 = vld [vmem:[%s9924_s3 + $0x348] sm:$0xff]  ;;  %v3769_v60 = vld [vmem:[%s9927_s6 + $0x10] sm:$0xff]  ;;  %4454 = vmatpush.msrb.mxu0 %v7967_v2 }
 0x15b   : > { %6523 = vpow2.f32 %v1895_v8  ;;  %v6518_v34 = vpop.eup %6517  ;;  %v1933_v23 = vmul.f32 1.442695, %v1733_v35  ;;  %v1589_v8 = vld [vmem:[%s9924_s3 + $0x1c0] sm:$0xff]  ;;  %v7894_v13 = vpop.f32.mrf.mxu0  ;;  %v1805_v35 = vmul.f32 1.442695, %v1669_v3  ;;  %3796 = vmatpush.msrb.mxu3 %v3769_v60  ;;  %v1591_v1 = vld [vmem:[%s9924_s3 + $0x1d0] sm:$0xff] }
 0x15c   : > { %v6520_v32 = vpop.eup %6519  ;;  %2050 = vst [vmem:[#allocation3 + $0x28] sm:$0xff] %v6518_v34  ;;  %6525 = vpow2.f32 %v1801_v21  ;;  %v645_v21 = vld [vmem:[%s9925_s4 + $0xd0] sm:$0xff] }
 0x15d   : > { %2116 = vst [vmem:[#allocation3 + $0x238] sm:$0xff] %v6520_v32  ;;  %v6522_v37 = vpop.eup %6521  ;;  %6527 = vpow2.f32 %v1933_v23 }
 0x15e   : > { %v1311_v11 = vpop.f32.mrf.mxu1  ;;  %2147 = vst [vmem:[#allocation3 + $0x330] sm:$0xff] %v6522_v37  ;;  %6529 = vpow2.f32 %v1995_v5  ;;  %v7909_v37 = vld [vmem:[%s9925_s4 + $0x30] sm:$0xff]  ;;  %v3097_v5 = vld [vmem:[%s9928_s7 + $0x18] sm:$0xff] }
 0x15f   : > { %v1715_v36 = vmul.f32 %v1587_v18, %v1311_v11  ;;  %v1937_v18 = vmul.f32 1.442695, %v1735_v7  ;;  %v1464_v19 = vpop.f32.mrf.mxu3  ;;  %v711_v11 = vld [vmem:[%s9925_s4 + $0x2e0] sm:$0xff]  ;;  %3122 = vmatpush.msrb.mxu2 %v3097_v5  ;;  %v1640_v7 = vld [vmem:[%s9924_s3 + $0x358] sm:$0xff] }
 0x160   : > { %v1766_v22 = vmul.f32 %v1638_v41, %v1464_v19  ;;  %5834 = vmatmul.msk.f32.gmra.mxu0 %vm747_vm0, %v645_v21  ;;  %5900 = vmatmul.msk.f32.gmra.mxu2 %vm747_vm0, %v711_v11  ;;  %v713_v21 = vld [vmem:[%s9925_s4 + $0x2f0] sm:$0xff]  ;;  %v7988_v11 = vld [vmem:[%s9925_s4 + $0x40] sm:$0xff] }
 0x161   : > { %v6524_v39 = vpop.eup %6523  ;;  %v1897_v10 = vmul.f32 1.442695, %v1715_v36  ;;  %5940 = vmatmul.msk.f32.gmra.mxu1 %vm747_vm0, %v7291_v45  ;;  %v1668_v45 = vmul.f32 %v1540_v43, %v7788_v17  ;;  %v1765_v17 = vmul.f32 %v1637_v48, %v1461_v51  ;;  %v1639_v43 = vld [vmem:[%s9924_s3 + $0x350] sm:$0xff] }
 0x162   : > { %2098 = vst [vmem:[#allocation3 + $0x1a8] sm:$0xff] %v6524_v39  ;;  %v6526_v24 = vpop.eup %6525  ;;  %v1999_v32 = vmul.f32 1.442695, %v1766_v22  ;;  %5930 = vmatmul.msk.f32.gmra.mxu3 %vm747_vm0, %v741_v33  ;;  %v1670_v39 = vmul.f32 %v1542_v38, %v7857_v49  ;;  %v1377_v42 = vpop.f32.mrf.mxu2  ;;  %v3096_v33 = vld [vmem:[%s9928_s7 + $0x10] sm:$0xff] }
 0x163   : > { %6531 = vpow2.f32 %v1897_v10  ;;  %v1803_v50 = vmul.f32 1.442695, %v1668_v45  ;;  %v6528_v52 = vpop.eup %6527  ;;  %2051 = vst [vmem:[#allocation3 + $0x30] sm:$0xff] %v6526_v24  ;;  %v1997_v57 = vmul.f32 1.442695, %v1765_v17  ;;  %v1736_v10 = vmul.f32 %v1608_v31, %v1374_v9  ;;  %v7931_v45 = vpop.f32.mrf.mxu0  ;;  %v742_v17 = vld [vmem:[%s9925_s4 + $0x3d8] sm:$0xff]  ;;  %3123 = vmatpush.msrb.mxu2 %v3096_v33 }
 0x164   : > { %2117 = vst [vmem:[#allocation3 + $0x240] sm:$0xff] %v6528_v52  ;;  %v6530_v26 = vpop.eup %6529  ;;  %v1592_v31 = vld [vmem:[%s9924_s3 + $0x1d8] sm:$0xff] }
 0x165   : > { %6533 = vpow2.f32 %v1803_v50  ;;  %2148 = vst [vmem:[#allocation3 + $0x338] sm:$0xff] %v6530_v26  ;;  %v1939_v25 = vmul.f32 1.442695, %v1736_v10  ;;  %v646_v50 = vld [vmem:[%s9925_s4 + $0xd8] sm:$0xff]  ;;  %v1641_v10 = vld [vmem:[%s9924_s3 + $0x360] sm:$0xff] }
 0x166   : > { %v1314_v53 = vpop.f32.mrf.mxu1  ;;  %6535 = vpow2.f32 %v1935_v54  ;;  %v712_v54 = vld [vmem:[%s9925_s4 + $0x2e8] sm:$0xff]  ;;  %v7946_v26 = vld [vmem:[%s9925_s4 + $0x38] sm:$0xff] }
 0x167   : > { %v1716_v56 = vmul.f32 %v1588_v46, %v1314_v53  ;;  %6537 = vpow2.f32 %v1997_v57  ;;  %v1807_v46 = vmul.f32 1.442695, %v1670_v39  ;;  %v1467_v47 = vpop.f32.mrf.mxu3  ;;  %v1543_v57 = vld [vmem:[%s9924_s3 + $0x50] sm:$0xff]  ;;  %v1612_v33 = vld [vmem:[%s9924_s3 + $0x278] sm:$0xff] }
 0x168   : > { %v1767_v49 = vmul.f32 %v1639_v43, %v1467_v47  ;;  %5835 = vmatmul.msk.f32.gmra.mxu0 %vm747_vm0, %v646_v50  ;;  %5901 = vmatmul.msk.f32.gmra.mxu2 %vm747_vm0, %v712_v54 }
 0x169   : > { %v6532_v27 = vpop.eup %6531  ;;  %v1899_v61 = vmul.f32 1.442695, %v1716_v56  ;;  %5941 = vmatmul.msk.f32.gmra.mxu1 %vm747_vm0, %v7872_v63 }
 0x16a   : > { %2099 = vst [vmem:[#allocation3 + $0x1b0] sm:$0xff] %v6532_v27  ;;  %v2001_v53 = vmul.f32 1.442695, %v1767_v49  ;;  %5931 = vmatmul.msk.f32.gmra.mxu3 %vm747_vm0, %v742_v17  ;;  %v1671_v27 = vmul.f32 %v1543_v57, %v7894_v13  ;;  %v1380_v3 = vpop.f32.mrf.mxu2  ;;  %v8025_v17 = vld [vmem:[%s9925_s4 + $0x48] sm:$0xff]  ;;  %v1611_v57 = vld [vmem:[%s9924_s3 + $0x270] sm:$0xff] }
 0x16b   : > { %6539 = vpow2.f32 %v1899_v61  ;;  %v6534_v14 = vpop.eup %6533  ;;  %v1737_v61 = vmul.f32 %v1609_v59, %v1377_v42 }
 0x16c   : > { %v6536_v20 = vpop.eup %6535  ;;  %2052 = vst [vmem:[#allocation3 + $0x38] sm:$0xff] %v6534_v14  ;;  %6541 = vpow2.f32 %v1805_v35  ;;  %v1809_v41 = vmul.f32 1.442695, %v1671_v27  ;;  %v1593_v27 = vld [vmem:[%s9924_s3 + $0x1e0] sm:$0xff] }
 0x16d   : > { %2118 = vst [vmem:[#allocation3 + $0x248] sm:$0xff] %v6536_v20  ;;  %v6538_v28 = vpop.eup %6537  ;;  %6543 = vpow2.f32 %v1937_v18  ;;  %v1941_v13 = vmul.f32 1.442695, %v1737_v61 }
 0x16e   : > { %v1317_v34 = vpop.f32.mrf.mxu1  ;;  %2149 = vst [vmem:[#allocation3 + $0x340] sm:$0xff] %v6538_v28  ;;  %6545 = vpow2.f32 %v1999_v32 }
 0x16f   : > { %v1717_v23 = vmul.f32 %v1589_v8, %v1317_v34  ;;  %v7972_v8 = vpop.f32.mrf.mxu0  ;;  %v1470_v14 = vpop.f32.mrf.mxu3 }
 0x170   : > { %v1768_v19 = vmul.f32 %v1640_v7, %v1470_v14  ;;  %5836 = vmatmul.msk.f32.gmra.mxu0 %vm747_vm0, %v647_v55  ;;  %5902 = vmatmul.msk.f32.gmra.mxu2 %vm747_vm0, %v713_v21 }
 0x171   : > { %v6540_v4 = vpop.eup %6539  ;;  %v1901_v36 = vmul.f32 1.442695, %v1717_v23  ;;  %5942 = vmatmul.msk.f32.gmra.mxu1 %vm747_vm0, %v7909_v37  ;;  %v743_v23 = vld [vmem:[%s9925_s4 + $0x3e0] sm:$0xff] }
 0x172   : > { %2100 = vst [vmem:[#allocation3 + $0x1b8] sm:$0xff] %v6540_v4  ;;  %v6542_v44 = vpop.eup %6541  ;;  %v2003_v22 = vmul.f32 1.442695, %v1768_v19  ;;  %v1544_v4 = vld [vmem:[%s9924_s3 + $0x58] sm:$0xff]  ;;  %5932 = vmatmul.msk.f32.gmra.mxu3 %vm747_vm0, %v743_v23  ;;  %v1383_v39 = vpop.f32.mrf.mxu2  ;;  %v8062_v23 = vld [vmem:[%s9925_s4 + $0x50] sm:$0xff] }
 0x173   : > { %6547 = vpow2.f32 %v1901_v36  ;;  %v6544_v48 = vpop.eup %6543  ;;  %2053 = vst [vmem:[#allocation3 + $0x40] sm:$0xff] %v6542_v44  ;;  %v1610_v36 = vld [vmem:[%s9924_s3 + $0x268] sm:$0xff]  ;;  %v1672_v5 = vmul.f32 %v1544_v4, %v7931_v45  ;;  %v1739_v60 = vmul.f32 %v1611_v57, %v1383_v39 }
 0x174   : > { %2119 = vst [vmem:[#allocation3 + $0x250] sm:$0xff] %v6544_v48  ;;  %6549 = vpow2.f32 %v1807_v46  ;;  %v6546_v52 = vpop.eup %6545  ;;  %v1738_v38 = vmul.f32 %v1610_v36, %v1380_v3  ;;  %v648_v48 = vld [vmem:[%s9925_s4 + $0xe8] sm:$0xff] }
 0x175   : > { %6551 = vpow2.f32 %v1939_v25  ;;  %2150 = vst [vmem:[#allocation3 + $0x348] sm:$0xff] %v6546_v52  ;;  %v1811_v43 = vmul.f32 1.442695, %v1672_v5  ;;  %v744_v52 = vld [vmem:[%s9925_s4 + $0x3e8] sm:$0xff] }
 0x176   : > { %v1320_v24 = vpop.f32.mrf.mxu1  ;;  %6553 = vpow2.f32 %v2001_v53  ;;  %v1943_v44 = vmul.f32 1.442695, %v1738_v38  ;;  %v1594_v5 = vld [vmem:[%s9924_s3 + $0x1e8] sm:$0xff] }
 0x177   : > { %v1718_v51 = vmul.f32 %v1590_v6, %v1320_v24  ;;  %v8010_v6 = vpop.f32.mrf.mxu0  ;;  %v1473_v46 = vpop.f32.mrf.mxu3 }
 0x178   : > { %v1769_v45 = vmul.f32 %v1641_v10, %v1473_v46  ;;  %5837 = vmatmul.msk.f32.gmra.mxu0 %vm747_vm0, %v648_v48 }
 0x179   : > { %v6548_v12 = vpop.eup %6547  ;;  %v1903_v56 = vmul.f32 1.442695, %v1718_v51  ;;  %5943 = vmatmul.msk.f32.gmra.mxu1 %vm747_vm0, %v7946_v26  ;;  %v714_v51 = vld [vmem:[%s9925_s4 + $0x2f8] sm:$0xff] }
 0x17a   : > { %2101 = vst [vmem:[#allocation3 + $0x1c0] sm:$0xff] %v6548_v12  ;;  %v6550_v9 = vpop.eup %6549  ;;  %v2005_v50 = vmul.f32 1.442695, %v1769_v45  ;;  %5903 = vmatmul.msk.f32.gmra.mxu2 %vm747_vm0, %v714_v51  ;;  %v3768_v12 = vld [vmem:[%s9927_s6 + $0x8] sm:$0xff]  ;;  %5933 = vmatmul.msk.f32.gmra.mxu3 %vm747_vm0, %v744_v52  ;;  %v1386_v61 = vpop.f32.mrf.mxu2 }
 0x17b   : > { %6555 = vpow2.f32 %v1903_v56  ;;  %v6552_v35 = vpop.eup %6551  ;;  %2054 = vst [vmem:[#allocation3 + $0x48] sm:$0xff] %v6550_v9  ;;  %v1545_v56 = vld [vmem:[%s9924_s3 + $0x60] sm:$0xff]  ;;  %3797 = vmatpush.msrb.mxu3 %v3768_v12  ;;  %v1945_v9 = vmul.f32 1.442695, %v1739_v60  ;;  %v1740_v36 = vmul.f32 %v1612_v33, %v1386_v61  ;;  %v1547_v12 = vld [vmem:[%s9924_s3 + $0x70] sm:$0xff]  ;;  %v1644_v61 = vld [vmem:[%s9924_s3 + $0x378] sm:$0xff] }
 0x17c   : > { %2120 = vst [vmem:[#allocation3 + $0x258] sm:$0xff] %v6552_v35  ;;  %6557 = vpow2.f32 %v1809_v41  ;;  %v6554_v34 = vpop.eup %6553  ;;  %v1673_v59 = vmul.f32 %v1545_v56, %v7972_v8  ;;  %v649_v35 = vld [vmem:[%s9925_s4 + $0xf0] sm:$0xff]  ;;  %v1613_v56 = vld [vmem:[%s9924_s3 + $0x280] sm:$0xff] }
 0x17d   : > { %6559 = vpow2.f32 %v1941_v13  ;;  %2151 = vst [vmem:[#allocation3 + $0x350] sm:$0xff] %v6554_v34  ;;  %v745_v34 = vld [vmem:[%s9925_s4 + $0x3f0] sm:$0xff] }
 0x17e   : > { %v1323_v18 = vpop.f32.mrf.mxu1  ;;  %6561 = vpow2.f32 %v2003_v22  ;;  %v1813_v7 = vmul.f32 1.442695, %v1673_v59  ;;  %v1595_v60 = vld [vmem:[%s9924_s3 + $0x1f0] sm:$0xff] }
 0x17f   : > { %v1719_v20 = vmul.f32 %v1591_v1, %v1323_v18  ;;  %v8047_v1 = vpop.f32.mrf.mxu0  ;;  %v1476_v41 = vpop.f32.mrf.mxu3 }
 0x180   : > { %v1770_v8 = vmul.f32 %v1642_v62, %v1476_v41  ;;  %5838 = vmatmul.msk.f32.gmra.mxu0 %vm747_vm0, %v649_v35  ;;  %v1675_v57 = vmul.f32 %v1547_v12, %v8047_v1  ;;  %v3094_v35 = vld [vmem:[%s9928_s7] sm:$0xff]  ;;  %v1646_v12 = vld [vmem:[%s9924_s3 + $0x388] sm:$0xff] }
 0x181   : > { %v6556_v28 = vpop.eup %6555  ;;  %v1905_v32 = vmul.f32 1.442695, %v1719_v20  ;;  %5944 = vmatmul.msk.f32.gmra.mxu1 %vm747_vm0, %v7988_v11  ;;  %v715_v20 = vld [vmem:[%s9925_s4 + $0x300] sm:$0xff] }
 0x182   : > { %2102 = vst [vmem:[#allocation3 + $0x1c8] sm:$0xff] %v6556_v28  ;;  %v6558_v42 = vpop.eup %6557  ;;  %v2007_v55 = vmul.f32 1.442695, %v1770_v8  ;;  %5904 = vmatmul.msk.f32.gmra.mxu2 %vm747_vm0, %v715_v20  ;;  %v3095_v28 = vld [vmem:[%s9928_s7 + $0x8] sm:$0xff]  ;;  %5934 = vmatmul.msk.f32.gmra.mxu3 %vm747_vm0, %v745_v34  ;;  %v1389_v38 = vpop.f32.mrf.mxu2  ;;  %v8133_v20 = vld [vmem:[%s9925_s4 + $0x60] sm:$0xff] }
 0x183   : > { %6563 = vpow2.f32 %v1905_v32  ;;  %v6560_v25 = vpop.eup %6559  ;;  %2055 = vst [vmem:[#allocation3 + $0x50] sm:$0xff] %v6558_v42  ;;  %v1546_v32 = vld [vmem:[%s9924_s3 + $0x68] sm:$0xff]  ;;  %3124 = vmatpush.msrb.mxu2 %v3095_v28  ;;  %v1741_v59 = vmul.f32 %v1613_v56, %v1389_v38  ;;  %v603_v34 = vld [vmem:[%s7261_s29] sm:$0xff] }
 0x184   : > { %2121 = vst [vmem:[#allocation3 + $0x260] sm:$0xff] %v6560_v25  ;;  %6565 = vpow2.f32 %v1811_v43  ;;  %v6562_v49 = vpop.eup %6561  ;;  %v1674_v4 = vmul.f32 %v1546_v32, %v8010_v6  ;;  %v1947_v43 = vmul.f32 1.442695, %v1740_v36  ;;  %v611_v28 = vmul.f32 %v603_v34, %v7132_v58  ;;  %v1645_v36 = vld [vmem:[%s9924_s3 + $0x380] sm:$0xff]  ;;  %v1596_v58 = vld [vmem:[%s9924_s3 + $0x1f8] sm:$0xff] }
 0x185   : > { %6567 = vpow2.f32 %v1943_v44  ;;  %2152 = vst [vmem:[#allocation3 + $0x358] sm:$0xff] %v6562_v49  ;;  %v716_v49 = vld [vmem:[%s9925_s4 + $0x308] sm:$0xff]  ;;  %3125 = vmatpush.msrb.mxu2 %v3094_v35 }
 0x186   : > { %v1326_v47 = vpop.f32.mrf.mxu1  ;;  %6569 = vpow2.f32 %v2005_v50  ;;  %v1815_v42 = vmul.f32 1.442695, %v1674_v4  ;;  %v746_v50 = vld [vmem:[%s9925_s4 + $0x3f8] sm:$0xff]  ;;  %v1615_v4 = vld [vmem:[%s9924_s3 + $0x290] sm:$0xff]  ;;  %4455 = vmatpush.msrb.mxu0 %v611_v28 }
 0x187   : > { %v1720_v24 = vmul.f32 %v1592_v31, %v1326_v47  ;;  %v1643_v31 = vld [vmem:[%s9924_s3 + $0x370] sm:$0xff]  ;;  %v8084_v39 = vpop.f32.mrf.mxu0  ;;  %v1479_v44 = vpop.f32.mrf.mxu3  ;;  %v650_v47 = vld [vmem:[%s9925_s4 + $0xf8] sm:$0xff] }
 0x188   : > { %v1771_v6 = vmul.f32 %v1643_v31, %v1479_v44  ;;  %5839 = vmatmul.msk.f32.gmra.mxu0 %vm747_vm0, %v650_v47 }
 0x189   : > { %v6564_v53 = vpop.eup %6563  ;;  %v1907_v54 = vmul.f32 1.442695, %v1720_v24  ;;  %5945 = vmatmul.msk.f32.gmra.mxu1 %vm747_vm0, %v8025_v17 }
 0x18a   : > { %2103 = vst [vmem:[#allocation3 + $0x1d0] sm:$0xff] %v6564_v53  ;;  %v6566_v3 = vpop.eup %6565  ;;  %v2009_v24 = vmul.f32 1.442695, %v1771_v6  ;;  %v8099_v53 = vld [vmem:[%s9925_s4 + $0x58] sm:$0xff]  ;;  %5905 = vmatmul.msk.f32.gmra.mxu2 %vm747_vm0, %v716_v49  ;;  %5935 = vmatmul.msk.f32.gmra.mxu3 %vm747_vm0, %v746_v50  ;;  %v6713_v49 = vld [vmem:[%s9925_s4] sm:$0xff] }
 0x18b   : > { %6571 = vpow2.f32 %v1907_v54  ;;  %v6568_v13 = vpop.eup %6567  ;;  %2056 = vst [vmem:[#allocation3 + $0x58] sm:$0xff] %v6566_v3  ;;  %v3767_v54 = vld [vmem:[%s9927_s6] sm:$0xff]  ;;  %v1817_v3 = vmul.f32 1.442695, %v1675_v57 }
 0x18c   : > { %2122 = vst [vmem:[#allocation3 + $0x268] sm:$0xff] %v6568_v13  ;;  %6573 = vpow2.f32 %v1813_v7  ;;  %v6570_v19 = vpop.eup %6569  ;;  %3798 = vmatpush.msrb.mxu3 %v3767_v54  ;;  %v1949_v7 = vmul.f32 1.442695, %v1741_v59 }
 0x18d   : > { %6575 = vpow2.f32 %v1945_v9  ;;  %2153 = vst [vmem:[#allocation3 + $0x360] sm:$0xff] %v6570_v19 }
 0x18e   : > { %v1329_v14 = vpop.f32.mrf.mxu1  ;;  %6577 = vpow2.f32 %v2007_v55  ;;  %6359 = vmatpush.msra.mxu3 %v7279_v40  ;;  %v651_v40 = vld [vmem:[%s9925_s4 + $0x100] sm:$0xff] }
 0x18f   : > { %v1721_v18 = vmul.f32 %v1593_v27, %v1329_v14  ;;  %v1392_v27 = vpop.f32.mrf.mxu2  ;;  %v1482_v9 = vpop.f32.mrf.mxu3 }
 0x190   : > { %v1197_v41 = vpop.f32.mrf.mxu0  ;;  %v1772_v1 = vmul.f32 %v1644_v61, %v1482_v9  ;;  %6360 = vmatpush.msra.mxu3 %v7376_v30  ;;  %5840 = vmatmul.msk.f32.gmra.mxu0 %vm747_vm0, %v651_v40 }
 0x191   : > { %v6572_v22 = vpop.eup %6571  ;;  %v1909_v21 = vmul.f32 1.442695, %v1721_v18  ;;  %5946 = vmatmul.msk.f32.gmra.mxu1 %vm747_vm0, %v8062_v23 }
 0x192   : > { %2104 = vst [vmem:[#allocation3 + $0x1d8] sm:$0xff] %v6572_v22  ;;  %v6574_v10 = vpop.eup %6573  ;;  %v2011_v19 = vmul.f32 1.442695, %v1772_v1  ;;  %6361 = vmatpush.msra.mxu3 %v7470_v15  ;;  %v1548_v22 = vld [vmem:[%s9924_s3 + $0x78] sm:$0xff]  ;;  %v1549_v15 = vld [vmem:[%s9924_s3 + $0x80] sm:$0xff] }
 0x193   : > { %6579 = vpow2.f32 %v1909_v21  ;;  %v6576_v46 = vpop.eup %6575  ;;  %2057 = vst [vmem:[#allocation3 + $0x60] sm:$0xff] %v6574_v10  ;;  %v1614_v21 = vld [vmem:[%s9924_s3 + $0x288] sm:$0xff]  ;;  %v1676_v32 = vmul.f32 %v1548_v22, %v8084_v39  ;;  %v1647_v22 = vld [vmem:[%s9924_s3 + $0x390] sm:$0xff] }
 0x194   : > { %2123 = vst [vmem:[#allocation3 + $0x270] sm:$0xff] %v6576_v46  ;;  %6581 = vpow2.f32 %v1815_v42  ;;  %v6578_v48 = vpop.eup %6577  ;;  %v1742_v33 = vmul.f32 %v1614_v21, %v1392_v27  ;;  %6362 = vmatpush.msra.mxu3 %v7564_v0  ;;  %v1598_v21 = vld [vmem:[%s9924_s3 + $0x208] sm:$0xff] }
 0x195   : > { %6583 = vpow2.f32 %v1947_v43  ;;  %2154 = vst [vmem:[#allocation3 + $0x368] sm:$0xff] %v6578_v48  ;;  %v1819_v39 = vmul.f32 1.442695, %v1676_v32 }
 0x196   : > { %v1332_v25 = vpop.f32.mrf.mxu1  ;;  %6585 = vpow2.f32 %v2009_v24  ;;  %v1951_v10 = vmul.f32 1.442695, %v1742_v33  ;;  %6363 = vmatpush.msra.mxu3 %v7680_v29 }
 0x197   : > { %v1722_v45 = vmul.f32 %v1594_v5, %v1332_v25  ;;  %v1677_v5 = vmul.f32 %v1549_v15, %v1197_v41  ;;  %v1395_v38 = vpop.f32.mrf.mxu2  ;;  %v1485_v43 = vpop.f32.mrf.mxu3 }
 0x198   : > { %v1743_v42 = vmul.f32 %v1615_v4, %v1395_v38  ;;  %v1200_v44 = vpop.f32.mrf.mxu0  ;;  %v1773_v0 = vmul.f32 %v1645_v36, %v1485_v43  ;;  %6364 = vmatpush.msra.mxu3 %v7813_v16  ;;  %6064 = vmatmul.msk.f32.vlgmr.msrb.gmra.mxu0 %vm747_vm0, %v6713_v49  ;;  %v1550_v16 = vld [vmem:[%s9924_s3 + $0x88] sm:$0xff]  ;;  %v6717_v43 = vld [vmem:[%s9925_s4 + $0x10] sm:$0xff] }
 0x199   : > { %v6580_v51 = vpop.eup %6579  ;;  %v1911_v52 = vmul.f32 1.442695, %v1722_v45  ;;  %5947 = vmatmul.msk.f32.gmra.mxu1 %vm747_vm0, %v8099_v53  ;;  %v1821_v6 = vmul.f32 1.442695, %v1677_v5  ;;  %v1678_v54 = vmul.f32 %v1550_v16, %v1200_v44 }
 0x19a   : > { %2105 = vst [vmem:[#allocation3 + $0x1e0] sm:$0xff] %v6580_v51  ;;  %v6582_v62 = vpop.eup %6581  ;;  %v1953_v45 = vmul.f32 1.442695, %v1743_v42  ;;  %v2013_v24 = vmul.f32 1.442695, %v1773_v0  ;;  %v8169_v51 = vld [vmem:[%s9925_s4 + $0x68] sm:$0xff]  ;;  %6365 = vmatpush.msra.mxu3 %v7967_v2 }
 0x19b   : > { %6587 = vpow2.f32 %v1911_v52  ;;  %v6584_v13 = vpop.eup %6583  ;;  %2058 = vst [vmem:[#allocation3 + $0x68] sm:$0xff] %v6582_v62  ;;  %v1616_v52 = vld [vmem:[%s9924_s3 + $0x298] sm:$0xff]  ;;  %v1597_v2 = vld [vmem:[%s9924_s3 + $0x200] sm:$0xff]  ;;  %v1823_v59 = vmul.f32 1.442695, %v1678_v54  ;;  %v1618_v0 = vld [vmem:[%s9924_s3 + $0x2a8] sm:$0xff] }
 0x19c   : > { %2124 = vst [vmem:[#allocation3 + $0x278] sm:$0xff] %v6584_v13  ;;  %6589 = vpow2.f32 %v1817_v3  ;;  %v6586_v18 = vpop.eup %6585  ;;  %6366 = vmatpush.msra.mxu3 %v611_v28 }
 0x19d   : > { %6591 = vpow2.f32 %v1949_v7  ;;  %2155 = vst [vmem:[#allocation3 + $0x370] sm:$0xff] %v6586_v18  ;;  %v8193_v18 = vld [vmem:[%s9925_s4 + $0x70] sm:$0xff] }
 0x19e   : > { %v1335_v14 = vpop.f32.mrf.mxu1  ;;  %6593 = vpow2.f32 %v2011_v19 }
 0x19f   : > { %v1723_v8 = vmul.f32 %v1595_v60, %v1335_v14  ;;  %v1398_v56 = vpop.f32.mrf.mxu2  ;;  %v1488_v27 = vpop.f32.mrf.mxu3 }
 0x1a0   : > { %v1744_v60 = vmul.f32 %v1616_v52, %v1398_v56  ;;  %v1203_v61 = vpop.f32.mrf.mxu0  ;;  %v1774_v7 = vmul.f32 %v1646_v12, %v1488_v27  ;;  %v6719_v27 = vld [vmem:[%s9925_s4 + $0x18] sm:$0xff] }
 0x1a1   : > { %v6588_v55 = vpop.eup %6587  ;;  %v1913_v30 = vmul.f32 1.442695, %v1723_v8  ;;  %5948 = vmatmul.msk.f32.gmra.mxu1 %vm747_vm0, %v8133_v20  ;;  %v6715_v8 = vld [vmem:[%s9925_s4 + $0x8] sm:$0xff] }
 0x1a2   : > { %2106 = vst [vmem:[#allocation3 + $0x1e8] sm:$0xff] %v6588_v55  ;;  %v6590_v31 = vpop.eup %6589  ;;  %v1955_v13 = vmul.f32 1.442695, %v1744_v60  ;;  %v2015_v1 = vmul.f32 1.442695, %v1774_v7  ;;  %6065 = vmatmul.msk.f32.gmra.mxu0 %vm747_vm0, %v6715_v8  ;;  %v1551_v55 = vld [vmem:[%s9924_s3 + $0x90] sm:$0xff] }
 0x1a3   : > { %6595 = vpow2.f32 %v1913_v30  ;;  %v6592_v46 = vpop.eup %6591  ;;  %2059 = vst [vmem:[#allocation3 + $0x70] sm:$0xff] %v6590_v31  ;;  %v1617_v30 = vld [vmem:[%s9924_s3 + $0x2a0] sm:$0xff]  ;;  %v1679_v34 = vmul.f32 %v1551_v55, %v1203_v61  ;;  %v1619_v7 = vld [vmem:[%s9924_s3 + $0x2b0] sm:$0xff] }
 0x1a4   : > { %2125 = vst [vmem:[#allocation3 + $0x280] sm:$0xff] %v6592_v46  ;;  %6597 = vpow2.f32 %v1819_v39  ;;  %v6594_v48 = vpop.eup %6593 }
 0x1a5   : > { %6599 = vpow2.f32 %v1951_v10  ;;  %2156 = vst [vmem:[#allocation3 + $0x378] sm:$0xff] %v6594_v48  ;;  %v1825_v33 = vmul.f32 1.442695, %v1679_v34  ;;  %v2582_v48 = vld [vmem:[%s9926_s5] sm:$0xff] }
 0x1a6   : > { %v1338_v25 = vpop.f32.mrf.mxu1  ;;  %6601 = vpow2.f32 %v1821_v6  ;;  %v1552_v6 = vld [vmem:[%s9924_s3 + $0x98] sm:$0xff] }
 0x1a7   : > { %v1724_v47 = vmul.f32 %v1596_v58, %v1338_v25  ;;  %6603 = vpow2.f32 %v1953_v45  ;;  %v1401_v28 = vpop.f32.mrf.mxu2  ;;  %v1491_v4 = vpop.f32.mrf.mxu3  ;;  %v8216_v25 = vld [vmem:[%s9925_s4 + $0x78] sm:$0xff] }
 0x1a8   : > { %v1745_v15 = vmul.f32 %v1617_v30, %v1401_v28  ;;  %v1206_v36 = vpop.f32.mrf.mxu0  ;;  %v1775_v5 = vmul.f32 %v1647_v22, %v1491_v4  ;;  %v1648_v45 = vld [vmem:[%s9924_s3 + $0x398] sm:$0xff]  ;;  %v1554_v4 = vld [vmem:[%s9924_s3 + $0xa8] sm:$0xff] }
 0x1a9   : > { %v6596_v29 = vpop.eup %6595  ;;  %v1915_v50 = vmul.f32 1.442695, %v1724_v47  ;;  %5949 = vmatmul.msk.f32.gmra.mxu1 %vm747_vm0, %v8169_v51  ;;  %v1680_v47 = vmul.f32 %v1552_v6, %v1206_v36  ;;  %v1620_v36 = vld [vmem:[%s9924_s3 + $0x2b8] sm:$0xff] }
 0x1aa   : > { %2107 = vst [vmem:[#allocation3 + $0x1f0] sm:$0xff] %v6596_v29  ;;  %v6598_v57 = vpop.eup %6597  ;;  %v1957_v39 = vmul.f32 1.442695, %v1745_v15  ;;  %v2017_v42 = vmul.f32 1.442695, %v1775_v5  ;;  %6066 = vmatmul.msk.f32.gmra.mxu0 %vm747_vm0, %v6717_v43  ;;  %v8262_v15 = vld [vmem:[%s9925_s4 + $0x88] sm:$0xff] }
 0x1ab   : > { %6605 = vpow2.f32 %v1915_v50  ;;  %v6600_v62 = vpop.eup %6599  ;;  %2060 = vst [vmem:[#allocation3 + $0x78] sm:$0xff] %v6598_v57  ;;  %v1827_v29 = vmul.f32 1.442695, %v1680_v47  ;;  %v1650_v5 = vld [vmem:[%s9924_s3 + $0x3a8] sm:$0xff] }
 0x1ac   : > { %6607 = vpow2.f32 %v2013_v24  ;;  %v6602_v9 = vpop.eup %6601  ;;  %2126 = vst [vmem:[#allocation3 + $0x288] sm:$0xff] %v6600_v62  ;;  %v8239_v62 = vld [vmem:[%s9925_s4 + $0x80] sm:$0xff] }
 0x1ad   : > { %6609 = vpow2.f32 %v1823_v59  ;;  %v6604_v14 = vpop.eup %6603  ;;  %2061 = vst [vmem:[#allocation3 + $0x80] sm:$0xff] %v6602_v9 }
 0x1ae   : > { %v1341_v3 = vpop.f32.mrf.mxu1  ;;  %2127 = vst [vmem:[#allocation3 + $0x290] sm:$0xff] %v6604_v14  ;;  %6611 = vpow2.f32 %v1955_v13  ;;  %v2583_v13 = vld [vmem:[%s9926_s5 + $0x8] sm:$0xff] }
 0x1af   : > { %v1725_v41 = vmul.f32 %v1597_v2, %v1341_v3  ;;  %6613 = vpow2.f32 %v2015_v1  ;;  %v1404_v24 = vpop.f32.mrf.mxu2  ;;  %v1494_v16 = vpop.f32.mrf.mxu3  ;;  %v1553_v3 = vld [vmem:[%s9924_s3 + $0xa0] sm:$0xff] }
 0x1b0   : > { %v1746_v50 = vmul.f32 %v1618_v0, %v1404_v24  ;;  %v1209_v52 = vpop.f32.mrf.mxu0  ;;  %v1776_v12 = vmul.f32 %v1648_v45, %v1494_v16  ;;  %v1651_v16 = vld [vmem:[%s9924_s3 + $0x3b0] sm:$0xff] }
 0x1b1   : > { %v6606_v35 = vpop.eup %6605  ;;  %v1917_v40 = vmul.f32 1.442695, %v1725_v41  ;;  %5950 = vmatmul.msk.f32.gmra.mxu1 %vm747_vm0, %v8193_v18  ;;  %v1681_v9 = vmul.f32 %v1553_v3, %v1209_v52  ;;  %v1649_v41 = vld [vmem:[%s9924_s3 + $0x3a0] sm:$0xff]  ;;  %v2585_v52 = vld [vmem:[%s9926_s5 + $0x18] sm:$0xff] }
 0x1b2   : > { %v6608_v19 = vpop.eup %6607  ;;  %2108 = vst [vmem:[#allocation3 + $0x1f8] sm:$0xff] %v6606_v35  ;;  %v1959_v57 = vmul.f32 1.442695, %v1746_v50  ;;  %v2019_v60 = vmul.f32 1.442695, %v1776_v12  ;;  %6067 = vmatmul.msk.f32.gmra.mxu0 %vm747_vm0, %v6719_v27 }
 0x1b3   : > { %6615 = vpow2.f32 %v1917_v40  ;;  %2157 = vst [vmem:[#allocation3 + $0x380] sm:$0xff] %v6608_v19  ;;  %v6610_v32 = vpop.eup %6609  ;;  %v1829_v8 = vmul.f32 1.442695, %v1681_v9 }
 0x1b4   : > { %2062 = vst [vmem:[#allocation3 + $0x88] sm:$0xff] %v6610_v32  ;;  %v6612_v38 = vpop.eup %6611  ;;  %6617 = vpow2.f32 %v1825_v33  ;;  %v6721_v33 = vld [vmem:[%s9925_s4 + $0x20] sm:$0xff] }
 0x1b5   : > { %v6614_v10 = vpop.eup %6613  ;;  %2128 = vst [vmem:[#allocation3 + $0x298] sm:$0xff] %v6612_v38  ;;  %6619 = vpow2.f32 %v1957_v39  ;;  %v2584_v38 = vld [vmem:[%s9926_s5 + $0x10] sm:$0xff] }
 0x1b6   : > { %v1344_v58 = vpop.f32.mrf.mxu1  ;;  %2158 = vst [vmem:[#allocation3 + $0x388] sm:$0xff] %v6614_v10  ;;  %6621 = vpow2.f32 %v2017_v42 }
 0x1b7   : > { %v1726_v31 = vmul.f32 %v1598_v21, %v1344_v58  ;;  %v1407_v14 = vpop.f32.mrf.mxu2  ;;  %v1497_v40 = vpop.f32.mrf.mxu3 }
 0x1b8   : > { %v1747_v35 = vmul.f32 %v1619_v7, %v1407_v14  ;;  %v1212_v19 = vpop.f32.mrf.mxu0  ;;  %v1777_v30 = vmul.f32 %v1649_v41, %v1497_v40  ;;  %v1556_v14 = vld [vmem:[%s9924_s3 + $0xb8] sm:$0xff] }
 0x1b9   : > { %v6616_v44 = vpop.eup %6615  ;;  %v1919_v46 = vmul.f32 1.442695, %v1726_v31  ;;  %5951 = vmatmul.msk.f32.gmra.mxu1 %vm747_vm0, %v8216_v25  ;;  %v1682_v58 = vmul.f32 %v1554_v4, %v1212_v19 }
 0x1ba   : > { %2109 = vst [vmem:[#allocation3 + $0x200] sm:$0xff] %v6616_v44  ;;  %v6618_v49 = vpop.eup %6617  ;;  %v1961_v21 = vmul.f32 1.442695, %v1747_v35  ;;  %v2021_v32 = vmul.f32 1.442695, %v1777_v30  ;;  %6068 = vmatmul.msk.f32.gmra.mxu0 %vm747_vm0, %v6721_v33  ;;  %v2586_v35 = vld [vmem:[%s9926_s5 + $0x20] sm:$0xff] }
 0x1bb   : > { %6623 = vpow2.f32 %v1919_v46  ;;  %2063 = vst [vmem:[#allocation3 + $0x90] sm:$0xff] %v6618_v49  ;;  %v6620_v2 = vpop.eup %6619  ;;  %v1831_v10 = vmul.f32 1.442695, %v1682_v58  ;;  %v8283_v49 = vld [vmem:[%s9925_s4 + $0x90] sm:$0xff] }
 0x1bc   : > { %6625 = vpow2.f32 %v1827_v29  ;;  %v6622_v59 = vpop.eup %6621  ;;  %2129 = vst [vmem:[#allocation3 + $0x2a0] sm:$0xff] %v6620_v2  ;;  %v1555_v29 = vld [vmem:[%s9924_s3 + $0xb0] sm:$0xff] }
 0x1bd   : > { %2159 = vst [vmem:[#allocation3 + $0x390] sm:$0xff] %v6622_v59  ;;  %6627 = vpow2.f32 %v1959_v57 }
 0x1be   : > { %v2198_v54 = vpop.f32.mrf.mxu1  ;;  %6629 = vpow2.f32 %v2019_v60 }
 0x1bf   : > { %v2710_v56 = vmul.f32 %v2582_v48, %v2198_v54  ;;  %6631 = vpow2.f32 %v1829_v8  ;;  %v1410_v31 = vpop.f32.mrf.mxu2  ;;  %v1500_v43 = vpop.f32.mrf.mxu3  ;;  %v1652_v8 = vld [vmem:[%s9924_s3 + $0x3b8] sm:$0xff] }
 0x1c0   : > { %6633 = vpow2.f32 %v1961_v21  ;;  %v1748_v42 = vmul.f32 %v1620_v36, %v1410_v31  ;;  %v1215_v44 = vpop.f32.mrf.mxu0  ;;  %v1778_v6 = vmul.f32 %v1650_v5, %v1500_v43  ;;  %v8325_v5 = vld [vmem:[%s9925_s4 + $0xa0] sm:$0xff] }
 0x1c1   : > { %v6624_v61 = vpop.eup %6623  ;;  %5952 = vmatmul.msk.f32.gmra.mxu1 %vm747_vm0, %v8239_v62  ;;  %3126 = vmatmul.f32.vlgmr.msrb.gmra.mxu2 %v2710_v56  ;;  %6635 = vpow2.f32 %v2021_v32  ;;  %v1683_v50 = vmul.f32 %v1555_v29, %v1215_v44 }
 0x1c2   : > { %2110 = vst [vmem:[#allocation3 + $0x208] sm:$0xff] %v6624_v61  ;;  %3799 = vmatmul.f32.vlgmr.msrb.gmra.mxu3 %v2710_v56  ;;  %v6626_v1 = vpop.eup %6625  ;;  %6637 = vpow2.f32 %v1831_v10  ;;  %v1963_v45 = vmul.f32 1.442695, %v1748_v42  ;;  %v2023_v24 = vmul.f32 1.442695, %v1778_v6  ;;  %6069 = vmatmul.msk.f32.gmra.mxu0 %vm747_vm0, %v7872_v63  ;;  %v1621_v63 = vld [vmem:[%s9924_s3 + $0x2c0] sm:$0xff] }
 0x1c3   : > { %2064 = vst [vmem:[#allocation3 + $0x98] sm:$0xff] %v6626_v1  ;;  %v6628_v34 = vpop.eup %6627  ;;  %v1833_v2 = vmul.f32 1.442695, %v1683_v50  ;;  %v2587_v10 = vld [vmem:[%s9926_s5 + $0x28] sm:$0xff] }
 0x1c4   : > { %v6630_v28 = vpop.eup %6629  ;;  %2130 = vst [vmem:[#allocation3 + $0x2a8] sm:$0xff] %v6628_v34  ;;  %6639 = vpow2.f32 %v1963_v45 }
 0x1c5   : > { %2160 = vst [vmem:[#allocation3 + $0x398] sm:$0xff] %v6630_v28  ;;  %v6632_v39 = vpop.eup %6631  ;;  %6641 = vpow2.f32 %v2023_v24 }
 0x1c6   : > { %v2201_v55 = vpop.f32.mrf.mxu1  ;;  %2065 = vst [vmem:[#allocation3 + $0xa0] sm:$0xff] %v6632_v39  ;;  %v6634_v0 = vpop.eup %6633  ;;  %6643 = vpow2.f32 %v1833_v2  ;;  %v1653_v39 = vld [vmem:[%s9924_s3 + $0x3c0] sm:$0xff]  ;;  %v2588_v2 = vld [vmem:[%s9926_s5 + $0x30] sm:$0xff] }
 0x1c7   : > { %v2711_v22 = vmul.f32 %v2583_v13, %v2201_v55  ;;  %v6636_v48 = vpop.eup %6635  ;;  %2131 = vst [vmem:[#allocation3 + $0x2b0] sm:$0xff] %v6634_v0  ;;  %v1413_v54 = vpop.f32.mrf.mxu2  ;;  %v8304_v13 = vld [vmem:[%s9925_s4 + $0x98] sm:$0xff] }
 0x1c8   : > { %2161 = vst [vmem:[#allocation3 + $0x3a0] sm:$0xff] %v6636_v48  ;;  %v6638_v12 = vpop.eup %6637  ;;  %v1749_v56 = vmul.f32 %v1621_v63, %v1413_v54  ;;  %v1503_v57 = vpop.f32.mrf.mxu3 }
 0x1c9   : > { %5953 = vmatmul.msk.f32.gmra.mxu1 %vm747_vm0, %v8262_v15  ;;  %3129 = vmatmul.f32.gmra.mxu2 %v2711_v22  ;;  %v1218_v59 = vpop.f32.mrf.mxu0  ;;  %2066 = vst [vmem:[#allocation3 + $0xa8] sm:$0xff] %v6638_v12  ;;  %v1779_v27 = vmul.f32 %v1651_v16, %v1503_v57  ;;  %v8346_v16 = vld [vmem:[%s9925_s4 + $0xa8] sm:$0xff] }
 0x1ca   : > { %3802 = vmatmul.f32.gmra.mxu3 %v2711_v22  ;;  %v6640_v61 = vpop.eup %6639  ;;  %v1965_v7 = vmul.f32 1.442695, %v1749_v56  ;;  %6070 = vmatmul.msk.f32.gmra.mxu0 %vm747_vm0, %v7909_v37  ;;  %v1622_v37 = vld [vmem:[%s9924_s3 + $0x2c8] sm:$0xff]  ;;  %v1684_v1 = vmul.f32 %v1556_v14, %v1218_v59 }
 0x1cb   : > { %v6642_v9 = vpop.eup %6641  ;;  %2132 = vst [vmem:[#allocation3 + $0x2b8] sm:$0xff] %v6640_v61  ;;  %v2025_v41 = vmul.f32 1.442695, %v1779_v27  ;;  %v1654_v12 = vld [vmem:[%s9924_s3 + $0x3c8] sm:$0xff] }
 0x1cc   : > { %2162 = vst [vmem:[#allocation3 + $0x3a8] sm:$0xff] %v6642_v9  ;;  %6645 = vpow2.f32 %v1965_v7  ;;  %v6644_v19 = vpop.eup %6643  ;;  %v1835_v55 = vmul.f32 1.442695, %v1684_v1 }
 0x1cd   : > { %6647 = vpow2.f32 %v2025_v41  ;;  %2067 = vst [vmem:[#allocation3 + $0xb0] sm:$0xff] %v6644_v19  ;;  %v1655_v19 = vld [vmem:[%s9924_s3 + $0x3d0] sm:$0xff] }
 0x1ce   : > { %v2204_v46 = vpop.f32.mrf.mxu1  ;;  %6649 = vpow2.f32 %v1835_v55  ;;  %v2589_v55 = vld [vmem:[%s9926_s5 + $0x38] sm:$0xff] }
 0x1cf   : > { %v2712_v47 = vmul.f32 %v2584_v38, %v2204_v46  ;;  %v1416_v40 = vpop.f32.mrf.mxu2  ;;  %v1557_v38 = vld [vmem:[%s9924_s3 + $0xc0] sm:$0xff] }
 0x1d0   : > { %v1750_v30 = vmul.f32 %v1622_v37, %v1416_v40  ;;  %v1506_v34 = vpop.f32.mrf.mxu3 }
 0x1d1   : > { %5954 = vmatmul.msk.f32.gmra.mxu1 %vm747_vm0, %v8283_v49  ;;  %3132 = vmatmul.f32.gmra.mxu2 %v2712_v47  ;;  %v1221_v22 = vpop.f32.mrf.mxu0  ;;  %v1780_v28 = vmul.f32 %v1652_v8, %v1506_v34  ;;  %v8367_v8 = vld [vmem:[%s9925_s4 + $0xb0] sm:$0xff] }
 0x1d2   : > { %3805 = vmatmul.f32.gmra.mxu3 %v2712_v47  ;;  %v6646_v32 = vpop.eup %6645  ;;  %v1967_v4 = vmul.f32 1.442695, %v1750_v30  ;;  %6071 = vmatmul.msk.f32.gmra.mxu0 %vm747_vm0, %v7946_v26  ;;  %v1623_v26 = vld [vmem:[%s9924_s3 + $0x2d0] sm:$0xff]  ;;  %v1685_v31 = vmul.f32 %v1557_v38, %v1221_v22 }
 0x1d3   : > { %v6648_v36 = vpop.eup %6647  ;;  %2133 = vst [vmem:[#allocation3 + $0x2c0] sm:$0xff] %v6646_v32  ;;  %v2027_v58 = vmul.f32 1.442695, %v1780_v28 }
 0x1d4   : > { %2163 = vst [vmem:[#allocation3 + $0x3b0] sm:$0xff] %v6648_v36  ;;  %6651 = vpow2.f32 %v1967_v4  ;;  %v6650_v43 = vpop.eup %6649  ;;  %v1837_v44 = vmul.f32 1.442695, %v1685_v31 }
 0x1d5   : > { %6653 = vpow2.f32 %v2027_v58  ;;  %2068 = vst [vmem:[#allocation3 + $0xb8] sm:$0xff] %v6650_v43  ;;  %v1656_v43 = vld [vmem:[%s9924_s3 + $0x3d8] sm:$0xff] }
 0x1d6   : > { %v2207_v60 = vpop.f32.mrf.mxu1  ;;  %6655 = vpow2.f32 %v1837_v44  ;;  %v2590_v44 = vld [vmem:[%s9926_s5 + $0x40] sm:$0xff] }
 0x1d7   : > { %v2713_v3 = vmul.f32 %v2585_v52, %v2207_v60  ;;  %v1419_v42 = vpop.f32.mrf.mxu2  ;;  %v1558_v52 = vld [vmem:[%s9924_s3 + $0xc8] sm:$0xff] }
 0x1d8   : > { %v1751_v46 = vmul.f32 %v1623_v26, %v1419_v42  ;;  %v1509_v6 = vpop.f32.mrf.mxu3 }
 0x1d9   : > { %5955 = vmatmul.msk.f32.gmra.mxu1 %vm747_vm0, %v8304_v13  ;;  %3135 = vmatmul.f32.gmra.mxu2 %v2713_v3  ;;  %v1224_v0 = vpop.f32.mrf.mxu0  ;;  %v1781_v45 = vmul.f32 %v1653_v39, %v1509_v6  ;;  %v8388_v39 = vld [vmem:[%s9925_s4 + $0xb8] sm:$0xff] }
 0x1da   : > { %3808 = vmatmul.f32.gmra.mxu3 %v2713_v3  ;;  %v6652_v48 = vpop.eup %6651  ;;  %v1969_v29 = vmul.f32 1.442695, %v1751_v46  ;;  %6072 = vmatmul.msk.f32.gmra.mxu0 %vm747_vm0, %v7988_v11  ;;  %v1624_v11 = vld [vmem:[%s9924_s3 + $0x2d8] sm:$0xff]  ;;  %v1686_v54 = vmul.f32 %v1558_v52, %v1224_v0 }
 0x1db   : > { %v6654_v63 = vpop.eup %6653  ;;  %2134 = vst [vmem:[#allocation3 + $0x2c8] sm:$0xff] %v6652_v48  ;;  %v2029_v50 = vmul.f32 1.442695, %v1781_v45 }
 0x1dc   : > { %2164 = vst [vmem:[#allocation3 + $0x3b8] sm:$0xff] %v6654_v63  ;;  %6657 = vpow2.f32 %v1969_v29  ;;  %v6656_v57 = vpop.eup %6655  ;;  %v1839_v59 = vmul.f32 1.442695, %v1686_v54 }
 0x1dd   : > { %6659 = vpow2.f32 %v2029_v50  ;;  %2069 = vst [vmem:[#allocation3 + $0xc0] sm:$0xff] %v6656_v57  ;;  %v1657_v57 = vld [vmem:[%s9924_s3 + $0x3e0] sm:$0xff] }
 0x1de   : > { %v2210_v21 = vpop.f32.mrf.mxu1  ;;  %6661 = vpow2.f32 %v1839_v59  ;;  %v2591_v59 = vld [vmem:[%s9926_s5 + $0x48] sm:$0xff] }
 0x1df   : > { %v2714_v33 = vmul.f32 %v2586_v35, %v2210_v21  ;;  %v1422_v56 = vpop.f32.mrf.mxu2  ;;  %v1559_v35 = vld [vmem:[%s9924_s3 + $0xd0] sm:$0xff] }
 0x1e0   : > { %v1752_v60 = vmul.f32 %v1624_v11, %v1422_v56  ;;  %v1512_v27 = vpop.f32.mrf.mxu3 }
 0x1e1   : > { %5956 = vmatmul.msk.f32.gmra.mxu1 %vm747_vm0, %v8325_v5  ;;  %3138 = vmatmul.f32.gmra.mxu2 %v2714_v33  ;;  %v1227_v61 = vpop.f32.mrf.mxu0  ;;  %v1782_v7 = vmul.f32 %v1654_v12, %v1512_v27  ;;  %v8409_v12 = vld [vmem:[%s9925_s4 + $0xc0] sm:$0xff] }
 0x1e2   : > { %3811 = vmatmul.f32.gmra.mxu3 %v2714_v33  ;;  %v6658_v9 = vpop.eup %6657  ;;  %v1971_v14 = vmul.f32 1.442695, %v1752_v60  ;;  %6073 = vmatmul.msk.f32.gmra.mxu0 %vm747_vm0, %v8025_v17  ;;  %v1625_v17 = vld [vmem:[%s9924_s3 + $0x2e0] sm:$0xff]  ;;  %v1687_v40 = vmul.f32 %v1559_v35, %v1227_v61 }
 0x1e3   : > { %v6660_v37 = vpop.eup %6659  ;;  %2135 = vst [vmem:[#allocation3 + $0x2d0] sm:$0xff] %v6658_v9  ;;  %v2031_v1 = vmul.f32 1.442695, %v1782_v7 }
 0x1e4   : > { %2165 = vst [vmem:[#allocation3 + $0x3c0] sm:$0xff] %v6660_v37  ;;  %6663 = vpow2.f32 %v1971_v14  ;;  %v6662_v34 = vpop.eup %6661  ;;  %v1841_v22 = vmul.f32 1.442695, %v1687_v40 }
 0x1e5   : > { %6665 = vpow2.f32 %v2031_v1  ;;  %2070 = vst [vmem:[#allocation3 + $0xc8] sm:$0xff] %v6662_v34  ;;  %v1658_v34 = vld [vmem:[%s9924_s3 + $0x3e8] sm:$0xff] }
 0x1e6   : > { %v2213_v47 = vpop.f32.mrf.mxu1  ;;  %6667 = vpow2.f32 %v1841_v22  ;;  %v2592_v22 = vld [vmem:[%s9926_s5 + $0x50] sm:$0xff] }
 0x1e7   : > { %v2715_v24 = vmul.f32 %v2587_v10, %v2213_v47  ;;  %v1425_v30 = vpop.f32.mrf.mxu2  ;;  %v1560_v10 = vld [vmem:[%s9924_s3 + $0xd8] sm:$0xff] }
 0x1e8   : > { %v1753_v21 = vmul.f32 %v1625_v17, %v1425_v30  ;;  %v1515_v28 = vpop.f32.mrf.mxu3 }
 0x1e9   : > { %5957 = vmatmul.msk.f32.gmra.mxu1 %vm747_vm0, %v8346_v16  ;;  %3141 = vmatmul.f32.gmra.mxu2 %v2715_v24  ;;  %v1230_v32 = vpop.f32.mrf.mxu0  ;;  %v1783_v4 = vmul.f32 %v1655_v19, %v1515_v28  ;;  %v8430_v19 = vld [vmem:[%s9925_s4 + $0xc8] sm:$0xff] }
 0x1ea   : > { %3814 = vmatmul.f32.gmra.mxu3 %v2715_v24  ;;  %v6664_v36 = vpop.eup %6663  ;;  %v1973_v38 = vmul.f32 1.442695, %v1753_v21  ;;  %6074 = vmatmul.msk.f32.gmra.mxu0 %vm747_vm0, %v8062_v23  ;;  %v1626_v23 = vld [vmem:[%s9924_s3 + $0x2e8] sm:$0xff]  ;;  %v1688_v42 = vmul.f32 %v1560_v10, %v1230_v32 }
 0x1eb   : > { %v6666_v26 = vpop.eup %6665  ;;  %2136 = vst [vmem:[#allocation3 + $0x2d8] sm:$0xff] %v6664_v36  ;;  %v2033_v31 = vmul.f32 1.442695, %v1783_v4 }
 0x1ec   : > { %2166 = vst [vmem:[#allocation3 + $0x3c8] sm:$0xff] %v6666_v26  ;;  %6669 = vpow2.f32 %v1973_v38  ;;  %v6668_v6 = vpop.eup %6667  ;;  %v1843_v0 = vmul.f32 1.442695, %v1688_v42 }
 0x1ed   : > { %6671 = vpow2.f32 %v2033_v31  ;;  %2071 = vst [vmem:[#allocation3 + $0xd0] sm:$0xff] %v6668_v6  ;;  %v1659_v6 = vld [vmem:[%s9924_s3 + $0x3f0] sm:$0xff] }
 0x1ee   : > { %v2216_v3 = vpop.f32.mrf.mxu1  ;;  %6673 = vpow2.f32 %v1843_v0  ;;  %v2593_v0 = vld [vmem:[%s9926_s5 + $0x58] sm:$0xff] }
 0x1ef   : > { %v2716_v41 = vmul.f32 %v2588_v2, %v2216_v3  ;;  %v1428_v46 = vpop.f32.mrf.mxu2  ;;  %v1561_v2 = vld [vmem:[%s9924_s3 + $0xe0] sm:$0xff] }
 0x1f0   : > { %v1754_v47 = vmul.f32 %v1626_v23, %v1428_v46  ;;  %v1518_v45 = vpop.f32.mrf.mxu3 }
 0x1f1   : > { %5958 = vmatmul.msk.f32.gmra.mxu1 %vm747_vm0, %v8367_v8  ;;  %3144 = vmatmul.f32.gmra.mxu2 %v2716_v41  ;;  %v1233_v48 = vpop.f32.mrf.mxu0  ;;  %v1784_v29 = vmul.f32 %v1656_v43, %v1518_v45  ;;  %v8451_v43 = vld [vmem:[%s9925_s4 + $0xd0] sm:$0xff] }
 0x1f2   : > { %3817 = vmatmul.f32.gmra.mxu3 %v2716_v41  ;;  %v6670_v63 = vpop.eup %6669  ;;  %v1975_v52 = vmul.f32 1.442695, %v1754_v47  ;;  %6075 = vmatmul.msk.f32.gmra.mxu0 %vm747_vm0, %v8099_v53  ;;  %v1627_v53 = vld [vmem:[%s9924_s3 + $0x2f0] sm:$0xff]  ;;  %v1689_v56 = vmul.f32 %v1561_v2, %v1233_v48 }
 0x1f3   : > { %v6672_v11 = vpop.eup %6671  ;;  %2137 = vst [vmem:[#allocation3 + $0x2e0] sm:$0xff] %v6670_v63  ;;  %v2035_v54 = vmul.f32 1.442695, %v1784_v29 }
 0x1f4   : > { %2167 = vst [vmem:[#allocation3 + $0x3d0] sm:$0xff] %v6672_v11  ;;  %6675 = vpow2.f32 %v1975_v52  ;;  %v6674_v27 = vpop.eup %6673  ;;  %v1845_v61 = vmul.f32 1.442695, %v1689_v56 }
 0x1f5   : > { %6677 = vpow2.f32 %v2035_v54  ;;  %2072 = vst [vmem:[#allocation3 + $0xd8] sm:$0xff] %v6674_v27  ;;  %v1660_v27 = vld [vmem:[%s9924_s3 + $0x3f8] sm:$0xff] }
 0x1f6   : > { %v2219_v33 = vpop.f32.mrf.mxu1  ;;  %6679 = vpow2.f32 %v1845_v61  ;;  %v2594_v61 = vld [vmem:[%s9926_s5 + $0x60] sm:$0xff] }
 0x1f7   : > { %v2717_v58 = vmul.f32 %v2589_v55, %v2219_v33  ;;  %v1431_v60 = vpop.f32.mrf.mxu2  ;;  %v1562_v55 = vld [vmem:[%s9924_s3 + $0xe8] sm:$0xff] }
 0x1f8   : > { %v1755_v3 = vmul.f32 %v1627_v53, %v1431_v60  ;;  %v1521_v7 = vpop.f32.mrf.mxu3 }
 0x1f9   : > { %5959 = vmatmul.msk.f32.gmra.mxu1 %vm747_vm0, %v8388_v39  ;;  %3147 = vmatmul.f32.gmra.mxu2 %v2717_v58  ;;  %v1236_v9 = vpop.f32.mrf.mxu0  ;;  %v1785_v14 = vmul.f32 %v1657_v57, %v1521_v7  ;;  %v8472_v57 = vld [vmem:[%s9925_s4 + $0xd8] sm:$0xff] }
 0x1fa   : > { %3820 = vmatmul.f32.gmra.mxu3 %v2717_v58  ;;  %v6676_v37 = vpop.eup %6675  ;;  %v1977_v35 = vmul.f32 1.442695, %v1755_v3  ;;  %6076 = vmatmul.msk.f32.gmra.mxu0 %vm747_vm0, %v8133_v20  ;;  %v1628_v20 = vld [vmem:[%s9924_s3 + $0x2f8] sm:$0xff]  ;;  %v1690_v30 = vmul.f32 %v1562_v55, %v1236_v9 }
 0x1fb   : > { %v6678_v17 = vpop.eup %6677  ;;  %2138 = vst [vmem:[#allocation3 + $0x2e8] sm:$0xff] %v6676_v37  ;;  %v2037_v40 = vmul.f32 1.442695, %v1785_v14 }
 0x1fc   : > { %2168 = vst [vmem:[#allocation3 + $0x3d8] sm:$0xff] %v6678_v17  ;;  %6681 = vpow2.f32 %v1977_v35  ;;  %v6680_v28 = vpop.eup %6679  ;;  %v1847_v32 = vmul.f32 1.442695, %v1690_v30 }
 0x1fd   : > { %6683 = vpow2.f32 %v2037_v40  ;;  %2073 = vst [vmem:[#allocation3 + $0xe0] sm:$0xff] %v6680_v28 }
 0x1fe   : > { %v2222_v24 = vpop.f32.mrf.mxu1  ;;  %6685 = vpow2.f32 %v1847_v32 }
 0x1ff   : > { %v2718_v50 = vmul.f32 %v2590_v44, %v2222_v24  ;;  %v1434_v21 = vpop.f32.mrf.mxu2  ;;  %v1563_v44 = vld [vmem:[%s9924_s3 + $0xf0] sm:$0xff] }
 0x200   : > { %v1756_v33 = vmul.f32 %v1628_v20, %v1434_v21  ;;  %v1524_v4 = vpop.f32.mrf.mxu3 }
 0x201   : > { %5960 = vmatmul.msk.f32.gmra.mxu1 %vm747_vm0, %v8409_v12  ;;  %3150 = vmatmul.f32.gmra.mxu2 %v2718_v50  ;;  %v1239_v36 = vpop.f32.mrf.mxu0  ;;  %v1786_v38 = vmul.f32 %v1658_v34, %v1524_v4  ;;  %v8493_v34 = vld [vmem:[%s9925_s4 + $0xe0] sm:$0xff] }
 0x202   : > { %3823 = vmatmul.f32.gmra.mxu3 %v2718_v50  ;;  %v6682_v26 = vpop.eup %6681  ;;  %v1979_v10 = vmul.f32 1.442695, %v1756_v33  ;;  %6077 = vmatmul.msk.f32.gmra.mxu0 %vm747_vm0, %v8169_v51  ;;  %v1629_v51 = vld [vmem:[%s9924_s3 + $0x300] sm:$0xff]  ;;  %v1691_v46 = vmul.f32 %v1563_v44, %v1239_v36  ;;  %v8520_v44 = vld [vmem:[%s9925_s4 + $0xf0] sm:$0xff] }
 0x203   : > { %v6684_v23 = vpop.eup %6683  ;;  %2139 = vst [vmem:[#allocation3 + $0x2f0] sm:$0xff] %v6682_v26  ;;  %v2039_v42 = vmul.f32 1.442695, %v1786_v38  ;;  %v8508_v26 = vld [vmem:[%s9925_s4 + $0xe8] sm:$0xff] }
 0x204   : > { %2169 = vst [vmem:[#allocation3 + $0x3e0] sm:$0xff] %v6684_v23  ;;  %6687 = vpow2.f32 %v1979_v10  ;;  %v6686_v45 = vpop.eup %6685  ;;  %v1849_v48 = vmul.f32 1.442695, %v1691_v46 }
 0x205   : > { %6689 = vpow2.f32 %v2039_v42  ;;  %2074 = vst [vmem:[#allocation3 + $0xe8] sm:$0xff] %v6686_v45 }
 0x206   : > { %v2225_v41 = vpop.f32.mrf.mxu1  ;;  %6691 = vpow2.f32 %v1849_v48 }
 0x207   : > { %v2719_v1 = vmul.f32 %v2591_v59, %v2225_v41  ;;  %v1437_v47 = vpop.f32.mrf.mxu2  ;;  %v1564_v59 = vld [vmem:[%s9924_s3 + $0xf8] sm:$0xff] }
 0x208   : > { %v1757_v24 = vmul.f32 %v1629_v51, %v1437_v47  ;;  %v1527_v29 = vpop.f32.mrf.mxu3  ;;  %v2597_v51 = vld [vmem:[%s9926_s5 + $0x78] sm:$0xff]  ;;  %v2598_v47 = vld [vmem:[%s9926_s5 + $0x80] sm:$0xff] }
 0x209   : > { %5961 = vmatmul.msk.f32.gmra.mxu1 %vm747_vm0, %v8430_v19  ;;  %3153 = vmatmul.f32.gmra.mxu2 %v2719_v1  ;;  %v1242_v63 = vpop.f32.mrf.mxu0  ;;  %v1787_v52 = vmul.f32 %v1659_v6, %v1527_v29 }
 0x20a   : > { %3826 = vmatmul.f32.gmra.mxu3 %v2719_v1  ;;  %v6688_v11 = vpop.eup %6687  ;;  %v1981_v2 = vmul.f32 1.442695, %v1757_v24  ;;  %6078 = vmatmul.msk.f32.gmra.mxu0 %vm747_vm0, %v8193_v18  ;;  %v1630_v18 = vld [vmem:[%s9924_s3 + $0x308] sm:$0xff]  ;;  %v1692_v60 = vmul.f32 %v1564_v59, %v1242_v63 }
 0x20b   : > { %v6690_v53 = vpop.eup %6689  ;;  %2140 = vst [vmem:[#allocation3 + $0x2f8] sm:$0xff] %v6688_v11  ;;  %v2041_v56 = vmul.f32 1.442695, %v1787_v52  ;;  %v2599_v63 = vld [vmem:[%s9926_s5 + $0x88] sm:$0xff] }
 0x20c   : > { %2170 = vst [vmem:[#allocation3 + $0x3e8] sm:$0xff] %v6690_v53  ;;  %6693 = vpow2.f32 %v1981_v2  ;;  %v6692_v7 = vpop.eup %6691  ;;  %v1851_v9 = vmul.f32 1.442695, %v1692_v60  ;;  %v8556_v2 = vld [vmem:[%s9925_s4 + $0x108] sm:$0xff] }
 0x20d   : > { %6695 = vpow2.f32 %v2041_v56  ;;  %2075 = vst [vmem:[#allocation3 + $0xf0] sm:$0xff] %v6692_v7  ;;  %v2600_v56 = vld [vmem:[%s9926_s5 + $0x90] sm:$0xff]  ;;  %v2601_v7 = vld [vmem:[%s9926_s5 + $0x98] sm:$0xff] }
 0x20e   : > { %v2228_v58 = vpop.f32.mrf.mxu1  ;;  %6697 = vpow2.f32 %v1851_v9 }
 0x20f   : > { %v2720_v31 = vmul.f32 %v2592_v22, %v2228_v58  ;;  %v1440_v3 = vpop.f32.mrf.mxu2  ;;  %v1565_v22 = vld [vmem:[%s9924_s3 + $0x100] sm:$0xff] }
 0x210   : > { %v1758_v41 = vmul.f32 %v1630_v18, %v1440_v3  ;;  %v1530_v14 = vpop.f32.mrf.mxu3 }
 0x211   : > { %5962 = vmatmul.msk.f32.gmra.mxu1 %vm747_vm0, %v8451_v43  ;;  %3156 = vmatmul.f32.gmra.mxu2 %v2720_v31  ;;  %v1245_v37 = vpop.f32.mrf.mxu0  ;;  %v1788_v35 = vmul.f32 %v1660_v27, %v1530_v14 }
 0x212   : > { %3829 = vmatmul.f32.gmra.mxu3 %v2720_v31  ;;  %v6694_v17 = vpop.eup %6693  ;;  %v1983_v55 = vmul.f32 1.442695, %v1758_v41  ;;  %6079 = vmatmul.msk.f32.gmra.mxu0 %vm747_vm0, %v8216_v25  ;;  %v1693_v21 = vmul.f32 %v1565_v22, %v1245_v37  ;;  %v2595_v25 = vld [vmem:[%s9926_s5 + $0x68] sm:$0xff]  ;;  %v2596_v31 = vld [vmem:[%s9926_s5 + $0x70] sm:$0xff]  ;;  %v8592_v22 = vld [vmem:[%s9925_s4 + $0x120] sm:$0xff] }
 0x213   : > { %v6696_v20 = vpop.eup %6695  ;;  %2141 = vst [vmem:[#allocation3 + $0x300] sm:$0xff] %v6694_v17  ;;  %v2043_v30 = vmul.f32 1.442695, %v1788_v35  ;;  %v2602_v17 = vld [vmem:[%s9926_s5 + $0xa0] sm:$0xff] }
 0x214   : > { %2171 = vst [vmem:[#allocation3 + $0x3f0] sm:$0xff] %v6696_v20  ;;  %6699 = vpow2.f32 %v1983_v55  ;;  %v6698_v28 = vpop.eup %6697  ;;  %v1853_v32 = vmul.f32 1.442695, %v1693_v21 }
 0x215   : > { %6701 = vpow2.f32 %v2043_v30  ;;  %2076 = vst [vmem:[#allocation3 + $0xf8] sm:$0xff] %v6698_v28 }
 0x216   : > { %v2231_v50 = vpop.f32.mrf.mxu1  ;;  %6703 = vpow2.f32 %v1853_v32 }
 0x217   : > { %v2721_v54 = vmul.f32 %v2593_v0, %v2231_v50 }
 0x219   : > { %5963 = vmatmul.msk.f32.gmra.mxu1 %vm747_vm0, %v8472_v57  ;;  %3159 = vmatmul.f32.gmra.mxu2 %v2721_v54  ;;  %v4457_v33 = vpop.f32.mrf.mxu0 }
 0x21a   : > { %3832 = vmatmul.f32.gmra.mxu3 %v2721_v54  ;;  %v6700_v36 = vpop.eup %6699  ;;  %6080 = vmatmul.msk.f32.gmra.mxu0 %vm747_vm0, %v8239_v62 }
 0x21b   : > { %v6702_v38 = vpop.eup %6701  ;;  %2142 = vst [vmem:[#allocation3 + $0x308] sm:$0xff] %v6700_v36  ;;  %v8604_v36 = vld [vmem:[%s9925_s4 + $0x128] sm:$0xff] }
 0x21c   : > { %2172 = vst [vmem:[#allocation3 + $0x3f8] sm:$0xff] %v6702_v38  ;;  %v6704_v10 = vpop.eup %6703  ;;  %v2604_v38 = vld [vmem:[%s9926_s5 + $0xb0] sm:$0xff] }
 0x21d   : > { %2077 = vst [vmem:[#allocation3 + $0x100] sm:$0xff] %v6704_v10 }
 0x21e   : > { %v2234_v1 = vpop.f32.mrf.mxu1 }
 0x21f   : > { %v2722_v40 = vmul.f32 %v2594_v61, %v2234_v1  ;;  %v8568_v61 = vld [vmem:[%s9925_s4 + $0x110] sm:$0xff]  ;;  %v8580_v1 = vld [vmem:[%s9925_s4 + $0x118] sm:$0xff] }
 0x221   : > { %5964 = vmatmul.msk.f32.gmra.mxu1 %vm747_vm0, %v8493_v34  ;;  %3162 = vmatmul.f32.gmra.mxu2 %v2722_v40  ;;  %v4460_v23 = vpop.f32.mrf.mxu0 }
 0x222   : > { %3835 = vmatmul.f32.gmra.mxu3 %v2722_v40  ;;  %6081 = vmatmul.msk.f32.gmra.mxu0 %vm747_vm0, %v8262_v15  ;;  %v8532_v15 = vld [vmem:[%s9925_s4 + $0xf8] sm:$0xff] }
 0x226   : > { %v2237_v4 = vpop.f32.mrf.mxu1 }
 0x227   : > { %v2723_v58 = vmul.f32 %v2595_v25, %v2237_v4  ;;  %v2603_v25 = vld [vmem:[%s9926_s5 + $0xa8] sm:$0xff] }
 0x229   : > { %5965 = vmatmul.msk.f32.gmra.mxu1 %vm747_vm0, %v8508_v26  ;;  %3165 = vmatmul.f32.gmra.mxu2 %v2723_v58  ;;  %v4463_v46 = vpop.f32.mrf.mxu0 }
 0x22a   : > { %3838 = vmatmul.f32.gmra.mxu3 %v2723_v58  ;;  %6082 = vmatmul.msk.f32.gmra.mxu0 %vm747_vm0, %v8283_v49  ;;  %v8544_v49 = vld [vmem:[%s9925_s4 + $0x100] sm:$0xff] }
 0x22e   : > { %v2240_v42 = vpop.f32.mrf.mxu1 }
 0x22f   : > { %v2724_v62 = vmul.f32 %v2596_v31, %v2240_v42 }
 0x231   : > { %5966 = vmatmul.msk.f32.gmra.mxu1 %vm747_vm0, %v8520_v44  ;;  %3168 = vmatmul.f32.gmra.mxu2 %v2724_v62  ;;  %v4466_v45 = vpop.f32.mrf.mxu0 }
 0x232   : > { %3841 = vmatmul.f32.gmra.mxu3 %v2724_v62  ;;  %6083 = vmatmul.msk.f32.gmra.mxu0 %vm747_vm0, %v8304_v13  ;;  %v8616_v62 = vld [vmem:[%s9925_s4 + $0x130] sm:$0xff] }
 0x236   : > { %v2243_v6 = vpop.f32.mrf.mxu1 }
 0x237   : > { %v2725_v0 = vmul.f32 %v2597_v51, %v2243_v6 }
 0x239   : > { %5967 = vmatmul.msk.f32.gmra.mxu1 %vm747_vm0, %v8532_v15  ;;  %3171 = vmatmul.f32.gmra.mxu2 %v2725_v0  ;;  %v4469_v52 = vpop.f32.mrf.mxu0 }
 0x23a   : > { %3844 = vmatmul.f32.gmra.mxu3 %v2725_v0  ;;  %6084 = vmatmul.msk.f32.gmra.mxu0 %vm747_vm0, %v8325_v5 }
 0x23e   : > { %v2246_v48 = vpop.f32.mrf.mxu1 }
 0x23f   : > { %v2726_v24 = vmul.f32 %v2598_v47, %v2246_v48  ;;  %v8628_v48 = vld [vmem:[%s9925_s4 + $0x138] sm:$0xff] }
 0x241   : > { %5968 = vmatmul.msk.f32.gmra.mxu1 %vm747_vm0, %v8544_v49  ;;  %3174 = vmatmul.f32.gmra.mxu2 %v2726_v24  ;;  %v4472_v18 = vpop.f32.mrf.mxu0 }
 0x242   : > { %3847 = vmatmul.f32.gmra.mxu3 %v2726_v24  ;;  %6085 = vmatmul.msk.f32.gmra.mxu0 %vm747_vm0, %v8346_v16 }
 0x244   : > { %v3127_v29 = vpop.f32.mrf.mxu2 }
 0x245   : > { %3511 = vst [vmem:[#allocation5] sm:$0xff] %v3127_v29  ;;  %v3800_v50 = vpop.f32.mrf.mxu3  ;;  %v2606_v29 = vld [vmem:[%s9926_s5 + $0xc0] sm:$0xff] }
 0x246   : > { %v2249_v11 = vpop.f32.mrf.mxu1  ;;  %v4841_v13 = vmul.f32 %v4457_v33, %v3800_v50 }
 0x247   : > { %v2727_v54 = vmul.f32 %v2599_v63, %v2249_v11 }
 0x248   : > { %4969 = vst [vmem:[#allocation4] sm:$0xff] %v4841_v13  ;;  %v8640_v13 = vld [vmem:[%s9925_s4 + $0x140] sm:$0xff] }
 0x249   : > { %5969 = vmatmul.msk.f32.gmra.mxu1 %vm747_vm0, %v8556_v2  ;;  %3177 = vmatmul.f32.gmra.mxu2 %v2727_v54  ;;  %v4475_v41 = vpop.f32.mrf.mxu0 }
 0x24a   : > { %3850 = vmatmul.f32.gmra.mxu3 %v2727_v54  ;;  %6086 = vmatmul.msk.f32.gmra.mxu0 %vm747_vm0, %v8367_v8 }
 0x24c   : > { %v3130_v53 = vpop.f32.mrf.mxu2 }
 0x24d   : > { %3512 = vst [vmem:[#allocation5 + $0x8] sm:$0xff] %v3130_v53  ;;  %v3803_v59 = vpop.f32.mrf.mxu3  ;;  %v2607_v53 = vld [vmem:[%s9926_s5 + $0xc8] sm:$0xff] }
 0x24e   : > { %v2252_v60 = vpop.f32.mrf.mxu1  ;;  %v4842_v5 = vmul.f32 %v4460_v23, %v3803_v59 }
 0x24f   : > { %v2728_v27 = vmul.f32 %v2600_v56, %v2252_v60 }
 0x250   : > { %4970 = vst [vmem:[#allocation4 + $0x8] sm:$0xff] %v4842_v5  ;;  %v8652_v5 = vld [vmem:[%s9925_s4 + $0x148] sm:$0xff] }
 0x251   : > { %5970 = vmatmul.msk.f32.gmra.mxu1 %vm747_vm0, %v8568_v61  ;;  %3180 = vmatmul.f32.gmra.mxu2 %v2728_v27  ;;  %v4478_v55 = vpop.f32.mrf.mxu0 }
 0x252   : > { %3853 = vmatmul.f32.gmra.mxu3 %v2728_v27  ;;  %6087 = vmatmul.msk.f32.gmra.mxu0 %vm747_vm0, %v8388_v39 }
 0x254   : > { %v3133_v3 = vpop.f32.mrf.mxu2 }
 0x255   : > { %3513 = vst [vmem:[#allocation5 + $0x10] sm:$0xff] %v3133_v3  ;;  %v3806_v9 = vpop.f32.mrf.mxu3  ;;  %v2608_v3 = vld [vmem:[%s9926_s5 + $0xd0] sm:$0xff] }
 0x256   : > { %v2255_v14 = vpop.f32.mrf.mxu1  ;;  %v4843_v16 = vmul.f32 %v4463_v46, %v3806_v9  ;;  %v2605_v46 = vld [vmem:[%s9926_s5 + $0xb8] sm:$0xff] }
 0x257   : > { %v2729_v37 = vmul.f32 %v2601_v7, %v2255_v14 }
 0x258   : > { %4971 = vst [vmem:[#allocation4 + $0x10] sm:$0xff] %v4843_v16  ;;  %v8664_v16 = vld [vmem:[%s9925_s4 + $0x150] sm:$0xff] }
 0x259   : > { %5971 = vmatmul.msk.f32.gmra.mxu1 %vm747_vm0, %v8580_v1  ;;  %3183 = vmatmul.f32.gmra.mxu2 %v2729_v37  ;;  %v4481_v32 = vpop.f32.mrf.mxu0 }
 0x25a   : > { %3856 = vmatmul.f32.gmra.mxu3 %v2729_v37  ;;  %6088 = vmatmul.msk.f32.gmra.mxu0 %vm747_vm0, %v8409_v12 }
 0x25c   : > { %v3136_v35 = vpop.f32.mrf.mxu2 }
 0x25d   : > { %3514 = vst [vmem:[#allocation5 + $0x18] sm:$0xff] %v3136_v35  ;;  %v3809_v40 = vpop.f32.mrf.mxu3  ;;  %v2609_v35 = vld [vmem:[%s9926_s5 + $0xd8] sm:$0xff] }
 0x25e   : > { %v2258_v20 = vpop.f32.mrf.mxu1  ;;  %v4844_v8 = vmul.f32 %v4466_v45, %v3809_v40 }
 0x25f   : > { %v2730_v30 = vmul.f32 %v2602_v17, %v2258_v20 }
 0x260   : > { %4972 = vst [vmem:[#allocation4 + $0x18] sm:$0xff] %v4844_v8  ;;  %v8676_v8 = vld [vmem:[%s9925_s4 + $0x158] sm:$0xff] }
 0x261   : > { %5972 = vmatmul.msk.f32.gmra.mxu1 %vm747_vm0, %v8592_v22  ;;  %3186 = vmatmul.f32.gmra.mxu2 %v2730_v30  ;;  %v4484_v10 = vpop.f32.mrf.mxu0 }
 0x262   : > { %3859 = vmatmul.f32.gmra.mxu3 %v2730_v30  ;;  %6089 = vmatmul.msk.f32.gmra.mxu0 %vm747_vm0, %v8430_v19 }
 0x264   : > { %v3139_v21 = vpop.f32.mrf.mxu2 }
 0x265   : > { %3515 = vst [vmem:[#allocation5 + $0x20] sm:$0xff] %v3139_v21  ;;  %v3812_v28 = vpop.f32.mrf.mxu3  ;;  %v2610_v21 = vld [vmem:[%s9926_s5 + $0xe0] sm:$0xff] }
 0x266   : > { %v2261_v33 = vpop.f32.mrf.mxu1  ;;  %v4845_v39 = vmul.f32 %v4469_v52, %v3812_v28 }
 0x267   : > { %v2731_v4 = vmul.f32 %v2603_v25, %v2261_v33 }
 0x268   : > { %4973 = vst [vmem:[#allocation4 + $0x20] sm:$0xff] %v4845_v39  ;;  %v8688_v39 = vld [vmem:[%s9925_s4 + $0x160] sm:$0xff] }
 0x269   : > { %5973 = vmatmul.msk.f32.gmra.mxu1 %vm747_vm0, %v8604_v36  ;;  %3189 = vmatmul.f32.gmra.mxu2 %v2731_v4  ;;  %v4487_v0 = vpop.f32.mrf.mxu0 }
 0x26a   : > { %3862 = vmatmul.f32.gmra.mxu3 %v2731_v4  ;;  %6090 = vmatmul.msk.f32.gmra.mxu0 %vm747_vm0, %v8451_v43 }
 0x26c   : > { %v3142_v58 = vpop.f32.mrf.mxu2 }
 0x26d   : > { %3516 = vst [vmem:[#allocation5 + $0x28] sm:$0xff] %v3142_v58  ;;  %v3815_v31 = vpop.f32.mrf.mxu3  ;;  %v2611_v58 = vld [vmem:[%s9926_s5 + $0xe8] sm:$0xff] }
 0x26e   : > { %v2264_v23 = vpop.f32.mrf.mxu1  ;;  %v4846_v12 = vmul.f32 %v4472_v18, %v3815_v31 }
 0x26f   : > { %v2732_v42 = vmul.f32 %v2604_v38, %v2264_v23 }
 0x270   : > { %4974 = vst [vmem:[#allocation4 + $0x28] sm:$0xff] %v4846_v12  ;;  %v8700_v12 = vld [vmem:[%s9925_s4 + $0x168] sm:$0xff] }
 0x271   : > { %5974 = vmatmul.msk.f32.gmra.mxu1 %vm747_vm0, %v8616_v62  ;;  %3192 = vmatmul.f32.gmra.mxu2 %v2732_v42  ;;  %v4490_v50 = vpop.f32.mrf.mxu0 }
 0x272   : > { %3865 = vmatmul.f32.gmra.mxu3 %v2732_v42  ;;  %6091 = vmatmul.msk.f32.gmra.mxu0 %vm747_vm0, %v8472_v57 }
 0x274   : > { %v3145_v51 = vpop.f32.mrf.mxu2 }
 0x275   : > { %3517 = vst [vmem:[#allocation5 + $0x30] sm:$0xff] %v3145_v51  ;;  %v3818_v6 = vpop.f32.mrf.mxu3  ;;  %v2612_v51 = vld [vmem:[%s9926_s5 + $0xf0] sm:$0xff] }
 0x276   : > { %v2267_v47 = vpop.f32.mrf.mxu1  ;;  %v4847_v19 = vmul.f32 %v4475_v41, %v3818_v6 }
 0x277   : > { %v2733_v45 = vmul.f32 %v2605_v46, %v2267_v47 }
 0x278   : > { %4975 = vst [vmem:[#allocation4 + $0x30] sm:$0xff] %v4847_v19  ;;  %v8712_v19 = vld [vmem:[%s9925_s4 + $0x170] sm:$0xff] }
 0x279   : > { %5975 = vmatmul.msk.f32.gmra.mxu1 %vm747_vm0, %v8628_v48  ;;  %3195 = vmatmul.f32.gmra.mxu2 %v2733_v45  ;;  %v4493_v59 = vpop.f32.mrf.mxu0 }
 0x27a   : > { %3868 = vmatmul.f32.gmra.mxu3 %v2733_v45  ;;  %6092 = vmatmul.msk.f32.gmra.mxu0 %vm747_vm0, %v8493_v34 }
 0x27c   : > { %v3148_v24 = vpop.f32.mrf.mxu2 }
 0x27d   : > { %3518 = vst [vmem:[#allocation5 + $0x38] sm:$0xff] %v3148_v24  ;;  %v3821_v63 = vpop.f32.mrf.mxu3  ;;  %v2613_v24 = vld [vmem:[%s9926_s5 + $0xf8] sm:$0xff] }
 0x27e   : > { %v2270_v52 = vpop.f32.mrf.mxu1  ;;  %v4848_v43 = vmul.f32 %v4478_v55, %v3821_v63 }
 0x27f   : > { %v2734_v11 = vmul.f32 %v2606_v29, %v2270_v52 }
 0x280   : > { %4976 = vst [vmem:[#allocation4 + $0x38] sm:$0xff] %v4848_v43  ;;  %v8724_v43 = vld [vmem:[%s9925_s4 + $0x178] sm:$0xff] }
 0x281   : > { %5976 = vmatmul.msk.f32.gmra.mxu1 %vm747_vm0, %v8640_v13  ;;  %3198 = vmatmul.f32.gmra.mxu2 %v2734_v11  ;;  %v4496_v9 = vpop.f32.mrf.mxu0 }
 0x282   : > { %3871 = vmatmul.f32.gmra.mxu3 %v2734_v11  ;;  %6093 = vmatmul.msk.f32.gmra.mxu0 %vm747_vm0, %v8508_v26 }
 0x284   : > { %v3151_v54 = vpop.f32.mrf.mxu2 }
 0x285   : > { %3519 = vst [vmem:[#allocation5 + $0x40] sm:$0xff] %v3151_v54  ;;  %v3824_v56 = vpop.f32.mrf.mxu3  ;;  %v2614_v54 = vld [vmem:[%s9926_s5 + $0x100] sm:$0xff] }
 0x286   : > { %v2273_v18 = vpop.f32.mrf.mxu1  ;;  %v4849_v57 = vmul.f32 %v4481_v32, %v3824_v56 }
 0x287   : > { %v2735_v60 = vmul.f32 %v2607_v53, %v2273_v18 }
 0x288   : > { %4977 = vst [vmem:[#allocation4 + $0x40] sm:$0xff] %v4849_v57  ;;  %v8736_v57 = vld [vmem:[%s9925_s4 + $0x180] sm:$0xff] }
 0x289   : > { %5977 = vmatmul.msk.f32.gmra.mxu1 %vm747_vm0, %v8652_v5  ;;  %3201 = vmatmul.f32.gmra.mxu2 %v2735_v60  ;;  %v4499_v40 = vpop.f32.mrf.mxu0 }
 0x28a   : > { %3874 = vmatmul.f32.gmra.mxu3 %v2735_v60  ;;  %6094 = vmatmul.msk.f32.gmra.mxu0 %vm747_vm0, %v8520_v44 }
 0x28c   : > { %v3154_v27 = vpop.f32.mrf.mxu2 }
 0x28d   : > { %3520 = vst [vmem:[#allocation5 + $0x48] sm:$0xff] %v3154_v27  ;;  %v3827_v7 = vpop.f32.mrf.mxu3  ;;  %v2615_v27 = vld [vmem:[%s9926_s5 + $0x108] sm:$0xff] }
 0x28e   : > { %v2276_v41 = vpop.f32.mrf.mxu1  ;;  %v4850_v34 = vmul.f32 %v4484_v10, %v3827_v7 }
 0x28f   : > { %v2736_v14 = vmul.f32 %v2608_v3, %v2276_v41 }
 0x290   : > { %4978 = vst [vmem:[#allocation4 + $0x48] sm:$0xff] %v4850_v34  ;;  %v8748_v34 = vld [vmem:[%s9925_s4 + $0x188] sm:$0xff] }
 0x291   : > { %5978 = vmatmul.msk.f32.gmra.mxu1 %vm747_vm0, %v8664_v16  ;;  %3204 = vmatmul.f32.gmra.mxu2 %v2736_v14  ;;  %v4502_v28 = vpop.f32.mrf.mxu0 }
 0x292   : > { %3877 = vmatmul.f32.gmra.mxu3 %v2736_v14  ;;  %6095 = vmatmul.msk.f32.gmra.mxu0 %vm747_vm0, %v8532_v15 }
 0x294   : > { %v3157_v37 = vpop.f32.mrf.mxu2 }
 0x295   : > { %3521 = vst [vmem:[#allocation5 + $0x50] sm:$0xff] %v3157_v37  ;;  %v3830_v17 = vpop.f32.mrf.mxu3  ;;  %v2616_v37 = vld [vmem:[%s9926_s5 + $0x110] sm:$0xff] }
 0x296   : > { %v2279_v55 = vpop.f32.mrf.mxu1  ;;  %v4851_v26 = vmul.f32 %v4487_v0, %v3830_v17 }
 0x297   : > { %v2737_v20 = vmul.f32 %v2609_v35, %v2279_v55 }
 0x298   : > { %4979 = vst [vmem:[#allocation4 + $0x50] sm:$0xff] %v4851_v26  ;;  %v8760_v26 = vld [vmem:[%s9925_s4 + $0x190] sm:$0xff] }
 0x299   : > { %5979 = vmatmul.msk.f32.gmra.mxu1 %vm747_vm0, %v8676_v8  ;;  %3207 = vmatmul.f32.gmra.mxu2 %v2737_v20  ;;  %v4505_v31 = vpop.f32.mrf.mxu0 }
 0x29a   : > { %3880 = vmatmul.f32.gmra.mxu3 %v2737_v20  ;;  %6096 = vmatmul.msk.f32.gmra.mxu0 %vm747_vm0, %v8544_v49 }
 0x29c   : > { %v3160_v30 = vpop.f32.mrf.mxu2 }
 0x29d   : > { %3522 = vst [vmem:[#allocation5 + $0x58] sm:$0xff] %v3160_v30  ;;  %v3833_v25 = vpop.f32.mrf.mxu3  ;;  %v2617_v30 = vld [vmem:[%s9926_s5 + $0x118] sm:$0xff] }
 0x29e   : > { %v2282_v32 = vpop.f32.mrf.mxu1  ;;  %v4852_v44 = vmul.f32 %v4490_v50, %v3833_v25 }
 0x29f   : > { %v2738_v33 = vmul.f32 %v2610_v21, %v2282_v32 }
 0x2a0   : > { %4980 = vst [vmem:[#allocation4 + $0x58] sm:$0xff] %v4852_v44  ;;  %v8772_v44 = vld [vmem:[%s9925_s4 + $0x198] sm:$0xff] }
 0x2a1   : > { %5980 = vmatmul.msk.f32.gmra.mxu1 %vm747_vm0, %v8688_v39  ;;  %3210 = vmatmul.f32.gmra.mxu2 %v2738_v33  ;;  %v4508_v6 = vpop.f32.mrf.mxu0 }
 0x2a2   : > { %3883 = vmatmul.f32.gmra.mxu3 %v2738_v33  ;;  %6097 = vmatmul.msk.f32.gmra.mxu0 %vm747_vm0, %v8556_v2 }
 0x2a4   : > { %v3163_v4 = vpop.f32.mrf.mxu2 }
 0x2a5   : > { %3523 = vst [vmem:[#allocation5 + $0x60] sm:$0xff] %v3163_v4  ;;  %v3836_v38 = vpop.f32.mrf.mxu3  ;;  %v2618_v4 = vld [vmem:[%s9926_s5 + $0x120] sm:$0xff] }
 0x2a6   : > { %v2285_v10 = vpop.f32.mrf.mxu1  ;;  %v4853_v15 = vmul.f32 %v4493_v59, %v3836_v38 }
 0x2a7   : > { %v2739_v23 = vmul.f32 %v2611_v58, %v2285_v10 }
 0x2a8   : > { %4981 = vst [vmem:[#allocation4 + $0x60] sm:$0xff] %v4853_v15  ;;  %v8784_v15 = vld [vmem:[%s9925_s4 + $0x1a0] sm:$0xff] }
 0x2a9   : > { %5981 = vmatmul.msk.f32.gmra.mxu1 %vm747_vm0, %v8700_v12  ;;  %3213 = vmatmul.f32.gmra.mxu2 %v2739_v23  ;;  %v4511_v63 = vpop.f32.mrf.mxu0 }
 0x2aa   : > { %3886 = vmatmul.f32.gmra.mxu3 %v2739_v23  ;;  %6098 = vmatmul.msk.f32.gmra.mxu0 %vm747_vm0, %v8568_v61 }
 0x2ac   : > { %v3166_v42 = vpop.f32.mrf.mxu2 }
 0x2ad   : > { %3524 = vst [vmem:[#allocation5 + $0x68] sm:$0xff] %v3166_v42  ;;  %v3839_v46 = vpop.f32.mrf.mxu3  ;;  %v2619_v42 = vld [vmem:[%s9926_s5 + $0x128] sm:$0xff] }
 0x2ae   : > { %v2288_v0 = vpop.f32.mrf.mxu1  ;;  %v4854_v49 = vmul.f32 %v4496_v9, %v3839_v46 }
 0x2af   : > { %v2740_v47 = vmul.f32 %v2612_v51, %v2288_v0 }
 0x2b0   : > { %4982 = vst [vmem:[#allocation4 + $0x68] sm:$0xff] %v4854_v49  ;;  %v8796_v49 = vld [vmem:[%s9925_s4 + $0x1a8] sm:$0xff] }
 0x2b1   : > { %5982 = vmatmul.msk.f32.gmra.mxu1 %vm747_vm0, %v8712_v19  ;;  %3216 = vmatmul.f32.gmra.mxu2 %v2740_v47  ;;  %v4514_v56 = vpop.f32.mrf.mxu0 }
 0x2b2   : > { %3889 = vmatmul.f32.gmra.mxu3 %v2740_v47  ;;  %6099 = vmatmul.msk.f32.gmra.mxu0 %vm747_vm0, %v8580_v1 }
 0x2b4   : > { %v3169_v45 = vpop.f32.mrf.mxu2 }
 0x2b5   : > { %3525 = vst [vmem:[#allocation5 + $0x70] sm:$0xff] %v3169_v45  ;;  %v3842_v29 = vpop.f32.mrf.mxu3  ;;  %v2620_v45 = vld [vmem:[%s9926_s5 + $0x130] sm:$0xff] }
 0x2b6   : > { %v2291_v50 = vpop.f32.mrf.mxu1  ;;  %v4855_v2 = vmul.f32 %v4499_v40, %v3842_v29 }
 0x2b7   : > { %v2741_v52 = vmul.f32 %v2613_v24, %v2291_v50 }
 0x2b8   : > { %4983 = vst [vmem:[#allocation4 + $0x70] sm:$0xff] %v4855_v2  ;;  %v8808_v2 = vld [vmem:[%s9925_s4 + $0x1b0] sm:$0xff] }
 0x2b9   : > { %5983 = vmatmul.msk.f32.gmra.mxu1 %vm747_vm0, %v8724_v43  ;;  %3219 = vmatmul.f32.gmra.mxu2 %v2741_v52  ;;  %v4517_v7 = vpop.f32.mrf.mxu0 }
 0x2ba   : > { %3892 = vmatmul.f32.gmra.mxu3 %v2741_v52  ;;  %6100 = vmatmul.msk.f32.gmra.mxu0 %vm747_vm0, %v8592_v22 }
 0x2bc   : > { %v3172_v11 = vpop.f32.mrf.mxu2 }
 0x2bd   : > { %3526 = vst [vmem:[#allocation5 + $0x78] sm:$0xff] %v3172_v11  ;;  %v3845_v53 = vpop.f32.mrf.mxu3  ;;  %v2621_v11 = vld [vmem:[%s9926_s5 + $0x138] sm:$0xff] }
 0x2be   : > { %v2294_v59 = vpop.f32.mrf.mxu1  ;;  %v4856_v61 = vmul.f32 %v4502_v28, %v3845_v53 }
 0x2bf   : > { %v2742_v18 = vmul.f32 %v2614_v54, %v2294_v59 }
 0x2c0   : > { %4984 = vst [vmem:[#allocation4 + $0x78] sm:$0xff] %v4856_v61  ;;  %v8820_v61 = vld [vmem:[%s9925_s4 + $0x1b8] sm:$0xff] }
 0x2c1   : > { %5984 = vmatmul.msk.f32.gmra.mxu1 %vm747_vm0, %v8736_v57  ;;  %3222 = vmatmul.f32.gmra.mxu2 %v2742_v18  ;;  %v4520_v17 = vpop.f32.mrf.mxu0 }
 0x2c2   : > { %3895 = vmatmul.f32.gmra.mxu3 %v2742_v18  ;;  %6101 = vmatmul.msk.f32.gmra.mxu0 %vm747_vm0, %v8604_v36 }
 0x2c4   : > { %v3175_v60 = vpop.f32.mrf.mxu2 }
 0x2c5   : > { %3527 = vst [vmem:[#allocation5 + $0x80] sm:$0xff] %v3175_v60  ;;  %v3848_v3 = vpop.f32.mrf.mxu3  ;;  %v2622_v60 = vld [vmem:[%s9926_s5 + $0x140] sm:$0xff] }
 0x2c6   : > { %v2297_v9 = vpop.f32.mrf.mxu1  ;;  %v4857_v1 = vmul.f32 %v4505_v31, %v3848_v3 }
 0x2c7   : > { %v2743_v41 = vmul.f32 %v2615_v27, %v2297_v9 }
 0x2c8   : > { %4985 = vst [vmem:[#allocation4 + $0x80] sm:$0xff] %v4857_v1  ;;  %v8832_v1 = vld [vmem:[%s9925_s4 + $0x1c0] sm:$0xff] }
 0x2c9   : > { %5985 = vmatmul.msk.f32.gmra.mxu1 %vm747_vm0, %v8748_v34  ;;  %3225 = vmatmul.f32.gmra.mxu2 %v2743_v41  ;;  %v4523_v25 = vpop.f32.mrf.mxu0 }
 0x2ca   : > { %3898 = vmatmul.f32.gmra.mxu3 %v2743_v41  ;;  %6102 = vmatmul.msk.f32.gmra.mxu0 %vm747_vm0, %v8616_v62 }
 0x2cc   : > { %v3178_v14 = vpop.f32.mrf.mxu2 }
 0x2cd   : > { %3528 = vst [vmem:[#allocation5 + $0x88] sm:$0xff] %v3178_v14  ;;  %v3851_v35 = vpop.f32.mrf.mxu3  ;;  %v2623_v14 = vld [vmem:[%s9926_s5 + $0x148] sm:$0xff] }
 0x2ce   : > { %v2300_v40 = vpop.f32.mrf.mxu1  ;;  %v4858_v22 = vmul.f32 %v4508_v6, %v3851_v35 }
 0x2cf   : > { %v2744_v55 = vmul.f32 %v2616_v37, %v2300_v40 }
 0x2d0   : > { %4986 = vst [vmem:[#allocation4 + $0x88] sm:$0xff] %v4858_v22  ;;  %v8844_v22 = vld [vmem:[%s9925_s4 + $0x1c8] sm:$0xff] }
 0x2d1   : > { %5986 = vmatmul.msk.f32.gmra.mxu1 %vm747_vm0, %v8760_v26  ;;  %3228 = vmatmul.f32.gmra.mxu2 %v2744_v55  ;;  %v4526_v38 = vpop.f32.mrf.mxu0 }
 0x2d2   : > { %3901 = vmatmul.f32.gmra.mxu3 %v2744_v55  ;;  %6103 = vmatmul.msk.f32.gmra.mxu0 %vm747_vm0, %v8628_v48 }
 0x2d4   : > { %v3181_v20 = vpop.f32.mrf.mxu2 }
 0x2d5   : > { %3529 = vst [vmem:[#allocation5 + $0x90] sm:$0xff] %v3181_v20  ;;  %v3854_v21 = vpop.f32.mrf.mxu3  ;;  %v2624_v20 = vld [vmem:[%s9926_s5 + $0x150] sm:$0xff] }
 0x2d6   : > { %v2303_v28 = vpop.f32.mrf.mxu1  ;;  %v4859_v36 = vmul.f32 %v4511_v63, %v3854_v21 }
 0x2d7   : > { %v2745_v32 = vmul.f32 %v2617_v30, %v2303_v28 }
 0x2d8   : > { %4987 = vst [vmem:[#allocation4 + $0x90] sm:$0xff] %v4859_v36  ;;  %v8856_v36 = vld [vmem:[%s9925_s4 + $0x1d0] sm:$0xff] }
 0x2d9   : > { %5987 = vmatmul.msk.f32.gmra.mxu1 %vm747_vm0, %v8772_v44  ;;  %3231 = vmatmul.f32.gmra.mxu2 %v2745_v32  ;;  %v4529_v46 = vpop.f32.mrf.mxu0 }
 0x2da   : > { %3904 = vmatmul.f32.gmra.mxu3 %v2745_v32  ;;  %6104 = vmatmul.msk.f32.gmra.mxu0 %vm747_vm0, %v8640_v13 }
 0x2dc   : > { %v3184_v33 = vpop.f32.mrf.mxu2 }
 0x2dd   : > { %3530 = vst [vmem:[#allocation5 + $0x98] sm:$0xff] %v3184_v33  ;;  %v3857_v58 = vpop.f32.mrf.mxu3  ;;  %v2625_v33 = vld [vmem:[%s9926_s5 + $0x158] sm:$0xff] }
 0x2de   : > { %v2306_v31 = vpop.f32.mrf.mxu1  ;;  %v4860_v62 = vmul.f32 %v4514_v56, %v3857_v58 }
 0x2df   : > { %v2746_v10 = vmul.f32 %v2618_v4, %v2306_v31 }
 0x2e0   : > { %4988 = vst [vmem:[#allocation4 + $0x98] sm:$0xff] %v4860_v62  ;;  %v8868_v62 = vld [vmem:[%s9925_s4 + $0x1d8] sm:$0xff] }
 0x2e1   : > { %5988 = vmatmul.msk.f32.gmra.mxu1 %vm747_vm0, %v8784_v15  ;;  %3234 = vmatmul.f32.gmra.mxu2 %v2746_v10  ;;  %v4532_v29 = vpop.f32.mrf.mxu0 }
 0x2e2   : > { %3907 = vmatmul.f32.gmra.mxu3 %v2746_v10  ;;  %6105 = vmatmul.msk.f32.gmra.mxu0 %vm747_vm0, %v8652_v5 }
 0x2e4   : > { %v3187_v23 = vpop.f32.mrf.mxu2 }
 0x2e5   : > { %3531 = vst [vmem:[#allocation5 + $0xa0] sm:$0xff] %v3187_v23  ;;  %v3860_v51 = vpop.f32.mrf.mxu3  ;;  %v2626_v23 = vld [vmem:[%s9926_s5 + $0x160] sm:$0xff] }
 0x2e6   : > { %v2309_v6 = vpop.f32.mrf.mxu1  ;;  %v4861_v48 = vmul.f32 %v4517_v7, %v3860_v51 }
 0x2e7   : > { %v2747_v0 = vmul.f32 %v2619_v42, %v2309_v6 }
 0x2e8   : > { %4989 = vst [vmem:[#allocation4 + $0xa0] sm:$0xff] %v4861_v48  ;;  %v8880_v48 = vld [vmem:[%s9925_s4 + $0x1e0] sm:$0xff] }
 0x2e9   : > { %5989 = vmatmul.msk.f32.gmra.mxu1 %vm747_vm0, %v8796_v49  ;;  %3237 = vmatmul.f32.gmra.mxu2 %v2747_v0  ;;  %v4535_v53 = vpop.f32.mrf.mxu0 }
 0x2ea   : > { %3910 = vmatmul.f32.gmra.mxu3 %v2747_v0  ;;  %6106 = vmatmul.msk.f32.gmra.mxu0 %vm747_vm0, %v8664_v16 }
 0x2ec   : > { %v3190_v47 = vpop.f32.mrf.mxu2 }
 0x2ed   : > { %3532 = vst [vmem:[#allocation5 + $0xa8] sm:$0xff] %v3190_v47  ;;  %v3863_v24 = vpop.f32.mrf.mxu3  ;;  %v2627_v47 = vld [vmem:[%s9926_s5 + $0x168] sm:$0xff] }
 0x2ee   : > { %v2312_v63 = vpop.f32.mrf.mxu1  ;;  %v4862_v13 = vmul.f32 %v4520_v17, %v3863_v24 }
 0x2ef   : > { %v2748_v50 = vmul.f32 %v2620_v45, %v2312_v63 }
 0x2f0   : > { %4990 = vst [vmem:[#allocation4 + $0xa8] sm:$0xff] %v4862_v13  ;;  %v8892_v13 = vld [vmem:[%s9925_s4 + $0x1e8] sm:$0xff] }
 0x2f1   : > { %5990 = vmatmul.msk.f32.gmra.mxu1 %vm747_vm0, %v8808_v2  ;;  %3240 = vmatmul.f32.gmra.mxu2 %v2748_v50  ;;  %v4538_v3 = vpop.f32.mrf.mxu0 }
 0x2f2   : > { %3913 = vmatmul.f32.gmra.mxu3 %v2748_v50  ;;  %6107 = vmatmul.msk.f32.gmra.mxu0 %vm747_vm0, %v8676_v8 }
 0x2f4   : > { %v3193_v52 = vpop.f32.mrf.mxu2 }
 0x2f5   : > { %3533 = vst [vmem:[#allocation5 + $0xb0] sm:$0xff] %v3193_v52  ;;  %v3866_v54 = vpop.f32.mrf.mxu3  ;;  %v2628_v52 = vld [vmem:[%s9926_s5 + $0x170] sm:$0xff] }
 0x2f6   : > { %v2315_v56 = vpop.f32.mrf.mxu1  ;;  %v4863_v5 = vmul.f32 %v4523_v25, %v3866_v54 }
 0x2f7   : > { %v2749_v59 = vmul.f32 %v2621_v11, %v2315_v56 }
 0x2f8   : > { %4991 = vst [vmem:[#allocation4 + $0xb0] sm:$0xff] %v4863_v5  ;;  %v8904_v5 = vld [vmem:[%s9925_s4 + $0x1f0] sm:$0xff] }
 0x2f9   : > { %5991 = vmatmul.msk.f32.gmra.mxu1 %vm747_vm0, %v8820_v61  ;;  %3243 = vmatmul.f32.gmra.mxu2 %v2749_v59  ;;  %v4541_v35 = vpop.f32.mrf.mxu0 }
 0x2fa   : > { %3916 = vmatmul.f32.gmra.mxu3 %v2749_v59  ;;  %6108 = vmatmul.msk.f32.gmra.mxu0 %vm747_vm0, %v8688_v39 }
 0x2fc   : > { %v3196_v18 = vpop.f32.mrf.mxu2 }
 0x2fd   : > { %3534 = vst [vmem:[#allocation5 + $0xb8] sm:$0xff] %v3196_v18  ;;  %v3869_v27 = vpop.f32.mrf.mxu3  ;;  %v2629_v18 = vld [vmem:[%s9926_s5 + $0x178] sm:$0xff] }
 0x2fe   : > { %v2318_v7 = vpop.f32.mrf.mxu1  ;;  %v4864_v16 = vmul.f32 %v4526_v38, %v3869_v27 }
 0x2ff   : > { %v2750_v9 = vmul.f32 %v2622_v60, %v2318_v7 }
 0x300   : > { %4992 = vst [vmem:[#allocation4 + $0xb8] sm:$0xff] %v4864_v16  ;;  %v8916_v16 = vld [vmem:[%s9925_s4 + $0x1f8] sm:$0xff] }
 0x301   : > { %5992 = vmatmul.msk.f32.gmra.mxu1 %vm747_vm0, %v8832_v1  ;;  %3246 = vmatmul.f32.gmra.mxu2 %v2750_v9  ;;  %v4544_v21 = vpop.f32.mrf.mxu0 }
 0x302   : > { %3919 = vmatmul.f32.gmra.mxu3 %v2750_v9  ;;  %6109 = vmatmul.msk.f32.gmra.mxu0 %vm747_vm0, %v8700_v12 }
 0x304   : > { %v3199_v41 = vpop.f32.mrf.mxu2 }
 0x305   : > { %3535 = vst [vmem:[#allocation5 + $0xc0] sm:$0xff] %v3199_v41  ;;  %v3872_v37 = vpop.f32.mrf.mxu3  ;;  %v2630_v41 = vld [vmem:[%s9926_s5 + $0x180] sm:$0xff] }
 0x306   : > { %v2321_v17 = vpop.f32.mrf.mxu1  ;;  %v4865_v8 = vmul.f32 %v4529_v46, %v3872_v37 }
 0x307   : > { %v2751_v40 = vmul.f32 %v2623_v14, %v2321_v17 }
 0x308   : > { %4993 = vst [vmem:[#allocation4 + $0xc0] sm:$0xff] %v4865_v8  ;;  %v8928_v8 = vld [vmem:[%s9925_s4 + $0x200] sm:$0xff] }
 0x309   : > { %5993 = vmatmul.msk.f32.gmra.mxu1 %vm747_vm0, %v8844_v22  ;;  %3249 = vmatmul.f32.gmra.mxu2 %v2751_v40  ;;  %v4547_v58 = vpop.f32.mrf.mxu0 }
 0x30a   : > { %3922 = vmatmul.f32.gmra.mxu3 %v2751_v40  ;;  %6110 = vmatmul.msk.f32.gmra.mxu0 %vm747_vm0, %v8712_v19 }
 0x30c   : > { %v3202_v55 = vpop.f32.mrf.mxu2 }
 0x30d   : > { %3536 = vst [vmem:[#allocation5 + $0xc8] sm:$0xff] %v3202_v55  ;;  %v3875_v30 = vpop.f32.mrf.mxu3  ;;  %v2631_v55 = vld [vmem:[%s9926_s5 + $0x188] sm:$0xff] }
 0x30e   : > { %v2324_v25 = vpop.f32.mrf.mxu1  ;;  %v4866_v39 = vmul.f32 %v4532_v29, %v3875_v30 }
 0x30f   : > { %v2752_v28 = vmul.f32 %v2624_v20, %v2324_v25 }
 0x310   : > { %4994 = vst [vmem:[#allocation4 + $0xc8] sm:$0xff] %v4866_v39  ;;  %v8940_v39 = vld [vmem:[%s9925_s4 + $0x208] sm:$0xff] }
 0x311   : > { %5994 = vmatmul.msk.f32.gmra.mxu1 %vm747_vm0, %v8856_v36  ;;  %3252 = vmatmul.f32.gmra.mxu2 %v2752_v28  ;;  %v4550_v51 = vpop.f32.mrf.mxu0 }
 0x312   : > { %3925 = vmatmul.f32.gmra.mxu3 %v2752_v28  ;;  %6111 = vmatmul.msk.f32.gmra.mxu0 %vm747_vm0, %v8724_v43 }
 0x314   : > { %v3205_v32 = vpop.f32.mrf.mxu2 }
 0x315   : > { %3537 = vst [vmem:[#allocation5 + $0xd0] sm:$0xff] %v3205_v32  ;;  %v3878_v4 = vpop.f32.mrf.mxu3  ;;  %v2632_v32 = vld [vmem:[%s9926_s5 + $0x190] sm:$0xff] }
 0x316   : > { %v2327_v38 = vpop.f32.mrf.mxu1  ;;  %v4867_v12 = vmul.f32 %v4535_v53, %v3878_v4 }
 0x317   : > { %v2753_v31 = vmul.f32 %v2625_v33, %v2327_v38 }
 0x318   : > { %4995 = vst [vmem:[#allocation4 + $0xd0] sm:$0xff] %v4867_v12  ;;  %v8952_v12 = vld [vmem:[%s9925_s4 + $0x210] sm:$0xff] }
 0x319   : > { %5995 = vmatmul.msk.f32.gmra.mxu1 %vm747_vm0, %v8868_v62  ;;  %3255 = vmatmul.f32.gmra.mxu2 %v2753_v31  ;;  %v4553_v24 = vpop.f32.mrf.mxu0 }
 0x31a   : > { %3928 = vmatmul.f32.gmra.mxu3 %v2753_v31  ;;  %6112 = vmatmul.msk.f32.gmra.mxu0 %vm747_vm0, %v8736_v57 }
 0x31c   : > { %v3208_v10 = vpop.f32.mrf.mxu2 }
 0x31d   : > { %3538 = vst [vmem:[#allocation5 + $0xd8] sm:$0xff] %v3208_v10  ;;  %v3881_v42 = vpop.f32.mrf.mxu3  ;;  %v2633_v10 = vld [vmem:[%s9926_s5 + $0x198] sm:$0xff] }
 0x31e   : > { %v2330_v46 = vpop.f32.mrf.mxu1  ;;  %v4868_v19 = vmul.f32 %v4538_v3, %v3881_v42 }
 0x31f   : > { %v2754_v6 = vmul.f32 %v2626_v23, %v2330_v46 }
 0x320   : > { %4996 = vst [vmem:[#allocation4 + $0xd8] sm:$0xff] %v4868_v19  ;;  %v8964_v19 = vld [vmem:[%s9925_s4 + $0x218] sm:$0xff] }
 0x321   : > { %5996 = vmatmul.msk.f32.gmra.mxu1 %vm747_vm0, %v8880_v48  ;;  %3258 = vmatmul.f32.gmra.mxu2 %v2754_v6  ;;  %v4556_v54 = vpop.f32.mrf.mxu0 }
 0x322   : > { %3931 = vmatmul.f32.gmra.mxu3 %v2754_v6  ;;  %6113 = vmatmul.msk.f32.gmra.mxu0 %vm747_vm0, %v8748_v34 }
 0x324   : > { %v3211_v0 = vpop.f32.mrf.mxu2 }
 0x325   : > { %3539 = vst [vmem:[#allocation5 + $0xe0] sm:$0xff] %v3211_v0  ;;  %v3884_v45 = vpop.f32.mrf.mxu3  ;;  %v2634_v0 = vld [vmem:[%s9926_s5 + $0x1a0] sm:$0xff] }
 0x326   : > { %v2333_v29 = vpop.f32.mrf.mxu1  ;;  %v4869_v43 = vmul.f32 %v4541_v35, %v3884_v45 }
 0x327   : > { %v2755_v63 = vmul.f32 %v2627_v47, %v2333_v29 }
 0x328   : > { %4997 = vst [vmem:[#allocation4 + $0xe0] sm:$0xff] %v4869_v43  ;;  %v8976_v43 = vld [vmem:[%s9925_s4 + $0x220] sm:$0xff] }
 0x329   : > { %5997 = vmatmul.msk.f32.gmra.mxu1 %vm747_vm0, %v8892_v13  ;;  %3261 = vmatmul.f32.gmra.mxu2 %v2755_v63  ;;  %v4559_v27 = vpop.f32.mrf.mxu0 }
 0x32a   : > { %3934 = vmatmul.f32.gmra.mxu3 %v2755_v63  ;;  %6114 = vmatmul.msk.f32.gmra.mxu0 %vm747_vm0, %v8760_v26 }
 0x32c   : > { %v3214_v50 = vpop.f32.mrf.mxu2 }
 0x32d   : > { %3540 = vst [vmem:[#allocation5 + $0xe8] sm:$0xff] %v3214_v50  ;;  %v3887_v11 = vpop.f32.mrf.mxu3  ;;  %v2635_v50 = vld [vmem:[%s9926_s5 + $0x1a8] sm:$0xff] }
 0x32e   : > { %v2336_v53 = vpop.f32.mrf.mxu1  ;;  %v4870_v57 = vmul.f32 %v4544_v21, %v3887_v11 }
 0x32f   : > { %v2756_v56 = vmul.f32 %v2628_v52, %v2336_v53 }
 0x330   : > { %4998 = vst [vmem:[#allocation4 + $0xe8] sm:$0xff] %v4870_v57  ;;  %v8988_v57 = vld [vmem:[%s9925_s4 + $0x228] sm:$0xff] }
 0x331   : > { %5998 = vmatmul.msk.f32.gmra.mxu1 %vm747_vm0, %v8904_v5  ;;  %3264 = vmatmul.f32.gmra.mxu2 %v2756_v56  ;;  %v4562_v37 = vpop.f32.mrf.mxu0 }
 0x332   : > { %3937 = vmatmul.f32.gmra.mxu3 %v2756_v56  ;;  %6115 = vmatmul.msk.f32.gmra.mxu0 %vm747_vm0, %v8772_v44 }
 0x334   : > { %v3217_v59 = vpop.f32.mrf.mxu2 }
 0x335   : > { %3541 = vst [vmem:[#allocation5 + $0xf0] sm:$0xff] %v3217_v59  ;;  %v3890_v60 = vpop.f32.mrf.mxu3  ;;  %v2636_v59 = vld [vmem:[%s9926_s5 + $0x1b0] sm:$0xff] }
 0x336   : > { %v2339_v3 = vpop.f32.mrf.mxu1  ;;  %v4871_v34 = vmul.f32 %v4547_v58, %v3890_v60 }
 0x337   : > { %v2757_v7 = vmul.f32 %v2629_v18, %v2339_v3 }
 0x338   : > { %4999 = vst [vmem:[#allocation4 + $0xf0] sm:$0xff] %v4871_v34  ;;  %v9000_v34 = vld [vmem:[%s9925_s4 + $0x230] sm:$0xff] }
 0x339   : > { %5999 = vmatmul.msk.f32.gmra.mxu1 %vm747_vm0, %v8916_v16  ;;  %3267 = vmatmul.f32.gmra.mxu2 %v2757_v7  ;;  %v4565_v30 = vpop.f32.mrf.mxu0 }
 0x33a   : > { %3940 = vmatmul.f32.gmra.mxu3 %v2757_v7  ;;  %6116 = vmatmul.msk.f32.gmra.mxu0 %vm747_vm0, %v8784_v15 }
 0x33c   : > { %v3220_v9 = vpop.f32.mrf.mxu2 }
 0x33d   : > { %3542 = vst [vmem:[#allocation5 + $0xf8] sm:$0xff] %v3220_v9  ;;  %v3893_v14 = vpop.f32.mrf.mxu3  ;;  %v2637_v9 = vld [vmem:[%s9926_s5 + $0x1b8] sm:$0xff] }
 0x33e   : > { %v2342_v35 = vpop.f32.mrf.mxu1  ;;  %v4872_v26 = vmul.f32 %v4550_v51, %v3893_v14 }
 0x33f   : > { %v2758_v17 = vmul.f32 %v2630_v41, %v2342_v35 }
 0x340   : > { %5000 = vst [vmem:[#allocation4 + $0xf8] sm:$0xff] %v4872_v26  ;;  %v9012_v26 = vld [vmem:[%s9925_s4 + $0x238] sm:$0xff] }
 0x341   : > { %6000 = vmatmul.msk.f32.gmra.mxu1 %vm747_vm0, %v8928_v8  ;;  %3270 = vmatmul.f32.gmra.mxu2 %v2758_v17  ;;  %v4568_v4 = vpop.f32.mrf.mxu0 }
 0x342   : > { %3943 = vmatmul.f32.gmra.mxu3 %v2758_v17  ;;  %6117 = vmatmul.msk.f32.gmra.mxu0 %vm747_vm0, %v8796_v49 }
 0x344   : > { %v3223_v40 = vpop.f32.mrf.mxu2 }
 0x345   : > { %3543 = vst [vmem:[#allocation5 + $0x100] sm:$0xff] %v3223_v40  ;;  %v3896_v20 = vpop.f32.mrf.mxu3  ;;  %v2638_v40 = vld [vmem:[%s9926_s5 + $0x1c0] sm:$0xff] }
 0x346   : > { %v2345_v21 = vpop.f32.mrf.mxu1  ;;  %v4873_v44 = vmul.f32 %v4553_v24, %v3896_v20 }
 0x347   : > { %v2759_v25 = vmul.f32 %v2631_v55, %v2345_v21 }
 0x348   : > { %5001 = vst [vmem:[#allocation4 + $0x100] sm:$0xff] %v4873_v44  ;;  %v9024_v44 = vld [vmem:[%s9925_s4 + $0x240] sm:$0xff] }
 0x349   : > { %6001 = vmatmul.msk.f32.gmra.mxu1 %vm747_vm0, %v8940_v39  ;;  %3273 = vmatmul.f32.gmra.mxu2 %v2759_v25  ;;  %v4571_v42 = vpop.f32.mrf.mxu0 }
 0x34a   : > { %3946 = vmatmul.f32.gmra.mxu3 %v2759_v25  ;;  %6118 = vmatmul.msk.f32.gmra.mxu0 %vm747_vm0, %v8808_v2 }
 0x34c   : > { %v3226_v28 = vpop.f32.mrf.mxu2 }
 0x34d   : > { %3544 = vst [vmem:[#allocation5 + $0x108] sm:$0xff] %v3226_v28  ;;  %v3899_v33 = vpop.f32.mrf.mxu3  ;;  %v2639_v28 = vld [vmem:[%s9926_s5 + $0x1c8] sm:$0xff] }
 0x34e   : > { %v2348_v58 = vpop.f32.mrf.mxu1  ;;  %v4874_v15 = vmul.f32 %v4556_v54, %v3899_v33 }
 0x34f   : > { %v2760_v38 = vmul.f32 %v2632_v32, %v2348_v58 }
 0x350   : > { %5002 = vst [vmem:[#allocation4 + $0x108] sm:$0xff] %v4874_v15  ;;  %v9036_v15 = vld [vmem:[%s9925_s4 + $0x248] sm:$0xff] }
 0x351   : > { %6002 = vmatmul.msk.f32.gmra.mxu1 %vm747_vm0, %v8952_v12  ;;  %3276 = vmatmul.f32.gmra.mxu2 %v2760_v38  ;;  %v4574_v45 = vpop.f32.mrf.mxu0 }
 0x352   : > { %3949 = vmatmul.f32.gmra.mxu3 %v2760_v38  ;;  %6119 = vmatmul.msk.f32.gmra.mxu0 %vm747_vm0, %v8820_v61 }
 0x354   : > { %v3229_v31 = vpop.f32.mrf.mxu2 }
 0x355   : > { %3545 = vst [vmem:[#allocation5 + $0x110] sm:$0xff] %v3229_v31  ;;  %v3902_v23 = vpop.f32.mrf.mxu3  ;;  %v2640_v31 = vld [vmem:[%s9926_s5 + $0x1d0] sm:$0xff] }
 0x356   : > { %v2351_v51 = vpop.f32.mrf.mxu1  ;;  %v4875_v49 = vmul.f32 %v4559_v27, %v3902_v23 }
 0x357   : > { %v2761_v46 = vmul.f32 %v2633_v10, %v2351_v51 }
 0x358   : > { %5003 = vst [vmem:[#allocation4 + $0x110] sm:$0xff] %v4875_v49  ;;  %v9048_v49 = vld [vmem:[%s9925_s4 + $0x250] sm:$0xff] }
 0x359   : > { %6003 = vmatmul.msk.f32.gmra.mxu1 %vm747_vm0, %v8964_v19  ;;  %3279 = vmatmul.f32.gmra.mxu2 %v2761_v46  ;;  %v4577_v11 = vpop.f32.mrf.mxu0 }
 0x35a   : > { %3952 = vmatmul.f32.gmra.mxu3 %v2761_v46  ;;  %6120 = vmatmul.msk.f32.gmra.mxu0 %vm747_vm0, %v8832_v1 }
 0x35c   : > { %v3232_v6 = vpop.f32.mrf.mxu2 }
 0x35d   : > { %3546 = vst [vmem:[#allocation5 + $0x118] sm:$0xff] %v3232_v6  ;;  %v3905_v47 = vpop.f32.mrf.mxu3  ;;  %v2641_v6 = vld [vmem:[%s9926_s5 + $0x1d8] sm:$0xff] }
 0x35e   : > { %v2354_v24 = vpop.f32.mrf.mxu1  ;;  %v4876_v2 = vmul.f32 %v4562_v37, %v3905_v47 }
 0x35f   : > { %v2762_v29 = vmul.f32 %v2634_v0, %v2354_v24 }
 0x360   : > { %5004 = vst [vmem:[#allocation4 + $0x118] sm:$0xff] %v4876_v2  ;;  %v9060_v2 = vld [vmem:[%s9925_s4 + $0x258] sm:$0xff] }
 0x361   : > { %6004 = vmatmul.msk.f32.gmra.mxu1 %vm747_vm0, %v8976_v43  ;;  %3282 = vmatmul.f32.gmra.mxu2 %v2762_v29  ;;  %v4580_v60 = vpop.f32.mrf.mxu0 }
 0x362   : > { %3955 = vmatmul.f32.gmra.mxu3 %v2762_v29  ;;  %6121 = vmatmul.msk.f32.gmra.mxu0 %vm747_vm0, %v8844_v22 }
 0x364   : > { %v3235_v63 = vpop.f32.mrf.mxu2 }
 0x365   : > { %3547 = vst [vmem:[#allocation5 + $0x120] sm:$0xff] %v3235_v63  ;;  %v3908_v52 = vpop.f32.mrf.mxu3  ;;  %v2642_v63 = vld [vmem:[%s9926_s5 + $0x1e0] sm:$0xff] }
 0x366   : > { %v2357_v54 = vpop.f32.mrf.mxu1  ;;  %v4877_v61 = vmul.f32 %v4565_v30, %v3908_v52 }
 0x367   : > { %v2763_v53 = vmul.f32 %v2635_v50, %v2357_v54 }
 0x368   : > { %5005 = vst [vmem:[#allocation4 + $0x120] sm:$0xff] %v4877_v61  ;;  %v9072_v61 = vld [vmem:[%s9925_s4 + $0x260] sm:$0xff] }
 0x369   : > { %6005 = vmatmul.msk.f32.gmra.mxu1 %vm747_vm0, %v8988_v57  ;;  %3285 = vmatmul.f32.gmra.mxu2 %v2763_v53  ;;  %v4583_v14 = vpop.f32.mrf.mxu0 }
 0x36a   : > { %3958 = vmatmul.f32.gmra.mxu3 %v2763_v53  ;;  %6122 = vmatmul.msk.f32.gmra.mxu0 %vm747_vm0, %v8856_v36 }
 0x36c   : > { %v3238_v56 = vpop.f32.mrf.mxu2 }
 0x36d   : > { %3548 = vst [vmem:[#allocation5 + $0x128] sm:$0xff] %v3238_v56  ;;  %v3911_v18 = vpop.f32.mrf.mxu3  ;;  %v2643_v56 = vld [vmem:[%s9926_s5 + $0x1e8] sm:$0xff] }
 0x36e   : > { %v2360_v27 = vpop.f32.mrf.mxu1  ;;  %v4878_v1 = vmul.f32 %v4568_v4, %v3911_v18 }
 0x36f   : > { %v2764_v3 = vmul.f32 %v2636_v59, %v2360_v27 }
 0x370   : > { %5006 = vst [vmem:[#allocation4 + $0x128] sm:$0xff] %v4878_v1  ;;  %v9084_v1 = vld [vmem:[%s9925_s4 + $0x268] sm:$0xff] }
 0x371   : > { %6006 = vmatmul.msk.f32.gmra.mxu1 %vm747_vm0, %v9000_v34  ;;  %3288 = vmatmul.f32.gmra.mxu2 %v2764_v3  ;;  %v4586_v20 = vpop.f32.mrf.mxu0 }
 0x372   : > { %3961 = vmatmul.f32.gmra.mxu3 %v2764_v3  ;;  %6123 = vmatmul.msk.f32.gmra.mxu0 %vm747_vm0, %v8868_v62 }
 0x374   : > { %v3241_v7 = vpop.f32.mrf.mxu2 }
 0x375   : > { %3549 = vst [vmem:[#allocation5 + $0x130] sm:$0xff] %v3241_v7  ;;  %v3914_v41 = vpop.f32.mrf.mxu3  ;;  %v2644_v7 = vld [vmem:[%s9926_s5 + $0x1f0] sm:$0xff] }
 0x376   : > { %v2363_v37 = vpop.f32.mrf.mxu1  ;;  %v4879_v22 = vmul.f32 %v4571_v42, %v3914_v41 }
 0x377   : > { %v2765_v35 = vmul.f32 %v2637_v9, %v2363_v37 }
 0x378   : > { %5007 = vst [vmem:[#allocation4 + $0x130] sm:$0xff] %v4879_v22  ;;  %v9096_v22 = vld [vmem:[%s9925_s4 + $0x270] sm:$0xff] }
 0x379   : > { %6007 = vmatmul.msk.f32.gmra.mxu1 %vm747_vm0, %v9012_v26  ;;  %3291 = vmatmul.f32.gmra.mxu2 %v2765_v35  ;;  %v4589_v33 = vpop.f32.mrf.mxu0 }
 0x37a   : > { %3964 = vmatmul.f32.gmra.mxu3 %v2765_v35  ;;  %6124 = vmatmul.msk.f32.gmra.mxu0 %vm747_vm0, %v8880_v48 }
 0x37c   : > { %v3244_v17 = vpop.f32.mrf.mxu2 }
 0x37d   : > { %3550 = vst [vmem:[#allocation5 + $0x138] sm:$0xff] %v3244_v17  ;;  %v3917_v55 = vpop.f32.mrf.mxu3  ;;  %v2645_v17 = vld [vmem:[%s9926_s5 + $0x1f8] sm:$0xff] }
 0x37e   : > { %v2366_v30 = vpop.f32.mrf.mxu1  ;;  %v4880_v36 = vmul.f32 %v4574_v45, %v3917_v55 }
 0x37f   : > { %v2766_v21 = vmul.f32 %v2638_v40, %v2366_v30 }
 0x380   : > { %5008 = vst [vmem:[#allocation4 + $0x138] sm:$0xff] %v4880_v36  ;;  %v9108_v36 = vld [vmem:[%s9925_s4 + $0x278] sm:$0xff] }
 0x381   : > { %6008 = vmatmul.msk.f32.gmra.mxu1 %vm747_vm0, %v9024_v44  ;;  %3294 = vmatmul.f32.gmra.mxu2 %v2766_v21  ;;  %v4592_v23 = vpop.f32.mrf.mxu0 }
 0x382   : > { %3967 = vmatmul.f32.gmra.mxu3 %v2766_v21  ;;  %6125 = vmatmul.msk.f32.gmra.mxu0 %vm747_vm0, %v8892_v13 }
 0x384   : > { %v3247_v25 = vpop.f32.mrf.mxu2 }
 0x385   : > { %3551 = vst [vmem:[#allocation5 + $0x140] sm:$0xff] %v3247_v25  ;;  %v3920_v32 = vpop.f32.mrf.mxu3  ;;  %v2646_v25 = vld [vmem:[%s9926_s5 + $0x200] sm:$0xff] }
 0x386   : > { %v2369_v4 = vpop.f32.mrf.mxu1  ;;  %v4881_v62 = vmul.f32 %v4577_v11, %v3920_v32 }
 0x387   : > { %v2767_v58 = vmul.f32 %v2639_v28, %v2369_v4 }
 0x388   : > { %5009 = vst [vmem:[#allocation4 + $0x140] sm:$0xff] %v4881_v62  ;;  %v9120_v62 = vld [vmem:[%s9925_s4 + $0x280] sm:$0xff] }
 0x389   : > { %6009 = vmatmul.msk.f32.gmra.mxu1 %vm747_vm0, %v9036_v15  ;;  %3297 = vmatmul.f32.gmra.mxu2 %v2767_v58  ;;  %v4595_v47 = vpop.f32.mrf.mxu0 }
 0x38a   : > { %3970 = vmatmul.f32.gmra.mxu3 %v2767_v58  ;;  %6126 = vmatmul.msk.f32.gmra.mxu0 %vm747_vm0, %v8904_v5 }
 0x38c   : > { %v3250_v38 = vpop.f32.mrf.mxu2 }
 0x38d   : > { %3552 = vst [vmem:[#allocation5 + $0x148] sm:$0xff] %v3250_v38  ;;  %v3923_v10 = vpop.f32.mrf.mxu3  ;;  %v2647_v38 = vld [vmem:[%s9926_s5 + $0x208] sm:$0xff] }
 0x38e   : > { %v2372_v42 = vpop.f32.mrf.mxu1  ;;  %v4882_v48 = vmul.f32 %v4580_v60, %v3923_v10 }
 0x38f   : > { %v2768_v51 = vmul.f32 %v2640_v31, %v2372_v42 }
 0x390   : > { %5010 = vst [vmem:[#allocation4 + $0x148] sm:$0xff] %v4882_v48  ;;  %v9132_v48 = vld [vmem:[%s9925_s4 + $0x288] sm:$0xff] }
 0x391   : > { %6010 = vmatmul.msk.f32.gmra.mxu1 %vm747_vm0, %v9048_v49  ;;  %3300 = vmatmul.f32.gmra.mxu2 %v2768_v51  ;;  %v4598_v52 = vpop.f32.mrf.mxu0 }
 0x392   : > { %3973 = vmatmul.f32.gmra.mxu3 %v2768_v51  ;;  %6127 = vmatmul.msk.f32.gmra.mxu0 %vm747_vm0, %v8916_v16 }
 0x394   : > { %v3253_v46 = vpop.f32.mrf.mxu2 }
 0x395   : > { %3553 = vst [vmem:[#allocation5 + $0x150] sm:$0xff] %v3253_v46  ;;  %v3926_v0 = vpop.f32.mrf.mxu3  ;;  %v2648_v46 = vld [vmem:[%s9926_s5 + $0x210] sm:$0xff] }
 0x396   : > { %v2375_v45 = vpop.f32.mrf.mxu1  ;;  %v4883_v13 = vmul.f32 %v4583_v14, %v3926_v0 }
 0x397   : > { %v2769_v24 = vmul.f32 %v2641_v6, %v2375_v45 }
 0x398   : > { %5011 = vst [vmem:[#allocation4 + $0x150] sm:$0xff] %v4883_v13  ;;  %v9144_v13 = vld [vmem:[%s9925_s4 + $0x290] sm:$0xff] }
 0x399   : > { %6011 = vmatmul.msk.f32.gmra.mxu1 %vm747_vm0, %v9060_v2  ;;  %3303 = vmatmul.f32.gmra.mxu2 %v2769_v24  ;;  %v4601_v18 = vpop.f32.mrf.mxu0 }
 0x39a   : > { %3976 = vmatmul.f32.gmra.mxu3 %v2769_v24  ;;  %6128 = vmatmul.msk.f32.gmra.mxu0 %vm747_vm0, %v8928_v8 }
 0x39c   : > { %v3256_v29 = vpop.f32.mrf.mxu2 }
 0x39d   : > { %3554 = vst [vmem:[#allocation5 + $0x158] sm:$0xff] %v3256_v29  ;;  %v3929_v50 = vpop.f32.mrf.mxu3  ;;  %v2649_v29 = vld [vmem:[%s9926_s5 + $0x218] sm:$0xff] }
 0x39e   : > { %v2378_v11 = vpop.f32.mrf.mxu1  ;;  %v4884_v5 = vmul.f32 %v4586_v20, %v3929_v50 }
 0x39f   : > { %v2770_v54 = vmul.f32 %v2642_v63, %v2378_v11 }
 0x3a0   : > { %5012 = vst [vmem:[#allocation4 + $0x158] sm:$0xff] %v4884_v5  ;;  %v9156_v5 = vld [vmem:[%s9925_s4 + $0x298] sm:$0xff] }
 0x3a1   : > { %6012 = vmatmul.msk.f32.gmra.mxu1 %vm747_vm0, %v9072_v61  ;;  %3306 = vmatmul.f32.gmra.mxu2 %v2770_v54  ;;  %v4604_v41 = vpop.f32.mrf.mxu0 }
 0x3a2   : > { %3979 = vmatmul.f32.gmra.mxu3 %v2770_v54  ;;  %6129 = vmatmul.msk.f32.gmra.mxu0 %vm747_vm0, %v8940_v39 }
 0x3a4   : > { %v3259_v53 = vpop.f32.mrf.mxu2 }
 0x3a5   : > { %3555 = vst [vmem:[#allocation5 + $0x160] sm:$0xff] %v3259_v53  ;;  %v3932_v59 = vpop.f32.mrf.mxu3  ;;  %v2650_v53 = vld [vmem:[%s9926_s5 + $0x220] sm:$0xff] }
 0x3a6   : > { %v2381_v60 = vpop.f32.mrf.mxu1  ;;  %v4885_v16 = vmul.f32 %v4589_v33, %v3932_v59 }
 0x3a7   : > { %v2771_v27 = vmul.f32 %v2643_v56, %v2381_v60 }
 0x3a8   : > { %5013 = vst [vmem:[#allocation4 + $0x160] sm:$0xff] %v4885_v16  ;;  %v9168_v16 = vld [vmem:[%s9925_s4 + $0x2a0] sm:$0xff] }
 0x3a9   : > { %6013 = vmatmul.msk.f32.gmra.mxu1 %vm747_vm0, %v9084_v1  ;;  %3309 = vmatmul.f32.gmra.mxu2 %v2771_v27  ;;  %v4607_v55 = vpop.f32.mrf.mxu0 }
 0x3aa   : > { %3982 = vmatmul.f32.gmra.mxu3 %v2771_v27  ;;  %6130 = vmatmul.msk.f32.gmra.mxu0 %vm747_vm0, %v8952_v12 }
 0x3ac   : > { %v3262_v3 = vpop.f32.mrf.mxu2 }
 0x3ad   : > { %3556 = vst [vmem:[#allocation5 + $0x168] sm:$0xff] %v3262_v3  ;;  %v3935_v9 = vpop.f32.mrf.mxu3  ;;  %v2651_v3 = vld [vmem:[%s9926_s5 + $0x228] sm:$0xff] }
 0x3ae   : > { %v2384_v14 = vpop.f32.mrf.mxu1  ;;  %v4886_v8 = vmul.f32 %v4592_v23, %v3935_v9 }
 0x3af   : > { %v2772_v37 = vmul.f32 %v2644_v7, %v2384_v14 }
 0x3b0   : > { %5014 = vst [vmem:[#allocation4 + $0x168] sm:$0xff] %v4886_v8  ;;  %v9180_v8 = vld [vmem:[%s9925_s4 + $0x2a8] sm:$0xff] }
 0x3b1   : > { %6014 = vmatmul.msk.f32.gmra.mxu1 %vm747_vm0, %v9096_v22  ;;  %3312 = vmatmul.f32.gmra.mxu2 %v2772_v37  ;;  %v4610_v32 = vpop.f32.mrf.mxu0 }
 0x3b2   : > { %3985 = vmatmul.f32.gmra.mxu3 %v2772_v37  ;;  %6131 = vmatmul.msk.f32.gmra.mxu0 %vm747_vm0, %v8964_v19 }
 0x3b4   : > { %v3265_v35 = vpop.f32.mrf.mxu2 }
 0x3b5   : > { %3557 = vst [vmem:[#allocation5 + $0x170] sm:$0xff] %v3265_v35  ;;  %v3938_v40 = vpop.f32.mrf.mxu3  ;;  %v2652_v35 = vld [vmem:[%s9926_s5 + $0x230] sm:$0xff] }
 0x3b6   : > { %v2387_v20 = vpop.f32.mrf.mxu1  ;;  %v4887_v39 = vmul.f32 %v4595_v47, %v3938_v40 }
 0x3b7   : > { %v2773_v30 = vmul.f32 %v2645_v17, %v2387_v20 }
 0x3b8   : > { %5015 = vst [vmem:[#allocation4 + $0x170] sm:$0xff] %v4887_v39  ;;  %v9192_v39 = vld [vmem:[%s9925_s4 + $0x2b0] sm:$0xff] }
 0x3b9   : > { %6015 = vmatmul.msk.f32.gmra.mxu1 %vm747_vm0, %v9108_v36  ;;  %3315 = vmatmul.f32.gmra.mxu2 %v2773_v30  ;;  %v4613_v10 = vpop.f32.mrf.mxu0 }
 0x3ba   : > { %3988 = vmatmul.f32.gmra.mxu3 %v2773_v30  ;;  %6132 = vmatmul.msk.f32.gmra.mxu0 %vm747_vm0, %v8976_v43 }
 0x3bc   : > { %v3268_v21 = vpop.f32.mrf.mxu2 }
 0x3bd   : > { %3558 = vst [vmem:[#allocation5 + $0x178] sm:$0xff] %v3268_v21  ;;  %v3941_v28 = vpop.f32.mrf.mxu3  ;;  %v2653_v21 = vld [vmem:[%s9926_s5 + $0x238] sm:$0xff] }
 0x3be   : > { %v2390_v33 = vpop.f32.mrf.mxu1  ;;  %v4888_v12 = vmul.f32 %v4598_v52, %v3941_v28 }
 0x3bf   : > { %v2774_v4 = vmul.f32 %v2646_v25, %v2390_v33 }
 0x3c0   : > { %5016 = vst [vmem:[#allocation4 + $0x178] sm:$0xff] %v4888_v12  ;;  %v9204_v12 = vld [vmem:[%s9925_s4 + $0x2b8] sm:$0xff] }
 0x3c1   : > { %6016 = vmatmul.msk.f32.gmra.mxu1 %vm747_vm0, %v9120_v62  ;;  %3318 = vmatmul.f32.gmra.mxu2 %v2774_v4  ;;  %v4616_v0 = vpop.f32.mrf.mxu0 }
 0x3c2   : > { %3991 = vmatmul.f32.gmra.mxu3 %v2774_v4  ;;  %6133 = vmatmul.msk.f32.gmra.mxu0 %vm747_vm0, %v8988_v57 }
 0x3c4   : > { %v3271_v58 = vpop.f32.mrf.mxu2 }
 0x3c5   : > { %3559 = vst [vmem:[#allocation5 + $0x180] sm:$0xff] %v3271_v58  ;;  %v3944_v31 = vpop.f32.mrf.mxu3  ;;  %v2654_v58 = vld [vmem:[%s9926_s5 + $0x240] sm:$0xff] }
 0x3c6   : > { %v2393_v23 = vpop.f32.mrf.mxu1  ;;  %v4889_v19 = vmul.f32 %v4601_v18, %v3944_v31 }
 0x3c7   : > { %v2775_v42 = vmul.f32 %v2647_v38, %v2393_v23 }
 0x3c8   : > { %5017 = vst [vmem:[#allocation4 + $0x180] sm:$0xff] %v4889_v19  ;;  %v9216_v19 = vld [vmem:[%s9925_s4 + $0x2c0] sm:$0xff] }
 0x3c9   : > { %6017 = vmatmul.msk.f32.gmra.mxu1 %vm747_vm0, %v9132_v48  ;;  %3321 = vmatmul.f32.gmra.mxu2 %v2775_v42  ;;  %v4619_v50 = vpop.f32.mrf.mxu0 }
 0x3ca   : > { %3994 = vmatmul.f32.gmra.mxu3 %v2775_v42  ;;  %6134 = vmatmul.msk.f32.gmra.mxu0 %vm747_vm0, %v9000_v34 }
 0x3cc   : > { %v3274_v51 = vpop.f32.mrf.mxu2 }
 0x3cd   : > { %3560 = vst [vmem:[#allocation5 + $0x188] sm:$0xff] %v3274_v51  ;;  %v3947_v6 = vpop.f32.mrf.mxu3  ;;  %v2655_v51 = vld [vmem:[%s9926_s5 + $0x248] sm:$0xff] }
 0x3ce   : > { %v2396_v47 = vpop.f32.mrf.mxu1  ;;  %v4890_v43 = vmul.f32 %v4604_v41, %v3947_v6 }
 0x3cf   : > { %v2776_v45 = vmul.f32 %v2648_v46, %v2396_v47 }
 0x3d0   : > { %5018 = vst [vmem:[#allocation4 + $0x188] sm:$0xff] %v4890_v43  ;;  %v9228_v43 = vld [vmem:[%s9925_s4 + $0x2c8] sm:$0xff] }
 0x3d1   : > { %6018 = vmatmul.msk.f32.gmra.mxu1 %vm747_vm0, %v9144_v13  ;;  %3324 = vmatmul.f32.gmra.mxu2 %v2776_v45  ;;  %v4622_v59 = vpop.f32.mrf.mxu0 }
 0x3d2   : > { %3997 = vmatmul.f32.gmra.mxu3 %v2776_v45  ;;  %6135 = vmatmul.msk.f32.gmra.mxu0 %vm747_vm0, %v9012_v26 }
 0x3d4   : > { %v3277_v24 = vpop.f32.mrf.mxu2 }
 0x3d5   : > { %3561 = vst [vmem:[#allocation5 + $0x190] sm:$0xff] %v3277_v24  ;;  %v3950_v63 = vpop.f32.mrf.mxu3  ;;  %v2656_v24 = vld [vmem:[%s9926_s5 + $0x250] sm:$0xff] }
 0x3d6   : > { %v2399_v52 = vpop.f32.mrf.mxu1  ;;  %v4891_v57 = vmul.f32 %v4607_v55, %v3950_v63 }
 0x3d7   : > { %v2777_v11 = vmul.f32 %v2649_v29, %v2399_v52 }
 0x3d8   : > { %5019 = vst [vmem:[#allocation4 + $0x190] sm:$0xff] %v4891_v57  ;;  %v9240_v57 = vld [vmem:[%s9925_s4 + $0x2d0] sm:$0xff] }
 0x3d9   : > { %6019 = vmatmul.msk.f32.gmra.mxu1 %vm747_vm0, %v9156_v5  ;;  %3327 = vmatmul.f32.gmra.mxu2 %v2777_v11  ;;  %v4625_v9 = vpop.f32.mrf.mxu0 }
 0x3da   : > { %4000 = vmatmul.f32.gmra.mxu3 %v2777_v11  ;;  %6136 = vmatmul.msk.f32.gmra.mxu0 %vm747_vm0, %v9024_v44 }
 0x3dc   : > { %v3280_v54 = vpop.f32.mrf.mxu2 }
 0x3dd   : > { %3562 = vst [vmem:[#allocation5 + $0x198] sm:$0xff] %v3280_v54  ;;  %v3953_v56 = vpop.f32.mrf.mxu3  ;;  %v2657_v54 = vld [vmem:[%s9926_s5 + $0x258] sm:$0xff] }
 0x3de   : > { %v2402_v18 = vpop.f32.mrf.mxu1  ;;  %v4892_v34 = vmul.f32 %v4610_v32, %v3953_v56 }
 0x3df   : > { %v2778_v60 = vmul.f32 %v2650_v53, %v2402_v18 }
 0x3e0   : > { %5020 = vst [vmem:[#allocation4 + $0x198] sm:$0xff] %v4892_v34  ;;  %v9252_v34 = vld [vmem:[%s9925_s4 + $0x2d8] sm:$0xff] }
 0x3e1   : > { %6020 = vmatmul.msk.f32.gmra.mxu1 %vm747_vm0, %v9168_v16  ;;  %3330 = vmatmul.f32.gmra.mxu2 %v2778_v60  ;;  %v4628_v40 = vpop.f32.mrf.mxu0 }
 0x3e2   : > { %4003 = vmatmul.f32.gmra.mxu3 %v2778_v60  ;;  %6137 = vmatmul.msk.f32.gmra.mxu0 %vm747_vm0, %v9036_v15 }
 0x3e4   : > { %v3283_v27 = vpop.f32.mrf.mxu2 }
 0x3e5   : > { %3563 = vst [vmem:[#allocation5 + $0x1a0] sm:$0xff] %v3283_v27  ;;  %v3956_v7 = vpop.f32.mrf.mxu3  ;;  %v2658_v27 = vld [vmem:[%s9926_s5 + $0x260] sm:$0xff] }
 0x3e6   : > { %v2405_v41 = vpop.f32.mrf.mxu1  ;;  %v4893_v26 = vmul.f32 %v4613_v10, %v3956_v7 }
 0x3e7   : > { %v2779_v14 = vmul.f32 %v2651_v3, %v2405_v41 }
 0x3e8   : > { %5021 = vst [vmem:[#allocation4 + $0x1a0] sm:$0xff] %v4893_v26  ;;  %v9264_v26 = vld [vmem:[%s9925_s4 + $0x2e0] sm:$0xff] }
 0x3e9   : > { %6021 = vmatmul.msk.f32.gmra.mxu1 %vm747_vm0, %v9180_v8  ;;  %3333 = vmatmul.f32.gmra.mxu2 %v2779_v14  ;;  %v4631_v28 = vpop.f32.mrf.mxu0 }
 0x3ea   : > { %4006 = vmatmul.f32.gmra.mxu3 %v2779_v14  ;;  %6138 = vmatmul.msk.f32.gmra.mxu0 %vm747_vm0, %v9048_v49 }
 0x3ec   : > { %v3286_v37 = vpop.f32.mrf.mxu2 }
 0x3ed   : > { %3564 = vst [vmem:[#allocation5 + $0x1a8] sm:$0xff] %v3286_v37  ;;  %v3959_v17 = vpop.f32.mrf.mxu3  ;;  %v2659_v37 = vld [vmem:[%s9926_s5 + $0x268] sm:$0xff] }
 0x3ee   : > { %v2408_v55 = vpop.f32.mrf.mxu1  ;;  %v4894_v44 = vmul.f32 %v4616_v0, %v3959_v17 }
 0x3ef   : > { %v2780_v20 = vmul.f32 %v2652_v35, %v2408_v55 }
 0x3f0   : > { %5022 = vst [vmem:[#allocation4 + $0x1a8] sm:$0xff] %v4894_v44  ;;  %v9276_v44 = vld [vmem:[%s9925_s4 + $0x2e8] sm:$0xff] }
 0x3f1   : > { %6022 = vmatmul.msk.f32.gmra.mxu1 %vm747_vm0, %v9192_v39  ;;  %3336 = vmatmul.f32.gmra.mxu2 %v2780_v20  ;;  %v4634_v31 = vpop.f32.mrf.mxu0 }
 0x3f2   : > { %4009 = vmatmul.f32.gmra.mxu3 %v2780_v20  ;;  %6139 = vmatmul.msk.f32.gmra.mxu0 %vm747_vm0, %v9060_v2 }
 0x3f4   : > { %v3289_v30 = vpop.f32.mrf.mxu2 }
 0x3f5   : > { %3565 = vst [vmem:[#allocation5 + $0x1b0] sm:$0xff] %v3289_v30  ;;  %v3962_v25 = vpop.f32.mrf.mxu3  ;;  %v2660_v30 = vld [vmem:[%s9926_s5 + $0x270] sm:$0xff] }
 0x3f6   : > { %v2411_v32 = vpop.f32.mrf.mxu1  ;;  %v4895_v15 = vmul.f32 %v4619_v50, %v3962_v25 }
 0x3f7   : > { %v2781_v33 = vmul.f32 %v2653_v21, %v2411_v32 }
 0x3f8   : > { %5023 = vst [vmem:[#allocation4 + $0x1b0] sm:$0xff] %v4895_v15  ;;  %v9288_v15 = vld [vmem:[%s9925_s4 + $0x2f0] sm:$0xff] }
 0x3f9   : > { %6023 = vmatmul.msk.f32.gmra.mxu1 %vm747_vm0, %v9204_v12  ;;  %3339 = vmatmul.f32.gmra.mxu2 %v2781_v33  ;;  %v4637_v6 = vpop.f32.mrf.mxu0 }
 0x3fa   : > { %4012 = vmatmul.f32.gmra.mxu3 %v2781_v33  ;;  %6140 = vmatmul.msk.f32.gmra.mxu0 %vm747_vm0, %v9072_v61 }
 0x3fc   : > { %v3292_v4 = vpop.f32.mrf.mxu2 }
 0x3fd   : > { %3566 = vst [vmem:[#allocation5 + $0x1b8] sm:$0xff] %v3292_v4  ;;  %v3965_v38 = vpop.f32.mrf.mxu3  ;;  %v2661_v4 = vld [vmem:[%s9926_s5 + $0x278] sm:$0xff] }
 0x3fe   : > { %v2414_v10 = vpop.f32.mrf.mxu1  ;;  %v4896_v49 = vmul.f32 %v4622_v59, %v3965_v38 }
 0x3ff   : > { %v2782_v23 = vmul.f32 %v2654_v58, %v2414_v10 }
 0x400   : > { %5024 = vst [vmem:[#allocation4 + $0x1b8] sm:$0xff] %v4896_v49  ;;  %v9300_v49 = vld [vmem:[%s9925_s4 + $0x2f8] sm:$0xff] }
 0x401   : > { %6024 = vmatmul.msk.f32.gmra.mxu1 %vm747_vm0, %v9216_v19  ;;  %3342 = vmatmul.f32.gmra.mxu2 %v2782_v23  ;;  %v4640_v63 = vpop.f32.mrf.mxu0 }
 0x402   : > { %4015 = vmatmul.f32.gmra.mxu3 %v2782_v23  ;;  %6141 = vmatmul.msk.f32.gmra.mxu0 %vm747_vm0, %v9084_v1 }
 0x404   : > { %v3295_v42 = vpop.f32.mrf.mxu2 }
 0x405   : > { %3567 = vst [vmem:[#allocation5 + $0x1c0] sm:$0xff] %v3295_v42  ;;  %v3968_v46 = vpop.f32.mrf.mxu3  ;;  %v2662_v42 = vld [vmem:[%s9926_s5 + $0x280] sm:$0xff] }
 0x406   : > { %v2417_v0 = vpop.f32.mrf.mxu1  ;;  %v4897_v2 = vmul.f32 %v4625_v9, %v3968_v46 }
 0x407   : > { %v2783_v47 = vmul.f32 %v2655_v51, %v2417_v0 }
 0x408   : > { %5025 = vst [vmem:[#allocation4 + $0x1c0] sm:$0xff] %v4897_v2  ;;  %v9312_v2 = vld [vmem:[%s9925_s4 + $0x300] sm:$0xff] }
 0x409   : > { %6025 = vmatmul.msk.f32.gmra.mxu1 %vm747_vm0, %v9228_v43  ;;  %3345 = vmatmul.f32.gmra.mxu2 %v2783_v47  ;;  %v4643_v56 = vpop.f32.mrf.mxu0 }
 0x40a   : > { %4018 = vmatmul.f32.gmra.mxu3 %v2783_v47  ;;  %6142 = vmatmul.msk.f32.gmra.mxu0 %vm747_vm0, %v9096_v22 }
 0x40c   : > { %v3298_v45 = vpop.f32.mrf.mxu2 }
 0x40d   : > { %3568 = vst [vmem:[#allocation5 + $0x1c8] sm:$0xff] %v3298_v45  ;;  %v3971_v29 = vpop.f32.mrf.mxu3  ;;  %v2663_v45 = vld [vmem:[%s9926_s5 + $0x288] sm:$0xff] }
 0x40e   : > { %v2420_v50 = vpop.f32.mrf.mxu1  ;;  %v4898_v61 = vmul.f32 %v4628_v40, %v3971_v29 }
 0x40f   : > { %v2784_v52 = vmul.f32 %v2656_v24, %v2420_v50 }
 0x410   : > { %5026 = vst [vmem:[#allocation4 + $0x1c8] sm:$0xff] %v4898_v61  ;;  %v9324_v61 = vld [vmem:[%s9925_s4 + $0x308] sm:$0xff] }
 0x411   : > { %6026 = vmatmul.msk.f32.gmra.mxu1 %vm747_vm0, %v9240_v57  ;;  %3348 = vmatmul.f32.gmra.mxu2 %v2784_v52  ;;  %v4646_v7 = vpop.f32.mrf.mxu0 }
 0x412   : > { %4021 = vmatmul.f32.gmra.mxu3 %v2784_v52  ;;  %6143 = vmatmul.msk.f32.gmra.mxu0 %vm747_vm0, %v9108_v36 }
 0x414   : > { %v3301_v11 = vpop.f32.mrf.mxu2 }
 0x415   : > { %3569 = vst [vmem:[#allocation5 + $0x1d0] sm:$0xff] %v3301_v11  ;;  %v3974_v53 = vpop.f32.mrf.mxu3  ;;  %v2664_v11 = vld [vmem:[%s9926_s5 + $0x290] sm:$0xff] }
 0x416   : > { %v2423_v59 = vpop.f32.mrf.mxu1  ;;  %v4899_v1 = vmul.f32 %v4631_v28, %v3974_v53 }
 0x417   : > { %v2785_v18 = vmul.f32 %v2657_v54, %v2423_v59 }
 0x418   : > { %5027 = vst [vmem:[#allocation4 + $0x1d0] sm:$0xff] %v4899_v1  ;;  %v9336_v1 = vld [vmem:[%s9925_s4 + $0x310] sm:$0xff] }
 0x419   : > { %6027 = vmatmul.msk.f32.gmra.mxu1 %vm747_vm0, %v9252_v34  ;;  %3351 = vmatmul.f32.gmra.mxu2 %v2785_v18  ;;  %v4649_v17 = vpop.f32.mrf.mxu0 }
 0x41a   : > { %4024 = vmatmul.f32.gmra.mxu3 %v2785_v18  ;;  %6144 = vmatmul.msk.f32.gmra.mxu0 %vm747_vm0, %v9120_v62 }
 0x41c   : > { %v3304_v60 = vpop.f32.mrf.mxu2 }
 0x41d   : > { %3570 = vst [vmem:[#allocation5 + $0x1d8] sm:$0xff] %v3304_v60  ;;  %v3977_v3 = vpop.f32.mrf.mxu3  ;;  %v2665_v60 = vld [vmem:[%s9926_s5 + $0x298] sm:$0xff] }
 0x41e   : > { %v2426_v9 = vpop.f32.mrf.mxu1  ;;  %v4900_v22 = vmul.f32 %v4634_v31, %v3977_v3 }
 0x41f   : > { %v2786_v41 = vmul.f32 %v2658_v27, %v2426_v9 }
 0x420   : > { %5028 = vst [vmem:[#allocation4 + $0x1d8] sm:$0xff] %v4900_v22  ;;  %v9348_v22 = vld [vmem:[%s9925_s4 + $0x318] sm:$0xff] }
 0x421   : > { %6028 = vmatmul.msk.f32.gmra.mxu1 %vm747_vm0, %v9264_v26  ;;  %3354 = vmatmul.f32.gmra.mxu2 %v2786_v41  ;;  %v4652_v25 = vpop.f32.mrf.mxu0 }
 0x422   : > { %4027 = vmatmul.f32.gmra.mxu3 %v2786_v41  ;;  %6145 = vmatmul.msk.f32.gmra.mxu0 %vm747_vm0, %v9132_v48 }
 0x424   : > { %v3307_v14 = vpop.f32.mrf.mxu2 }
 0x425   : > { %3571 = vst [vmem:[#allocation5 + $0x1e0] sm:$0xff] %v3307_v14  ;;  %v3980_v35 = vpop.f32.mrf.mxu3  ;;  %v2666_v14 = vld [vmem:[%s9926_s5 + $0x2a0] sm:$0xff] }
 0x426   : > { %v2429_v40 = vpop.f32.mrf.mxu1  ;;  %v4901_v36 = vmul.f32 %v4637_v6, %v3980_v35 }
 0x427   : > { %v2787_v55 = vmul.f32 %v2659_v37, %v2429_v40 }
 0x428   : > { %5029 = vst [vmem:[#allocation4 + $0x1e0] sm:$0xff] %v4901_v36  ;;  %v9360_v36 = vld [vmem:[%s9925_s4 + $0x320] sm:$0xff] }
 0x429   : > { %6029 = vmatmul.msk.f32.gmra.mxu1 %vm747_vm0, %v9276_v44  ;;  %3357 = vmatmul.f32.gmra.mxu2 %v2787_v55  ;;  %v4655_v38 = vpop.f32.mrf.mxu0 }
 0x42a   : > { %4030 = vmatmul.f32.gmra.mxu3 %v2787_v55  ;;  %6146 = vmatmul.msk.f32.gmra.mxu0 %vm747_vm0, %v9144_v13 }
 0x42c   : > { %v3310_v20 = vpop.f32.mrf.mxu2 }
 0x42d   : > { %3572 = vst [vmem:[#allocation5 + $0x1e8] sm:$0xff] %v3310_v20  ;;  %v3983_v21 = vpop.f32.mrf.mxu3  ;;  %v2667_v20 = vld [vmem:[%s9926_s5 + $0x2a8] sm:$0xff] }
 0x42e   : > { %v2432_v28 = vpop.f32.mrf.mxu1  ;;  %v4902_v62 = vmul.f32 %v4640_v63, %v3983_v21 }
 0x42f   : > { %v2788_v32 = vmul.f32 %v2660_v30, %v2432_v28 }
 0x430   : > { %5030 = vst [vmem:[#allocation4 + $0x1e8] sm:$0xff] %v4902_v62  ;;  %v9372_v62 = vld [vmem:[%s9925_s4 + $0x328] sm:$0xff] }
 0x431   : > { %6030 = vmatmul.msk.f32.gmra.mxu1 %vm747_vm0, %v9288_v15  ;;  %3360 = vmatmul.f32.gmra.mxu2 %v2788_v32  ;;  %v4658_v46 = vpop.f32.mrf.mxu0 }
 0x432   : > { %4033 = vmatmul.f32.gmra.mxu3 %v2788_v32  ;;  %6147 = vmatmul.msk.f32.gmra.mxu0 %vm747_vm0, %v9156_v5 }
 0x434   : > { %v3313_v33 = vpop.f32.mrf.mxu2 }
 0x435   : > { %3573 = vst [vmem:[#allocation5 + $0x1f0] sm:$0xff] %v3313_v33  ;;  %v3986_v58 = vpop.f32.mrf.mxu3  ;;  %v2668_v33 = vld [vmem:[%s9926_s5 + $0x2b0] sm:$0xff] }
 0x436   : > { %v2435_v31 = vpop.f32.mrf.mxu1  ;;  %v4903_v48 = vmul.f32 %v4643_v56, %v3986_v58 }
 0x437   : > { %v2789_v10 = vmul.f32 %v2661_v4, %v2435_v31 }
 0x438   : > { %5031 = vst [vmem:[#allocation4 + $0x1f0] sm:$0xff] %v4903_v48  ;;  %v9384_v48 = vld [vmem:[%s9925_s4 + $0x330] sm:$0xff] }
 0x439   : > { %6031 = vmatmul.msk.f32.gmra.mxu1 %vm747_vm0, %v9300_v49  ;;  %3363 = vmatmul.f32.gmra.mxu2 %v2789_v10  ;;  %v4661_v29 = vpop.f32.mrf.mxu0 }
 0x43a   : > { %4036 = vmatmul.f32.gmra.mxu3 %v2789_v10  ;;  %6148 = vmatmul.msk.f32.gmra.mxu0 %vm747_vm0, %v9168_v16 }
 0x43c   : > { %v3316_v23 = vpop.f32.mrf.mxu2 }
 0x43d   : > { %3574 = vst [vmem:[#allocation5 + $0x1f8] sm:$0xff] %v3316_v23  ;;  %v3989_v51 = vpop.f32.mrf.mxu3  ;;  %v2669_v23 = vld [vmem:[%s9926_s5 + $0x2b8] sm:$0xff] }
 0x43e   : > { %v2438_v6 = vpop.f32.mrf.mxu1  ;;  %v4904_v13 = vmul.f32 %v4646_v7, %v3989_v51 }
 0x43f   : > { %v2790_v0 = vmul.f32 %v2662_v42, %v2438_v6 }
 0x440   : > { %5032 = vst [vmem:[#allocation4 + $0x1f8] sm:$0xff] %v4904_v13  ;;  %v9396_v13 = vld [vmem:[%s9925_s4 + $0x338] sm:$0xff] }
 0x441   : > { %6032 = vmatmul.msk.f32.gmra.mxu1 %vm747_vm0, %v9312_v2  ;;  %3366 = vmatmul.f32.gmra.mxu2 %v2790_v0  ;;  %v4664_v53 = vpop.f32.mrf.mxu0 }
 0x442   : > { %4039 = vmatmul.f32.gmra.mxu3 %v2790_v0  ;;  %6149 = vmatmul.msk.f32.gmra.mxu0 %vm747_vm0, %v9180_v8 }
 0x444   : > { %v3319_v47 = vpop.f32.mrf.mxu2 }
 0x445   : > { %3575 = vst [vmem:[#allocation5 + $0x200] sm:$0xff] %v3319_v47  ;;  %v3992_v24 = vpop.f32.mrf.mxu3  ;;  %v2670_v47 = vld [vmem:[%s9926_s5 + $0x2c0] sm:$0xff] }
 0x446   : > { %v2441_v63 = vpop.f32.mrf.mxu1  ;;  %v4905_v5 = vmul.f32 %v4649_v17, %v3992_v24 }
 0x447   : > { %v2791_v50 = vmul.f32 %v2663_v45, %v2441_v63 }
 0x448   : > { %5033 = vst [vmem:[#allocation4 + $0x200] sm:$0xff] %v4905_v5  ;;  %v9408_v5 = vld [vmem:[%s9925_s4 + $0x340] sm:$0xff] }
 0x449   : > { %6033 = vmatmul.msk.f32.gmra.mxu1 %vm747_vm0, %v9324_v61  ;;  %3369 = vmatmul.f32.gmra.mxu2 %v2791_v50  ;;  %v4667_v3 = vpop.f32.mrf.mxu0 }
 0x44a   : > { %4042 = vmatmul.f32.gmra.mxu3 %v2791_v50  ;;  %6150 = vmatmul.msk.f32.gmra.mxu0 %vm747_vm0, %v9192_v39 }
 0x44c   : > { %v3322_v52 = vpop.f32.mrf.mxu2 }
 0x44d   : > { %3576 = vst [vmem:[#allocation5 + $0x208] sm:$0xff] %v3322_v52  ;;  %v3995_v54 = vpop.f32.mrf.mxu3  ;;  %v2671_v52 = vld [vmem:[%s9926_s5 + $0x2c8] sm:$0xff] }
 0x44e   : > { %v2444_v56 = vpop.f32.mrf.mxu1  ;;  %v4906_v16 = vmul.f32 %v4652_v25, %v3995_v54 }
 0x44f   : > { %v2792_v59 = vmul.f32 %v2664_v11, %v2444_v56 }
 0x450   : > { %5034 = vst [vmem:[#allocation4 + $0x208] sm:$0xff] %v4906_v16  ;;  %v9420_v16 = vld [vmem:[%s9925_s4 + $0x348] sm:$0xff] }
 0x451   : > { %6034 = vmatmul.msk.f32.gmra.mxu1 %vm747_vm0, %v9336_v1  ;;  %3372 = vmatmul.f32.gmra.mxu2 %v2792_v59  ;;  %v4670_v35 = vpop.f32.mrf.mxu0 }
 0x452   : > { %4045 = vmatmul.f32.gmra.mxu3 %v2792_v59  ;;  %6151 = vmatmul.msk.f32.gmra.mxu0 %vm747_vm0, %v9204_v12 }
 0x454   : > { %v3325_v18 = vpop.f32.mrf.mxu2 }
 0x455   : > { %3577 = vst [vmem:[#allocation5 + $0x210] sm:$0xff] %v3325_v18  ;;  %v3998_v27 = vpop.f32.mrf.mxu3  ;;  %v2672_v18 = vld [vmem:[%s9926_s5 + $0x2d0] sm:$0xff] }
 0x456   : > { %v2447_v7 = vpop.f32.mrf.mxu1  ;;  %v4907_v8 = vmul.f32 %v4655_v38, %v3998_v27 }
 0x457   : > { %v2793_v9 = vmul.f32 %v2665_v60, %v2447_v7 }
 0x458   : > { %5035 = vst [vmem:[#allocation4 + $0x210] sm:$0xff] %v4907_v8  ;;  %v9432_v8 = vld [vmem:[%s9925_s4 + $0x350] sm:$0xff] }
 0x459   : > { %6035 = vmatmul.msk.f32.gmra.mxu1 %vm747_vm0, %v9348_v22  ;;  %3375 = vmatmul.f32.gmra.mxu2 %v2793_v9  ;;  %v4673_v21 = vpop.f32.mrf.mxu0 }
 0x45a   : > { %4048 = vmatmul.f32.gmra.mxu3 %v2793_v9  ;;  %6152 = vmatmul.msk.f32.gmra.mxu0 %vm747_vm0, %v9216_v19 }
 0x45c   : > { %v3328_v41 = vpop.f32.mrf.mxu2 }
 0x45d   : > { %3578 = vst [vmem:[#allocation5 + $0x218] sm:$0xff] %v3328_v41  ;;  %v4001_v37 = vpop.f32.mrf.mxu3  ;;  %v2673_v41 = vld [vmem:[%s9926_s5 + $0x2d8] sm:$0xff] }
 0x45e   : > { %v2450_v17 = vpop.f32.mrf.mxu1  ;;  %v4908_v39 = vmul.f32 %v4658_v46, %v4001_v37 }
 0x45f   : > { %v2794_v40 = vmul.f32 %v2666_v14, %v2450_v17 }
 0x460   : > { %5036 = vst [vmem:[#allocation4 + $0x218] sm:$0xff] %v4908_v39  ;;  %v9444_v39 = vld [vmem:[%s9925_s4 + $0x358] sm:$0xff] }
 0x461   : > { %6036 = vmatmul.msk.f32.gmra.mxu1 %vm747_vm0, %v9360_v36  ;;  %3378 = vmatmul.f32.gmra.mxu2 %v2794_v40  ;;  %v4676_v58 = vpop.f32.mrf.mxu0 }
 0x462   : > { %4051 = vmatmul.f32.gmra.mxu3 %v2794_v40  ;;  %6153 = vmatmul.msk.f32.gmra.mxu0 %vm747_vm0, %v9228_v43 }
 0x464   : > { %v3331_v55 = vpop.f32.mrf.mxu2 }
 0x465   : > { %3579 = vst [vmem:[#allocation5 + $0x220] sm:$0xff] %v3331_v55  ;;  %v4004_v30 = vpop.f32.mrf.mxu3  ;;  %v2674_v55 = vld [vmem:[%s9926_s5 + $0x2e0] sm:$0xff] }
 0x466   : > { %v2453_v25 = vpop.f32.mrf.mxu1  ;;  %v4909_v12 = vmul.f32 %v4661_v29, %v4004_v30 }
 0x467   : > { %v2795_v28 = vmul.f32 %v2667_v20, %v2453_v25 }
 0x468   : > { %5037 = vst [vmem:[#allocation4 + $0x220] sm:$0xff] %v4909_v12  ;;  %v9456_v12 = vld [vmem:[%s9925_s4 + $0x360] sm:$0xff] }
 0x469   : > { %6037 = vmatmul.msk.f32.gmra.mxu1 %vm747_vm0, %v9372_v62  ;;  %3381 = vmatmul.f32.gmra.mxu2 %v2795_v28  ;;  %v4679_v51 = vpop.f32.mrf.mxu0 }
 0x46a   : > { %4054 = vmatmul.f32.gmra.mxu3 %v2795_v28  ;;  %6154 = vmatmul.msk.f32.gmra.mxu0 %vm747_vm0, %v9240_v57 }
 0x46c   : > { %v3334_v32 = vpop.f32.mrf.mxu2 }
 0x46d   : > { %3580 = vst [vmem:[#allocation5 + $0x228] sm:$0xff] %v3334_v32  ;;  %v4007_v4 = vpop.f32.mrf.mxu3  ;;  %v2675_v32 = vld [vmem:[%s9926_s5 + $0x2e8] sm:$0xff] }
 0x46e   : > { %v2456_v38 = vpop.f32.mrf.mxu1  ;;  %v4910_v19 = vmul.f32 %v4664_v53, %v4007_v4 }
 0x46f   : > { %v2796_v31 = vmul.f32 %v2668_v33, %v2456_v38 }
 0x470   : > { %5038 = vst [vmem:[#allocation4 + $0x228] sm:$0xff] %v4910_v19  ;;  %v9468_v19 = vld [vmem:[%s9925_s4 + $0x368] sm:$0xff] }
 0x471   : > { %6038 = vmatmul.msk.f32.gmra.mxu1 %vm747_vm0, %v9384_v48  ;;  %3384 = vmatmul.f32.gmra.mxu2 %v2796_v31  ;;  %v4682_v24 = vpop.f32.mrf.mxu0 }
 0x472   : > { %4057 = vmatmul.f32.gmra.mxu3 %v2796_v31  ;;  %6155 = vmatmul.msk.f32.gmra.mxu0 %vm747_vm0, %v9252_v34 }
 0x474   : > { %v3337_v10 = vpop.f32.mrf.mxu2 }
 0x475   : > { %3581 = vst [vmem:[#allocation5 + $0x230] sm:$0xff] %v3337_v10  ;;  %v4010_v42 = vpop.f32.mrf.mxu3  ;;  %v2676_v10 = vld [vmem:[%s9926_s5 + $0x2f0] sm:$0xff] }
 0x476   : > { %v2459_v46 = vpop.f32.mrf.mxu1  ;;  %v4911_v43 = vmul.f32 %v4667_v3, %v4010_v42 }
 0x477   : > { %v2797_v6 = vmul.f32 %v2669_v23, %v2459_v46 }
 0x478   : > { %5039 = vst [vmem:[#allocation4 + $0x230] sm:$0xff] %v4911_v43  ;;  %v9480_v43 = vld [vmem:[%s9925_s4 + $0x370] sm:$0xff] }
 0x479   : > { %6039 = vmatmul.msk.f32.gmra.mxu1 %vm747_vm0, %v9396_v13  ;;  %3387 = vmatmul.f32.gmra.mxu2 %v2797_v6  ;;  %v4685_v54 = vpop.f32.mrf.mxu0 }
 0x47a   : > { %4060 = vmatmul.f32.gmra.mxu3 %v2797_v6  ;;  %6156 = vmatmul.msk.f32.gmra.mxu0 %vm747_vm0, %v9264_v26 }
 0x47c   : > { %v3340_v0 = vpop.f32.mrf.mxu2 }
 0x47d   : > { %3582 = vst [vmem:[#allocation5 + $0x238] sm:$0xff] %v3340_v0  ;;  %v4013_v45 = vpop.f32.mrf.mxu3  ;;  %v2677_v0 = vld [vmem:[%s9926_s5 + $0x2f8] sm:$0xff] }
 0x47e   : > { %v2462_v29 = vpop.f32.mrf.mxu1  ;;  %v4912_v57 = vmul.f32 %v4670_v35, %v4013_v45 }
 0x47f   : > { %v2798_v63 = vmul.f32 %v2670_v47, %v2462_v29 }
 0x480   : > { %5040 = vst [vmem:[#allocation4 + $0x238] sm:$0xff] %v4912_v57  ;;  %v9492_v57 = vld [vmem:[%s9925_s4 + $0x378] sm:$0xff] }
 0x481   : > { %6040 = vmatmul.msk.f32.gmra.mxu1 %vm747_vm0, %v9408_v5  ;;  %3390 = vmatmul.f32.gmra.mxu2 %v2798_v63  ;;  %v4688_v27 = vpop.f32.mrf.mxu0 }
 0x482   : > { %4063 = vmatmul.f32.gmra.mxu3 %v2798_v63  ;;  %6157 = vmatmul.msk.f32.gmra.mxu0 %vm747_vm0, %v9276_v44 }
 0x484   : > { %v3343_v50 = vpop.f32.mrf.mxu2 }
 0x485   : > { %3583 = vst [vmem:[#allocation5 + $0x240] sm:$0xff] %v3343_v50  ;;  %v4016_v11 = vpop.f32.mrf.mxu3  ;;  %v2678_v50 = vld [vmem:[%s9926_s5 + $0x300] sm:$0xff] }
 0x486   : > { %v2465_v53 = vpop.f32.mrf.mxu1  ;;  %v4913_v34 = vmul.f32 %v4673_v21, %v4016_v11 }
 0x487   : > { %v2799_v56 = vmul.f32 %v2671_v52, %v2465_v53 }
 0x488   : > { %5041 = vst [vmem:[#allocation4 + $0x240] sm:$0xff] %v4913_v34  ;;  %v9504_v34 = vld [vmem:[%s9925_s4 + $0x380] sm:$0xff] }
 0x489   : > { %6041 = vmatmul.msk.f32.gmra.mxu1 %vm747_vm0, %v9420_v16  ;;  %3393 = vmatmul.f32.gmra.mxu2 %v2799_v56  ;;  %v4691_v37 = vpop.f32.mrf.mxu0 }
 0x48a   : > { %4066 = vmatmul.f32.gmra.mxu3 %v2799_v56  ;;  %6158 = vmatmul.msk.f32.gmra.mxu0 %vm747_vm0, %v9288_v15 }
 0x48c   : > { %v3346_v59 = vpop.f32.mrf.mxu2 }
 0x48d   : > { %3584 = vst [vmem:[#allocation5 + $0x248] sm:$0xff] %v3346_v59  ;;  %v4019_v60 = vpop.f32.mrf.mxu3  ;;  %v2679_v59 = vld [vmem:[%s9926_s5 + $0x308] sm:$0xff] }
 0x48e   : > { %v2468_v3 = vpop.f32.mrf.mxu1  ;;  %v4914_v26 = vmul.f32 %v4676_v58, %v4019_v60 }
 0x48f   : > { %v2800_v7 = vmul.f32 %v2672_v18, %v2468_v3 }
 0x490   : > { %5042 = vst [vmem:[#allocation4 + $0x248] sm:$0xff] %v4914_v26  ;;  %v9516_v26 = vld [vmem:[%s9925_s4 + $0x388] sm:$0xff] }
 0x491   : > { %6042 = vmatmul.msk.f32.gmra.mxu1 %vm747_vm0, %v9432_v8  ;;  %3396 = vmatmul.f32.gmra.mxu2 %v2800_v7  ;;  %v4694_v30 = vpop.f32.mrf.mxu0 }
 0x492   : > { %4069 = vmatmul.f32.gmra.mxu3 %v2800_v7  ;;  %6159 = vmatmul.msk.f32.gmra.mxu0 %vm747_vm0, %v9300_v49 }
 0x494   : > { %v3349_v9 = vpop.f32.mrf.mxu2 }
 0x495   : > { %3585 = vst [vmem:[#allocation5 + $0x250] sm:$0xff] %v3349_v9  ;;  %v4022_v14 = vpop.f32.mrf.mxu3  ;;  %v2680_v9 = vld [vmem:[%s9926_s5 + $0x310] sm:$0xff] }
 0x496   : > { %v2471_v35 = vpop.f32.mrf.mxu1  ;;  %v4915_v44 = vmul.f32 %v4679_v51, %v4022_v14 }
 0x497   : > { %v2801_v17 = vmul.f32 %v2673_v41, %v2471_v35 }
 0x498   : > { %5043 = vst [vmem:[#allocation4 + $0x250] sm:$0xff] %v4915_v44  ;;  %v9528_v44 = vld [vmem:[%s9925_s4 + $0x390] sm:$0xff] }
 0x499   : > { %6043 = vmatmul.msk.f32.gmra.mxu1 %vm747_vm0, %v9444_v39  ;;  %3399 = vmatmul.f32.gmra.mxu2 %v2801_v17  ;;  %v4697_v4 = vpop.f32.mrf.mxu0 }
 0x49a   : > { %4072 = vmatmul.f32.gmra.mxu3 %v2801_v17  ;;  %6160 = vmatmul.msk.f32.gmra.mxu0 %vm747_vm0, %v9312_v2 }
 0x49c   : > { %v3352_v40 = vpop.f32.mrf.mxu2 }
 0x49d   : > { %3586 = vst [vmem:[#allocation5 + $0x258] sm:$0xff] %v3352_v40  ;;  %v4025_v20 = vpop.f32.mrf.mxu3  ;;  %v2681_v40 = vld [vmem:[%s9926_s5 + $0x318] sm:$0xff] }
 0x49e   : > { %v2474_v21 = vpop.f32.mrf.mxu1  ;;  %v4916_v15 = vmul.f32 %v4682_v24, %v4025_v20 }
 0x49f   : > { %v2802_v25 = vmul.f32 %v2674_v55, %v2474_v21 }
 0x4a0   : > { %5044 = vst [vmem:[#allocation4 + $0x258] sm:$0xff] %v4916_v15  ;;  %v9540_v15 = vld [vmem:[%s9925_s4 + $0x398] sm:$0xff] }
 0x4a1   : > { %6044 = vmatmul.msk.f32.gmra.mxu1 %vm747_vm0, %v9456_v12  ;;  %3402 = vmatmul.f32.gmra.mxu2 %v2802_v25  ;;  %v4700_v42 = vpop.f32.mrf.mxu0 }
 0x4a2   : > { %4075 = vmatmul.f32.gmra.mxu3 %v2802_v25  ;;  %6161 = vmatmul.msk.f32.gmra.mxu0 %vm747_vm0, %v9324_v61 }
 0x4a4   : > { %v3355_v28 = vpop.f32.mrf.mxu2 }
 0x4a5   : > { %3587 = vst [vmem:[#allocation5 + $0x260] sm:$0xff] %v3355_v28  ;;  %v4028_v33 = vpop.f32.mrf.mxu3  ;;  %v2682_v28 = vld [vmem:[%s9926_s5 + $0x320] sm:$0xff] }
 0x4a6   : > { %v2477_v58 = vpop.f32.mrf.mxu1  ;;  %v4917_v49 = vmul.f32 %v4685_v54, %v4028_v33 }
 0x4a7   : > { %v2803_v38 = vmul.f32 %v2675_v32, %v2477_v58 }
 0x4a8   : > { %5045 = vst [vmem:[#allocation4 + $0x260] sm:$0xff] %v4917_v49  ;;  %v9552_v49 = vld [vmem:[%s9925_s4 + $0x3a0] sm:$0xff] }
 0x4a9   : > { %6045 = vmatmul.msk.f32.gmra.mxu1 %vm747_vm0, %v9468_v19  ;;  %3405 = vmatmul.f32.gmra.mxu2 %v2803_v38  ;;  %v4703_v45 = vpop.f32.mrf.mxu0 }
 0x4aa   : > { %4078 = vmatmul.f32.gmra.mxu3 %v2803_v38  ;;  %6162 = vmatmul.msk.f32.gmra.mxu0 %vm747_vm0, %v9336_v1 }
 0x4ac   : > { %v3358_v31 = vpop.f32.mrf.mxu2 }
 0x4ad   : > { %3588 = vst [vmem:[#allocation5 + $0x268] sm:$0xff] %v3358_v31  ;;  %v4031_v23 = vpop.f32.mrf.mxu3  ;;  %v2683_v31 = vld [vmem:[%s9926_s5 + $0x328] sm:$0xff] }
 0x4ae   : > { %v2480_v51 = vpop.f32.mrf.mxu1  ;;  %v4918_v2 = vmul.f32 %v4688_v27, %v4031_v23 }
 0x4af   : > { %v2804_v46 = vmul.f32 %v2676_v10, %v2480_v51 }
 0x4b0   : > { %5046 = vst [vmem:[#allocation4 + $0x268] sm:$0xff] %v4918_v2  ;;  %v9564_v2 = vld [vmem:[%s9925_s4 + $0x3a8] sm:$0xff] }
 0x4b1   : > { %6046 = vmatmul.msk.f32.gmra.mxu1 %vm747_vm0, %v9480_v43  ;;  %3408 = vmatmul.f32.gmra.mxu2 %v2804_v46  ;;  %v4706_v11 = vpop.f32.mrf.mxu0 }
 0x4b2   : > { %4081 = vmatmul.f32.gmra.mxu3 %v2804_v46  ;;  %6163 = vmatmul.msk.f32.gmra.mxu0 %vm747_vm0, %v9348_v22 }
 0x4b4   : > { %v3361_v6 = vpop.f32.mrf.mxu2 }
 0x4b5   : > { %3589 = vst [vmem:[#allocation5 + $0x270] sm:$0xff] %v3361_v6  ;;  %v4034_v47 = vpop.f32.mrf.mxu3  ;;  %v2684_v6 = vld [vmem:[%s9926_s5 + $0x330] sm:$0xff] }
 0x4b6   : > { %v2483_v24 = vpop.f32.mrf.mxu1  ;;  %v4919_v61 = vmul.f32 %v4691_v37, %v4034_v47 }
 0x4b7   : > { %v2805_v29 = vmul.f32 %v2677_v0, %v2483_v24 }
 0x4b8   : > { %5047 = vst [vmem:[#allocation4 + $0x270] sm:$0xff] %v4919_v61  ;;  %v9576_v61 = vld [vmem:[%s9925_s4 + $0x3b0] sm:$0xff] }
 0x4b9   : > { %6047 = vmatmul.msk.f32.gmra.mxu1 %vm747_vm0, %v9492_v57  ;;  %3411 = vmatmul.f32.gmra.mxu2 %v2805_v29  ;;  %v4709_v60 = vpop.f32.mrf.mxu0 }
 0x4ba   : > { %4084 = vmatmul.f32.gmra.mxu3 %v2805_v29  ;;  %6164 = vmatmul.msk.f32.gmra.mxu0 %vm747_vm0, %v9360_v36 }
 0x4bc   : > { %v3364_v63 = vpop.f32.mrf.mxu2 }
 0x4bd   : > { %3590 = vst [vmem:[#allocation5 + $0x278] sm:$0xff] %v3364_v63  ;;  %v4037_v52 = vpop.f32.mrf.mxu3  ;;  %v2685_v63 = vld [vmem:[%s9926_s5 + $0x338] sm:$0xff] }
 0x4be   : > { %v2486_v54 = vpop.f32.mrf.mxu1  ;;  %v4920_v1 = vmul.f32 %v4694_v30, %v4037_v52 }
 0x4bf   : > { %v2806_v53 = vmul.f32 %v2678_v50, %v2486_v54 }
 0x4c0   : > { %5048 = vst [vmem:[#allocation4 + $0x278] sm:$0xff] %v4920_v1  ;;  %v9588_v1 = vld [vmem:[%s9925_s4 + $0x3b8] sm:$0xff] }
 0x4c1   : > { %6048 = vmatmul.msk.f32.gmra.mxu1 %vm747_vm0, %v9504_v34  ;;  %3414 = vmatmul.f32.gmra.mxu2 %v2806_v53  ;;  %v4712_v14 = vpop.f32.mrf.mxu0 }
 0x4c2   : > { %4087 = vmatmul.f32.gmra.mxu3 %v2806_v53  ;;  %6165 = vmatmul.msk.f32.gmra.mxu0 %vm747_vm0, %v9372_v62 }
 0x4c4   : > { %v3367_v56 = vpop.f32.mrf.mxu2 }
 0x4c5   : > { %3591 = vst [vmem:[#allocation5 + $0x280] sm:$0xff] %v3367_v56  ;;  %v4040_v18 = vpop.f32.mrf.mxu3  ;;  %v2686_v56 = vld [vmem:[%s9926_s5 + $0x340] sm:$0xff] }
 0x4c6   : > { %v2489_v27 = vpop.f32.mrf.mxu1  ;;  %v4921_v22 = vmul.f32 %v4697_v4, %v4040_v18 }
 0x4c7   : > { %v2807_v3 = vmul.f32 %v2679_v59, %v2489_v27 }
 0x4c8   : > { %5049 = vst [vmem:[#allocation4 + $0x280] sm:$0xff] %v4921_v22  ;;  %v9600_v22 = vld [vmem:[%s9925_s4 + $0x3c0] sm:$0xff] }
 0x4c9   : > { %6049 = vmatmul.msk.f32.gmra.mxu1 %vm747_vm0, %v9516_v26  ;;  %3417 = vmatmul.f32.gmra.mxu2 %v2807_v3  ;;  %v4715_v20 = vpop.f32.mrf.mxu0 }
 0x4ca   : > { %4090 = vmatmul.f32.gmra.mxu3 %v2807_v3  ;;  %6166 = vmatmul.msk.f32.gmra.mxu0 %vm747_vm0, %v9384_v48 }
 0x4cc   : > { %v3370_v7 = vpop.f32.mrf.mxu2 }
 0x4cd   : > { %3592 = vst [vmem:[#allocation5 + $0x288] sm:$0xff] %v3370_v7  ;;  %v4043_v41 = vpop.f32.mrf.mxu3  ;;  %v2687_v7 = vld [vmem:[%s9926_s5 + $0x348] sm:$0xff] }
 0x4ce   : > { %v2492_v37 = vpop.f32.mrf.mxu1  ;;  %v4922_v36 = vmul.f32 %v4700_v42, %v4043_v41 }
 0x4cf   : > { %v2808_v35 = vmul.f32 %v2680_v9, %v2492_v37 }
 0x4d0   : > { %5050 = vst [vmem:[#allocation4 + $0x288] sm:$0xff] %v4922_v36  ;;  %v9612_v36 = vld [vmem:[%s9925_s4 + $0x3c8] sm:$0xff] }
 0x4d1   : > { %6050 = vmatmul.msk.f32.gmra.mxu1 %vm747_vm0, %v9528_v44  ;;  %3420 = vmatmul.f32.gmra.mxu2 %v2808_v35  ;;  %v4718_v33 = vpop.f32.mrf.mxu0 }
 0x4d2   : > { %4093 = vmatmul.f32.gmra.mxu3 %v2808_v35  ;;  %6167 = vmatmul.msk.f32.gmra.mxu0 %vm747_vm0, %v9396_v13 }
 0x4d4   : > { %v3373_v17 = vpop.f32.mrf.mxu2 }
 0x4d5   : > { %3593 = vst [vmem:[#allocation5 + $0x290] sm:$0xff] %v3373_v17  ;;  %v4046_v55 = vpop.f32.mrf.mxu3  ;;  %v2688_v17 = vld [vmem:[%s9926_s5 + $0x350] sm:$0xff] }
 0x4d6   : > { %v2495_v30 = vpop.f32.mrf.mxu1  ;;  %v4923_v62 = vmul.f32 %v4703_v45, %v4046_v55 }
 0x4d7   : > { %v2809_v21 = vmul.f32 %v2681_v40, %v2495_v30 }
 0x4d8   : > { %5051 = vst [vmem:[#allocation4 + $0x290] sm:$0xff] %v4923_v62  ;;  %v9624_v62 = vld [vmem:[%s9925_s4 + $0x3d0] sm:$0xff] }
 0x4d9   : > { %6051 = vmatmul.msk.f32.gmra.mxu1 %vm747_vm0, %v9540_v15  ;;  %3423 = vmatmul.f32.gmra.mxu2 %v2809_v21  ;;  %v4721_v23 = vpop.f32.mrf.mxu0 }
 0x4da   : > { %4096 = vmatmul.f32.gmra.mxu3 %v2809_v21  ;;  %6168 = vmatmul.msk.f32.gmra.mxu0 %vm747_vm0, %v9408_v5 }
 0x4dc   : > { %v3376_v25 = vpop.f32.mrf.mxu2 }
 0x4dd   : > { %3594 = vst [vmem:[#allocation5 + $0x298] sm:$0xff] %v3376_v25  ;;  %v4049_v32 = vpop.f32.mrf.mxu3  ;;  %v2689_v25 = vld [vmem:[%s9926_s5 + $0x358] sm:$0xff] }
 0x4de   : > { %v2498_v4 = vpop.f32.mrf.mxu1  ;;  %v4924_v48 = vmul.f32 %v4706_v11, %v4049_v32 }
 0x4df   : > { %v2810_v58 = vmul.f32 %v2682_v28, %v2498_v4 }
 0x4e0   : > { %5052 = vst [vmem:[#allocation4 + $0x298] sm:$0xff] %v4924_v48  ;;  %v9636_v48 = vld [vmem:[%s9925_s4 + $0x3d8] sm:$0xff] }
 0x4e1   : > { %6052 = vmatmul.msk.f32.gmra.mxu1 %vm747_vm0, %v9552_v49  ;;  %3426 = vmatmul.f32.gmra.mxu2 %v2810_v58  ;;  %v4724_v47 = vpop.f32.mrf.mxu0 }
 0x4e2   : > { %4099 = vmatmul.f32.gmra.mxu3 %v2810_v58  ;;  %6169 = vmatmul.msk.f32.gmra.mxu0 %vm747_vm0, %v9420_v16 }
 0x4e4   : > { %v3379_v38 = vpop.f32.mrf.mxu2 }
 0x4e5   : > { %3595 = vst [vmem:[#allocation5 + $0x2a0] sm:$0xff] %v3379_v38  ;;  %v4052_v10 = vpop.f32.mrf.mxu3  ;;  %v2690_v38 = vld [vmem:[%s9926_s5 + $0x360] sm:$0xff] }
 0x4e6   : > { %v2501_v42 = vpop.f32.mrf.mxu1  ;;  %v4925_v13 = vmul.f32 %v4709_v60, %v4052_v10 }
 0x4e7   : > { %v2811_v51 = vmul.f32 %v2683_v31, %v2501_v42 }
 0x4e8   : > { %5053 = vst [vmem:[#allocation4 + $0x2a0] sm:$0xff] %v4925_v13  ;;  %v9648_v13 = vld [vmem:[%s9925_s4 + $0x3e0] sm:$0xff] }
 0x4e9   : > { %6053 = vmatmul.msk.f32.gmra.mxu1 %vm747_vm0, %v9564_v2  ;;  %3429 = vmatmul.f32.gmra.mxu2 %v2811_v51  ;;  %v4727_v52 = vpop.f32.mrf.mxu0 }
 0x4ea   : > { %4102 = vmatmul.f32.gmra.mxu3 %v2811_v51  ;;  %6170 = vmatmul.msk.f32.gmra.mxu0 %vm747_vm0, %v9432_v8 }
 0x4ec   : > { %v3382_v46 = vpop.f32.mrf.mxu2 }
 0x4ed   : > { %3596 = vst [vmem:[#allocation5 + $0x2a8] sm:$0xff] %v3382_v46  ;;  %v4055_v0 = vpop.f32.mrf.mxu3  ;;  %v2691_v46 = vld [vmem:[%s9926_s5 + $0x368] sm:$0xff] }
 0x4ee   : > { %v2504_v45 = vpop.f32.mrf.mxu1  ;;  %v4926_v5 = vmul.f32 %v4712_v14, %v4055_v0 }
 0x4ef   : > { %v2812_v24 = vmul.f32 %v2684_v6, %v2504_v45 }
 0x4f0   : > { %5054 = vst [vmem:[#allocation4 + $0x2a8] sm:$0xff] %v4926_v5  ;;  %v9660_v5 = vld [vmem:[%s9925_s4 + $0x3e8] sm:$0xff] }
 0x4f1   : > { %6054 = vmatmul.msk.f32.gmra.mxu1 %vm747_vm0, %v9576_v61  ;;  %3432 = vmatmul.f32.gmra.mxu2 %v2812_v24  ;;  %v4730_v18 = vpop.f32.mrf.mxu0 }
 0x4f2   : > { %4105 = vmatmul.f32.gmra.mxu3 %v2812_v24  ;;  %6171 = vmatmul.msk.f32.gmra.mxu0 %vm747_vm0, %v9444_v39 }
 0x4f4   : > { %v3385_v29 = vpop.f32.mrf.mxu2 }
 0x4f5   : > { %3597 = vst [vmem:[#allocation5 + $0x2b0] sm:$0xff] %v3385_v29  ;;  %v4058_v50 = vpop.f32.mrf.mxu3  ;;  %v2692_v29 = vld [vmem:[%s9926_s5 + $0x370] sm:$0xff] }
 0x4f6   : > { %v2507_v11 = vpop.f32.mrf.mxu1  ;;  %v4927_v16 = vmul.f32 %v4715_v20, %v4058_v50 }
 0x4f7   : > { %v2813_v54 = vmul.f32 %v2685_v63, %v2507_v11 }
 0x4f8   : > { %5055 = vst [vmem:[#allocation4 + $0x2b0] sm:$0xff] %v4927_v16  ;;  %v9672_v16 = vld [vmem:[%s9925_s4 + $0x3f0] sm:$0xff] }
 0x4f9   : > { %6055 = vmatmul.msk.f32.gmra.mxu1 %vm747_vm0, %v9588_v1  ;;  %3435 = vmatmul.f32.gmra.mxu2 %v2813_v54  ;;  %v4733_v41 = vpop.f32.mrf.mxu0 }
 0x4fa   : > { %4108 = vmatmul.f32.gmra.mxu3 %v2813_v54  ;;  %6172 = vmatmul.msk.f32.gmra.mxu0 %vm747_vm0, %v9456_v12 }
 0x4fc   : > { %v3388_v53 = vpop.f32.mrf.mxu2 }
 0x4fd   : > { %3598 = vst [vmem:[#allocation5 + $0x2b8] sm:$0xff] %v3388_v53  ;;  %v4061_v59 = vpop.f32.mrf.mxu3  ;;  %v2693_v53 = vld [vmem:[%s9926_s5 + $0x378] sm:$0xff] }
 0x4fe   : > { %v2510_v60 = vpop.f32.mrf.mxu1  ;;  %v4928_v8 = vmul.f32 %v4718_v33, %v4061_v59 }
 0x4ff   : > { %v2814_v27 = vmul.f32 %v2686_v56, %v2510_v60 }
 0x500   : > { %5056 = vst [vmem:[#allocation4 + $0x2b8] sm:$0xff] %v4928_v8  ;;  %v9684_v8 = vld [vmem:[%s9925_s4 + $0x3f8] sm:$0xff] }
 0x501   : > { %6056 = vmatmul.msk.f32.gmra.mxu1 %vm747_vm0, %v9600_v22  ;;  %3438 = vmatmul.f32.gmra.mxu2 %v2814_v27  ;;  %v4736_v55 = vpop.f32.mrf.mxu0 }
 0x502   : > { %4111 = vmatmul.f32.gmra.mxu3 %v2814_v27  ;;  %6173 = vmatmul.msk.f32.gmra.mxu0 %vm747_vm0, %v9468_v19 }
 0x504   : > { %v3391_v3 = vpop.f32.mrf.mxu2 }
 0x505   : > { %3599 = vst [vmem:[#allocation5 + $0x2c0] sm:$0xff] %v3391_v3  ;;  %v4064_v9 = vpop.f32.mrf.mxu3  ;;  %v2694_v3 = vld [vmem:[%s9926_s5 + $0x380] sm:$0xff] }
 0x506   : > { %v2513_v14 = vpop.f32.mrf.mxu1  ;;  %v4929_v39 = vmul.f32 %v4721_v23, %v4064_v9 }
 0x507   : > { %v2815_v37 = vmul.f32 %v2687_v7, %v2513_v14 }
 0x508   : > { %5057 = vst [vmem:[#allocation4 + $0x2c0] sm:$0xff] %v4929_v39 }
 0x509   : > { %6057 = vmatmul.msk.f32.gmra.mxu1 %vm747_vm0, %v9612_v36  ;;  %3441 = vmatmul.f32.gmra.mxu2 %v2815_v37  ;;  %v4739_v32 = vpop.f32.mrf.mxu0 }
 0x50a   : > { %4114 = vmatmul.f32.gmra.mxu3 %v2815_v37  ;;  %6174 = vmatmul.msk.f32.gmra.mxu0 %vm747_vm0, %v9480_v43  ;;  %v2695_v37 = vld [vmem:[%s9926_s5 + $0x388] sm:$0xff] }
 0x50c   : > { %v3394_v35 = vpop.f32.mrf.mxu2 }
 0x50d   : > { %3600 = vst [vmem:[#allocation5 + $0x2c8] sm:$0xff] %v3394_v35  ;;  %v4067_v40 = vpop.f32.mrf.mxu3 }
 0x50e   : > { %v2516_v20 = vpop.f32.mrf.mxu1  ;;  %v4930_v12 = vmul.f32 %v4724_v47, %v4067_v40 }
 0x50f   : > { %v2816_v30 = vmul.f32 %v2688_v17, %v2516_v20 }
 0x510   : > { %5058 = vst [vmem:[#allocation4 + $0x2c8] sm:$0xff] %v4930_v12  ;;  %v2696_v12 = vld [vmem:[%s9926_s5 + $0x390] sm:$0xff] }
 0x511   : > { %6058 = vmatmul.msk.f32.gmra.mxu1 %vm747_vm0, %v9624_v62  ;;  %3444 = vmatmul.f32.gmra.mxu2 %v2816_v30  ;;  %v4742_v10 = vpop.f32.mrf.mxu0 }
 0x512   : > { %4117 = vmatmul.f32.gmra.mxu3 %v2816_v30  ;;  %6175 = vmatmul.msk.f32.gmra.mxu0 %vm747_vm0, %v9492_v57 }
 0x514   : > { %v3397_v21 = vpop.f32.mrf.mxu2 }
 0x515   : > { %3601 = vst [vmem:[#allocation5 + $0x2d0] sm:$0xff] %v3397_v21  ;;  %v4070_v28 = vpop.f32.mrf.mxu3 }
 0x516   : > { %v2519_v33 = vpop.f32.mrf.mxu1  ;;  %v4931_v19 = vmul.f32 %v4727_v52, %v4070_v28 }
 0x517   : > { %v2817_v4 = vmul.f32 %v2689_v25, %v2519_v33  ;;  %v2697_v33 = vld [vmem:[%s9926_s5 + $0x398] sm:$0xff] }
 0x518   : > { %5059 = vst [vmem:[#allocation4 + $0x2d0] sm:$0xff] %v4931_v19 }
 0x519   : > { %6059 = vmatmul.msk.f32.gmra.mxu1 %vm747_vm0, %v9636_v48  ;;  %3447 = vmatmul.f32.gmra.mxu2 %v2817_v4  ;;  %v4745_v0 = vpop.f32.mrf.mxu0 }
 0x51a   : > { %4120 = vmatmul.f32.gmra.mxu3 %v2817_v4  ;;  %6176 = vmatmul.msk.f32.gmra.mxu0 %vm747_vm0, %v9504_v34 }
 0x51c   : > { %v3400_v58 = vpop.f32.mrf.mxu2 }
 0x51d   : > { %3602 = vst [vmem:[#allocation5 + $0x2d8] sm:$0xff] %v3400_v58  ;;  %v4073_v31 = vpop.f32.mrf.mxu3 }
 0x51e   : > { %v2522_v23 = vpop.f32.mrf.mxu1  ;;  %v4932_v43 = vmul.f32 %v4730_v18, %v4073_v31 }
 0x51f   : > { %v2818_v42 = vmul.f32 %v2690_v38, %v2522_v23 }
 0x520   : > { %5060 = vst [vmem:[#allocation4 + $0x2d8] sm:$0xff] %v4932_v43 }
 0x521   : > { %6060 = vmatmul.msk.f32.gmra.mxu1 %vm747_vm0, %v9648_v13  ;;  %3450 = vmatmul.f32.gmra.mxu2 %v2818_v42  ;;  %v4748_v50 = vpop.f32.mrf.mxu0 }
 0x522   : > { %4123 = vmatmul.f32.gmra.mxu3 %v2818_v42  ;;  %6177 = vmatmul.msk.f32.gmra.mxu0 %vm747_vm0, %v9516_v26 }
 0x524   : > { %v3403_v51 = vpop.f32.mrf.mxu2 }
 0x525   : > { %3603 = vst [vmem:[#allocation5 + $0x2e0] sm:$0xff] %v3403_v51  ;;  %v4076_v6 = vpop.f32.mrf.mxu3 }
 0x526   : > { %v2525_v47 = vpop.f32.mrf.mxu1  ;;  %v4933_v57 = vmul.f32 %v4733_v41, %v4076_v6  ;;  %v2699_v6 = vld [vmem:[%s9926_s5 + $0x3a8] sm:$0xff] }
 0x527   : > { %v2819_v45 = vmul.f32 %v2691_v46, %v2525_v47 }
 0x528   : > { %5061 = vst [vmem:[#allocation4 + $0x2e0] sm:$0xff] %v4933_v57 }
 0x529   : > { %6061 = vmatmul.msk.f32.gmra.mxu1 %vm747_vm0, %v9660_v5  ;;  %3453 = vmatmul.f32.gmra.mxu2 %v2819_v45  ;;  %v4751_v59 = vpop.f32.mrf.mxu0 }
 0x52a   : > { %4126 = vmatmul.f32.gmra.mxu3 %v2819_v45  ;;  %6178 = vmatmul.msk.f32.gmra.mxu0 %vm747_vm0, %v9528_v44 }
 0x52c   : > { %v3406_v24 = vpop.f32.mrf.mxu2 }
 0x52d   : > { %3604 = vst [vmem:[#allocation5 + $0x2e8] sm:$0xff] %v3406_v24  ;;  %v4079_v63 = vpop.f32.mrf.mxu3 }
 0x52e   : > { %v2528_v52 = vpop.f32.mrf.mxu1  ;;  %v4934_v34 = vmul.f32 %v4736_v55, %v4079_v63 }
 0x52f   : > { %v2820_v11 = vmul.f32 %v2692_v29, %v2528_v52  ;;  %v2700_v29 = vld [vmem:[%s9926_s5 + $0x3b0] sm:$0xff] }
 0x530   : > { %5062 = vst [vmem:[#allocation4 + $0x2e8] sm:$0xff] %v4934_v34 }
 0x531   : > { %6062 = vmatmul.msk.f32.gmra.mxu1 %vm747_vm0, %v9672_v16  ;;  %3456 = vmatmul.f32.gmra.mxu2 %v2820_v11  ;;  %v4754_v9 = vpop.f32.mrf.mxu0 }
 0x532   : > { %4129 = vmatmul.f32.gmra.mxu3 %v2820_v11  ;;  %6179 = vmatmul.msk.f32.gmra.mxu0 %vm747_vm0, %v9540_v15 }
 0x534   : > { %v3409_v54 = vpop.f32.mrf.mxu2 }
 0x535   : > { %3605 = vst [vmem:[#allocation5 + $0x2f0] sm:$0xff] %v3409_v54  ;;  %v4082_v56 = vpop.f32.mrf.mxu3  ;;  %v2701_v54 = vld [vmem:[%s9926_s5 + $0x3b8] sm:$0xff] }
 0x536   : > { %v2531_v18 = vpop.f32.mrf.mxu1  ;;  %v4935_v26 = vmul.f32 %v4739_v32, %v4082_v56 }
 0x537   : > { %v2821_v60 = vmul.f32 %v2693_v53, %v2531_v18 }
 0x538   : > { %5063 = vst [vmem:[#allocation4 + $0x2f0] sm:$0xff] %v4935_v26 }
 0x539   : > { %6063 = vmatmul.msk.f32.gmra.mxu1 %vm747_vm0, %v9684_v8  ;;  %3459 = vmatmul.f32.gmra.mxu2 %v2821_v60  ;;  %v4757_v17 = vpop.f32.mrf.mxu0 }
 0x53a   : > { %4132 = vmatmul.f32.gmra.mxu3 %v2821_v60  ;;  %6180 = vmatmul.msk.f32.gmra.mxu0 %vm747_vm0, %v9552_v49  ;;  %v2702_v60 = vld [vmem:[%s9926_s5 + $0x3c0] sm:$0xff] }
 0x53c   : > { %v3412_v27 = vpop.f32.mrf.mxu2 }
 0x53d   : > { %3606 = vst [vmem:[#allocation5 + $0x2f8] sm:$0xff] %v3412_v27  ;;  %v4085_v7 = vpop.f32.mrf.mxu3 }
 0x53e   : > { %v2534_v41 = vpop.f32.mrf.mxu1  ;;  %v4936_v44 = vmul.f32 %v4742_v10, %v4085_v7  ;;  %v2698_v10 = vld [vmem:[%s9926_s5 + $0x3a0] sm:$0xff] }
 0x53f   : > { %v2822_v14 = vmul.f32 %v2694_v3, %v2534_v41 }
 0x540   : > { %5064 = vst [vmem:[#allocation4 + $0x2f8] sm:$0xff] %v4936_v44  ;;  %v2703_v44 = vld [vmem:[%s9926_s5 + $0x3c8] sm:$0xff] }
 0x541   : > { %3462 = vmatmul.f32.gmra.mxu2 %v2822_v14  ;;  %v4760_v21 = vpop.f32.mrf.mxu0 }
 0x542   : > { %4135 = vmatmul.f32.gmra.mxu3 %v2822_v14  ;;  %6181 = vmatmul.msk.f32.gmra.mxu0 %vm747_vm0, %v9564_v2 }
 0x544   : > { %v3415_v39 = vpop.f32.mrf.mxu2 }
 0x545   : > { %3607 = vst [vmem:[#allocation5 + $0x300] sm:$0xff] %v3415_v39  ;;  %v4088_v35 = vpop.f32.mrf.mxu3 }
 0x546   : > { %v2537_v40 = vpop.f32.mrf.mxu1  ;;  %v4937_v55 = vmul.f32 %v4745_v0, %v4088_v35 }
 0x547   : > { %v2823_v20 = vmul.f32 %v2695_v37, %v2537_v40  ;;  %v2704_v40 = vld [vmem:[%s9926_s5 + $0x3d0] sm:$0xff] }
 0x548   : > { %5065 = vst [vmem:[#allocation4 + $0x300] sm:$0xff] %v4937_v55 }
 0x549   : > { %3465 = vmatmul.f32.gmra.mxu2 %v2823_v20  ;;  %v4763_v4 = vpop.f32.mrf.mxu0 }
 0x54a   : > { %4138 = vmatmul.f32.gmra.mxu3 %v2823_v20  ;;  %6182 = vmatmul.msk.f32.gmra.mxu0 %vm747_vm0, %v9576_v61 }
 0x54c   : > { %v3418_v15 = vpop.f32.mrf.mxu2 }
 0x54d   : > { %3608 = vst [vmem:[#allocation5 + $0x308] sm:$0xff] %v3418_v15  ;;  %v4091_v30 = vpop.f32.mrf.mxu3 }
 0x54e   : > { %v2540_v25 = vpop.f32.mrf.mxu1  ;;  %v4938_v28 = vmul.f32 %v4748_v50, %v4091_v30 }
 0x54f   : > { %v2824_v32 = vmul.f32 %v2696_v12, %v2540_v25 }
 0x550   : > { %5066 = vst [vmem:[#allocation4 + $0x308] sm:$0xff] %v4938_v28 }
 0x551   : > { %3468 = vmatmul.f32.gmra.mxu2 %v2824_v32  ;;  %v4766_v43 = vpop.f32.mrf.mxu0 }
 0x552   : > { %4141 = vmatmul.f32.gmra.mxu3 %v2824_v32  ;;  %6183 = vmatmul.msk.f32.gmra.mxu0 %vm747_vm0, %v9588_v1 }
 0x554   : > { %v3421_v49 = vpop.f32.mrf.mxu2 }
 0x555   : > { %3609 = vst [vmem:[#allocation5 + $0x310] sm:$0xff] %v3421_v49  ;;  %v4094_v19 = vpop.f32.mrf.mxu3 }
 0x556   : > { %v2543_v58 = vpop.f32.mrf.mxu1  ;;  %v4939_v38 = vmul.f32 %v4751_v59, %v4094_v19  ;;  %v2706_v19 = vld [vmem:[%s9926_s5 + $0x3e0] sm:$0xff] }
 0x557   : > { %v2825_v31 = vmul.f32 %v2697_v33, %v2543_v58 }
 0x558   : > { %5067 = vst [vmem:[#allocation4 + $0x310] sm:$0xff] %v4939_v38 }
 0x559   : > { %3471 = vmatmul.f32.gmra.mxu2 %v2825_v31  ;;  %v4769_v47 = vpop.f32.mrf.mxu0 }
 0x55a   : > { %4144 = vmatmul.f32.gmra.mxu3 %v2825_v31  ;;  %6184 = vmatmul.msk.f32.gmra.mxu0 %vm747_vm0, %v9600_v22 }
 0x55c   : > { %v3424_v2 = vpop.f32.mrf.mxu2 }
 0x55d   : > { %3610 = vst [vmem:[#allocation5 + $0x318] sm:$0xff] %v3424_v2  ;;  %v4097_v23 = vpop.f32.mrf.mxu3 }
 0x55e   : > { %v2546_v42 = vpop.f32.mrf.mxu1  ;;  %v4940_v51 = vmul.f32 %v4754_v9, %v4097_v23 }
 0x55f   : > { %v2826_v46 = vmul.f32 %v2698_v10, %v2546_v42 }
 0x560   : > { %5068 = vst [vmem:[#allocation4 + $0x318] sm:$0xff] %v4940_v51 }
 0x561   : > { %3474 = vmatmul.f32.gmra.mxu2 %v2826_v46  ;;  %v4772_v50 = vpop.f32.mrf.mxu0 }
 0x562   : > { %4147 = vmatmul.f32.gmra.mxu3 %v2826_v46  ;;  %6185 = vmatmul.msk.f32.gmra.mxu0 %vm747_vm0, %v9612_v36 }
 0x564   : > { %v3427_v61 = vpop.f32.mrf.mxu2 }
 0x565   : > { %3611 = vst [vmem:[#allocation5 + $0x320] sm:$0xff] %v3427_v61  ;;  %v4100_v0 = vpop.f32.mrf.mxu3 }
 0x566   : > { %v2549_v57 = vpop.f32.mrf.mxu1  ;;  %v4941_v45 = vmul.f32 %v4757_v17, %v4100_v0 }
 0x567   : > { %v2827_v24 = vmul.f32 %v2699_v6, %v2549_v57  ;;  %v2708_v6 = vld [vmem:[%s9926_s5 + $0x3f0] sm:$0xff] }
 0x568   : > { %5069 = vst [vmem:[#allocation4 + $0x320] sm:$0xff] %v4941_v45 }
 0x569   : > { %3477 = vmatmul.f32.gmra.mxu2 %v2827_v24  ;;  %v4775_v56 = vpop.f32.mrf.mxu0 }
 0x56a   : > { %4150 = vmatmul.f32.gmra.mxu3 %v2827_v24  ;;  %6186 = vmatmul.msk.f32.gmra.mxu0 %vm747_vm0, %v9624_v62 }
 0x56c   : > { %v3430_v1 = vpop.f32.mrf.mxu2 }
 0x56d   : > { %3612 = vst [vmem:[#allocation5 + $0x328] sm:$0xff] %v3430_v1  ;;  %v4103_v63 = vpop.f32.mrf.mxu3 }
 0x56e   : > { %v2552_v52 = vpop.f32.mrf.mxu1  ;;  %v4942_v34 = vmul.f32 %v4760_v21, %v4103_v63  ;;  %v2705_v21 = vld [vmem:[%s9926_s5 + $0x3d8] sm:$0xff] }
 0x56f   : > { %v2828_v11 = vmul.f32 %v2700_v29, %v2552_v52  ;;  %v2709_v29 = vld [vmem:[%s9926_s5 + $0x3f8] sm:$0xff] }
 0x570   : > { %5070 = vst [vmem:[#allocation4 + $0x328] sm:$0xff] %v4942_v34 }
 0x571   : > { %3480 = vmatmul.f32.gmra.mxu2 %v2828_v11  ;;  %v4778_v3 = vpop.f32.mrf.mxu0 }
 0x572   : > { %4153 = vmatmul.f32.gmra.mxu3 %v2828_v11  ;;  %6187 = vmatmul.msk.f32.gmra.mxu0 %vm747_vm0, %v9636_v48 }
 0x574   : > { %v3433_v22 = vpop.f32.mrf.mxu2 }
 0x575   : > { %3613 = vst [vmem:[#allocation5 + $0x330] sm:$0xff] %v3433_v22  ;;  %v4106_v53 = vpop.f32.mrf.mxu3 }
 0x576   : > { %v2555_v59 = vpop.f32.mrf.mxu1  ;;  %v4943_v18 = vmul.f32 %v4763_v4, %v4106_v53 }
 0x577   : > { %v2829_v26 = vmul.f32 %v2701_v54, %v2555_v59 }
 0x578   : > { %5071 = vst [vmem:[#allocation4 + $0x330] sm:$0xff] %v4943_v18 }
 0x579   : > { %3483 = vmatmul.f32.gmra.mxu2 %v2829_v26  ;;  %v4781_v39 = vpop.f32.mrf.mxu0 }
 0x57a   : > { %4156 = vmatmul.f32.gmra.mxu3 %v2829_v26  ;;  %6188 = vmatmul.msk.f32.gmra.mxu0 %vm747_vm0, %v9648_v13 }
 0x57c   : > { %v3436_v36 = vpop.f32.mrf.mxu2 }
 0x57d   : > { %3614 = vst [vmem:[#allocation5 + $0x338] sm:$0xff] %v3436_v36  ;;  %v4109_v27 = vpop.f32.mrf.mxu3 }
 0x57e   : > { %v2558_v7 = vpop.f32.mrf.mxu1  ;;  %v4944_v9 = vmul.f32 %v4766_v43, %v4109_v27 }
 0x57f   : > { %v2830_v41 = vmul.f32 %v2702_v60, %v2558_v7 }
 0x580   : > { %5072 = vst [vmem:[#allocation4 + $0x338] sm:$0xff] %v4944_v9 }
 0x581   : > { %3486 = vmatmul.f32.gmra.mxu2 %v2830_v41  ;;  %v4784_v20 = vpop.f32.mrf.mxu0 }
 0x582   : > { %4159 = vmatmul.f32.gmra.mxu3 %v2830_v41  ;;  %6189 = vmatmul.msk.f32.gmra.mxu0 %vm747_vm0, %v9660_v5 }
 0x584   : > { %v3439_v62 = vpop.f32.mrf.mxu2 }
 0x585   : > { %3615 = vst [vmem:[#allocation5 + $0x340] sm:$0xff] %v3439_v62  ;;  %v4112_v14 = vpop.f32.mrf.mxu3 }
 0x586   : > { %v2561_v37 = vpop.f32.mrf.mxu1  ;;  %v4945_v35 = vmul.f32 %v4769_v47, %v4112_v14 }
 0x587   : > { %v2831_v17 = vmul.f32 %v2703_v44, %v2561_v37 }
 0x588   : > { %5073 = vst [vmem:[#allocation4 + $0x340] sm:$0xff] %v4945_v35 }
 0x589   : > { %3489 = vmatmul.f32.gmra.mxu2 %v2831_v17  ;;  %v4787_v28 = vpop.f32.mrf.mxu0 }
 0x58a   : > { %4162 = vmatmul.f32.gmra.mxu3 %v2831_v17  ;;  %6190 = vmatmul.msk.f32.gmra.mxu0 %vm747_vm0, %v9672_v16  ;;  %v2707_v16 = vld [vmem:[%s9926_s5 + $0x3e8] sm:$0xff] }
 0x58c   : > { %v3442_v48 = vpop.f32.mrf.mxu2 }
 0x58d   : > { %3616 = vst [vmem:[#allocation5 + $0x348] sm:$0xff] %v3442_v48  ;;  %v4115_v55 = vpop.f32.mrf.mxu3 }
 0x58e   : > { %v2564_v15 = vpop.f32.mrf.mxu1  ;;  %v4946_v12 = vmul.f32 %v4772_v50, %v4115_v55 }
 0x58f   : > { %v2832_v30 = vmul.f32 %v2704_v40, %v2564_v15 }
 0x590   : > { %5074 = vst [vmem:[#allocation4 + $0x348] sm:$0xff] %v4946_v12 }
 0x591   : > { %3492 = vmatmul.f32.gmra.mxu2 %v2832_v30  ;;  %v4790_v58 = vpop.f32.mrf.mxu0 }
 0x592   : > { %4165 = vmatmul.f32.gmra.mxu3 %v2832_v30 }
 0x594   : > { %v3445_v13 = vpop.f32.mrf.mxu2 }
 0x595   : > { %3617 = vst [vmem:[#allocation5 + $0x350] sm:$0xff] %v3445_v13  ;;  %v4118_v25 = vpop.f32.mrf.mxu3 }
 0x596   : > { %v2567_v32 = vpop.f32.mrf.mxu1  ;;  %v4947_v49 = vmul.f32 %v4775_v56, %v4118_v25 }
 0x597   : > { %v2833_v33 = vmul.f32 %v2705_v21, %v2567_v32 }
 0x598   : > { %5075 = vst [vmem:[#allocation4 + $0x350] sm:$0xff] %v4947_v49 }
 0x599   : > { %3495 = vmatmul.f32.gmra.mxu2 %v2833_v33  ;;  %v4793_v46 = vpop.f32.mrf.mxu0 }
 0x59a   : > { %4168 = vmatmul.f32.gmra.mxu3 %v2833_v33 }
 0x59c   : > { %v3448_v5 = vpop.f32.mrf.mxu2 }
 0x59d   : > { %3618 = vst [vmem:[#allocation5 + $0x358] sm:$0xff] %v3448_v5  ;;  %v4121_v4 = vpop.f32.mrf.mxu3 }
 0x59e   : > { %v2570_v38 = vpop.f32.mrf.mxu1  ;;  %v4948_v31 = vmul.f32 %v4778_v3, %v4121_v4 }
 0x59f   : > { %v2834_v2 = vmul.f32 %v2706_v19, %v2570_v38 }
 0x5a0   : > { %5076 = vst [vmem:[#allocation4 + $0x358] sm:$0xff] %v4948_v31 }
 0x5a1   : > { %3498 = vmatmul.f32.gmra.mxu2 %v2834_v2  ;;  %v4796_v24 = vpop.f32.mrf.mxu0 }
 0x5a2   : > { %4171 = vmatmul.f32.gmra.mxu3 %v2834_v2 }
 0x5a4   : > { %v3451_v10 = vpop.f32.mrf.mxu2 }
 0x5a5   : > { %3619 = vst [vmem:[#allocation5 + $0x360] sm:$0xff] %v3451_v10  ;;  %v4124_v23 = vpop.f32.mrf.mxu3 }
 0x5a6   : > { %v2573_v43 = vpop.f32.mrf.mxu1  ;;  %v4949_v42 = vmul.f32 %v4781_v39, %v4124_v23 }
 0x5a7   : > { %v2835_v51 = vmul.f32 %v2707_v16, %v2573_v43 }
 0x5a8   : > { %5077 = vst [vmem:[#allocation4 + $0x360] sm:$0xff] %v4949_v42 }
 0x5a9   : > { %3501 = vmatmul.f32.gmra.mxu2 %v2835_v51  ;;  %v4799_v11 = vpop.f32.mrf.mxu0 }
 0x5aa   : > { %4174 = vmatmul.f32.gmra.mxu3 %v2835_v51 }
 0x5ac   : > { %v3454_v61 = vpop.f32.mrf.mxu2 }
 0x5ad   : > { %3620 = vst [vmem:[#allocation5 + $0x368] sm:$0xff] %v3454_v61  ;;  %v4127_v0 = vpop.f32.mrf.mxu3 }
 0x5ae   : > { %v2576_v47 = vpop.f32.mrf.mxu1  ;;  %v4950_v57 = vmul.f32 %v4784_v20, %v4127_v0  ;;  %v9765_v0 = vld [vmem:[%s9929_s8] sm:$0x1] }
 0x5af   : > { %v2836_v45 = vmul.f32 %v2708_v6, %v2576_v47 }
 0x5b0   : > { %5078 = vst [vmem:[#allocation4 + $0x368] sm:$0xff] %v4950_v57 }
 0x5b1   : > { %3504 = vmatmul.f32.gmra.mxu2 %v2836_v45  ;;  %v4802_v18 = vpop.f32.mrf.mxu0 }
 0x5b2   : > { %4177 = vmatmul.f32.gmra.mxu3 %v2836_v45 }
 0x5b4   : > { %v3457_v1 = vpop.f32.mrf.mxu2 }
 0x5b5   : > { %3621 = vst [vmem:[#allocation5 + $0x370] sm:$0xff] %v3457_v1  ;;  %v4130_v63 = vpop.f32.mrf.mxu3 }
 0x5b6   : > { %v2579_v50 = vpop.f32.mrf.mxu1  ;;  %v4951_v52 = vmul.f32 %v4787_v28, %v4130_v63 }
 0x5b7   : > { %v2837_v34 = vmul.f32 %v2709_v29, %v2579_v50 }
 0x5b8   : > { %5079 = vst [vmem:[#allocation4 + $0x370] sm:$0xff] %v4951_v52 }
 0x5b9   : > { %3507 = vmatmul.f32.gmra.mxu2 %v2837_v34  ;;  %v4805_v3 = vpop.f32.mrf.mxu0 }
 0x5ba   : > { %4180 = vmatmul.f32.gmra.mxu3 %v2837_v34 }
 0x5bc   : > { %v3460_v22 = vpop.f32.mrf.mxu2 }
 0x5bd   : > { %3622 = vst [vmem:[#allocation5 + $0x378] sm:$0xff] %v3460_v22  ;;  %v4133_v54 = vpop.f32.mrf.mxu3 }
 0x5be   : > { %v4952_v53 = vmul.f32 %v4790_v58, %v4133_v54  ;;  %v9767_v54 = vmov 0.0  }
 0x5c0   : > { %5080 = vst [vmem:[#allocation4 + $0x378] sm:$0xff] %v4952_v53  ;;  %v9769_v53 = vmov 0.0  }
 0x5c1   : > { %v4808_v62 = vpop.f32.mrf.mxu0 }
 0x5c2   : > { %6191 = vmatmul.msk.f32.vlgmr.msra.gmra.mxu3 %vm747_vm0, %v9684_v8 }
 0x5c4   : > { %v3463_v56 = vpop.f32.mrf.mxu2 }
 0x5c5   : > { %3623 = vst [vmem:[#allocation5 + $0x380] sm:$0xff] %v3463_v56  ;;  %v4136_v59 = vpop.f32.mrf.mxu3 }
 0x5c6   : > { %v4953_v26 = vmul.f32 %v4793_v46, %v4136_v59 }
 0x5c8   : > { %5081 = vst [vmem:[#allocation4 + $0x380] sm:$0xff] %v4953_v26 }
 0x5c9   : > { %v4811_v39 = vpop.f32.mrf.mxu0 }
 0x5cc   : > { %v3466_v36 = vpop.f32.mrf.mxu2 }
 0x5cd   : > { %3624 = vst [vmem:[#allocation5 + $0x388] sm:$0xff] %v3466_v36  ;;  %v4139_v60 = vpop.f32.mrf.mxu3 }
 0x5ce   : > { %v4954_v27 = vmul.f32 %v4796_v24, %v4139_v60 }
 0x5d0   : > { %5082 = vst [vmem:[#allocation4 + $0x388] sm:$0xff] %v4954_v27 }
 0x5d1   : > { %v4814_v55 = vpop.f32.mrf.mxu0 }
 0x5d4   : > { %v3469_v7 = vpop.f32.mrf.mxu2 }
 0x5d5   : > { %3625 = vst [vmem:[#allocation5 + $0x390] sm:$0xff] %v3469_v7  ;;  %v4142_v9 = vpop.f32.mrf.mxu3 }
 0x5d6   : > { %v4955_v41 = vmul.f32 %v4799_v11, %v4142_v9 }
 0x5d8   : > { %5083 = vst [vmem:[#allocation4 + $0x390] sm:$0xff] %v4955_v41 }
 0x5d9   : > { %v4817_v13 = vpop.f32.mrf.mxu0 }
 0x5dc   : > { %v3472_v44 = vpop.f32.mrf.mxu2 }
 0x5dd   : > { %3626 = vst [vmem:[#allocation5 + $0x398] sm:$0xff] %v3472_v44  ;;  %v4145_v8 = vpop.f32.mrf.mxu3 }
 0x5de   : > { %v4956_v14 = vmul.f32 %v4802_v18, %v4145_v8 }
 0x5e0   : > { %5084 = vst [vmem:[#allocation4 + $0x398] sm:$0xff] %v4956_v14 }
 0x5e1   : > { %v4820_v32 = vpop.f32.mrf.mxu0 }
 0x5e4   : > { %v3475_v37 = vpop.f32.mrf.mxu2 }
 0x5e5   : > { %3627 = vst [vmem:[#allocation5 + $0x3a0] sm:$0xff] %v3475_v37  ;;  %v4148_v35 = vpop.f32.mrf.mxu3 }
 0x5e6   : > { %v4957_v17 = vmul.f32 %v4805_v3, %v4148_v35 }
 0x5e8   : > { %5085 = vst [vmem:[#allocation4 + $0x3a0] sm:$0xff] %v4957_v17 }
 0x5e9   : > { %v4823_v19 = vpop.f32.mrf.mxu0 }
 0x5ec   : > { %v3478_v48 = vpop.f32.mrf.mxu2 }
 0x5ed   : > { %3628 = vst [vmem:[#allocation5 + $0x3a8] sm:$0xff] %v3478_v48  ;;  %v4151_v40 = vpop.f32.mrf.mxu3 }
 0x5ee   : > { %v4958_v20 = vmul.f32 %v4808_v62, %v4151_v40 }
 0x5f0   : > { %5086 = vst [vmem:[#allocation4 + $0x3a8] sm:$0xff] %v4958_v20 }
 0x5f1   : > { %v4826_v10 = vpop.f32.mrf.mxu0 }
 0x5f4   : > { %v3481_v15 = vpop.f32.mrf.mxu2 }
 0x5f5   : > { %3629 = vst [vmem:[#allocation5 + $0x3b0] sm:$0xff] %v3481_v15  ;;  %v4154_v12 = vpop.f32.mrf.mxu3 }
 0x5f6   : > { %v4959_v30 = vmul.f32 %v4811_v39, %v4154_v12 }
 0x5f8   : > { %5087 = vst [vmem:[#allocation4 + $0x3b0] sm:$0xff] %v4959_v30 }
 0x5f9   : > { %v4829_v51 = vpop.f32.mrf.mxu0 }
 0x5fc   : > { %v3484_v21 = vpop.f32.mrf.mxu2 }
 0x5fd   : > { %3630 = vst [vmem:[#allocation5 + $0x3b8] sm:$0xff] %v3484_v21  ;;  %v4157_v25 = vpop.f32.mrf.mxu3 }
 0x5fe   : > { %v4960_v28 = vmul.f32 %v4814_v55, %v4157_v25 }
 0x600   : > { %5088 = vst [vmem:[#allocation4 + $0x3b8] sm:$0xff] %v4960_v28 }
 0x601   : > { %v4832_v47 = vpop.f32.mrf.mxu0 }
 0x604   : > { %v3487_v49 = vpop.f32.mrf.mxu2 }
 0x605   : > { %3631 = vst [vmem:[#allocation5 + $0x3c0] sm:$0xff] %v3487_v49  ;;  %v4160_v33 = vpop.f32.mrf.mxu3 }
 0x606   : > { %v4961_v5 = vmul.f32 %v4817_v13, %v4160_v33 }
 0x608   : > { %5089 = vst [vmem:[#allocation4 + $0x3c0] sm:$0xff] %v4961_v5 }
 0x609   : > { %v4835_v1 = vpop.f32.mrf.mxu0 }
 0x60c   : > { %v3490_v4 = vpop.f32.mrf.mxu2 }
 0x60d   : > { %3632 = vst [vmem:[#allocation5 + $0x3c8] sm:$0xff] %v3490_v4  ;;  %v4163_v58 = vpop.f32.mrf.mxu3 }
 0x60e   : > { %v4962_v38 = vmul.f32 %v4820_v32, %v4163_v58 }
 0x610   : > { %5090 = vst [vmem:[#allocation4 + $0x3c8] sm:$0xff] %v4962_v38 }
 0x614   : > { %v3493_v31 = vpop.f32.mrf.mxu2 }
 0x615   : > { %3633 = vst [vmem:[#allocation5 + $0x3d0] sm:$0xff] %v3493_v31  ;;  %v4166_v2 = vpop.f32.mrf.mxu3 }
 0x616   : > { %v4963_v16 = vmul.f32 %v4823_v19, %v4166_v2 }
 0x618   : > { %5091 = vst [vmem:[#allocation4 + $0x3d0] sm:$0xff] %v4963_v16 }
 0x61c   : > { %v3496_v23 = vpop.f32.mrf.mxu2 }
 0x61d   : > { %3634 = vst [vmem:[#allocation5 + $0x3d8] sm:$0xff] %v3496_v23  ;;  %v4169_v43 = vpop.f32.mrf.mxu3 }
 0x61e   : > { %v4964_v42 = vmul.f32 %v4826_v10, %v4169_v43 }
 0x620   : > { %5092 = vst [vmem:[#allocation4 + $0x3d8] sm:$0xff] %v4964_v42 }
 0x624   : > { %v3499_v46 = vpop.f32.mrf.mxu2 }
 0x625   : > { %3635 = vst [vmem:[#allocation5 + $0x3e0] sm:$0xff] %v3499_v46  ;;  %v4172_v61 = vpop.f32.mrf.mxu3 }
 0x626   : > { %v4965_v6 = vmul.f32 %v4829_v51, %v4172_v61 }
 0x628   : > { %5093 = vst [vmem:[#allocation4 + $0x3e0] sm:$0xff] %v4965_v6 }
 0x62c   : > { %v3502_v57 = vpop.f32.mrf.mxu2 }
 0x62d   : > { %3636 = vst [vmem:[#allocation5 + $0x3e8] sm:$0xff] %v3502_v57  ;;  %v4175_v45 = vpop.f32.mrf.mxu3 }
 0x62e   : > { %v4966_v24 = vmul.f32 %v4832_v47, %v4175_v45 }
 0x630   : > { %5094 = vst [vmem:[#allocation4 + $0x3e8] sm:$0xff] %v4966_v24 }
 0x634   : > { %v3505_v29 = vpop.f32.mrf.mxu2 }
 0x635   : > { %3637 = vst [vmem:[#allocation5 + $0x3f0] sm:$0xff] %v3505_v29  ;;  %v4178_v63 = vpop.f32.mrf.mxu3 }
 0x636   : > { %v4967_v50 = vmul.f32 %v4835_v1, %v4178_v63 }
 0x638   : > { %5095 = vst [vmem:[#allocation4 + $0x3f0] sm:$0xff] %v4967_v50 }
 0x63c   : > { %v3508_v52 = vpop.f32.mrf.mxu2 }
 0x63d   : > { %3638 = vst [vmem:[#allocation5 + $0x3f8] sm:$0xff] %v3508_v52  ;;  %v4181_v34 = vpop.f32.mrf.mxu3 }
 0x645   : > { %v4838_v11 = vpop.f32.mrf.mxu3 }
 0x646   : > { %v4968_v22 = vmul.f32 %v4838_v11, %v4181_v34 }
 0x648   : > { %5096 = vst [vmem:[#allocation4 + $0x3f8] sm:$0xff] %v4968_v22 }
 0x649 LB: >> { %s6193_s24 = sshll.u32 %s6879_s23, 8  ;;  %s6192_s11 = sshll.u32 %s6879_s23, 4  ;;  %s6879_s23 = sphi %s9771_s23, %s5111_s23   ;;  %v6875_v53 = vphi %v9769_v53, %v5484_v53   ;;  %v6871_v54 = vphi %v9767_v54, %v5485_v54  }
 0x64a   : >> { %s9779_s26 = scalar_lea.vmem [#allocation3], %s6193_s24  ;;  %s9783_s27 = scalar_lea.vmem [#allocation4], %s6193_s24 }
 0x64b   : >> { %v5117_v56 = vld [vmem:[%s9779_s26] sm:$0xff]  ;;  %v5118_v59 = vld [vmem:[%s9779_s26 + $0x8] sm:$0xff]  ;;  %s9787_s30 = scalar_lea.vmem [#allocation5], %s6193_s24  ;;  %v6195_v7 = vld [vmem:[%s9779_s26 + $0x10] sm:$0xff]  ;;  %s9864_s28 = scalar_lea.vmem %s7261_s29, %s6192_s11 }
 0x64c   : >> { %v5119_v26 = vmul.f32 %v6875_v53, %v5117_v56  ;;  %v5120_v36 = vmul.f32 %v6871_v54, %v5118_v59  ;;  %v5127_v27 = vld [vmem:[%s9787_s30] sm:$0xff]  ;;  %v5128_v3 = vld [vmem:[%s9787_s30 + $0x8] sm:$0xff]  ;;  %v6196_v9 = vld [vmem:[%s9779_s26 + $0x18] sm:$0xff]  ;;  %s9889_s17 = scalar_lea.vmem %s469_s25, %s6192_s11  ;;  %s5111_s23 = sadd.s32 1, %s6879_s23  }
 0x64d   : >> { %v6201_v17 = vld [vmem:[%s9787_s30 + $0x10] sm:$0xff]  ;;  %v6202_v48 = vld [vmem:[%s9787_s30 + $0x18] sm:$0xff]  ;;  %v6204_v40 = vld [vmem:[%s9779_s26 + $0x20] sm:$0xff]  ;;  %p5108_p5 = scmp.ge.s32.totalorder %s5111_s23, 4  }
 0x64e   : >> { %v6205_v12 = vld [vmem:[%s9779_s26 + $0x28] sm:$0xff]  ;;  %v6210_v33 = vld [vmem:[%s9787_s30 + $0x20] sm:$0xff]  ;;  %v6213_v5 = vld [vmem:[%s9779_s26 + $0x30] sm:$0xff] }
 0x64f   : >> { %v5122_v18 = vld [vmem:[%s9783_s27] sm:$0xff]  ;;  %v5123_v60 = vld [vmem:[%s9783_s27 + $0x8] sm:$0xff]  ;;  %v6198_v44 = vld [vmem:[%s9783_s27 + $0x10] sm:$0xff] }
 0x650   : >> { %v5124_v41 = vadd.f32 %v5122_v18, %v5119_v26  ;;  %v5125_v62 = vadd.f32 %v5123_v60, %v5120_v36  ;;  %v6199_v8 = vld [vmem:[%s9783_s27 + $0x18] sm:$0xff]  ;;  %v6207_v30 = vld [vmem:[%s9783_s27 + $0x20] sm:$0xff]  ;;  %v6208_v32 = vld [vmem:[%s9783_s27 + $0x28] sm:$0xff] }
 0x651   : >> { %v6211_v38 = vld [vmem:[%s9787_s30 + $0x28] sm:$0xff]  ;;  %v6214_v31 = vld [vmem:[%s9779_s26 + $0x38] sm:$0xff]  ;;  %v6216_v10 = vld [vmem:[%s9783_s27 + $0x30] sm:$0xff] }
 0x652   : >> { %v5129_v14 = vmul.f32 %v5127_v27, %v5124_v41  ;;  %v5130_v39 = vmul.f32 %v5128_v3, %v5125_v62  ;;  %v5143_v37 = vmul.f32 %v6195_v7, %v5124_v41  ;;  %v5144_v35 = vmul.f32 %v6196_v9, %v5125_v62  ;;  %v6217_v51 = vld [vmem:[%s9783_s27 + $0x38] sm:$0xff]  ;;  %v6219_v6 = vld [vmem:[%s9787_s30 + $0x30] sm:$0xff]  ;;  %v6222_v47 = vld [vmem:[%s9779_s26 + $0x40] sm:$0xff] }
 0x653   : >> { %v6220_v1 = vld [vmem:[%s9787_s30 + $0x38] sm:$0xff]  ;;  %v6223_v29 = vld [vmem:[%s9779_s26 + $0x48] sm:$0xff]  ;;  %v6225_v52 = vld [vmem:[%s9783_s27 + $0x40] sm:$0xff] }
 0x654   : >> { %v5131_v55 = vadd.f32 %v5130_v39, %v5129_v14  ;;  %v5148_v20 = vadd.f32 %v6198_v44, %v5143_v37  ;;  %v5149_v15 = vadd.f32 %v6199_v8, %v5144_v35  ;;  %v6226_v53 = vld [vmem:[%s9783_s27 + $0x48] sm:$0xff]  ;;  %v6228_v26 = vld [vmem:[%s9787_s30 + $0x40] sm:$0xff]  ;;  %v6231_v36 = vld [vmem:[%s9779_s26 + $0x50] sm:$0xff] }
 0x655   : >> { %v6229_v7 = vld [vmem:[%s9787_s30 + $0x48] sm:$0xff]  ;;  %v6232_v9 = vld [vmem:[%s9779_s26 + $0x58] sm:$0xff]  ;;  %v6234_v8 = vld [vmem:[%s9783_s27 + $0x50] sm:$0xff] }
 0x656   : >> { %v5132_v13 = vrot.slane %v5131_v55, 4  ;;  %v5153_v21 = vmul.f32 %v6201_v17, %v5148_v20  ;;  %v5154_v25 = vmul.f32 %v6202_v48, %v5149_v15  ;;  %v5167_v28 = vmul.f32 %v6204_v40, %v5148_v20  ;;  %v6235_v35 = vld [vmem:[%s9783_s27 + $0x58] sm:$0xff]  ;;  %v6237_v20 = vld [vmem:[%s9787_s30 + $0x50] sm:$0xff] }
 0x657   : >> { %v5168_v49 = vmul.f32 %v6205_v12, %v5149_v15  ;;  %v6240_v15 = vld [vmem:[%s9779_s26 + $0x60] sm:$0xff] }
 0x658   : >> { %v5133_v19 = vadd.f32 %v5132_v13, %v5131_v55  ;;  %v5155_v4 = vadd.f32 %v5154_v25, %v5153_v21  ;;  %v5172_v58 = vadd.f32 %v6207_v30, %v5167_v28  ;;  %v6238_v13 = vld [vmem:[%s9787_s30 + $0x58] sm:$0xff] }
 0x659   : >> { %v5173_v2 = vadd.f32 %v6208_v32, %v5168_v49  ;;  %v6241_v49 = vld [vmem:[%s9779_s26 + $0x68] sm:$0xff] }
 0x65a   : >> { %v5134_v16 = vrot.slane %v5133_v19, 2  ;;  %v5156_v23 = vrot.slane %v5155_v4, 4  ;;  %v5177_v43 = vmul.f32 %v6210_v33, %v5172_v58  ;;  %v5191_v42 = vmul.f32 %v6213_v5, %v5172_v58  ;;  %v6243_v33 = vld [vmem:[%s9783_s27 + $0x60] sm:$0xff] }
 0x65b   : >> { %v5178_v46 = vmul.f32 %v6211_v38, %v5173_v2  ;;  %v5192_v61 = vmul.f32 %v6214_v31, %v5173_v2  ;;  %v6244_v2 = vld [vmem:[%s9783_s27 + $0x68] sm:$0xff] }
 0x65c   : >> { %v5135_v57 = vadd.f32 %v5134_v16, %v5133_v19  ;;  %v5157_v45 = vadd.f32 %v5156_v23, %v5155_v4  ;;  %v5196_v24 = vadd.f32 %v6216_v10, %v5191_v42  ;;  %v6246_v10 = vld [vmem:[%s9787_s30 + $0x60] sm:$0xff]  ;;  %v6249_v16 = vld [vmem:[%s9779_s26 + $0x70] sm:$0xff] }
 0x65d   : >> { %v5179_v63 = vadd.f32 %v5178_v46, %v5177_v43  ;;  %v5197_v50 = vadd.f32 %v6217_v51, %v5192_v61 }
 0x65e   : >> { %v5136_v34 = vrot.slane %v5135_v57, 1  ;;  %v5158_v11 = vrot.slane %v5157_v45, 2  ;;  %v5201_v22 = vmul.f32 %v6219_v6, %v5196_v24  ;;  %v5215_v54 = vmul.f32 %v6222_v47, %v5196_v24  ;;  %v6247_v6 = vld [vmem:[%s9787_s30 + $0x68] sm:$0xff]  ;;  %v6250_v47 = vld [vmem:[%s9779_s26 + $0x78] sm:$0xff] }
 0x65f   : >> { %v5180_v56 = vrot.slane %v5179_v63, 4  ;;  %v5202_v59 = vmul.f32 %v6220_v1, %v5197_v50  ;;  %v5216_v18 = vmul.f32 %v6223_v29, %v5197_v50  ;;  %v6253_v29 = vld [vmem:[%s9783_s27 + $0x78] sm:$0xff] }
 0x660   : >> { %v5137_v60 = vadd.f32 %v5136_v34, %v5135_v57  ;;  %v5159_v27 = vadd.f32 %v5158_v11, %v5157_v45  ;;  %v5220_v3 = vadd.f32 %v6225_v52, %v5215_v54  ;;  %v6252_v57 = vld [vmem:[%s9783_s27 + $0x70] sm:$0xff]  ;;  %v6258_v11 = vld [vmem:[%s9779_s26 + $0x80] sm:$0xff] }
 0x661   : >> { %v5181_v41 = vadd.f32 %v5180_v56, %v5179_v63  ;;  %v5203_v62 = vadd.f32 %v5202_v59, %v5201_v22  ;;  %v5221_v44 = vadd.f32 %v6226_v53, %v5216_v18  ;;  %v6255_v63 = vld [vmem:[%s9787_s30 + $0x70] sm:$0xff] }
 0x662   : >> { %5138 = vst [vmem:[#allocation7] sm:$0x1] %v5137_v60  ;;  %v5160_v14 = vrot.slane %v5159_v27, 1  ;;  %v5225_v39 = vmul.f32 %v6228_v26, %v5220_v3  ;;  %v5239_v37 = vmul.f32 %v6231_v36, %v5220_v3  ;;  %v6256_v26 = vld [vmem:[%s9787_s30 + $0x78] sm:$0xff]  ;;  %v6259_v36 = vld [vmem:[%s9779_s26 + $0x88] sm:$0xff]  ;;  %v6261_v60 = vld [vmem:[%s9783_s27 + $0x80] sm:$0xff] }
 0x663   : >> { %v5182_v17 = vrot.slane %v5181_v41, 2  ;;  %v5204_v48 = vrot.slane %v5203_v62, 4  ;;  %v5226_v40 = vmul.f32 %v6229_v7, %v5221_v44  ;;  %v5240_v55 = vmul.f32 %v6232_v9, %v5221_v44  ;;  %v6262_v44 = vld [vmem:[%s9783_s27 + $0x88] sm:$0xff] }
 0x664   : >> { %v5161_v12 = vadd.f32 %v5160_v14, %v5159_v27  ;;  %v5244_v30 = vadd.f32 %v6234_v8, %v5239_v37  ;;  %v6264_v8 = vld [vmem:[%s9787_s30 + $0x80] sm:$0xff] }
 0x665   : >> { %v5183_v21 = vadd.f32 %v5182_v17, %v5181_v41  ;;  %v5205_v25 = vadd.f32 %v5204_v48, %v5203_v62  ;;  %v5227_v28 = vadd.f32 %v5226_v40, %v5225_v39  ;;  %v5245_v32 = vadd.f32 %v6235_v35, %v5240_v55  ;;  %v6267_v17 = vld [vmem:[%s9779_s26 + $0x90] sm:$0xff]  ;;  %v6265_v55 = vld [vmem:[%s9787_s30 + $0x88] sm:$0xff] }
 0x666   : >> { %5162 = vst [vmem:[#allocation7 + $0x1] sm:$0x1] %v5161_v12  ;;  %v5249_v5 = vmul.f32 %v6237_v20, %v5244_v30  ;;  %v5263_v19 = vmul.f32 %v6240_v15, %v5244_v30  ;;  %v6268_v20 = vld [vmem:[%s9779_s26 + $0x98] sm:$0xff] }
 0x667   : >> { %v5184_v4 = vrot.slane %v5183_v21, 1  ;;  %v5206_v58 = vrot.slane %v5205_v25, 2  ;;  %v5228_v38 = vrot.slane %v5227_v28, 4  ;;  %v5250_v31 = vmul.f32 %v6238_v13, %v5245_v32 }
 0x668   : >> { %v5264_v23 = vmul.f32 %v6241_v49, %v5245_v32  ;;  %v5268_v43 = vadd.f32 %v6243_v33, %v5263_v19  ;;  %v6271_v32 = vld [vmem:[%s9783_s27 + $0x98] sm:$0xff] }
 0x669   : >> { %v5185_v42 = vadd.f32 %v5184_v4, %v5183_v21  ;;  %v5207_v51 = vadd.f32 %v5206_v58, %v5205_v25  ;;  %v5229_v46 = vadd.f32 %v5228_v38, %v5227_v28  ;;  %v5251_v61 = vadd.f32 %v5250_v31, %v5249_v5  ;;  %v6270_v21 = vld [vmem:[%s9783_s27 + $0x90] sm:$0xff]  ;;  %v6276_v58 = vld [vmem:[%s9779_s26 + $0xa0] sm:$0xff] }
 0x66a   : >> { %v5269_v45 = vadd.f32 %v6244_v2, %v5264_v23  ;;  %v5273_v24 = vmul.f32 %v6246_v10, %v5268_v43  ;;  %v5287_v1 = vmul.f32 %v6249_v16, %v5268_v43  ;;  %v6273_v4 = vld [vmem:[%s9787_s30 + $0x90] sm:$0xff]  ;;  %v6274_v2 = vld [vmem:[%s9787_s30 + $0x98] sm:$0xff] }
 0x66b   : >> { %5186 = vst [vmem:[#allocation7 + $0x2] sm:$0x1] %v5185_v42  ;;  %v5208_v50 = vrot.slane %v5207_v51, 1  ;;  %v5230_v52 = vrot.slane %v5229_v46, 2  ;;  %v5252_v34 = vrot.slane %v5251_v61, 4  ;;  %v6277_v42 = vld [vmem:[%s9779_s26 + $0xa8] sm:$0xff] }
 0x66c   : >> { %v5274_v22 = vmul.f32 %v6247_v6, %v5269_v45  ;;  %v5288_v54 = vmul.f32 %v6250_v47, %v5269_v45  ;;  %v5292_v53 = vadd.f32 %v6252_v57, %v5287_v1  ;;  %v6282_v1 = vld [vmem:[%s9787_s30 + $0xa0] sm:$0xff] }
 0x66d   : >> { %v5209_v56 = vadd.f32 %v5208_v50, %v5207_v51  ;;  %v5231_v59 = vadd.f32 %v5230_v52, %v5229_v46  ;;  %v5253_v18 = vadd.f32 %v5252_v34, %v5251_v61  ;;  %v6279_v51 = vld [vmem:[%s9783_s27 + $0xa0] sm:$0xff] }
 0x66e   : >> { %v5275_v27 = vadd.f32 %v5274_v22, %v5273_v24  ;;  %v5293_v3 = vadd.f32 %v6253_v29, %v5288_v54  ;;  %v5297_v7 = vmul.f32 %v6255_v63, %v5292_v53  ;;  %v5311_v9 = vmul.f32 %v6258_v11, %v5292_v53  ;;  %v6280_v24 = vld [vmem:[%s9783_s27 + $0xa8] sm:$0xff]  ;;  %v6285_v29 = vld [vmem:[%s9779_s26 + $0xb0] sm:$0xff]  ;;  %v6286_v53 = vld [vmem:[%s9779_s26 + $0xb8] sm:$0xff] }
 0x66f   : >> { %5210 = vst [vmem:[#allocation7 + $0x3] sm:$0x1] %v5209_v56  ;;  %v5232_v41 = vrot.slane %v5231_v59, 1  ;;  %v5254_v62 = vrot.slane %v5253_v18, 2  ;;  %v6283_v54 = vld [vmem:[%s9787_s30 + $0xa8] sm:$0xff]  ;;  %v6288_v56 = vld [vmem:[%s9783_s27 + $0xb0] sm:$0xff] }
 0x670   : >> { %v5276_v14 = vrot.slane %v5275_v27, 4  ;;  %v5298_v39 = vmul.f32 %v6256_v26, %v5293_v3  ;;  %v5312_v37 = vmul.f32 %v6259_v36, %v5293_v3  ;;  %v5316_v35 = vadd.f32 %v6261_v60, %v5311_v9  ;;  %v6289_v36 = vld [vmem:[%s9783_s27 + $0xb8] sm:$0xff]  ;;  %v6294_v60 = vld [vmem:[%s9779_s26 + $0xc0] sm:$0xff]  ;;  %v6291_v9 = vld [vmem:[%s9787_s30 + $0xb0] sm:$0xff] }
 0x671   : >> { %v5233_v48 = vadd.f32 %v5232_v41, %v5231_v59  ;;  %v5255_v40 = vadd.f32 %v5254_v62, %v5253_v18 }
 0x672   : >> { %v5277_v15 = vadd.f32 %v5276_v14, %v5275_v27  ;;  %v5299_v12 = vadd.f32 %v5298_v39, %v5297_v7  ;;  %v5317_v30 = vadd.f32 %v6262_v44, %v5312_v37  ;;  %v5321_v13 = vmul.f32 %v6264_v8, %v5316_v35  ;;  %v6292_v37 = vld [vmem:[%s9787_s30 + $0xb8] sm:$0xff] }
 0x673   : >> { %5234 = vst [vmem:[#allocation7 + $0x4] sm:$0x1] %v5233_v48  ;;  %v5256_v25 = vrot.slane %v5255_v40, 1  ;;  %v5335_v28 = vmul.f32 %v6267_v17, %v5316_v35  ;;  %v6295_v35 = vld [vmem:[%s9779_s26 + $0xc8] sm:$0xff]  ;;  %v6297_v17 = vld [vmem:[%s9783_s27 + $0xc0] sm:$0xff] }
 0x674   : >> { %v5278_v49 = vrot.slane %v5277_v15, 2  ;;  %v5300_v33 = vrot.slane %v5299_v12, 4  ;;  %v5322_v5 = vmul.f32 %v6265_v55, %v5317_v30  ;;  %v5336_v19 = vmul.f32 %v6268_v20, %v5317_v30  ;;  %v6298_v30 = vld [vmem:[%s9783_s27 + $0xc8] sm:$0xff] }
 0x675   : >> { %v5257_v38 = vadd.f32 %v5256_v25, %v5255_v40  ;;  %v5340_v31 = vadd.f32 %v6270_v21, %v5335_v28 }
 0x676   : >> { %v5279_v10 = vadd.f32 %v5278_v49, %v5277_v15  ;;  %v5301_v16 = vadd.f32 %v5300_v33, %v5299_v12  ;;  %v5323_v23 = vadd.f32 %v5322_v5, %v5321_v13  ;;  %v5341_v43 = vadd.f32 %v6271_v32, %v5336_v19  ;;  %v6300_v13 = vld [vmem:[%s9787_s30 + $0xc0] sm:$0xff]  ;;  %v6303_v49 = vld [vmem:[%s9779_s26 + $0xd0] sm:$0xff]  ;;  %v6301_v19 = vld [vmem:[%s9787_s30 + $0xc8] sm:$0xff] }
 0x677   : >> { %5258 = vst [vmem:[#allocation7 + $0x5] sm:$0x1] %v5257_v38  ;;  %v5345_v46 = vmul.f32 %v6273_v4, %v5340_v31  ;;  %v5359_v61 = vmul.f32 %v6276_v58, %v5340_v31  ;;  %v6304_v4 = vld [vmem:[%s9779_s26 + $0xd8] sm:$0xff]  ;;  %v5502_v58 = vld [vmem:[%s9864_s28] sm:$0xff]  ;;  %v5505_v38 = vperm.slane %v9765_v0, 0 }
 0x678   : >> { %v5280_v6 = vrot.slane %v5279_v10, 1  ;;  %v5302_v47 = vrot.slane %v5301_v16, 2  ;;  %v5324_v57 = vrot.slane %v5323_v23, 4  ;;  %v5346_v45 = vmul.f32 %v6274_v2, %v5341_v43 }
 0x679   : >> { %v5360_v63 = vmul.f32 %v6277_v42, %v5341_v43  ;;  %v5364_v50 = vadd.f32 %v6279_v51, %v5359_v61  ;;  %v6307_v51 = vld [vmem:[%s9783_s27 + $0xd8] sm:$0xff] }
 0x67a   : >> { %v5281_v52 = vadd.f32 %v5280_v6, %v5279_v10  ;;  %v5303_v34 = vadd.f32 %v5302_v47, %v5301_v16  ;;  %v5325_v11 = vadd.f32 %v5324_v57, %v5323_v23  ;;  %v5347_v22 = vadd.f32 %v5346_v45, %v5345_v46  ;;  %v6306_v23 = vld [vmem:[%s9783_s27 + $0xd0] sm:$0xff] }
 0x67b   : >> { %v5365_v59 = vadd.f32 %v6280_v24, %v5360_v63  ;;  %v5369_v18 = vmul.f32 %v6282_v1, %v5364_v50  ;;  %v5383_v26 = vmul.f32 %v6285_v29, %v5364_v50  ;;  %v5507_v46 = vmul.f32 %v5505_v38, %v5502_v58  ;;  %v6309_v45 = vld [vmem:[%s9787_s30 + $0xd0] sm:$0xff]  ;;  %v6312_v24 = vld [vmem:[%s9779_s26 + $0xe0] sm:$0xff]  ;;  %v6310_v63 = vld [vmem:[%s9787_s30 + $0xd8] sm:$0xff] }
 0x67c   : >> { %5282 = vst [vmem:[#allocation7 + $0x6] sm:$0x1] %v5281_v52  ;;  %v5304_v27 = vrot.slane %v5303_v34, 1  ;;  %v5326_v3 = vrot.slane %v5325_v11, 2  ;;  %v5348_v7 = vrot.slane %v5347_v22, 4 }
 0x67d   : >> { %v5370_v41 = vmul.f32 %v6283_v54, %v5365_v59  ;;  %v5384_v62 = vmul.f32 %v6286_v53, %v5365_v59  ;;  %v5388_v44 = vadd.f32 %v6288_v56, %v5383_v26  ;;  %v6315_v54 = vld [vmem:[%s9783_s27 + $0xe0] sm:$0xff] }
 0x67e   : >> { %v5305_v8 = vadd.f32 %v5304_v27, %v5303_v34  ;;  %v5327_v14 = vadd.f32 %v5326_v3, %v5325_v11  ;;  %v5349_v39 = vadd.f32 %v5348_v7, %v5347_v22  ;;  %v6313_v22 = vld [vmem:[%s9779_s26 + $0xe8] sm:$0xff]  ;;  %v6318_v7 = vld [vmem:[%s9787_s30 + $0xe0] sm:$0xff] }
 0x67f   : >> { %v5371_v48 = vadd.f32 %v5370_v41, %v5369_v18  ;;  %v5389_v40 = vadd.f32 %v6289_v36, %v5384_v62  ;;  %v5393_v55 = vmul.f32 %v6291_v9, %v5388_v44  ;;  %v5407_v20 = vmul.f32 %v6294_v60, %v5388_v44  ;;  %v6316_v3 = vld [vmem:[%s9783_s27 + $0xe8] sm:$0xff]  ;;  %v6321_v9 = vld [vmem:[%s9779_s26 + $0xf0] sm:$0xff] }
 0x680   : >> { %5306 = vst [vmem:[#allocation7 + $0x7] sm:$0x1] %v5305_v8  ;;  %v5328_v15 = vrot.slane %v5327_v14, 1  ;;  %v5350_v12 = vrot.slane %v5349_v39, 2 }
 0x681   : >> { %v5372_v21 = vrot.slane %v5371_v48, 4  ;;  %v5394_v25 = vmul.f32 %v6292_v37, %v5389_v40  ;;  %v5408_v28 = vmul.f32 %v6295_v35, %v5389_v40  ;;  %v5412_v32 = vadd.f32 %v6297_v17, %v5407_v20  ;;  %v6319_v37 = vld [vmem:[%s9787_s30 + $0xe8] sm:$0xff]  ;;  %v6322_v35 = vld [vmem:[%s9779_s26 + $0xf8] sm:$0xff]  ;;  %v6324_v17 = vld [vmem:[%s9783_s27 + $0xf0] sm:$0xff] }
 0x682   : >> { %v5329_v33 = vadd.f32 %v5328_v15, %v5327_v14  ;;  %v5351_v5 = vadd.f32 %v5350_v12, %v5349_v39  ;;  %v6325_v20 = vld [vmem:[%s9783_s27 + $0xf8] sm:$0xff] }
 0x683   : >> { %v5373_v31 = vadd.f32 %v5372_v21, %v5371_v48  ;;  %v5395_v2 = vadd.f32 %v5394_v25, %v5393_v55  ;;  %v5413_v10 = vadd.f32 %v6298_v30, %v5408_v28  ;;  %v5417_v16 = vmul.f32 %v6300_v13, %v5412_v32  ;;  %v6327_v13 = vld [vmem:[%s9787_s30 + $0xf0] sm:$0xff] }
 0x684   : >> { %5330 = vst [vmem:[#allocation7 + $0x8] sm:$0x1] %v5329_v33  ;;  %v5352_v43 = vrot.slane %v5351_v5, 1  ;;  %v5431_v42 = vmul.f32 %v6303_v49, %v5412_v32  ;;  %v6328_v33 = vld [vmem:[%s9787_s30 + $0xf8] sm:$0xff] }
 0x685   : >> { %v5374_v61 = vrot.slane %v5373_v31, 2  ;;  %v5396_v6 = vrot.slane %v5395_v2, 4  ;;  %v5418_v47 = vmul.f32 %v6301_v19, %v5413_v10  ;;  %v5432_v57 = vmul.f32 %v6304_v4, %v5413_v10 }
 0x686   : >> { %v5353_v1 = vadd.f32 %v5352_v43, %v5351_v5  ;;  %v5436_v29 = vadd.f32 %v6306_v23, %v5431_v42 }
 0x687   : >> { %v5375_v50 = vadd.f32 %v5374_v61, %v5373_v31  ;;  %v5397_v52 = vadd.f32 %v5396_v6, %v5395_v2  ;;  %v5419_v34 = vadd.f32 %v5418_v47, %v5417_v16  ;;  %v5437_v11 = vadd.f32 %v6307_v51, %v5432_v57  ;;  %v5499_v53 = vld [vmem:[#allocation7] sm:$0xff] }
 0x688   : >> { %5354 = vst [vmem:[#allocation7 + $0x9] sm:$0x1] %v5353_v1  ;;  %v5441_v56 = vmul.f32 %v6309_v45, %v5436_v29  ;;  %v5455_v59 = vmul.f32 %v6312_v24, %v5436_v29  ;;  %v5509_v18 = vadd.f32 %v5507_v46, %v5499_v53 }
 0x689   : >> { %v5376_v26 = vrot.slane %v5375_v50, 1  ;;  %v5398_v36 = vrot.slane %v5397_v52, 2  ;;  %v5420_v60 = vrot.slane %v5419_v34, 4  ;;  %v5442_v27 = vmul.f32 %v6310_v63, %v5437_v11 }
 0x68a   : >> { %v5456_v41 = vmul.f32 %v6313_v22, %v5437_v11  ;;  %v5460_v62 = vadd.f32 %v6315_v54, %v5455_v59  ;;  %5512 = vst [vmem:[%s9889_s17] sm:$0xff] %v5509_v18 }
 0x68b   : >> { %v5377_v44 = vadd.f32 %v5376_v26, %v5375_v50  ;;  %v5399_v8 = vadd.f32 %v5398_v36, %v5397_v52  ;;  %v5421_v14 = vadd.f32 %v5420_v60, %v5419_v34  ;;  %v5443_v39 = vadd.f32 %v5442_v27, %v5441_v56  ;;  %v5503_v50 = vld [vmem:[%s9864_s28 + $0x8] sm:$0xff] }
 0x68c   : >> { %v5461_v48 = vadd.f32 %v6316_v3, %v5456_v41  ;;  %v5465_v40 = vmul.f32 %v6318_v7, %v5460_v62  ;;  %v5479_v55 = vmul.f32 %v6321_v9, %v5460_v62  ;;  %v5508_v52 = vmul.f32 %v5505_v38, %v5503_v50 }
 0x68d   : >> { %5378 = vst [vmem:[#allocation7 + $0xa] sm:$0x1] %v5377_v44  ;;  %v5400_v15 = vrot.slane %v5399_v8, 1  ;;  %v5422_v12 = vrot.slane %v5421_v14, 2  ;;  %v5444_v30 = vrot.slane %v5443_v39, 4 }
 0x68e   : >> { %v5466_v21 = vmul.f32 %v6319_v37, %v5461_v48  ;;  %v5480_v25 = vmul.f32 %v6322_v35, %v5461_v48  ;;  %v5484_v53 = vadd.f32 %v6324_v17, %v5479_v55  }
 0x68f   : >> { %v5401_v28 = vadd.f32 %v5400_v15, %v5399_v8  ;;  %v5423_v32 = vadd.f32 %v5422_v12, %v5421_v14  ;;  %v5445_v49 = vadd.f32 %v5444_v30, %v5443_v39 }
 0x690   : >> { %v5467_v5 = vadd.f32 %v5466_v21, %v5465_v40  ;;  %v5485_v54 = vadd.f32 %v6325_v20, %v5480_v25   ;;  %v5489_v19 = vmul.f32 %v6327_v13, %v5484_v53 }
 0x691   : >> { %5402 = vst [vmem:[#allocation7 + $0xb] sm:$0x1] %v5401_v28  ;;  %v5424_v4 = vrot.slane %v5423_v32, 1  ;;  %v5446_v58 = vrot.slane %v5445_v49, 2 }
 0x692   : >> { %v5468_v31 = vrot.slane %v5467_v5, 4  ;;  %v5490_v2 = vmul.f32 %v6328_v33, %v5485_v54 }
 0x693   : >> { %v5425_v10 = vadd.f32 %v5424_v4, %v5423_v32  ;;  %v5447_v16 = vadd.f32 %v5446_v58, %v5445_v49 }
 0x694   : >> { %v5469_v23 = vadd.f32 %v5468_v31, %v5467_v5  ;;  %v5491_v43 = vadd.f32 %v5490_v2, %v5489_v19 }
 0x695   : >> { %5426 = vst [vmem:[#allocation7 + $0xc] sm:$0x1] %v5425_v10  ;;  %v5448_v42 = vrot.slane %v5447_v16, 1 }
 0x696   : >> { %v5470_v51 = vrot.slane %v5469_v23, 2  ;;  %v5492_v46 = vrot.slane %v5491_v43, 4 }
 0x697   : >> { %v5449_v61 = vadd.f32 %v5448_v42, %v5447_v16 }
 0x698   : >> { %v5471_v6 = vadd.f32 %v5470_v51, %v5469_v23  ;;  %v5493_v47 = vadd.f32 %v5492_v46, %v5491_v43 }
 0x699   : >> { %5450 = vst [vmem:[#allocation7 + $0xd] sm:$0x1] %v5449_v61 }
 0x69a   : >> { %v5472_v57 = vrot.slane %v5471_v6, 1  ;;  %v5494_v45 = vrot.slane %v5493_v47, 2 }
 0x69c   : >> { %v5473_v24 = vadd.f32 %v5472_v57, %v5471_v6  ;;  %v5495_v1 = vadd.f32 %v5494_v45, %v5493_v47 }
 0x69e   : >> { %5474 = vst [vmem:[#allocation7 + $0xe] sm:$0x1] %v5473_v24  ;;  %v5496_v29 = vrot.slane %v5495_v1, 1 }
 0x6a0   : >> { %v5497_v63 = vadd.f32 %v5496_v29, %v5495_v1 }
 0x6a2   : >> { %5498 = vst [vmem:[#allocation7 + $0xf] sm:$0x1] %v5497_v63 }
 0x6a8   : > { %5110 = sbr.rel (!%p5108_p5) target bundleno = 1609 (0x649), region = 157 }
 0x6a9   : >> { %v5500_v34 = vld [vmem:[#allocation7 + $0x8] sm:$0xff] }
 0x6aa   : >> { %v5510_v11 = vadd.f32 %v5508_v52, %v5500_v34 }
 0x6ac   : >> { %5513 = vst [vmem:[%s9889_s17 + $0x8] sm:$0xff] %v5510_v11 }
 0x6ad PF: > { %s20_s15 = sadd.s32 1, %s6867_s15   ;;  %s9948_s13 = smov %s6863_s14 }
 0x6ae   : > { %p17_p6 = scmp.ge.s32.totalorder %s20_s15, 4   ;;  %s9949_s14 = smov %s9951_s16 }
 0x6b0   :  { %19 = sbr.rel (!%p17_p6) target bundleno = 2 (0x2), region = 168 }

</bundles_post_ra>
